<compile_context>
chip_gen: v5e
topology: v5e:2x2
jax: 0.10.0
libtpu: 0.0.40
codegen_flags: <defaults>
</compile_context>

<pallas_src>
import math

import numpy as np

import jax
import jax.numpy as jnp
from jax.experimental import pallas as pl
from jax.experimental.pallas import tpu as pltpu

_CPAD = 128                 # lane width of every activation / weight operand
_GRP = 16                   # lanes reserved per image (max channel count = 16)
_IMGS = _CPAD // _GRP       # 8 images packed per grid step


# ----------------------------- Pallas kernel --------------------------------

def _mm(a, b):
    return jnp.dot(a, b, preferred_element_type=jnp.float32)


def _conv_taps_apply(sel_ref, w_ref, h, ntaps):
    """sum_t  S_t @ (h @ W_t):  conv / transposed-conv as gather/scatter GEMMs."""
    acc = _mm(sel_ref[0], _mm(h, w_ref[0]))
    for t in range(1, ntaps):
        acc = acc + _mm(sel_ref[t], _mm(h, w_ref[t]))
    return acc


def _pool_relu(sel_ref, h, ntaps):
    """relu(max_t  P_t @ h).  Window taps falling in the pool padding have an
    all-zero selection row, i.e. they contribute 0 instead of -inf; because a
    ReLU immediately follows the pool this is numerically identical to
    PyTorch's -inf padding."""
    m = _mm(sel_ref[0], h)
    for t in range(1, ntaps):
        m = jnp.maximum(m, _mm(sel_ref[t], h))
    return jnp.maximum(m, 0.0)


def _autoencoder_kernel(xc_ref, w1_ref, b_ref,
                        p1s_ref, e2s_ref, w2_ref,
                        p2s_ref, e3s_ref, w3_ref,
                        g4s_ref, w4_ref,
                        g5s_ref, w5_ref, w6_ref,
                        out_ref):
    b = b_ref[...]                                              # (6, 128)

    # ------------------------------- encoder --------------------------------
    # Conv2d(1,16,k=2,s=2): input arrives space-to-depth'd -> a single GEMM.
    h = _mm(xc_ref[...], w1_ref[...]) + b[0:1, :]               # (196, 128)
    # MaxPool2d(2,2,pad=1) + ReLU
    h = _pool_relu(p1s_ref, h, 4)                               # (64, 128)
    # Conv2d(16,12,k=3,s=1)
    h = _conv_taps_apply(e2s_ref, w2_ref, h, 9) + b[1:2, :]     # (36, 128)
    # MaxPool2d(2,2) + ReLU
    h = _pool_relu(p2s_ref, h, 4)                               # (9, 128)
    # Conv2d(12,8,k=3,s=2,p=1)   (latent code, no activation)
    h = _conv_taps_apply(e3s_ref, w3_ref, h, 9) + b[2:3, :]     # (4, 128)

    # ------------------------------- decoder --------------------------------
    # ConvTranspose2d(8,12,k=3,s=2) + ReLU
    h = jnp.maximum(_conv_taps_apply(g4s_ref, w4_ref, h, 9) + b[3:4, :], 0.0)   # (25, 128)
    # ConvTranspose2d(12,12,k=3,s=3) + ReLU
    h = jnp.maximum(_conv_taps_apply(g5s_ref, w5_ref, h, 9) + b[4:5, :], 0.0)   # (225, 128)
    # ConvTranspose2d(12,1,k=2,s=2) + ReLU: kernel==stride -> non-overlapping,
    # so emit the 4 output phases per image on its lane slot; the 2x2
    # interleave + crop happens once in XLA on the HBM-resident output.
    o = _mm(h, w6_ref[...]) + b[5:6, :]                         # (225, 128)
    out_ref[...] = jnp.maximum(o, 0.0)


# ------------------------- forward-pass wrapper ------------------------------

def autoencoder_forward(ops, x):
    """x: (N,1,28,28) float32 -> (N,1,28,28) float32 (same as the PyTorch module)."""
    N = x.shape[0]
    assert x.shape[1:] == (1, 28, 28), x.shape
    x = x.astype(jnp.float32)

    # Pad the batch to a multiple of the lane-pack factor (8 images / step).
    G = (N + _IMGS - 1) // _IMGS
    Np = G * _IMGS
    if Np != N:
        x = jnp.concatenate([x, jnp.zeros((Np - N,) + x.shape[1:], jnp.float32)], axis=0)

    # Space-to-depth for Conv2d(k=2,s=2): (Np,1,28,28) -> (Np,196,4); pad the 4
    # taps to the 16-lane per-image slot and pack 8 images onto the lane axis.
    xc = x.reshape(Np, 14, 2, 14, 2).transpose(0, 1, 3, 2, 4).reshape(Np, 196, 4)
    xc = jnp.pad(xc, ((0, 0), (0, 0), (0, _GRP - 4)))
    xc = xc.reshape(G, _IMGS, 196, _GRP).transpose(0, 2, 1, 3).reshape(G, 196, _CPAD)

    def whole(a):
        nd = a.ndim
        return pl.BlockSpec(a.shape, lambda i, nd=nd: (0,) * nd)

    out_phases = pl.pallas_call(
        _autoencoder_kernel,
        out_shape=jax.ShapeDtypeStruct((G, 225, _CPAD), jnp.float32),
        grid=(G,),
        in_specs=[
            pl.BlockSpec((None, 196, _CPAD), lambda i: (i, 0, 0)),   # 8-image group
            whole(ops["w1"]), whole(ops["b"]),
            whole(ops["p1s"]), whole(ops["e2s"]), whole(ops["w2"]),
            whole(ops["p2s"]), whole(ops["e3s"]), whole(ops["w3"]),
            whole(ops["g4s"]), whole(ops["w4"]),
            whole(ops["g5s"]), whole(ops["w5"]), whole(ops["w6"]),
        ],
        out_specs=pl.BlockSpec((None, 225, _CPAD), lambda i: (i, 0, 0)),
        compiler_params=pltpu.CompilerParams(
            dimension_semantics=("parallel",),           # shard image-groups over TCs
            vmem_limit_bytes=40 * 1024 * 1024),          # total use is ~7 MiB
    )(xc, ops["w1"], ops["b"],
      ops["p1s"], ops["e2s"], ops["w2"],
      ops["p2s"], ops["e3s"], ops["w3"],
      ops["g4s"], ops["w4"],
      ops["g5s"], ops["w5"], ops["w6"])

    # Unpack lanes -> per-image 4 ConvT(k=2,s=2) phases, depth-to-space, crop 30->28.
    ph = out_phases.reshape(G, 225, _IMGS, _GRP)[..., :4]
    ph = ph.transpose(0, 2, 1, 3).reshape(Np, 225, 4)
    full = ph.reshape(Np, 15, 15, 2, 2).transpose(0, 1, 3, 2, 4).reshape(Np, 30, 30)
    return full[:N, 1:29, 1:29][:, None, :, :]


# ----------------- constant gather/scatter + padded-weight build -------------

def _conv_select(H, W, OH, OW, k, stride, pad):
    """0/1 row-gather matrices (k*k, OH*OW, H*W) for a conv/pool window tap.
    Out-of-bounds (padding) taps leave an all-zero row."""
    mats = np.zeros((k * k, OH * OW, H * W), np.float32)
    for dy in range(k):
        for dx in range(k):
            t = dy * k + dx
            for yo in range(OH):
                yi = yo * stride - pad + dy
                if not (0 <= yi < H):
                    continue
                for xo in range(OW):
                    xi = xo * stride - pad + dx
                    if 0 <= xi < W:
                        mats[t, yo * OW + xo, yi * W + xi] = 1.0
    return mats


def _convT_scatter(H, W, OH, OW, k, stride):
    """0/1 row-scatter matrices (k*k, OH*OW, H*W) for a transposed-conv tap."""
    mats = np.zeros((k * k, OH * OW, H * W), np.float32)
    for dy in range(k):
        for dx in range(k):
            t = dy * k + dx
            for y in range(H):
                for x in range(W):
                    mats[t, (y * stride + dy) * OW + (x * stride + dx), y * W + x] = 1.0
    return mats


def _conv_taps(w):     # (Cout,Cin,kh,kw) -> (kh*kw, 128, 128), tap[ci,co]=w[co,ci,dy,dx]
    w = np.asarray(w)
    cout, cin, kh, kw = w.shape
    out = np.zeros((kh * kw, _CPAD, _CPAD), np.float32)
    for dy in range(kh):
        for dx in range(kw):
            out[dy * kw + dx, :cin, :cout] = w[:, :, dy, dx].T
    return out


def _convT_taps(w):    # (Cin,Cout,kh,kw) -> (kh*kw, 128, 128), tap[ci,co]=w[ci,co,dy,dx]
    w = np.asarray(w)
    cin, cout, kh, kw = w.shape
    out = np.zeros((kh * kw, _CPAD, _CPAD), np.float32)
    for dy in range(kh):
        for dx in range(kw):
            out[dy * kw + dx, :cin, :cout] = w[:, :, dy, dx]
    return out


def _tile_lane_blockdiag(m):
    """Replicate the top-left (16,16) block of the trailing 2 axes onto the 8
    diagonal 16x16 blocks so 8 lane-packed images share one 128x128 weight."""
    out = np.zeros_like(m)
    blk = m[..., :_GRP, :_GRP]
    for j in range(_IMGS):
        out[..., j * _GRP:(j + 1) * _GRP, j * _GRP:(j + 1) * _GRP] = blk
    return out


def _tile_lane_bias(b):
    out = np.zeros_like(b)
    for j in range(_IMGS):
        out[:, j * _GRP:(j + 1) * _GRP] = b[:, :_GRP]
    return out


def build_operators(params):
    w1, b1 = params["e1"]
    w2, b2 = params["e2"]
    w3, b3 = params["e3"]
    w4, b4 = params["d1"]
    w5, b5 = params["d2"]
    w6, b6 = params["d3"]

    # Conv2d(1,16,k=2,s=2) on the space-to-depth'd input: one GEMM per image slot.
    W1 = np.zeros((_CPAD, _CPAD), np.float32)
    w1n = np.asarray(w1)
    for dy in range(2):
        for dx in range(2):
            W1[dy * 2 + dx, :16] = w1n[:, 0, dy, dx]

    # ConvTranspose2d(12,1,k=2,s=2): 4 output phases on each image's lane slot.
    W6 = np.zeros((_CPAD, _CPAD), np.float32)
    w6n = np.asarray(w6)
    for dy in range(2):
        for dx in range(2):
            W6[:12, dy * 2 + dx] = w6n[:, 0, dy, dx]

    B = np.zeros((6, _CPAD), np.float32)
    B[0, :16] = np.asarray(b1)
    B[1, :12] = np.asarray(b2)
    B[2, :8] = np.asarray(b3)
    B[3, :12] = np.asarray(b4)
    B[4, :12] = np.asarray(b5)
    B[5, :4] = np.asarray(b6)[0]

    ops = dict(
        w1=_tile_lane_blockdiag(W1),
        b=_tile_lane_bias(B),
        w6=_tile_lane_blockdiag(W6),
        p1s=_conv_select(14, 14, 8, 8, 2, 2, 1),   # MaxPool(2,2,p=1): 14x14 -> 8x8
        e2s=_conv_select(8, 8, 6, 6, 3, 1, 0),     # Conv k3 s1      :  8x8  -> 6x6
        w2=_tile_lane_blockdiag(_conv_taps(w2)),
        p2s=_conv_select(6, 6, 3, 3, 2, 2, 0),     # MaxPool(2,2)    :  6x6  -> 3x3
        e3s=_conv_select(3, 3, 2, 2, 3, 2, 1),     # Conv k3 s2 p1   :  3x3  -> 2x2
        w3=_tile_lane_blockdiag(_conv_taps(w3)),
        g4s=_convT_scatter(2, 2, 5, 5, 3, 2),      # ConvT k3 s2     :  2x2  -> 5x5
        w4=_tile_lane_blockdiag(_convT_taps(w4)),
        g5s=_convT_scatter(5, 5, 15, 15, 3, 3),    # ConvT k3 s3     :  5x5  -> 15x15
        w5=_tile_lane_blockdiag(_convT_taps(w5)),
    )
    return {k: jnp.asarray(v) for k, v in ops.items()}


# --------------------------- model parameters --------------------------------

def _init_params():
    """Deterministic PyTorch-default-style uniform init for all layers."""
    root = jax.random.PRNGKey(42)
    keys = jax.random.split(root, 6)

    def conv_p(key, cout, cin, k):
        k1, k2 = jax.random.split(key)
        s = 1.0 / math.sqrt(cin * k * k)
        w = jax.random.uniform(k1, (cout, cin, k, k), jnp.float32, -s, s)
        b = jax.random.uniform(k2, (cout,), jnp.float32, -s, s)
        return w, b

    def convT_p(key, cin, cout, k):
        k1, k2 = jax.random.split(key)
        s = 1.0 / math.sqrt(cout * k * k)
        w = jax.random.uniform(k1, (cin, cout, k, k), jnp.float32, -s, s)
        b = jax.random.uniform(k2, (cout,), jnp.float32, -s, s)
        return w, b

    return {
        "e1": conv_p(keys[0], 16, 1, 2),    # Conv2d(1, 16, k=2, s=2)
        "e2": conv_p(keys[1], 12, 16, 3),   # Conv2d(16, 12, k=3, s=1)
        "e3": conv_p(keys[2], 8, 12, 3),    # Conv2d(12, 8, k=3, s=2, p=1)
        "d1": convT_p(keys[3], 8, 12, 3),   # ConvTranspose2d(8, 12, k=3, s=2)
        "d2": convT_p(keys[4], 12, 12, 3),  # ConvTranspose2d(12, 12, k=3, s=3)
        "d3": convT_p(keys[5], 12, 1, 2),   # ConvTranspose2d(12, 1, k=2, s=2)
    }


# ------------------- pure-XLA reference (for a sanity check) -----------------

def reference_forward(params, x):
    dn = ("NCHW", "OIHW", "NCHW")

    def conv(h, w, b, stride, pad):
        y = jax.lax.conv_general_dilated(
            h, w, window_strides=(stride, stride),
            padding=[(pad, pad), (pad, pad)], dimension_numbers=dn,
            precision=jax.lax.Precision.HIGHEST)
        return y + b.reshape(1, -1, 1, 1)

    def convT(h, w, b, stride):
        k = w.shape[2]
        wf = jnp.flip(w, (2, 3)).transpose(1, 0, 2, 3)
        y = jax.lax.conv_general_dilated(
            h, wf, window_strides=(1, 1), padding=[(k - 1, k - 1)] * 2,
            lhs_dilation=(stride, stride), dimension_numbers=dn,
            precision=jax.lax.Precision.HIGHEST)
        return y + b.reshape(1, -1, 1, 1)

    def pool(h, pad):
        return jax.lax.reduce_window(
            h, -jnp.inf, jax.lax.max, (1, 1, 2, 2), (1, 1, 2, 2),
            [(0, 0), (0, 0), (pad, pad), (pad, pad)])

    h = conv(x, *params["e1"], 2, 0)
    h = jax.nn.relu(pool(h, 1))
    h = conv(h, *params["e2"], 1, 0)
    h = jax.nn.relu(pool(h, 0))
    h = conv(h, *params["e3"], 2, 1)
    h = jax.nn.relu(convT(h, *params["d1"], 2))
    h = jax.nn.relu(convT(h, *params["d2"], 3))
    h = jax.nn.relu(convT(h, *params["d3"], 2))
    xo = (h.shape[2] - x.shape[2]) // 2
    yo = (h.shape[3] - x.shape[3]) // 2
    return h[:, :, xo:xo + x.shape[2], yo:yo + x.shape[3]]


# ------------------------------------ main ------------------------------------

if __name__ == "__main__":
    params = _init_params()
    ops = build_operators(params)

    # 28x28 single-channel input (MNIST-like), as implied by get_features' view(-1, 32)
    x = jax.random.normal(jax.random.PRNGKey(0), (2, 1, 28, 28), jnp.float32)

    fwd = jax.jit(autoencoder_forward)
    out = jax.block_until_ready(fwd(ops, x))

    assert out.shape == x.shape, f"unexpected output shape {out.shape}"
    assert out.dtype == jnp.float32
    assert bool(jnp.all(out >= 0.0))          # final ReLU

    # Cross-check the fused kernel against a plain lax.conv reference.
    ref = jax.block_until_ready(jax.jit(reference_forward)(params, x))
    err = float(jnp.max(jnp.abs(out - ref)))
    assert err < 2e-2, f"kernel/reference mismatch: max abs err = {err}"

    print("KERNEL_OK")
</pallas_src>

<mosaic_0001>
module attributes {stable_mosaic.version = 11 : i64} {
  func.func @_autoencoder_kernel(%arg0: i32, %arg1: memref<1x196x128xf32, #tpu.memory_space<vmem>>, %arg2: memref<128x128xf32, #tpu.memory_space<vmem>>, %arg3: memref<6x128xf32, #tpu.memory_space<vmem>>, %arg4: memref<4x64x196xf32, #tpu.memory_space<vmem>>, %arg5: memref<9x36x64xf32, #tpu.memory_space<vmem>>, %arg6: memref<9x128x128xf32, #tpu.memory_space<vmem>>, %arg7: memref<4x9x36xf32, #tpu.memory_space<vmem>>, %arg8: memref<9x4x9xf32, #tpu.memory_space<vmem>>, %arg9: memref<9x128x128xf32, #tpu.memory_space<vmem>>, %arg10: memref<9x25x4xf32, #tpu.memory_space<vmem>>, %arg11: memref<9x128x128xf32, #tpu.memory_space<vmem>>, %arg12: memref<9x225x25xf32, #tpu.memory_space<vmem>>, %arg13: memref<9x128x128xf32, #tpu.memory_space<vmem>>, %arg14: memref<128x128xf32, #tpu.memory_space<vmem>>, %arg15: memref<1x225x128xf32, #tpu.memory_space<vmem>>) attributes {dimension_semantics = [#tpu.dimension_semantics<parallel>], iteration_bounds = array<i64: 1>, scalar_prefetch = 0 : i64, scratch_operands = 0 : i64, tpu.core_type = #tpu.core_type<tc>, window_params = [{transform_indices = @transform_0, window_bounds = array<i64: 1, 196, 128>}, {pipeline_mode = #tpu.pipeline_mode<synchronous>, transform_indices = @transform_1, window_bounds = array<i64: 128, 128>}, {pipeline_mode = #tpu.pipeline_mode<synchronous>, transform_indices = @transform_2, window_bounds = array<i64: 6, 128>}, {pipeline_mode = #tpu.pipeline_mode<synchronous>, transform_indices = @transform_3, window_bounds = array<i64: 4, 64, 196>}, {pipeline_mode = #tpu.pipeline_mode<synchronous>, transform_indices = @transform_4, window_bounds = array<i64: 9, 36, 64>}, {pipeline_mode = #tpu.pipeline_mode<synchronous>, transform_indices = @transform_5, window_bounds = array<i64: 9, 128, 128>}, {pipeline_mode = #tpu.pipeline_mode<synchronous>, transform_indices = @transform_6, window_bounds = array<i64: 4, 9, 36>}, {pipeline_mode = #tpu.pipeline_mode<synchronous>, transform_indices = @transform_7, window_bounds = array<i64: 9, 4, 9>}, {pipeline_mode = #tpu.pipeline_mode<synchronous>, transform_indices = @transform_8, window_bounds = array<i64: 9, 128, 128>}, {pipeline_mode = #tpu.pipeline_mode<synchronous>, transform_indices = @transform_9, window_bounds = array<i64: 9, 25, 4>}, {pipeline_mode = #tpu.pipeline_mode<synchronous>, transform_indices = @transform_10, window_bounds = array<i64: 9, 128, 128>}, {pipeline_mode = #tpu.pipeline_mode<synchronous>, transform_indices = @transform_11, window_bounds = array<i64: 9, 225, 25>}, {pipeline_mode = #tpu.pipeline_mode<synchronous>, transform_indices = @transform_12, window_bounds = array<i64: 9, 128, 128>}, {pipeline_mode = #tpu.pipeline_mode<synchronous>, transform_indices = @transform_13, window_bounds = array<i64: 128, 128>}, {transform_indices = @transform_14, window_bounds = array<i64: 1, 225, 128>}]} {
    %c0 = arith.constant 0 : index
    %c0_0 = arith.constant 0 : index
    %0 = vector.load %arg3[%c0, %c0_0] : memref<6x128xf32, #tpu.memory_space<vmem>>, vector<6x128xf32>
    %c0_1 = arith.constant 0 : index
    %c0_2 = arith.constant 0 : index
    %c0_3 = arith.constant 0 : index
    %1 = vector.load %arg1[%c0_1, %c0_2, %c0_3] : memref<1x196x128xf32, #tpu.memory_space<vmem>>, vector<1x196x128xf32>
    %2 = vector.shape_cast %1 : vector<1x196x128xf32> to vector<196x128xf32>
    %c0_4 = arith.constant 0 : index
    %c0_5 = arith.constant 0 : index
    %3 = vector.load %arg2[%c0_4, %c0_5] : memref<128x128xf32, #tpu.memory_space<vmem>>, vector<128x128xf32>
    %cst = arith.constant dense<0.000000e+00> : vector<196x128xf32>
    %4 = tpu.matmul %2, %3, %cst {dimension_numbers = #tpu.dot_dimension_numbers<[1], [0], [0], [1], [0, 0, 1, 1], [], []>} : vector<196x128xf32>, vector<128x128xf32>, vector<196x128xf32> -> vector<196x128xf32>
    %5 = vector.extract_strided_slice %0 {offsets = [0, 0], sizes = [1, 128], strides = [1, 1]} : vector<6x128xf32> to vector<1x128xf32>
    %6 = vector.broadcast %5 : vector<1x128xf32> to vector<196x128xf32>
    %7 = arith.addf %4, %6 : vector<196x128xf32>
    %c0_6 = arith.constant 0 : index
    %c0_7 = arith.constant 0 : index
    %c0_8 = arith.constant 0 : index
    %8 = vector.load %arg4[%c0_6, %c0_7, %c0_8] : memref<4x64x196xf32, #tpu.memory_space<vmem>>, vector<1x64x196xf32>
    %9 = vector.shape_cast %8 : vector<1x64x196xf32> to vector<64x196xf32>
    %cst_9 = arith.constant dense<0.000000e+00> : vector<64x128xf32>
    %10 = tpu.matmul %9, %7, %cst_9 {dimension_numbers = #tpu.dot_dimension_numbers<[1], [0], [0], [1], [0, 0, 1, 1], [], []>} : vector<64x196xf32>, vector<196x128xf32>, vector<64x128xf32> -> vector<64x128xf32>
    %c1 = arith.constant 1 : index
    %c0_10 = arith.constant 0 : index
    %c0_11 = arith.constant 0 : index
    %11 = vector.load %arg4[%c1, %c0_10, %c0_11] : memref<4x64x196xf32, #tpu.memory_space<vmem>>, vector<1x64x196xf32>
    %12 = vector.shape_cast %11 : vector<1x64x196xf32> to vector<64x196xf32>
    %cst_12 = arith.constant dense<0.000000e+00> : vector<64x128xf32>
    %13 = tpu.matmul %12, %7, %cst_12 {dimension_numbers = #tpu.dot_dimension_numbers<[1], [0], [0], [1], [0, 0, 1, 1], [], []>} : vector<64x196xf32>, vector<196x128xf32>, vector<64x128xf32> -> vector<64x128xf32>
    %14 = arith.maximumf %10, %13 : vector<64x128xf32>
    %c2 = arith.constant 2 : index
    %c0_13 = arith.constant 0 : index
    %c0_14 = arith.constant 0 : index
    %15 = vector.load %arg4[%c2, %c0_13, %c0_14] : memref<4x64x196xf32, #tpu.memory_space<vmem>>, vector<1x64x196xf32>
    %16 = vector.shape_cast %15 : vector<1x64x196xf32> to vector<64x196xf32>
    %cst_15 = arith.constant dense<0.000000e+00> : vector<64x128xf32>
    %17 = tpu.matmul %16, %7, %cst_15 {dimension_numbers = #tpu.dot_dimension_numbers<[1], [0], [0], [1], [0, 0, 1, 1], [], []>} : vector<64x196xf32>, vector<196x128xf32>, vector<64x128xf32> -> vector<64x128xf32>
    %18 = arith.maximumf %14, %17 : vector<64x128xf32>
    %c3 = arith.constant 3 : index
    %c0_16 = arith.constant 0 : index
    %c0_17 = arith.constant 0 : index
    %19 = vector.load %arg4[%c3, %c0_16, %c0_17] : memref<4x64x196xf32, #tpu.memory_space<vmem>>, vector<1x64x196xf32>
    %20 = vector.shape_cast %19 : vector<1x64x196xf32> to vector<64x196xf32>
    %cst_18 = arith.constant dense<0.000000e+00> : vector<64x128xf32>
    %21 = tpu.matmul %20, %7, %cst_18 {dimension_numbers = #tpu.dot_dimension_numbers<[1], [0], [0], [1], [0, 0, 1, 1], [], []>} : vector<64x196xf32>, vector<196x128xf32>, vector<64x128xf32> -> vector<64x128xf32>
    %22 = arith.maximumf %18, %21 : vector<64x128xf32>
    %cst_19 = arith.constant 0.000000e+00 : f32
    %23 = vector.broadcast %cst_19 : f32 to vector<64x128xf32>
    %24 = arith.maximumf %22, %23 : vector<64x128xf32>
    %c0_20 = arith.constant 0 : index
    %c0_21 = arith.constant 0 : index
    %c0_22 = arith.constant 0 : index
    %25 = vector.load %arg5[%c0_20, %c0_21, %c0_22] : memref<9x36x64xf32, #tpu.memory_space<vmem>>, vector<1x36x64xf32>
    %26 = vector.shape_cast %25 : vector<1x36x64xf32> to vector<36x64xf32>
    %c0_23 = arith.constant 0 : index
    %c0_24 = arith.constant 0 : index
    %c0_25 = arith.constant 0 : index
    %27 = vector.load %arg6[%c0_23, %c0_24, %c0_25] : memref<9x128x128xf32, #tpu.memory_space<vmem>>, vector<1x128x128xf32>
    %28 = vector.shape_cast %27 : vector<1x128x128xf32> to vector<128x128xf32>
    %cst_26 = arith.constant dense<0.000000e+00> : vector<64x128xf32>
    %29 = tpu.matmul %24, %28, %cst_26 {dimension_numbers = #tpu.dot_dimension_numbers<[1], [0], [0], [1], [0, 0, 1, 1], [], []>} : vector<64x128xf32>, vector<128x128xf32>, vector<64x128xf32> -> vector<64x128xf32>
    %cst_27 = arith.constant dense<0.000000e+00> : vector<36x128xf32>
    %30 = tpu.matmul %26, %29, %cst_27 {dimension_numbers = #tpu.dot_dimension_numbers<[1], [0], [0], [1], [0, 0, 1, 1], [], []>} : vector<36x64xf32>, vector<64x128xf32>, vector<36x128xf32> -> vector<36x128xf32>
    %c1_28 = arith.constant 1 : index
    %c0_29 = arith.constant 0 : index
    %c0_30 = arith.constant 0 : index
    %31 = vector.load %arg5[%c1_28, %c0_29, %c0_30] : memref<9x36x64xf32, #tpu.memory_space<vmem>>, vector<1x36x64xf32>
    %32 = vector.shape_cast %31 : vector<1x36x64xf32> to vector<36x64xf32>
    %c1_31 = arith.constant 1 : index
    %c0_32 = arith.constant 0 : index
    %c0_33 = arith.constant 0 : index
    %33 = vector.load %arg6[%c1_31, %c0_32, %c0_33] : memref<9x128x128xf32, #tpu.memory_space<vmem>>, vector<1x128x128xf32>
    %34 = vector.shape_cast %33 : vector<1x128x128xf32> to vector<128x128xf32>
    %cst_34 = arith.constant dense<0.000000e+00> : vector<64x128xf32>
    %35 = tpu.matmul %24, %34, %cst_34 {dimension_numbers = #tpu.dot_dimension_numbers<[1], [0], [0], [1], [0, 0, 1, 1], [], []>} : vector<64x128xf32>, vector<128x128xf32>, vector<64x128xf32> -> vector<64x128xf32>
    %cst_35 = arith.constant dense<0.000000e+00> : vector<36x128xf32>
    %36 = tpu.matmul %32, %35, %cst_35 {dimension_numbers = #tpu.dot_dimension_numbers<[1], [0], [0], [1], [0, 0, 1, 1], [], []>} : vector<36x64xf32>, vector<64x128xf32>, vector<36x128xf32> -> vector<36x128xf32>
    %37 = arith.addf %30, %36 : vector<36x128xf32>
    %c2_36 = arith.constant 2 : index
    %c0_37 = arith.constant 0 : index
    %c0_38 = arith.constant 0 : index
    %38 = vector.load %arg5[%c2_36, %c0_37, %c0_38] : memref<9x36x64xf32, #tpu.memory_space<vmem>>, vector<1x36x64xf32>
    %39 = vector.shape_cast %38 : vector<1x36x64xf32> to vector<36x64xf32>
    %c2_39 = arith.constant 2 : index
    %c0_40 = arith.constant 0 : index
    %c0_41 = arith.constant 0 : index
    %40 = vector.load %arg6[%c2_39, %c0_40, %c0_41] : memref<9x128x128xf32, #tpu.memory_space<vmem>>, vector<1x128x128xf32>
    %41 = vector.shape_cast %40 : vector<1x128x128xf32> to vector<128x128xf32>
    %cst_42 = arith.constant dense<0.000000e+00> : vector<64x128xf32>
    %42 = tpu.matmul %24, %41, %cst_42 {dimension_numbers = #tpu.dot_dimension_numbers<[1], [0], [0], [1], [0, 0, 1, 1], [], []>} : vector<64x128xf32>, vector<128x128xf32>, vector<64x128xf32> -> vector<64x128xf32>
    %cst_43 = arith.constant dense<0.000000e+00> : vector<36x128xf32>
    %43 = tpu.matmul %39, %42, %cst_43 {dimension_numbers = #tpu.dot_dimension_numbers<[1], [0], [0], [1], [0, 0, 1, 1], [], []>} : vector<36x64xf32>, vector<64x128xf32>, vector<36x128xf32> -> vector<36x128xf32>
    %44 = arith.addf %37, %43 : vector<36x128xf32>
    %c3_44 = arith.constant 3 : index
    %c0_45 = arith.constant 0 : index
    %c0_46 = arith.constant 0 : index
    %45 = vector.load %arg5[%c3_44, %c0_45, %c0_46] : memref<9x36x64xf32, #tpu.memory_space<vmem>>, vector<1x36x64xf32>
    %46 = vector.shape_cast %45 : vector<1x36x64xf32> to vector<36x64xf32>
    %c3_47 = arith.constant 3 : index
    %c0_48 = arith.constant 0 : index
    %c0_49 = arith.constant 0 : index
    %47 = vector.load %arg6[%c3_47, %c0_48, %c0_49] : memref<9x128x128xf32, #tpu.memory_space<vmem>>, vector<1x128x128xf32>
    %48 = vector.shape_cast %47 : vector<1x128x128xf32> to vector<128x128xf32>
    %cst_50 = arith.constant dense<0.000000e+00> : vector<64x128xf32>
    %49 = tpu.matmul %24, %48, %cst_50 {dimension_numbers = #tpu.dot_dimension_numbers<[1], [0], [0], [1], [0, 0, 1, 1], [], []>} : vector<64x128xf32>, vector<128x128xf32>, vector<64x128xf32> -> vector<64x128xf32>
    %cst_51 = arith.constant dense<0.000000e+00> : vector<36x128xf32>
    %50 = tpu.matmul %46, %49, %cst_51 {dimension_numbers = #tpu.dot_dimension_numbers<[1], [0], [0], [1], [0, 0, 1, 1], [], []>} : vector<36x64xf32>, vector<64x128xf32>, vector<36x128xf32> -> vector<36x128xf32>
    %51 = arith.addf %44, %50 : vector<36x128xf32>
    %c4 = arith.constant 4 : index
    %c0_52 = arith.constant 0 : index
    %c0_53 = arith.constant 0 : index
    %52 = vector.load %arg5[%c4, %c0_52, %c0_53] : memref<9x36x64xf32, #tpu.memory_space<vmem>>, vector<1x36x64xf32>
    %53 = vector.shape_cast %52 : vector<1x36x64xf32> to vector<36x64xf32>
    %c4_54 = arith.constant 4 : index
    %c0_55 = arith.constant 0 : index
    %c0_56 = arith.constant 0 : index
    %54 = vector.load %arg6[%c4_54, %c0_55, %c0_56] : memref<9x128x128xf32, #tpu.memory_space<vmem>>, vector<1x128x128xf32>
    %55 = vector.shape_cast %54 : vector<1x128x128xf32> to vector<128x128xf32>
    %cst_57 = arith.constant dense<0.000000e+00> : vector<64x128xf32>
    %56 = tpu.matmul %24, %55, %cst_57 {dimension_numbers = #tpu.dot_dimension_numbers<[1], [0], [0], [1], [0, 0, 1, 1], [], []>} : vector<64x128xf32>, vector<128x128xf32>, vector<64x128xf32> -> vector<64x128xf32>
    %cst_58 = arith.constant dense<0.000000e+00> : vector<36x128xf32>
    %57 = tpu.matmul %53, %56, %cst_58 {dimension_numbers = #tpu.dot_dimension_numbers<[1], [0], [0], [1], [0, 0, 1, 1], [], []>} : vector<36x64xf32>, vector<64x128xf32>, vector<36x128xf32> -> vector<36x128xf32>
    %58 = arith.addf %51, %57 : vector<36x128xf32>
    %c5 = arith.constant 5 : index
    %c0_59 = arith.constant 0 : index
    %c0_60 = arith.constant 0 : index
    %59 = vector.load %arg5[%c5, %c0_59, %c0_60] : memref<9x36x64xf32, #tpu.memory_space<vmem>>, vector<1x36x64xf32>
    %60 = vector.shape_cast %59 : vector<1x36x64xf32> to vector<36x64xf32>
    %c5_61 = arith.constant 5 : index
    %c0_62 = arith.constant 0 : index
    %c0_63 = arith.constant 0 : index
    %61 = vector.load %arg6[%c5_61, %c0_62, %c0_63] : memref<9x128x128xf32, #tpu.memory_space<vmem>>, vector<1x128x128xf32>
    %62 = vector.shape_cast %61 : vector<1x128x128xf32> to vector<128x128xf32>
    %cst_64 = arith.constant dense<0.000000e+00> : vector<64x128xf32>
    %63 = tpu.matmul %24, %62, %cst_64 {dimension_numbers = #tpu.dot_dimension_numbers<[1], [0], [0], [1], [0, 0, 1, 1], [], []>} : vector<64x128xf32>, vector<128x128xf32>, vector<64x128xf32> -> vector<64x128xf32>
    %cst_65 = arith.constant dense<0.000000e+00> : vector<36x128xf32>
    %64 = tpu.matmul %60, %63, %cst_65 {dimension_numbers = #tpu.dot_dimension_numbers<[1], [0], [0], [1], [0, 0, 1, 1], [], []>} : vector<36x64xf32>, vector<64x128xf32>, vector<36x128xf32> -> vector<36x128xf32>
    %65 = arith.addf %58, %64 : vector<36x128xf32>
    %c6 = arith.constant 6 : index
    %c0_66 = arith.constant 0 : index
    %c0_67 = arith.constant 0 : index
    %66 = vector.load %arg5[%c6, %c0_66, %c0_67] : memref<9x36x64xf32, #tpu.memory_space<vmem>>, vector<1x36x64xf32>
    %67 = vector.shape_cast %66 : vector<1x36x64xf32> to vector<36x64xf32>
    %c6_68 = arith.constant 6 : index
    %c0_69 = arith.constant 0 : index
    %c0_70 = arith.constant 0 : index
    %68 = vector.load %arg6[%c6_68, %c0_69, %c0_70] : memref<9x128x128xf32, #tpu.memory_space<vmem>>, vector<1x128x128xf32>
    %69 = vector.shape_cast %68 : vector<1x128x128xf32> to vector<128x128xf32>
    %cst_71 = arith.constant dense<0.000000e+00> : vector<64x128xf32>
    %70 = tpu.matmul %24, %69, %cst_71 {dimension_numbers = #tpu.dot_dimension_numbers<[1], [0], [0], [1], [0, 0, 1, 1], [], []>} : vector<64x128xf32>, vector<128x128xf32>, vector<64x128xf32> -> vector<64x128xf32>
    %cst_72 = arith.constant dense<0.000000e+00> : vector<36x128xf32>
    %71 = tpu.matmul %67, %70, %cst_72 {dimension_numbers = #tpu.dot_dimension_numbers<[1], [0], [0], [1], [0, 0, 1, 1], [], []>} : vector<36x64xf32>, vector<64x128xf32>, vector<36x128xf32> -> vector<36x128xf32>
    %72 = arith.addf %65, %71 : vector<36x128xf32>
    %c7 = arith.constant 7 : index
    %c0_73 = arith.constant 0 : index
    %c0_74 = arith.constant 0 : index
    %73 = vector.load %arg5[%c7, %c0_73, %c0_74] : memref<9x36x64xf32, #tpu.memory_space<vmem>>, vector<1x36x64xf32>
    %74 = vector.shape_cast %73 : vector<1x36x64xf32> to vector<36x64xf32>
    %c7_75 = arith.constant 7 : index
    %c0_76 = arith.constant 0 : index
    %c0_77 = arith.constant 0 : index
    %75 = vector.load %arg6[%c7_75, %c0_76, %c0_77] : memref<9x128x128xf32, #tpu.memory_space<vmem>>, vector<1x128x128xf32>
    %76 = vector.shape_cast %75 : vector<1x128x128xf32> to vector<128x128xf32>
    %cst_78 = arith.constant dense<0.000000e+00> : vector<64x128xf32>
    %77 = tpu.matmul %24, %76, %cst_78 {dimension_numbers = #tpu.dot_dimension_numbers<[1], [0], [0], [1], [0, 0, 1, 1], [], []>} : vector<64x128xf32>, vector<128x128xf32>, vector<64x128xf32> -> vector<64x128xf32>
    %cst_79 = arith.constant dense<0.000000e+00> : vector<36x128xf32>
    %78 = tpu.matmul %74, %77, %cst_79 {dimension_numbers = #tpu.dot_dimension_numbers<[1], [0], [0], [1], [0, 0, 1, 1], [], []>} : vector<36x64xf32>, vector<64x128xf32>, vector<36x128xf32> -> vector<36x128xf32>
    %79 = arith.addf %72, %78 : vector<36x128xf32>
    %c8 = arith.constant 8 : index
    %c0_80 = arith.constant 0 : index
    %c0_81 = arith.constant 0 : index
    %80 = vector.load %arg5[%c8, %c0_80, %c0_81] : memref<9x36x64xf32, #tpu.memory_space<vmem>>, vector<1x36x64xf32>
    %81 = vector.shape_cast %80 : vector<1x36x64xf32> to vector<36x64xf32>
    %c8_82 = arith.constant 8 : index
    %c0_83 = arith.constant 0 : index
    %c0_84 = arith.constant 0 : index
    %82 = vector.load %arg6[%c8_82, %c0_83, %c0_84] : memref<9x128x128xf32, #tpu.memory_space<vmem>>, vector<1x128x128xf32>
    %83 = vector.shape_cast %82 : vector<1x128x128xf32> to vector<128x128xf32>
    %cst_85 = arith.constant dense<0.000000e+00> : vector<64x128xf32>
    %84 = tpu.matmul %24, %83, %cst_85 {dimension_numbers = #tpu.dot_dimension_numbers<[1], [0], [0], [1], [0, 0, 1, 1], [], []>} : vector<64x128xf32>, vector<128x128xf32>, vector<64x128xf32> -> vector<64x128xf32>
    %cst_86 = arith.constant dense<0.000000e+00> : vector<36x128xf32>
    %85 = tpu.matmul %81, %84, %cst_86 {dimension_numbers = #tpu.dot_dimension_numbers<[1], [0], [0], [1], [0, 0, 1, 1], [], []>} : vector<36x64xf32>, vector<64x128xf32>, vector<36x128xf32> -> vector<36x128xf32>
    %86 = arith.addf %79, %85 : vector<36x128xf32>
    %87 = vector.extract_strided_slice %0 {offsets = [1, 0], sizes = [1, 128], strides = [1, 1]} : vector<6x128xf32> to vector<1x128xf32>
    %88 = vector.broadcast %87 : vector<1x128xf32> to vector<36x128xf32>
    %89 = arith.addf %86, %88 : vector<36x128xf32>
    %c0_87 = arith.constant 0 : index
    %c0_88 = arith.constant 0 : index
    %c0_89 = arith.constant 0 : index
    %90 = vector.load %arg7[%c0_87, %c0_88, %c0_89] : memref<4x9x36xf32, #tpu.memory_space<vmem>>, vector<1x9x36xf32>
    %91 = vector.shape_cast %90 : vector<1x9x36xf32> to vector<9x36xf32>
    %cst_90 = arith.constant dense<0.000000e+00> : vector<9x128xf32>
    %92 = tpu.matmul %91, %89, %cst_90 {dimension_numbers = #tpu.dot_dimension_numbers<[1], [0], [0], [1], [0, 0, 1, 1], [], []>} : vector<9x36xf32>, vector<36x128xf32>, vector<9x128xf32> -> vector<9x128xf32>
    %c1_91 = arith.constant 1 : index
    %c0_92 = arith.constant 0 : index
    %c0_93 = arith.constant 0 : index
    %93 = vector.load %arg7[%c1_91, %c0_92, %c0_93] : memref<4x9x36xf32, #tpu.memory_space<vmem>>, vector<1x9x36xf32>
    %94 = vector.shape_cast %93 : vector<1x9x36xf32> to vector<9x36xf32>
    %cst_94 = arith.constant dense<0.000000e+00> : vector<9x128xf32>
    %95 = tpu.matmul %94, %89, %cst_94 {dimension_numbers = #tpu.dot_dimension_numbers<[1], [0], [0], [1], [0, 0, 1, 1], [], []>} : vector<9x36xf32>, vector<36x128xf32>, vector<9x128xf32> -> vector<9x128xf32>
    %96 = arith.maximumf %92, %95 : vector<9x128xf32>
    %c2_95 = arith.constant 2 : index
    %c0_96 = arith.constant 0 : index
    %c0_97 = arith.constant 0 : index
    %97 = vector.load %arg7[%c2_95, %c0_96, %c0_97] : memref<4x9x36xf32, #tpu.memory_space<vmem>>, vector<1x9x36xf32>
    %98 = vector.shape_cast %97 : vector<1x9x36xf32> to vector<9x36xf32>
    %cst_98 = arith.constant dense<0.000000e+00> : vector<9x128xf32>
    %99 = tpu.matmul %98, %89, %cst_98 {dimension_numbers = #tpu.dot_dimension_numbers<[1], [0], [0], [1], [0, 0, 1, 1], [], []>} : vector<9x36xf32>, vector<36x128xf32>, vector<9x128xf32> -> vector<9x128xf32>
    %100 = arith.maximumf %96, %99 : vector<9x128xf32>
    %c3_99 = arith.constant 3 : index
    %c0_100 = arith.constant 0 : index
    %c0_101 = arith.constant 0 : index
    %101 = vector.load %arg7[%c3_99, %c0_100, %c0_101] : memref<4x9x36xf32, #tpu.memory_space<vmem>>, vector<1x9x36xf32>
    %102 = vector.shape_cast %101 : vector<1x9x36xf32> to vector<9x36xf32>
    %cst_102 = arith.constant dense<0.000000e+00> : vector<9x128xf32>
    %103 = tpu.matmul %102, %89, %cst_102 {dimension_numbers = #tpu.dot_dimension_numbers<[1], [0], [0], [1], [0, 0, 1, 1], [], []>} : vector<9x36xf32>, vector<36x128xf32>, vector<9x128xf32> -> vector<9x128xf32>
    %104 = arith.maximumf %100, %103 : vector<9x128xf32>
    %cst_103 = arith.constant 0.000000e+00 : f32
    %105 = vector.broadcast %cst_103 : f32 to vector<9x128xf32>
    %106 = arith.maximumf %104, %105 : vector<9x128xf32>
    %c0_104 = arith.constant 0 : index
    %c0_105 = arith.constant 0 : index
    %c0_106 = arith.constant 0 : index
    %107 = vector.load %arg8[%c0_104, %c0_105, %c0_106] : memref<9x4x9xf32, #tpu.memory_space<vmem>>, vector<1x4x9xf32>
    %108 = vector.shape_cast %107 : vector<1x4x9xf32> to vector<4x9xf32>
    %c0_107 = arith.constant 0 : index
    %c0_108 = arith.constant 0 : index
    %c0_109 = arith.constant 0 : index
    %109 = vector.load %arg9[%c0_107, %c0_108, %c0_109] : memref<9x128x128xf32, #tpu.memory_space<vmem>>, vector<1x128x128xf32>
    %110 = vector.shape_cast %109 : vector<1x128x128xf32> to vector<128x128xf32>
    %cst_110 = arith.constant dense<0.000000e+00> : vector<9x128xf32>
    %111 = tpu.matmul %106, %110, %cst_110 {dimension_numbers = #tpu.dot_dimension_numbers<[1], [0], [0], [1], [0, 0, 1, 1], [], []>} : vector<9x128xf32>, vector<128x128xf32>, vector<9x128xf32> -> vector<9x128xf32>
    %cst_111 = arith.constant dense<0.000000e+00> : vector<4x128xf32>
    %112 = tpu.matmul %108, %111, %cst_111 {dimension_numbers = #tpu.dot_dimension_numbers<[1], [0], [0], [1], [0, 0, 1, 1], [], []>} : vector<4x9xf32>, vector<9x128xf32>, vector<4x128xf32> -> vector<4x128xf32>
    %c1_112 = arith.constant 1 : index
    %c0_113 = arith.constant 0 : index
    %c0_114 = arith.constant 0 : index
    %113 = vector.load %arg8[%c1_112, %c0_113, %c0_114] : memref<9x4x9xf32, #tpu.memory_space<vmem>>, vector<1x4x9xf32>
    %114 = vector.shape_cast %113 : vector<1x4x9xf32> to vector<4x9xf32>
    %c1_115 = arith.constant 1 : index
    %c0_116 = arith.constant 0 : index
    %c0_117 = arith.constant 0 : index
    %115 = vector.load %arg9[%c1_115, %c0_116, %c0_117] : memref<9x128x128xf32, #tpu.memory_space<vmem>>, vector<1x128x128xf32>
    %116 = vector.shape_cast %115 : vector<1x128x128xf32> to vector<128x128xf32>
    %cst_118 = arith.constant dense<0.000000e+00> : vector<9x128xf32>
    %117 = tpu.matmul %106, %116, %cst_118 {dimension_numbers = #tpu.dot_dimension_numbers<[1], [0], [0], [1], [0, 0, 1, 1], [], []>} : vector<9x128xf32>, vector<128x128xf32>, vector<9x128xf32> -> vector<9x128xf32>
    %cst_119 = arith.constant dense<0.000000e+00> : vector<4x128xf32>
    %118 = tpu.matmul %114, %117, %cst_119 {dimension_numbers = #tpu.dot_dimension_numbers<[1], [0], [0], [1], [0, 0, 1, 1], [], []>} : vector<4x9xf32>, vector<9x128xf32>, vector<4x128xf32> -> vector<4x128xf32>
    %119 = arith.addf %112, %118 : vector<4x128xf32>
    %c2_120 = arith.constant 2 : index
    %c0_121 = arith.constant 0 : index
    %c0_122 = arith.constant 0 : index
    %120 = vector.load %arg8[%c2_120, %c0_121, %c0_122] : memref<9x4x9xf32, #tpu.memory_space<vmem>>, vector<1x4x9xf32>
    %121 = vector.shape_cast %120 : vector<1x4x9xf32> to vector<4x9xf32>
    %c2_123 = arith.constant 2 : index
    %c0_124 = arith.constant 0 : index
    %c0_125 = arith.constant 0 : index
    %122 = vector.load %arg9[%c2_123, %c0_124, %c0_125] : memref<9x128x128xf32, #tpu.memory_space<vmem>>, vector<1x128x128xf32>
    %123 = vector.shape_cast %122 : vector<1x128x128xf32> to vector<128x128xf32>
    %cst_126 = arith.constant dense<0.000000e+00> : vector<9x128xf32>
    %124 = tpu.matmul %106, %123, %cst_126 {dimension_numbers = #tpu.dot_dimension_numbers<[1], [0], [0], [1], [0, 0, 1, 1], [], []>} : vector<9x128xf32>, vector<128x128xf32>, vector<9x128xf32> -> vector<9x128xf32>
    %cst_127 = arith.constant dense<0.000000e+00> : vector<4x128xf32>
    %125 = tpu.matmul %121, %124, %cst_127 {dimension_numbers = #tpu.dot_dimension_numbers<[1], [0], [0], [1], [0, 0, 1, 1], [], []>} : vector<4x9xf32>, vector<9x128xf32>, vector<4x128xf32> -> vector<4x128xf32>
    %126 = arith.addf %119, %125 : vector<4x128xf32>
    %c3_128 = arith.constant 3 : index
    %c0_129 = arith.constant 0 : index
    %c0_130 = arith.constant 0 : index
    %127 = vector.load %arg8[%c3_128, %c0_129, %c0_130] : memref<9x4x9xf32, #tpu.memory_space<vmem>>, vector<1x4x9xf32>
    %128 = vector.shape_cast %127 : vector<1x4x9xf32> to vector<4x9xf32>
    %c3_131 = arith.constant 3 : index
    %c0_132 = arith.constant 0 : index
    %c0_133 = arith.constant 0 : index
    %129 = vector.load %arg9[%c3_131, %c0_132, %c0_133] : memref<9x128x128xf32, #tpu.memory_space<vmem>>, vector<1x128x128xf32>
    %130 = vector.shape_cast %129 : vector<1x128x128xf32> to vector<128x128xf32>
    %cst_134 = arith.constant dense<0.000000e+00> : vector<9x128xf32>
    %131 = tpu.matmul %106, %130, %cst_134 {dimension_numbers = #tpu.dot_dimension_numbers<[1], [0], [0], [1], [0, 0, 1, 1], [], []>} : vector<9x128xf32>, vector<128x128xf32>, vector<9x128xf32> -> vector<9x128xf32>
    %cst_135 = arith.constant dense<0.000000e+00> : vector<4x128xf32>
    %132 = tpu.matmul %128, %131, %cst_135 {dimension_numbers = #tpu.dot_dimension_numbers<[1], [0], [0], [1], [0, 0, 1, 1], [], []>} : vector<4x9xf32>, vector<9x128xf32>, vector<4x128xf32> -> vector<4x128xf32>
    %133 = arith.addf %126, %132 : vector<4x128xf32>
    %c4_136 = arith.constant 4 : index
    %c0_137 = arith.constant 0 : index
    %c0_138 = arith.constant 0 : index
    %134 = vector.load %arg8[%c4_136, %c0_137, %c0_138] : memref<9x4x9xf32, #tpu.memory_space<vmem>>, vector<1x4x9xf32>
    %135 = vector.shape_cast %134 : vector<1x4x9xf32> to vector<4x9xf32>
    %c4_139 = arith.constant 4 : index
    %c0_140 = arith.constant 0 : index
    %c0_141 = arith.constant 0 : index
    %136 = vector.load %arg9[%c4_139, %c0_140, %c0_141] : memref<9x128x128xf32, #tpu.memory_space<vmem>>, vector<1x128x128xf32>
    %137 = vector.shape_cast %136 : vector<1x128x128xf32> to vector<128x128xf32>
    %cst_142 = arith.constant dense<0.000000e+00> : vector<9x128xf32>
    %138 = tpu.matmul %106, %137, %cst_142 {dimension_numbers = #tpu.dot_dimension_numbers<[1], [0], [0], [1], [0, 0, 1, 1], [], []>} : vector<9x128xf32>, vector<128x128xf32>, vector<9x128xf32> -> vector<9x128xf32>
    %cst_143 = arith.constant dense<0.000000e+00> : vector<4x128xf32>
    %139 = tpu.matmul %135, %138, %cst_143 {dimension_numbers = #tpu.dot_dimension_numbers<[1], [0], [0], [1], [0, 0, 1, 1], [], []>} : vector<4x9xf32>, vector<9x128xf32>, vector<4x128xf32> -> vector<4x128xf32>
    %140 = arith.addf %133, %139 : vector<4x128xf32>
    %c5_144 = arith.constant 5 : index
    %c0_145 = arith.constant 0 : index
    %c0_146 = arith.constant 0 : index
    %141 = vector.load %arg8[%c5_144, %c0_145, %c0_146] : memref<9x4x9xf32, #tpu.memory_space<vmem>>, vector<1x4x9xf32>
    %142 = vector.shape_cast %141 : vector<1x4x9xf32> to vector<4x9xf32>
    %c5_147 = arith.constant 5 : index
    %c0_148 = arith.constant 0 : index
    %c0_149 = arith.constant 0 : index
    %143 = vector.load %arg9[%c5_147, %c0_148, %c0_149] : memref<9x128x128xf32, #tpu.memory_space<vmem>>, vector<1x128x128xf32>
    %144 = vector.shape_cast %143 : vector<1x128x128xf32> to vector<128x128xf32>
    %cst_150 = arith.constant dense<0.000000e+00> : vector<9x128xf32>
    %145 = tpu.matmul %106, %144, %cst_150 {dimension_numbers = #tpu.dot_dimension_numbers<[1], [0], [0], [1], [0, 0, 1, 1], [], []>} : vector<9x128xf32>, vector<128x128xf32>, vector<9x128xf32> -> vector<9x128xf32>
    %cst_151 = arith.constant dense<0.000000e+00> : vector<4x128xf32>
    %146 = tpu.matmul %142, %145, %cst_151 {dimension_numbers = #tpu.dot_dimension_numbers<[1], [0], [0], [1], [0, 0, 1, 1], [], []>} : vector<4x9xf32>, vector<9x128xf32>, vector<4x128xf32> -> vector<4x128xf32>
    %147 = arith.addf %140, %146 : vector<4x128xf32>
    %c6_152 = arith.constant 6 : index
    %c0_153 = arith.constant 0 : index
    %c0_154 = arith.constant 0 : index
    %148 = vector.load %arg8[%c6_152, %c0_153, %c0_154] : memref<9x4x9xf32, #tpu.memory_space<vmem>>, vector<1x4x9xf32>
    %149 = vector.shape_cast %148 : vector<1x4x9xf32> to vector<4x9xf32>
    %c6_155 = arith.constant 6 : index
    %c0_156 = arith.constant 0 : index
    %c0_157 = arith.constant 0 : index
    %150 = vector.load %arg9[%c6_155, %c0_156, %c0_157] : memref<9x128x128xf32, #tpu.memory_space<vmem>>, vector<1x128x128xf32>
    %151 = vector.shape_cast %150 : vector<1x128x128xf32> to vector<128x128xf32>
    %cst_158 = arith.constant dense<0.000000e+00> : vector<9x128xf32>
    %152 = tpu.matmul %106, %151, %cst_158 {dimension_numbers = #tpu.dot_dimension_numbers<[1], [0], [0], [1], [0, 0, 1, 1], [], []>} : vector<9x128xf32>, vector<128x128xf32>, vector<9x128xf32> -> vector<9x128xf32>
    %cst_159 = arith.constant dense<0.000000e+00> : vector<4x128xf32>
    %153 = tpu.matmul %149, %152, %cst_159 {dimension_numbers = #tpu.dot_dimension_numbers<[1], [0], [0], [1], [0, 0, 1, 1], [], []>} : vector<4x9xf32>, vector<9x128xf32>, vector<4x128xf32> -> vector<4x128xf32>
    %154 = arith.addf %147, %153 : vector<4x128xf32>
    %c7_160 = arith.constant 7 : index
    %c0_161 = arith.constant 0 : index
    %c0_162 = arith.constant 0 : index
    %155 = vector.load %arg8[%c7_160, %c0_161, %c0_162] : memref<9x4x9xf32, #tpu.memory_space<vmem>>, vector<1x4x9xf32>
    %156 = vector.shape_cast %155 : vector<1x4x9xf32> to vector<4x9xf32>
    %c7_163 = arith.constant 7 : index
    %c0_164 = arith.constant 0 : index
    %c0_165 = arith.constant 0 : index
    %157 = vector.load %arg9[%c7_163, %c0_164, %c0_165] : memref<9x128x128xf32, #tpu.memory_space<vmem>>, vector<1x128x128xf32>
    %158 = vector.shape_cast %157 : vector<1x128x128xf32> to vector<128x128xf32>
    %cst_166 = arith.constant dense<0.000000e+00> : vector<9x128xf32>
    %159 = tpu.matmul %106, %158, %cst_166 {dimension_numbers = #tpu.dot_dimension_numbers<[1], [0], [0], [1], [0, 0, 1, 1], [], []>} : vector<9x128xf32>, vector<128x128xf32>, vector<9x128xf32> -> vector<9x128xf32>
    %cst_167 = arith.constant dense<0.000000e+00> : vector<4x128xf32>
    %160 = tpu.matmul %156, %159, %cst_167 {dimension_numbers = #tpu.dot_dimension_numbers<[1], [0], [0], [1], [0, 0, 1, 1], [], []>} : vector<4x9xf32>, vector<9x128xf32>, vector<4x128xf32> -> vector<4x128xf32>
    %161 = arith.addf %154, %160 : vector<4x128xf32>
    %c8_168 = arith.constant 8 : index
    %c0_169 = arith.constant 0 : index
    %c0_170 = arith.constant 0 : index
    %162 = vector.load %arg8[%c8_168, %c0_169, %c0_170] : memref<9x4x9xf32, #tpu.memory_space<vmem>>, vector<1x4x9xf32>
    %163 = vector.shape_cast %162 : vector<1x4x9xf32> to vector<4x9xf32>
    %c8_171 = arith.constant 8 : index
    %c0_172 = arith.constant 0 : index
    %c0_173 = arith.constant 0 : index
    %164 = vector.load %arg9[%c8_171, %c0_172, %c0_173] : memref<9x128x128xf32, #tpu.memory_space<vmem>>, vector<1x128x128xf32>
    %165 = vector.shape_cast %164 : vector<1x128x128xf32> to vector<128x128xf32>
    %cst_174 = arith.constant dense<0.000000e+00> : vector<9x128xf32>
    %166 = tpu.matmul %106, %165, %cst_174 {dimension_numbers = #tpu.dot_dimension_numbers<[1], [0], [0], [1], [0, 0, 1, 1], [], []>} : vector<9x128xf32>, vector<128x128xf32>, vector<9x128xf32> -> vector<9x128xf32>
    %cst_175 = arith.constant dense<0.000000e+00> : vector<4x128xf32>
    %167 = tpu.matmul %163, %166, %cst_175 {dimension_numbers = #tpu.dot_dimension_numbers<[1], [0], [0], [1], [0, 0, 1, 1], [], []>} : vector<4x9xf32>, vector<9x128xf32>, vector<4x128xf32> -> vector<4x128xf32>
    %168 = arith.addf %161, %167 : vector<4x128xf32>
    %169 = vector.extract_strided_slice %0 {offsets = [2, 0], sizes = [1, 128], strides = [1, 1]} : vector<6x128xf32> to vector<1x128xf32>
    %170 = vector.broadcast %169 : vector<1x128xf32> to vector<4x128xf32>
    %171 = arith.addf %168, %170 : vector<4x128xf32>
    %c0_176 = arith.constant 0 : index
    %c0_177 = arith.constant 0 : index
    %c0_178 = arith.constant 0 : index
    %172 = vector.load %arg10[%c0_176, %c0_177, %c0_178] : memref<9x25x4xf32, #tpu.memory_space<vmem>>, vector<1x25x4xf32>
    %173 = vector.shape_cast %172 : vector<1x25x4xf32> to vector<25x4xf32>
    %c0_179 = arith.constant 0 : index
    %c0_180 = arith.constant 0 : index
    %c0_181 = arith.constant 0 : index
    %174 = vector.load %arg11[%c0_179, %c0_180, %c0_181] : memref<9x128x128xf32, #tpu.memory_space<vmem>>, vector<1x128x128xf32>
    %175 = vector.shape_cast %174 : vector<1x128x128xf32> to vector<128x128xf32>
    %cst_182 = arith.constant dense<0.000000e+00> : vector<4x128xf32>
    %176 = tpu.matmul %171, %175, %cst_182 {dimension_numbers = #tpu.dot_dimension_numbers<[1], [0], [0], [1], [0, 0, 1, 1], [], []>} : vector<4x128xf32>, vector<128x128xf32>, vector<4x128xf32> -> vector<4x128xf32>
    %cst_183 = arith.constant dense<0.000000e+00> : vector<25x128xf32>
    %177 = tpu.matmul %173, %176, %cst_183 {dimension_numbers = #tpu.dot_dimension_numbers<[1], [0], [0], [1], [0, 0, 1, 1], [], []>} : vector<25x4xf32>, vector<4x128xf32>, vector<25x128xf32> -> vector<25x128xf32>
    %c1_184 = arith.constant 1 : index
    %c0_185 = arith.constant 0 : index
    %c0_186 = arith.constant 0 : index
    %178 = vector.load %arg10[%c1_184, %c0_185, %c0_186] : memref<9x25x4xf32, #tpu.memory_space<vmem>>, vector<1x25x4xf32>
    %179 = vector.shape_cast %178 : vector<1x25x4xf32> to vector<25x4xf32>
    %c1_187 = arith.constant 1 : index
    %c0_188 = arith.constant 0 : index
    %c0_189 = arith.constant 0 : index
    %180 = vector.load %arg11[%c1_187, %c0_188, %c0_189] : memref<9x128x128xf32, #tpu.memory_space<vmem>>, vector<1x128x128xf32>
    %181 = vector.shape_cast %180 : vector<1x128x128xf32> to vector<128x128xf32>
    %cst_190 = arith.constant dense<0.000000e+00> : vector<4x128xf32>
    %182 = tpu.matmul %171, %181, %cst_190 {dimension_numbers = #tpu.dot_dimension_numbers<[1], [0], [0], [1], [0, 0, 1, 1], [], []>} : vector<4x128xf32>, vector<128x128xf32>, vector<4x128xf32> -> vector<4x128xf32>
    %cst_191 = arith.constant dense<0.000000e+00> : vector<25x128xf32>
    %183 = tpu.matmul %179, %182, %cst_191 {dimension_numbers = #tpu.dot_dimension_numbers<[1], [0], [0], [1], [0, 0, 1, 1], [], []>} : vector<25x4xf32>, vector<4x128xf32>, vector<25x128xf32> -> vector<25x128xf32>
    %184 = arith.addf %177, %183 : vector<25x128xf32>
    %c2_192 = arith.constant 2 : index
    %c0_193 = arith.constant 0 : index
    %c0_194 = arith.constant 0 : index
    %185 = vector.load %arg10[%c2_192, %c0_193, %c0_194] : memref<9x25x4xf32, #tpu.memory_space<vmem>>, vector<1x25x4xf32>
    %186 = vector.shape_cast %185 : vector<1x25x4xf32> to vector<25x4xf32>
    %c2_195 = arith.constant 2 : index
    %c0_196 = arith.constant 0 : index
    %c0_197 = arith.constant 0 : index
    %187 = vector.load %arg11[%c2_195, %c0_196, %c0_197] : memref<9x128x128xf32, #tpu.memory_space<vmem>>, vector<1x128x128xf32>
    %188 = vector.shape_cast %187 : vector<1x128x128xf32> to vector<128x128xf32>
    %cst_198 = arith.constant dense<0.000000e+00> : vector<4x128xf32>
    %189 = tpu.matmul %171, %188, %cst_198 {dimension_numbers = #tpu.dot_dimension_numbers<[1], [0], [0], [1], [0, 0, 1, 1], [], []>} : vector<4x128xf32>, vector<128x128xf32>, vector<4x128xf32> -> vector<4x128xf32>
    %cst_199 = arith.constant dense<0.000000e+00> : vector<25x128xf32>
    %190 = tpu.matmul %186, %189, %cst_199 {dimension_numbers = #tpu.dot_dimension_numbers<[1], [0], [0], [1], [0, 0, 1, 1], [], []>} : vector<25x4xf32>, vector<4x128xf32>, vector<25x128xf32> -> vector<25x128xf32>
    %191 = arith.addf %184, %190 : vector<25x128xf32>
    %c3_200 = arith.constant 3 : index
    %c0_201 = arith.constant 0 : index
    %c0_202 = arith.constant 0 : index
    %192 = vector.load %arg10[%c3_200, %c0_201, %c0_202] : memref<9x25x4xf32, #tpu.memory_space<vmem>>, vector<1x25x4xf32>
    %193 = vector.shape_cast %192 : vector<1x25x4xf32> to vector<25x4xf32>
    %c3_203 = arith.constant 3 : index
    %c0_204 = arith.constant 0 : index
    %c0_205 = arith.constant 0 : index
    %194 = vector.load %arg11[%c3_203, %c0_204, %c0_205] : memref<9x128x128xf32, #tpu.memory_space<vmem>>, vector<1x128x128xf32>
    %195 = vector.shape_cast %194 : vector<1x128x128xf32> to vector<128x128xf32>
    %cst_206 = arith.constant dense<0.000000e+00> : vector<4x128xf32>
    %196 = tpu.matmul %171, %195, %cst_206 {dimension_numbers = #tpu.dot_dimension_numbers<[1], [0], [0], [1], [0, 0, 1, 1], [], []>} : vector<4x128xf32>, vector<128x128xf32>, vector<4x128xf32> -> vector<4x128xf32>
    %cst_207 = arith.constant dense<0.000000e+00> : vector<25x128xf32>
    %197 = tpu.matmul %193, %196, %cst_207 {dimension_numbers = #tpu.dot_dimension_numbers<[1], [0], [0], [1], [0, 0, 1, 1], [], []>} : vector<25x4xf32>, vector<4x128xf32>, vector<25x128xf32> -> vector<25x128xf32>
    %198 = arith.addf %191, %197 : vector<25x128xf32>
    %c4_208 = arith.constant 4 : index
    %c0_209 = arith.constant 0 : index
    %c0_210 = arith.constant 0 : index
    %199 = vector.load %arg10[%c4_208, %c0_209, %c0_210] : memref<9x25x4xf32, #tpu.memory_space<vmem>>, vector<1x25x4xf32>
    %200 = vector.shape_cast %199 : vector<1x25x4xf32> to vector<25x4xf32>
    %c4_211 = arith.constant 4 : index
    %c0_212 = arith.constant 0 : index
    %c0_213 = arith.constant 0 : index
    %201 = vector.load %arg11[%c4_211, %c0_212, %c0_213] : memref<9x128x128xf32, #tpu.memory_space<vmem>>, vector<1x128x128xf32>
    %202 = vector.shape_cast %201 : vector<1x128x128xf32> to vector<128x128xf32>
    %cst_214 = arith.constant dense<0.000000e+00> : vector<4x128xf32>
    %203 = tpu.matmul %171, %202, %cst_214 {dimension_numbers = #tpu.dot_dimension_numbers<[1], [0], [0], [1], [0, 0, 1, 1], [], []>} : vector<4x128xf32>, vector<128x128xf32>, vector<4x128xf32> -> vector<4x128xf32>
    %cst_215 = arith.constant dense<0.000000e+00> : vector<25x128xf32>
    %204 = tpu.matmul %200, %203, %cst_215 {dimension_numbers = #tpu.dot_dimension_numbers<[1], [0], [0], [1], [0, 0, 1, 1], [], []>} : vector<25x4xf32>, vector<4x128xf32>, vector<25x128xf32> -> vector<25x128xf32>
    %205 = arith.addf %198, %204 : vector<25x128xf32>
    %c5_216 = arith.constant 5 : index
    %c0_217 = arith.constant 0 : index
    %c0_218 = arith.constant 0 : index
    %206 = vector.load %arg10[%c5_216, %c0_217, %c0_218] : memref<9x25x4xf32, #tpu.memory_space<vmem>>, vector<1x25x4xf32>
    %207 = vector.shape_cast %206 : vector<1x25x4xf32> to vector<25x4xf32>
    %c5_219 = arith.constant 5 : index
    %c0_220 = arith.constant 0 : index
    %c0_221 = arith.constant 0 : index
    %208 = vector.load %arg11[%c5_219, %c0_220, %c0_221] : memref<9x128x128xf32, #tpu.memory_space<vmem>>, vector<1x128x128xf32>
    %209 = vector.shape_cast %208 : vector<1x128x128xf32> to vector<128x128xf32>
    %cst_222 = arith.constant dense<0.000000e+00> : vector<4x128xf32>
    %210 = tpu.matmul %171, %209, %cst_222 {dimension_numbers = #tpu.dot_dimension_numbers<[1], [0], [0], [1], [0, 0, 1, 1], [], []>} : vector<4x128xf32>, vector<128x128xf32>, vector<4x128xf32> -> vector<4x128xf32>
    %cst_223 = arith.constant dense<0.000000e+00> : vector<25x128xf32>
    %211 = tpu.matmul %207, %210, %cst_223 {dimension_numbers = #tpu.dot_dimension_numbers<[1], [0], [0], [1], [0, 0, 1, 1], [], []>} : vector<25x4xf32>, vector<4x128xf32>, vector<25x128xf32> -> vector<25x128xf32>
    %212 = arith.addf %205, %211 : vector<25x128xf32>
    %c6_224 = arith.constant 6 : index
    %c0_225 = arith.constant 0 : index
    %c0_226 = arith.constant 0 : index
    %213 = vector.load %arg10[%c6_224, %c0_225, %c0_226] : memref<9x25x4xf32, #tpu.memory_space<vmem>>, vector<1x25x4xf32>
    %214 = vector.shape_cast %213 : vector<1x25x4xf32> to vector<25x4xf32>
    %c6_227 = arith.constant 6 : index
    %c0_228 = arith.constant 0 : index
    %c0_229 = arith.constant 0 : index
    %215 = vector.load %arg11[%c6_227, %c0_228, %c0_229] : memref<9x128x128xf32, #tpu.memory_space<vmem>>, vector<1x128x128xf32>
    %216 = vector.shape_cast %215 : vector<1x128x128xf32> to vector<128x128xf32>
    %cst_230 = arith.constant dense<0.000000e+00> : vector<4x128xf32>
    %217 = tpu.matmul %171, %216, %cst_230 {dimension_numbers = #tpu.dot_dimension_numbers<[1], [0], [0], [1], [0, 0, 1, 1], [], []>} : vector<4x128xf32>, vector<128x128xf32>, vector<4x128xf32> -> vector<4x128xf32>
    %cst_231 = arith.constant dense<0.000000e+00> : vector<25x128xf32>
    %218 = tpu.matmul %214, %217, %cst_231 {dimension_numbers = #tpu.dot_dimension_numbers<[1], [0], [0], [1], [0, 0, 1, 1], [], []>} : vector<25x4xf32>, vector<4x128xf32>, vector<25x128xf32> -> vector<25x128xf32>
    %219 = arith.addf %212, %218 : vector<25x128xf32>
    %c7_232 = arith.constant 7 : index
    %c0_233 = arith.constant 0 : index
    %c0_234 = arith.constant 0 : index
    %220 = vector.load %arg10[%c7_232, %c0_233, %c0_234] : memref<9x25x4xf32, #tpu.memory_space<vmem>>, vector<1x25x4xf32>
    %221 = vector.shape_cast %220 : vector<1x25x4xf32> to vector<25x4xf32>
    %c7_235 = arith.constant 7 : index
    %c0_236 = arith.constant 0 : index
    %c0_237 = arith.constant 0 : index
    %222 = vector.load %arg11[%c7_235, %c0_236, %c0_237] : memref<9x128x128xf32, #tpu.memory_space<vmem>>, vector<1x128x128xf32>
    %223 = vector.shape_cast %222 : vector<1x128x128xf32> to vector<128x128xf32>
    %cst_238 = arith.constant dense<0.000000e+00> : vector<4x128xf32>
    %224 = tpu.matmul %171, %223, %cst_238 {dimension_numbers = #tpu.dot_dimension_numbers<[1], [0], [0], [1], [0, 0, 1, 1], [], []>} : vector<4x128xf32>, vector<128x128xf32>, vector<4x128xf32> -> vector<4x128xf32>
    %cst_239 = arith.constant dense<0.000000e+00> : vector<25x128xf32>
    %225 = tpu.matmul %221, %224, %cst_239 {dimension_numbers = #tpu.dot_dimension_numbers<[1], [0], [0], [1], [0, 0, 1, 1], [], []>} : vector<25x4xf32>, vector<4x128xf32>, vector<25x128xf32> -> vector<25x128xf32>
    %226 = arith.addf %219, %225 : vector<25x128xf32>
    %c8_240 = arith.constant 8 : index
    %c0_241 = arith.constant 0 : index
    %c0_242 = arith.constant 0 : index
    %227 = vector.load %arg10[%c8_240, %c0_241, %c0_242] : memref<9x25x4xf32, #tpu.memory_space<vmem>>, vector<1x25x4xf32>
    %228 = vector.shape_cast %227 : vector<1x25x4xf32> to vector<25x4xf32>
    %c8_243 = arith.constant 8 : index
    %c0_244 = arith.constant 0 : index
    %c0_245 = arith.constant 0 : index
    %229 = vector.load %arg11[%c8_243, %c0_244, %c0_245] : memref<9x128x128xf32, #tpu.memory_space<vmem>>, vector<1x128x128xf32>
    %230 = vector.shape_cast %229 : vector<1x128x128xf32> to vector<128x128xf32>
    %cst_246 = arith.constant dense<0.000000e+00> : vector<4x128xf32>
    %231 = tpu.matmul %171, %230, %cst_246 {dimension_numbers = #tpu.dot_dimension_numbers<[1], [0], [0], [1], [0, 0, 1, 1], [], []>} : vector<4x128xf32>, vector<128x128xf32>, vector<4x128xf32> -> vector<4x128xf32>
    %cst_247 = arith.constant dense<0.000000e+00> : vector<25x128xf32>
    %232 = tpu.matmul %228, %231, %cst_247 {dimension_numbers = #tpu.dot_dimension_numbers<[1], [0], [0], [1], [0, 0, 1, 1], [], []>} : vector<25x4xf32>, vector<4x128xf32>, vector<25x128xf32> -> vector<25x128xf32>
    %233 = arith.addf %226, %232 : vector<25x128xf32>
    %234 = vector.extract_strided_slice %0 {offsets = [3, 0], sizes = [1, 128], strides = [1, 1]} : vector<6x128xf32> to vector<1x128xf32>
    %235 = vector.broadcast %234 : vector<1x128xf32> to vector<25x128xf32>
    %236 = arith.addf %233, %235 : vector<25x128xf32>
    %cst_248 = arith.constant 0.000000e+00 : f32
    %237 = vector.broadcast %cst_248 : f32 to vector<25x128xf32>
    %238 = arith.maximumf %236, %237 : vector<25x128xf32>
    %c0_249 = arith.constant 0 : index
    %c0_250 = arith.constant 0 : index
    %c0_251 = arith.constant 0 : index
    %239 = vector.load %arg12[%c0_249, %c0_250, %c0_251] : memref<9x225x25xf32, #tpu.memory_space<vmem>>, vector<1x225x25xf32>
    %240 = vector.shape_cast %239 : vector<1x225x25xf32> to vector<225x25xf32>
    %c0_252 = arith.constant 0 : index
    %c0_253 = arith.constant 0 : index
    %c0_254 = arith.constant 0 : index
    %241 = vector.load %arg13[%c0_252, %c0_253, %c0_254] : memref<9x128x128xf32, #tpu.memory_space<vmem>>, vector<1x128x128xf32>
    %242 = vector.shape_cast %241 : vector<1x128x128xf32> to vector<128x128xf32>
    %cst_255 = arith.constant dense<0.000000e+00> : vector<25x128xf32>
    %243 = tpu.matmul %238, %242, %cst_255 {dimension_numbers = #tpu.dot_dimension_numbers<[1], [0], [0], [1], [0, 0, 1, 1], [], []>} : vector<25x128xf32>, vector<128x128xf32>, vector<25x128xf32> -> vector<25x128xf32>
    %cst_256 = arith.constant dense<0.000000e+00> : vector<225x128xf32>
    %244 = tpu.matmul %240, %243, %cst_256 {dimension_numbers = #tpu.dot_dimension_numbers<[1], [0], [0], [1], [0, 0, 1, 1], [], []>} : vector<225x25xf32>, vector<25x128xf32>, vector<225x128xf32> -> vector<225x128xf32>
    %c1_257 = arith.constant 1 : index
    %c0_258 = arith.constant 0 : index
    %c0_259 = arith.constant 0 : index
    %245 = vector.load %arg12[%c1_257, %c0_258, %c0_259] : memref<9x225x25xf32, #tpu.memory_space<vmem>>, vector<1x225x25xf32>
    %246 = vector.shape_cast %245 : vector<1x225x25xf32> to vector<225x25xf32>
    %c1_260 = arith.constant 1 : index
    %c0_261 = arith.constant 0 : index
    %c0_262 = arith.constant 0 : index
    %247 = vector.load %arg13[%c1_260, %c0_261, %c0_262] : memref<9x128x128xf32, #tpu.memory_space<vmem>>, vector<1x128x128xf32>
    %248 = vector.shape_cast %247 : vector<1x128x128xf32> to vector<128x128xf32>
    %cst_263 = arith.constant dense<0.000000e+00> : vector<25x128xf32>
    %249 = tpu.matmul %238, %248, %cst_263 {dimension_numbers = #tpu.dot_dimension_numbers<[1], [0], [0], [1], [0, 0, 1, 1], [], []>} : vector<25x128xf32>, vector<128x128xf32>, vector<25x128xf32> -> vector<25x128xf32>
    %cst_264 = arith.constant dense<0.000000e+00> : vector<225x128xf32>
    %250 = tpu.matmul %246, %249, %cst_264 {dimension_numbers = #tpu.dot_dimension_numbers<[1], [0], [0], [1], [0, 0, 1, 1], [], []>} : vector<225x25xf32>, vector<25x128xf32>, vector<225x128xf32> -> vector<225x128xf32>
    %251 = arith.addf %244, %250 : vector<225x128xf32>
    %c2_265 = arith.constant 2 : index
    %c0_266 = arith.constant 0 : index
    %c0_267 = arith.constant 0 : index
    %252 = vector.load %arg12[%c2_265, %c0_266, %c0_267] : memref<9x225x25xf32, #tpu.memory_space<vmem>>, vector<1x225x25xf32>
    %253 = vector.shape_cast %252 : vector<1x225x25xf32> to vector<225x25xf32>
    %c2_268 = arith.constant 2 : index
    %c0_269 = arith.constant 0 : index
    %c0_270 = arith.constant 0 : index
    %254 = vector.load %arg13[%c2_268, %c0_269, %c0_270] : memref<9x128x128xf32, #tpu.memory_space<vmem>>, vector<1x128x128xf32>
    %255 = vector.shape_cast %254 : vector<1x128x128xf32> to vector<128x128xf32>
    %cst_271 = arith.constant dense<0.000000e+00> : vector<25x128xf32>
    %256 = tpu.matmul %238, %255, %cst_271 {dimension_numbers = #tpu.dot_dimension_numbers<[1], [0], [0], [1], [0, 0, 1, 1], [], []>} : vector<25x128xf32>, vector<128x128xf32>, vector<25x128xf32> -> vector<25x128xf32>
    %cst_272 = arith.constant dense<0.000000e+00> : vector<225x128xf32>
    %257 = tpu.matmul %253, %256, %cst_272 {dimension_numbers = #tpu.dot_dimension_numbers<[1], [0], [0], [1], [0, 0, 1, 1], [], []>} : vector<225x25xf32>, vector<25x128xf32>, vector<225x128xf32> -> vector<225x128xf32>
    %258 = arith.addf %251, %257 : vector<225x128xf32>
    %c3_273 = arith.constant 3 : index
    %c0_274 = arith.constant 0 : index
    %c0_275 = arith.constant 0 : index
    %259 = vector.load %arg12[%c3_273, %c0_274, %c0_275] : memref<9x225x25xf32, #tpu.memory_space<vmem>>, vector<1x225x25xf32>
    %260 = vector.shape_cast %259 : vector<1x225x25xf32> to vector<225x25xf32>
    %c3_276 = arith.constant 3 : index
    %c0_277 = arith.constant 0 : index
    %c0_278 = arith.constant 0 : index
    %261 = vector.load %arg13[%c3_276, %c0_277, %c0_278] : memref<9x128x128xf32, #tpu.memory_space<vmem>>, vector<1x128x128xf32>
    %262 = vector.shape_cast %261 : vector<1x128x128xf32> to vector<128x128xf32>
    %cst_279 = arith.constant dense<0.000000e+00> : vector<25x128xf32>
    %263 = tpu.matmul %238, %262, %cst_279 {dimension_numbers = #tpu.dot_dimension_numbers<[1], [0], [0], [1], [0, 0, 1, 1], [], []>} : vector<25x128xf32>, vector<128x128xf32>, vector<25x128xf32> -> vector<25x128xf32>
    %cst_280 = arith.constant dense<0.000000e+00> : vector<225x128xf32>
    %264 = tpu.matmul %260, %263, %cst_280 {dimension_numbers = #tpu.dot_dimension_numbers<[1], [0], [0], [1], [0, 0, 1, 1], [], []>} : vector<225x25xf32>, vector<25x128xf32>, vector<225x128xf32> -> vector<225x128xf32>
    %265 = arith.addf %258, %264 : vector<225x128xf32>
    %c4_281 = arith.constant 4 : index
    %c0_282 = arith.constant 0 : index
    %c0_283 = arith.constant 0 : index
    %266 = vector.load %arg12[%c4_281, %c0_282, %c0_283] : memref<9x225x25xf32, #tpu.memory_space<vmem>>, vector<1x225x25xf32>
    %267 = vector.shape_cast %266 : vector<1x225x25xf32> to vector<225x25xf32>
    %c4_284 = arith.constant 4 : index
    %c0_285 = arith.constant 0 : index
    %c0_286 = arith.constant 0 : index
    %268 = vector.load %arg13[%c4_284, %c0_285, %c0_286] : memref<9x128x128xf32, #tpu.memory_space<vmem>>, vector<1x128x128xf32>
    %269 = vector.shape_cast %268 : vector<1x128x128xf32> to vector<128x128xf32>
    %cst_287 = arith.constant dense<0.000000e+00> : vector<25x128xf32>
    %270 = tpu.matmul %238, %269, %cst_287 {dimension_numbers = #tpu.dot_dimension_numbers<[1], [0], [0], [1], [0, 0, 1, 1], [], []>} : vector<25x128xf32>, vector<128x128xf32>, vector<25x128xf32> -> vector<25x128xf32>
    %cst_288 = arith.constant dense<0.000000e+00> : vector<225x128xf32>
    %271 = tpu.matmul %267, %270, %cst_288 {dimension_numbers = #tpu.dot_dimension_numbers<[1], [0], [0], [1], [0, 0, 1, 1], [], []>} : vector<225x25xf32>, vector<25x128xf32>, vector<225x128xf32> -> vector<225x128xf32>
    %272 = arith.addf %265, %271 : vector<225x128xf32>
    %c5_289 = arith.constant 5 : index
    %c0_290 = arith.constant 0 : index
    %c0_291 = arith.constant 0 : index
    %273 = vector.load %arg12[%c5_289, %c0_290, %c0_291] : memref<9x225x25xf32, #tpu.memory_space<vmem>>, vector<1x225x25xf32>
    %274 = vector.shape_cast %273 : vector<1x225x25xf32> to vector<225x25xf32>
    %c5_292 = arith.constant 5 : index
    %c0_293 = arith.constant 0 : index
    %c0_294 = arith.constant 0 : index
    %275 = vector.load %arg13[%c5_292, %c0_293, %c0_294] : memref<9x128x128xf32, #tpu.memory_space<vmem>>, vector<1x128x128xf32>
    %276 = vector.shape_cast %275 : vector<1x128x128xf32> to vector<128x128xf32>
    %cst_295 = arith.constant dense<0.000000e+00> : vector<25x128xf32>
    %277 = tpu.matmul %238, %276, %cst_295 {dimension_numbers = #tpu.dot_dimension_numbers<[1], [0], [0], [1], [0, 0, 1, 1], [], []>} : vector<25x128xf32>, vector<128x128xf32>, vector<25x128xf32> -> vector<25x128xf32>
    %cst_296 = arith.constant dense<0.000000e+00> : vector<225x128xf32>
    %278 = tpu.matmul %274, %277, %cst_296 {dimension_numbers = #tpu.dot_dimension_numbers<[1], [0], [0], [1], [0, 0, 1, 1], [], []>} : vector<225x25xf32>, vector<25x128xf32>, vector<225x128xf32> -> vector<225x128xf32>
    %279 = arith.addf %272, %278 : vector<225x128xf32>
    %c6_297 = arith.constant 6 : index
    %c0_298 = arith.constant 0 : index
    %c0_299 = arith.constant 0 : index
    %280 = vector.load %arg12[%c6_297, %c0_298, %c0_299] : memref<9x225x25xf32, #tpu.memory_space<vmem>>, vector<1x225x25xf32>
    %281 = vector.shape_cast %280 : vector<1x225x25xf32> to vector<225x25xf32>
    %c6_300 = arith.constant 6 : index
    %c0_301 = arith.constant 0 : index
    %c0_302 = arith.constant 0 : index
    %282 = vector.load %arg13[%c6_300, %c0_301, %c0_302] : memref<9x128x128xf32, #tpu.memory_space<vmem>>, vector<1x128x128xf32>
    %283 = vector.shape_cast %282 : vector<1x128x128xf32> to vector<128x128xf32>
    %cst_303 = arith.constant dense<0.000000e+00> : vector<25x128xf32>
    %284 = tpu.matmul %238, %283, %cst_303 {dimension_numbers = #tpu.dot_dimension_numbers<[1], [0], [0], [1], [0, 0, 1, 1], [], []>} : vector<25x128xf32>, vector<128x128xf32>, vector<25x128xf32> -> vector<25x128xf32>
    %cst_304 = arith.constant dense<0.000000e+00> : vector<225x128xf32>
    %285 = tpu.matmul %281, %284, %cst_304 {dimension_numbers = #tpu.dot_dimension_numbers<[1], [0], [0], [1], [0, 0, 1, 1], [], []>} : vector<225x25xf32>, vector<25x128xf32>, vector<225x128xf32> -> vector<225x128xf32>
    %286 = arith.addf %279, %285 : vector<225x128xf32>
    %c7_305 = arith.constant 7 : index
    %c0_306 = arith.constant 0 : index
    %c0_307 = arith.constant 0 : index
    %287 = vector.load %arg12[%c7_305, %c0_306, %c0_307] : memref<9x225x25xf32, #tpu.memory_space<vmem>>, vector<1x225x25xf32>
    %288 = vector.shape_cast %287 : vector<1x225x25xf32> to vector<225x25xf32>
    %c7_308 = arith.constant 7 : index
    %c0_309 = arith.constant 0 : index
    %c0_310 = arith.constant 0 : index
    %289 = vector.load %arg13[%c7_308, %c0_309, %c0_310] : memref<9x128x128xf32, #tpu.memory_space<vmem>>, vector<1x128x128xf32>
    %290 = vector.shape_cast %289 : vector<1x128x128xf32> to vector<128x128xf32>
    %cst_311 = arith.constant dense<0.000000e+00> : vector<25x128xf32>
    %291 = tpu.matmul %238, %290, %cst_311 {dimension_numbers = #tpu.dot_dimension_numbers<[1], [0], [0], [1], [0, 0, 1, 1], [], []>} : vector<25x128xf32>, vector<128x128xf32>, vector<25x128xf32> -> vector<25x128xf32>
    %cst_312 = arith.constant dense<0.000000e+00> : vector<225x128xf32>
    %292 = tpu.matmul %288, %291, %cst_312 {dimension_numbers = #tpu.dot_dimension_numbers<[1], [0], [0], [1], [0, 0, 1, 1], [], []>} : vector<225x25xf32>, vector<25x128xf32>, vector<225x128xf32> -> vector<225x128xf32>
    %293 = arith.addf %286, %292 : vector<225x128xf32>
    %c8_313 = arith.constant 8 : index
    %c0_314 = arith.constant 0 : index
    %c0_315 = arith.constant 0 : index
    %294 = vector.load %arg12[%c8_313, %c0_314, %c0_315] : memref<9x225x25xf32, #tpu.memory_space<vmem>>, vector<1x225x25xf32>
    %295 = vector.shape_cast %294 : vector<1x225x25xf32> to vector<225x25xf32>
    %c8_316 = arith.constant 8 : index
    %c0_317 = arith.constant 0 : index
    %c0_318 = arith.constant 0 : index
    %296 = vector.load %arg13[%c8_316, %c0_317, %c0_318] : memref<9x128x128xf32, #tpu.memory_space<vmem>>, vector<1x128x128xf32>
    %297 = vector.shape_cast %296 : vector<1x128x128xf32> to vector<128x128xf32>
    %cst_319 = arith.constant dense<0.000000e+00> : vector<25x128xf32>
    %298 = tpu.matmul %238, %297, %cst_319 {dimension_numbers = #tpu.dot_dimension_numbers<[1], [0], [0], [1], [0, 0, 1, 1], [], []>} : vector<25x128xf32>, vector<128x128xf32>, vector<25x128xf32> -> vector<25x128xf32>
    %cst_320 = arith.constant dense<0.000000e+00> : vector<225x128xf32>
    %299 = tpu.matmul %295, %298, %cst_320 {dimension_numbers = #tpu.dot_dimension_numbers<[1], [0], [0], [1], [0, 0, 1, 1], [], []>} : vector<225x25xf32>, vector<25x128xf32>, vector<225x128xf32> -> vector<225x128xf32>
    %300 = arith.addf %293, %299 : vector<225x128xf32>
    %301 = vector.extract_strided_slice %0 {offsets = [4, 0], sizes = [1, 128], strides = [1, 1]} : vector<6x128xf32> to vector<1x128xf32>
    %302 = vector.broadcast %301 : vector<1x128xf32> to vector<225x128xf32>
    %303 = arith.addf %300, %302 : vector<225x128xf32>
    %cst_321 = arith.constant 0.000000e+00 : f32
    %304 = vector.broadcast %cst_321 : f32 to vector<225x128xf32>
    %305 = arith.maximumf %303, %304 : vector<225x128xf32>
    %c0_322 = arith.constant 0 : index
    %c0_323 = arith.constant 0 : index
    %306 = vector.load %arg14[%c0_322, %c0_323] : memref<128x128xf32, #tpu.memory_space<vmem>>, vector<128x128xf32>
    %cst_324 = arith.constant dense<0.000000e+00> : vector<225x128xf32>
    %307 = tpu.matmul %305, %306, %cst_324 {dimension_numbers = #tpu.dot_dimension_numbers<[1], [0], [0], [1], [0, 0, 1, 1], [], []>} : vector<225x128xf32>, vector<128x128xf32>, vector<225x128xf32> -> vector<225x128xf32>
    %308 = vector.extract_strided_slice %0 {offsets = [5, 0], sizes = [1, 128], strides = [1, 1]} : vector<6x128xf32> to vector<1x128xf32>
    %309 = vector.broadcast %308 : vector<1x128xf32> to vector<225x128xf32>
    %310 = arith.addf %307, %309 : vector<225x128xf32>
    %cst_325 = arith.constant 0.000000e+00 : f32
    %311 = vector.broadcast %cst_325 : f32 to vector<225x128xf32>
    %312 = arith.maximumf %310, %311 : vector<225x128xf32>
    %c0_326 = arith.constant 0 : index
    %c0_327 = arith.constant 0 : index
    %c0_328 = arith.constant 0 : index
    %313 = vector.load %arg15[%c0_326, %c0_327, %c0_328] : memref<1x225x128xf32, #tpu.memory_space<vmem>>, vector<1x225x128xf32>
    %314 = vector.shape_cast %313 : vector<1x225x128xf32> to vector<225x128xf32>
    %315 = vector.shape_cast %312 : vector<225x128xf32> to vector<1x225x128xf32>
    tpu.vector_store %arg15[%c0_326, %c0_327, %c0_328], %315 {strides = array<i32>} : memref<1x225x128xf32, #tpu.memory_space<vmem>>, vector<1x225x128xf32>,
    return
  }
  func.func @transform_0(%arg0: i32) -> (i32, i32, i32) {
    %c0_i32 = arith.constant 0 : i32
    %c0_i32_0 = arith.constant 0 : i32
    %c0_i32_1 = arith.constant 0 : i32
    return %arg0, %c0_i32, %c0_i32_0 : i32, i32, i32
  }
  func.func @transform_1(%arg0: i32) -> (i32, i32) {
    %c0_i32 = arith.constant 0 : i32
    %c0_i32_0 = arith.constant 0 : i32
    %c0_i32_1 = arith.constant 0 : i32
    return %c0_i32, %c0_i32_0 : i32, i32
  }
  func.func @transform_2(%arg0: i32) -> (i32, i32) {
    %c0_i32 = arith.constant 0 : i32
    %c0_i32_0 = arith.constant 0 : i32
    %c0_i32_1 = arith.constant 0 : i32
    return %c0_i32, %c0_i32_0 : i32, i32
  }
  func.func @transform_3(%arg0: i32) -> (i32, i32, i32) {
    %c0_i32 = arith.constant 0 : i32
    %c0_i32_0 = arith.constant 0 : i32
    %c0_i32_1 = arith.constant 0 : i32
    %c0_i32_2 = arith.constant 0 : i32
    return %c0_i32, %c0_i32_0, %c0_i32_1 : i32, i32, i32
  }
  func.func @transform_4(%arg0: i32) -> (i32, i32, i32) {
    %c0_i32 = arith.constant 0 : i32
    %c0_i32_0 = arith.constant 0 : i32
    %c0_i32_1 = arith.constant 0 : i32
    %c0_i32_2 = arith.constant 0 : i32
    return %c0_i32, %c0_i32_0, %c0_i32_1 : i32, i32, i32
  }
  func.func @transform_5(%arg0: i32) -> (i32, i32, i32) {
    %c0_i32 = arith.constant 0 : i32
    %c0_i32_0 = arith.constant 0 : i32
    %c0_i32_1 = arith.constant 0 : i32
    %c0_i32_2 = arith.constant 0 : i32
    return %c0_i32, %c0_i32_0, %c0_i32_1 : i32, i32, i32
  }
  func.func @transform_6(%arg0: i32) -> (i32, i32, i32) {
    %c0_i32 = arith.constant 0 : i32
    %c0_i32_0 = arith.constant 0 : i32
    %c0_i32_1 = arith.constant 0 : i32
    %c0_i32_2 = arith.constant 0 : i32
    return %c0_i32, %c0_i32_0, %c0_i32_1 : i32, i32, i32
  }
  func.func @transform_7(%arg0: i32) -> (i32, i32, i32) {
    %c0_i32 = arith.constant 0 : i32
    %c0_i32_0 = arith.constant 0 : i32
    %c0_i32_1 = arith.constant 0 : i32
    %c0_i32_2 = arith.constant 0 : i32
    return %c0_i32, %c0_i32_0, %c0_i32_1 : i32, i32, i32
  }
  func.func @transform_8(%arg0: i32) -> (i32, i32, i32) {
    %c0_i32 = arith.constant 0 : i32
    %c0_i32_0 = arith.constant 0 : i32
    %c0_i32_1 = arith.constant 0 : i32
    %c0_i32_2 = arith.constant 0 : i32
    return %c0_i32, %c0_i32_0, %c0_i32_1 : i32, i32, i32
  }
  func.func @transform_9(%arg0: i32) -> (i32, i32, i32) {
    %c0_i32 = arith.constant 0 : i32
    %c0_i32_0 = arith.constant 0 : i32
    %c0_i32_1 = arith.constant 0 : i32
    %c0_i32_2 = arith.constant 0 : i32
    return %c0_i32, %c0_i32_0, %c0_i32_1 : i32, i32, i32
  }
  func.func @transform_10(%arg0: i32) -> (i32, i32, i32) {
    %c0_i32 = arith.constant 0 : i32
    %c0_i32_0 = arith.constant 0 : i32
    %c0_i32_1 = arith.constant 0 : i32
    %c0_i32_2 = arith.constant 0 : i32
    return %c0_i32, %c0_i32_0, %c0_i32_1 : i32, i32, i32
  }
  func.func @transform_11(%arg0: i32) -> (i32, i32, i32) {
    %c0_i32 = arith.constant 0 : i32
    %c0_i32_0 = arith.constant 0 : i32
    %c0_i32_1 = arith.constant 0 : i32
    %c0_i32_2 = arith.constant 0 : i32
    return %c0_i32, %c0_i32_0, %c0_i32_1 : i32, i32, i32
  }
  func.func @transform_12(%arg0: i32) -> (i32, i32, i32) {
    %c0_i32 = arith.constant 0 : i32
    %c0_i32_0 = arith.constant 0 : i32
    %c0_i32_1 = arith.constant 0 : i32
    %c0_i32_2 = arith.constant 0 : i32
    return %c0_i32, %c0_i32_0, %c0_i32_1 : i32, i32, i32
  }
  func.func @transform_13(%arg0: i32) -> (i32, i32) {
    %c0_i32 = arith.constant 0 : i32
    %c0_i32_0 = arith.constant 0 : i32
    %c0_i32_1 = arith.constant 0 : i32
    return %c0_i32, %c0_i32_0 : i32, i32
  }
  func.func @transform_14(%arg0: i32) -> (i32, i32, i32) {
    %c0_i32 = arith.constant 0 : i32
    %c0_i32_0 = arith.constant 0 : i32
    %c0_i32_1 = arith.constant 0 : i32
    return %arg0, %c0_i32, %c0_i32_0 : i32, i32, i32
  }
}

</mosaic_0001>

<bundles_post_ra>
// kernel: autoencoder_forward.1
= control target key start
LH: loop header
LB: loop body
LE: loop exit
PB: predicated region body
PF: predicated region fallthrough
CT: control target
= control target key end

     0   :  { %vm223_vm0 = vcmask 1043456   ;;  %vm198_vm1 = vcmask 556032   ;;  %vm836_vm2 = vcmask 523264   ;;  %vm1751_vm3 = vcmask 293888   ;;  %s12507_s1 = inlined_call_operand.vmem [shape: f32[128,128], index: 1, kind: input, shape index: {}]   ;;  %s12508_s0 = inlined_call_operand.vmem [shape: f32[1,196,128], index: 0, kind: input, shape index: {}]   ;;  %s12509_s2 = inlined_call_operand.vmem [shape: f32[6,128], index: 2, kind: input, shape index: {}]   ;;  %s12510_s3 = inlined_call_operand.vmem [shape: f32[4,64,196], index: 3, kind: input, shape index: {}]   ;;  %s12511_s5 = inlined_call_operand.vmem [shape: f32[9,128,128], index: 5, kind: input, shape index: {}]   ;;  %s12512_s4 = inlined_call_operand.vmem [shape: f32[9,36,64], index: 4, kind: input, shape index: {}]   ;;  %s12513_s6 = inlined_call_operand.vmem [shape: f32[4,9,36], index: 6, kind: input, shape index: {}]   ;;  %s12514_s8 = inlined_call_operand.vmem [shape: f32[9,128,128], index: 8, kind: input, shape index: {}]   ;;  %s12515_s7 = inlined_call_operand.vmem [shape: f32[9,4,9], index: 7, kind: input, shape index: {}]   ;;  %s12516_s10 = inlined_call_operand.vmem [shape: f32[9,128,128], index: 10, kind: input, shape index: {}]   ;;  %s12517_s9 = inlined_call_operand.vmem [shape: f32[9,25,4], index: 9, kind: input, shape index: {}]   ;;  %s12518_s12 = inlined_call_operand.vmem [shape: f32[9,128,128], index: 12, kind: input, shape index: {}]   ;;  %s12519_s11 = inlined_call_operand.vmem [shape: f32[9,225,25], index: 11, kind: input, shape index: {}]   ;;  %s12520_s13 = inlined_call_operand.vmem [shape: f32[128,128], index: 13, kind: input, shape index: {}]   ;;  %s12521_s14 = inlined_call_operand.vmem [shape: f32[1,225,128], index: 14, kind: output, shape index: {}]  }
   0x1   :  { %v88_v0 = vld [vmem:[%s12507_s1 + $0x78] sm:$0xff]  ;;  %v87_v1 = vld [vmem:[%s12507_s1 + $0x70] sm:$0xff]  ;;  %v86_v2 = vld [vmem:[%s12507_s1 + $0x68] sm:$0xff]  ;;  %vm1974_vm4 = vcmask 1040384   ;;  %vm1970_vm5 = vcmask 72704   ;;  %vm2591_vm6 = vcmask 31744  }
   0x2   :  { %90 = vmatpush.msra.mxu0 %v88_v0  ;;  %v85_v3 = vld [vmem:[%s12507_s1 + $0x60] sm:$0xff]  ;;  %v84_v4 = vld [vmem:[%s12507_s1 + $0x58] sm:$0xff]  ;;  %v83_v5 = vld [vmem:[%s12507_s1 + $0x50] sm:$0xff]  ;;  %vm3469_vm7 = vcmask 203776  }
   0x3   :  { %v82_v6 = vld [vmem:[%s12507_s1 + $0x48] sm:$0xff]  ;;  %v81_v7 = vld [vmem:[%s12507_s1 + $0x40] sm:$0xff]  ;;  %v80_v8 = vld [vmem:[%s12507_s1 + $0x38] sm:$0xff] }
   0x4   :  { %91 = vmatpush.msra.mxu0 %v87_v1  ;;  %v79_v9 = vld [vmem:[%s12507_s1 + $0x30] sm:$0xff]  ;;  %v78_v10 = vld [vmem:[%s12507_s1 + $0x28] sm:$0xff]  ;;  %v77_v11 = vld [vmem:[%s12507_s1 + $0x20] sm:$0xff] }
   0x5   :  { %v76_v12 = vld [vmem:[%s12507_s1 + $0x18] sm:$0xff]  ;;  %v75_v13 = vld [vmem:[%s12507_s1 + $0x10] sm:$0xff]  ;;  %v74_v14 = vld [vmem:[%s12507_s1 + $0x8] sm:$0xff] }
   0x6   :  { %92 = vmatpush.msra.mxu0 %v86_v2  ;;  %v73_v15 = vld [vmem:[%s12507_s1] sm:$0xff]  ;;  %v49_v17 = vld [vmem:[%s12508_s0 + $0x8] sm:$0xff]  ;;  %v50_v18 = vld [vmem:[%s12508_s0 + $0x10] sm:$0xff] }
   0x7   :  { %v48_v16 = vld [vmem:[%s12508_s0] sm:$0xff]  ;;  %v51_v19 = vld [vmem:[%s12508_s0 + $0x18] sm:$0xff]  ;;  %v53_v21 = vld [vmem:[%s12508_s0 + $0x28] sm:$0xff] }
   0x8   :  { %93 = vmatpush.msra.mxu0 %v85_v3  ;;  %v52_v20 = vld [vmem:[%s12508_s0 + $0x20] sm:$0xff]  ;;  %v54_v22 = vld [vmem:[%s12508_s0 + $0x30] sm:$0xff]  ;;  %v55_v23 = vld [vmem:[%s12508_s0 + $0x38] sm:$0xff] }
   0x9   :  { %v56_v24 = vld [vmem:[%s12508_s0 + $0x40] sm:$0xff]  ;;  %v57_v25 = vld [vmem:[%s12508_s0 + $0x48] sm:$0xff]  ;;  %v58_v26 = vld [vmem:[%s12508_s0 + $0x50] sm:$0xff] }
   0xa   :  { %94 = vmatpush.msra.mxu0 %v84_v4  ;;  %v59_v27 = vld [vmem:[%s12508_s0 + $0x58] sm:$0xff]  ;;  %v60_v28 = vld [vmem:[%s12508_s0 + $0x60] sm:$0xff]  ;;  %v61_v29 = vld [vmem:[%s12508_s0 + $0x68] sm:$0xff] }
   0xb   :  { %v62_v30 = vld [vmem:[%s12508_s0 + $0x70] sm:$0xff]  ;;  %v63_v31 = vld [vmem:[%s12508_s0 + $0x78] sm:$0xff]  ;;  %v64_v33 = vld [vmem:[%s12508_s0 + $0x80] sm:$0xff] }
   0xc   :  { %95 = vmatpush.msra.mxu0 %v83_v5  ;;  %v65_v35 = vld [vmem:[%s12508_s0 + $0x88] sm:$0xff]  ;;  %v66_v37 = vld [vmem:[%s12508_s0 + $0x90] sm:$0xff]  ;;  %v67_v39 = vld [vmem:[%s12508_s0 + $0x98] sm:$0xff] }
   0xd   :  { %v68_v41 = vld [vmem:[%s12508_s0 + $0xa0] sm:$0xff]  ;;  %v69_v43 = vld [vmem:[%s12508_s0 + $0xa8] sm:$0xff]  ;;  %v70_v45 = vld [vmem:[%s12508_s0 + $0xb0] sm:$0xff] }
   0xe   :  { %96 = vmatpush.msra.mxu0 %v82_v6  ;;  %v71_v47 = vld [vmem:[%s12508_s0 + $0xb8] sm:$0xff]  ;;  %v72_v49 = vld [vmem:[%s12508_s0 + $0xc0] sm:$0xf] }
   0xf   :  { %v47_v56 = vld [vmem:[%s12509_s2] sm:$0x3f] }
  0x10   :  { %97 = vmatpush.msra.mxu0 %v81_v7  ;;  %v7715_v57 = vperm.slane %v47_v56, 0  ;;  %v6232_v56 = vld [vmem:[%s12510_s3 + $0x128] sm:$0xff] }
  0x12   :  { %98 = vmatpush.msra.mxu0 %v80_v8 }
  0x14   :  { %99 = vmatpush.msra.mxu0 %v79_v9 }
  0x16   :  { %100 = vmatpush.msra.mxu0 %v78_v10 }
  0x18   :  { %101 = vmatpush.msra.mxu0 %v77_v11 }
  0x1a   :  { %102 = vmatpush.msra.mxu0 %v76_v12 }
  0x1c   :  { %103 = vmatpush.msra.mxu0 %v75_v13 }
  0x1e   :  { %104 = vmatpush.msra.mxu0 %v74_v14 }
  0x20   :  { %105 = vmatpush.msra.mxu0 %v73_v15 }
  0x21   :  { %106 = vmatmul.f32.vlgmr.msra.gmra.mxu0 %v48_v16 }
  0x29   :  { %109 = vmatmul.f32.gmra.mxu0 %v49_v17 }
  0x31   :  { %112 = vmatmul.f32.gmra.mxu0 %v50_v18  ;;  %v6202_v18 = vld [vmem:[%s12510_s3 + $0x80] sm:$0xff] }
  0x39   :  { %115 = vmatmul.f32.gmra.mxu0 %v51_v19 }
  0x41   :  { %118 = vmatmul.f32.gmra.mxu0 %v52_v20  ;;  %v182_v20 = vld [vmem:[%s12510_s3] sm:$0xff] }
  0x49   :  { %121 = vmatmul.f32.gmra.mxu0 %v53_v21  ;;  %v6204_v21 = vld [vmem:[%s12510_s3 + $0x90] sm:$0xff] }
  0x51   :  { %124 = vmatmul.f32.gmra.mxu0 %v54_v22 }
  0x59   :  { %127 = vmatmul.f32.gmra.mxu0 %v55_v23 }
  0x61   :  { %130 = vmatmul.f32.gmra.mxu0 %v56_v24  ;;  %v184_v24 = vld [vmem:[%s12510_s3 + $0x10] sm:$0xff] }
  0x69   :  { %133 = vmatmul.f32.gmra.mxu0 %v57_v25 }
  0x71   :  { %136 = vmatmul.f32.gmra.mxu0 %v58_v26  ;;  %v6206_v26 = vld [vmem:[%s12510_s3 + $0xa0] sm:$0xff] }
  0x79   :  { %139 = vmatmul.f32.gmra.mxu0 %v59_v27 }
  0x81   :  { %142 = vmatmul.f32.gmra.mxu0 %v60_v28 }
  0x89   :  { %145 = vmatmul.f32.gmra.mxu0 %v61_v29 }
  0x91   :  { %148 = vmatmul.f32.gmra.mxu0 %v62_v30  ;;  %v186_v30 = vld [vmem:[%s12510_s3 + $0x20] sm:$0xff] }
  0x99   :  { %151 = vmatmul.f32.gmra.mxu0 %v63_v31 }
  0x9e   :  { %v7675_v32 = vpop.f32.mrf.mxu0 }
  0x9f   :  { %v7814_v13 = vadd.f32 %v7675_v32, %v7715_v57  ;;  %v6208_v32 = vld [vmem:[%s12510_s3 + $0xb0] sm:$0xff] }
  0xa1   :  { %154 = vmatmul.f32.gmra.mxu0 %v64_v33 }
  0xa6   :  { %v7680_v34 = vpop.f32.mrf.mxu0 }
  0xa7   :  { %v7807_v12 = vadd.f32 %v7680_v34, %v7715_v57 }
  0xa9   :  { %157 = vmatmul.f32.gmra.mxu0 %v65_v35 }
  0xae   :  { %v7685_v36 = vpop.f32.mrf.mxu0 }
  0xaf   :  { %v7800_v11 = vadd.f32 %v7685_v36, %v7715_v57  ;;  %v183_v36 = vld [vmem:[%s12510_s3 + $0x8] sm:$0xff] }
  0xb1   :  { %160 = vmatmul.f32.gmra.mxu0 %v66_v37  ;;  %v188_v37 = vld [vmem:[%s12510_s3 + $0x30] sm:$0xff] }
  0xb6   :  { %v7690_v38 = vpop.f32.mrf.mxu0 }
  0xb7   :  { %v7793_v10 = vadd.f32 %v7690_v38, %v7715_v57  ;;  %v6210_v38 = vld [vmem:[%s12510_s3 + $0xc0] sm:$0xff] }
  0xb9   :  { %163 = vmatmul.f32.gmra.mxu0 %v67_v39  ;;  %v185_v39 = vld [vmem:[%s12510_s3 + $0x18] sm:$0xff] }
  0xbe   :  { %v7695_v40 = vpop.f32.mrf.mxu0 }
  0xbf   :  { %v7786_v8 = vadd.f32 %v7695_v40, %v7715_v57  ;;  %v190_v40 = vld [vmem:[%s12510_s3 + $0x40] sm:$0xff] }
  0xc1   :  { %166 = vmatmul.f32.gmra.mxu0 %v68_v41  ;;  %v6212_v41 = vld [vmem:[%s12510_s3 + $0xd0] sm:$0xff] }
  0xc6   :  { %v122_v42 = vpop.f32.mrf.mxu0 }
  0xc7   :  { %v7779_v7 = vadd.f32 %v122_v42, %v7715_v57  ;;  %v187_v42 = vld [vmem:[%s12510_s3 + $0x28] sm:$0xff] }
  0xc9   :  { %169 = vmatmul.f32.gmra.mxu0 %v69_v43  ;;  %v192_v43 = vld [vmem:[%s12510_s3 + $0x50] sm:$0xff] }
  0xce   :  { %v125_v44 = vpop.f32.mrf.mxu0 }
  0xcf   :  { %v7773_v6 = vadd.f32 %v125_v44, %v7715_v57  ;;  %v6214_v44 = vld [vmem:[%s12510_s3 + $0xe0] sm:$0xff] }
  0xd1   :  { %172 = vmatmul.f32.gmra.mxu0 %v70_v45  ;;  %v189_v45 = vld [vmem:[%s12510_s3 + $0x38] sm:$0xff] }
  0xd6   :  { %v128_v46 = vpop.f32.mrf.mxu0 }
  0xd7   :  { %v7767_v5 = vadd.f32 %v128_v46, %v7715_v57  ;;  %v194_v46 = vld [vmem:[%s12510_s3 + $0x60] sm:$0xff] }
  0xd9   :  { %175 = vmatmul.f32.gmra.mxu0 %v71_v47  ;;  %v6216_v47 = vld [vmem:[%s12510_s3 + $0xf0] sm:$0xff] }
  0xde   :  { %v131_v48 = vpop.f32.mrf.mxu0 }
  0xdf   :  { %v7759_v3 = vadd.f32 %v131_v48, %v7715_v57  ;;  %v191_v48 = vld [vmem:[%s12510_s3 + $0x48] sm:$0xff] }
  0xe1   :  { %178 = vmatmul.f32.gmra.mxu0 %v72_v49  ;;  %v196_v49 = vld [vmem:[%s12510_s3 + $0x70] sm:$0xff] }
  0xe6   :  { %v134_v50 = vpop.f32.mrf.mxu0 }
  0xe7   :  { %v7753_v2 = vadd.f32 %v134_v50, %v7715_v57  ;;  %v6228_v50 = vld [vmem:[%s12510_s3 + $0x108] sm:$0xff] }
  0xee   :  { %v137_v51 = vpop.f32.mrf.mxu0 }
  0xef   :  { %v7747_v1 = vadd.f32 %v137_v51, %v7715_v57  ;;  %v6227_v51 = vld [vmem:[%s12510_s3 + $0x100] sm:$0xff] }
  0xf6   :  { %v140_v52 = vpop.f32.mrf.mxu0 }
  0xf7   :  { %v7741_v0 = vadd.f32 %v140_v52, %v7715_v57  ;;  %v193_v52 = vld [vmem:[%s12510_s3 + $0x58] sm:$0xff] }
  0xfe   :  { %v143_v53 = vpop.f32.mrf.mxu0 }
  0xff   :  { %v7733_v62 = vadd.f32 %v143_v53, %v7715_v57  ;;  %v6230_v53 = vld [vmem:[%s12510_s3 + $0x118] sm:$0xff] }
 0x106   :  { %v146_v54 = vpop.f32.mrf.mxu0 }
 0x107   :  { %v7727_v61 = vadd.f32 %v146_v54, %v7715_v57  ;;  %v6229_v54 = vld [vmem:[%s12510_s3 + $0x110] sm:$0xff] }
 0x10e   :  { %v149_v55 = vpop.f32.mrf.mxu0 }
 0x10f   :  { %v7721_v60 = vadd.f32 %v149_v55, %v7715_v57  ;;  %v195_v55 = vld [vmem:[%s12510_s3 + $0x68] sm:$0xff] }
 0x116   :  { %v152_v58 = vpop.f32.mrf.mxu0 }
 0x117   :  { %v7718_v59 = vadd.f32 %v152_v58, %v7715_v57  ;;  %v197_v58 = vld [vmem:[%s12510_s3 + $0x78] sm:$0xff] }
 0x119   :  { %227 = vmatpush.msrb.mxu0 %v7718_v59  ;;  %350 = vmatpush.msra.mxu3 %v7718_v59 }
 0x11a   :  { %481 = vmatpush.msra.mxu1 %v7718_v59 }
 0x11b   :  { %228 = vmatpush.msrb.mxu0 %v7721_v60  ;;  %351 = vmatpush.msra.mxu3 %v7721_v60 }
 0x11c   :  { %482 = vmatpush.msra.mxu1 %v7721_v60 }
 0x11d   :  { %229 = vmatpush.msrb.mxu0 %v7727_v61  ;;  %352 = vmatpush.msra.mxu3 %v7727_v61 }
 0x11e   :  { %483 = vmatpush.msra.mxu1 %v7727_v61  ;;  %v7738_v63 = vpop.f32.mrf.mxu0 }
 0x11f   :  { %230 = vmatpush.msrb.mxu0 %v7733_v62  ;;  %353 = vmatpush.msra.mxu3 %v7733_v62  ;;  %v156_v35 = vadd.f32 %v7738_v63, %v7715_v57  ;;  %v6235_v63 = vld [vmem:[%s12510_s3 + $0x140] sm:$0xff] }
 0x120   :  { %484 = vmatpush.msra.mxu1 %v7733_v62 }
 0x121   :  { %231 = vmatpush.msrb.mxu0 %v7741_v0  ;;  %354 = vmatpush.msra.mxu3 %v7741_v0 }
 0x122   :  { %485 = vmatpush.msra.mxu1 %v7741_v0 }
 0x123   :  { %232 = vmatpush.msrb.mxu0 %v7747_v1  ;;  %355 = vmatpush.msra.mxu3 %v7747_v1 }
 0x124   :  { %486 = vmatpush.msra.mxu1 %v7747_v1 }
 0x125   :  { %233 = vmatpush.msrb.mxu0 %v7753_v2  ;;  %356 = vmatpush.msra.mxu3 %v7753_v2 }
 0x126   :  { %487 = vmatpush.msra.mxu1 %v7753_v2  ;;  %v7764_v4 = vpop.f32.mrf.mxu0 }
 0x127   :  { %234 = vmatpush.msrb.mxu0 %v7759_v3  ;;  %357 = vmatpush.msra.mxu3 %v7759_v3  ;;  %v159_v34 = vadd.f32 %v7764_v4, %v7715_v57  ;;  %v6240_v4 = vld [vmem:[%s12510_s3 + $0x168] sm:$0xff] }
 0x128   :  { %488 = vmatpush.msra.mxu1 %v7759_v3 }
 0x129   :  { %235 = vmatpush.msrb.mxu0 %v7767_v5  ;;  %358 = vmatpush.msra.mxu3 %v7767_v5 }
 0x12a   :  { %489 = vmatpush.msra.mxu1 %v7767_v5 }
 0x12b   :  { %236 = vmatpush.msrb.mxu0 %v7773_v6  ;;  %359 = vmatpush.msra.mxu3 %v7773_v6 }
 0x12c   :  { %490 = vmatpush.msra.mxu1 %v7773_v6 }
 0x12d   :  { %237 = vmatpush.msrb.mxu0 %v7779_v7  ;;  %360 = vmatpush.msra.mxu3 %v7779_v7 }
 0x12e   :  { %491 = vmatpush.msra.mxu1 %v7779_v7  ;;  %v161_v9 = vpop.f32.mrf.mxu0 }
 0x12f   :  { %238 = vmatpush.msrb.mxu0 %v7786_v8  ;;  %361 = vmatpush.msra.mxu3 %v7786_v8  ;;  %v162_v33 = vadd.f32 %v161_v9, %v7715_v57  ;;  %v6211_v9 = vld [vmem:[%s12510_s3 + $0xc8] sm:$0xff] }
 0x130   :  { %492 = vmatpush.msra.mxu1 %v7786_v8 }
 0x131   :  { %239 = vmatpush.msrb.mxu0 %v7793_v10  ;;  %362 = vmatpush.msra.mxu3 %v7793_v10 }
 0x132   :  { %493 = vmatpush.msra.mxu1 %v7793_v10 }
 0x133   :  { %240 = vmatpush.msrb.mxu0 %v7800_v11  ;;  %363 = vmatpush.msra.mxu3 %v7800_v11 }
 0x134   :  { %494 = vmatpush.msra.mxu1 %v7800_v11 }
 0x135   :  { %241 = vmatpush.msrb.mxu0 %v7807_v12  ;;  %364 = vmatpush.msra.mxu3 %v7807_v12 }
 0x136   :  { %495 = vmatpush.msra.mxu1 %v7807_v12  ;;  %v164_v14 = vpop.f32.mrf.mxu0 }
 0x137   :  { %242 = vmatpush.msrb.mxu0 %v7814_v13  ;;  %365 = vmatpush.msra.mxu3 %v7814_v13  ;;  %v165_v31 = vadd.f32 %v164_v14, %v7715_v57  ;;  %v6257_v14 = vld [vmem:[%s12510_s3 + $0x1a8] sm:$0xff] }
 0x138   :  { %496 = vmatpush.msra.mxu1 %v7814_v13  ;;  %366 = vmatmul.f32.vlgmr.msra.gmra.mxu3 %v6202_v18 }
 0x139   :  { %243 = vmatmul.f32.vlgmr.msrb.gmra.mxu0 %v182_v20  ;;  %497 = vmatmul.f32.vlgmr.msra.gmra.mxu1 %v6227_v51  ;;  %v6254_v20 = vld [vmem:[%s12510_s3 + $0x190] sm:$0xff] }
 0x13e   :  { %v167_v15 = vpop.f32.mrf.mxu0 }
 0x13f   :  { %v168_v29 = vadd.f32 %v167_v15, %v7715_v57  ;;  %v6217_v15 = vld [vmem:[%s12510_s3 + $0xf8] sm:$0xff] }
 0x140   :  { %369 = vmatmul.f32.gmra.mxu3 %v6204_v21 }
 0x141   :  { %246 = vmatmul.f32.gmra.mxu0 %v184_v24  ;;  %500 = vmatmul.f32.gmra.mxu1 %v6229_v54  ;;  %v6327_v54 = vld [vmem:[%s12511_s5 + $0x170] sm:$0xff] }
 0x146   :  { %v170_v16 = vpop.f32.mrf.mxu0 }
 0x147   :  { %v171_v28 = vadd.f32 %v170_v16, %v7715_v57  ;;  %v6259_v16 = vld [vmem:[%s12510_s3 + $0x1b8] sm:$0xff] }
 0x148   :  { %372 = vmatmul.f32.gmra.mxu3 %v6206_v26  ;;  %v6258_v26 = vld [vmem:[%s12510_s3 + $0x1b0] sm:$0xff] }
 0x149   :  { %249 = vmatmul.f32.gmra.mxu0 %v186_v30 }
 0x14e   :  { %v173_v17 = vpop.f32.mrf.mxu0 }
 0x14f   :  { %v174_v27 = vadd.f32 %v173_v17, %v7715_v57  ;;  %v6252_v17 = vld [vmem:[%s12510_s3 + $0x180] sm:$0xff] }
 0x150   :  { %375 = vmatmul.f32.gmra.mxu3 %v6208_v32 }
 0x151   :  { %252 = vmatmul.f32.gmra.mxu0 %v188_v37 }
 0x156   :  { %v176_v19 = vpop.f32.mrf.mxu0 }
 0x157   :  { %v177_v25 = vadd.f32 %v176_v19, %v7715_v57  ;;  %v6261_v19 = vld [vmem:[%s12510_s3 + $0x1c8] sm:$0xff] }
 0x158   :  { %378 = vmatmul.f32.gmra.mxu3 %v6210_v38 }
 0x159   :  { %255 = vmatmul.f32.gmra.mxu0 %v190_v40  ;;  %v6266_v40 = vld [vmem:[%s12510_s3 + $0x1f0] sm:$0xff] }
 0x15e   :  { %v179_v22 = vpop.f32.mrf.mxu0 }
 0x15f   :  { %v180_v23 = vadd.f32 %v179_v22, %v7715_v57  ;;  %v6231_v57 = vld [vmem:[%s12510_s3 + $0x120] sm:$0xff]  ;;  %v6263_v22 = vld [vmem:[%s12510_s3 + $0x1d8] sm:$0xff] }
 0x160   :  { %381 = vmatmul.f32.gmra.mxu3 %v6212_v41  ;;  %503 = vmatmul.f32.gmra.mxu1 %v6231_v57  ;;  %v6326_v57 = vld [vmem:[%s12511_s5 + $0x168] sm:$0xff] }
 0x161   :  { %6193 = vmatpush.msk.msra.mxu2 %vm223_vm0, %v180_v23  ;;  %6243 = vmatpush.msk.msrb.mxu3 %vm223_vm0, %v180_v23 }
 0x162   :  { %6268 = vmatpush.msk.msrb.mxu1 %vm223_vm0, %v180_v23  ;;  %258 = vmatmul.f32.gmra.mxu0 %v192_v43 }
 0x163   :  { %276 = vmatpush.msra.mxu2 %v177_v25  ;;  %530 = vmatpush.msrb.mxu3 %v177_v25 }
 0x164   :  { %661 = vmatpush.msrb.mxu1 %v177_v25 }
 0x165   :  { %277 = vmatpush.msra.mxu2 %v174_v27  ;;  %531 = vmatpush.msrb.mxu3 %v174_v27 }
 0x166   :  { %662 = vmatpush.msrb.mxu1 %v174_v27 }
 0x167   :  { %278 = vmatpush.msra.mxu2 %v171_v28  ;;  %532 = vmatpush.msrb.mxu3 %v171_v28 }
 0x168   :  { %663 = vmatpush.msrb.mxu1 %v171_v28  ;;  %384 = vmatmul.f32.gmra.mxu3 %v6214_v44 }
 0x169   :  { %279 = vmatpush.msra.mxu2 %v168_v29  ;;  %533 = vmatpush.msrb.mxu3 %v168_v29 }
 0x16a   :  { %664 = vmatpush.msrb.mxu1 %v168_v29  ;;  %261 = vmatmul.f32.gmra.mxu0 %v194_v46 }
 0x16b   :  { %280 = vmatpush.msra.mxu2 %v165_v31  ;;  %534 = vmatpush.msrb.mxu3 %v165_v31 }
 0x16c   :  { %665 = vmatpush.msrb.mxu1 %v165_v31 }
 0x16d   :  { %281 = vmatpush.msra.mxu2 %v162_v33  ;;  %535 = vmatpush.msrb.mxu3 %v162_v33 }
 0x16e   :  { %666 = vmatpush.msrb.mxu1 %v162_v33 }
 0x16f   :  { %282 = vmatpush.msra.mxu2 %v159_v34  ;;  %536 = vmatpush.msrb.mxu3 %v159_v34 }
 0x170   :  { %667 = vmatpush.msrb.mxu1 %v159_v34  ;;  %387 = vmatmul.f32.gmra.mxu3 %v6216_v47  ;;  %v730_v47 = vld [vmem:[%s12511_s5 + $0x78] sm:$0xff] }
 0x171   :  { %283 = vmatpush.msra.mxu2 %v156_v35  ;;  %537 = vmatpush.msrb.mxu3 %v156_v35 }
 0x172   :  { %668 = vmatpush.msrb.mxu1 %v156_v35  ;;  %6194 = vmatmul.msk.f32.vlgmr.msra.gmra.mxu2 %vm198_vm1, %v183_v36  ;;  %v6264_v36 = vld [vmem:[%s12510_s3 + $0x1e0] sm:$0xff] }
 0x173   :  { %6218 = vmatpush.msk.msrb.mxu2 %vm223_vm0, %v180_v23  ;;  %264 = vmatmul.f32.gmra.mxu0 %v196_v49  ;;  %v6256_v23 = vld [vmem:[%s12510_s3 + $0x1a0] sm:$0xff]  ;;  %v6328_v49 = vld [vmem:[%s12511_s5 + $0x178] sm:$0xff] }
 0x174   :  { %731 = vmatpush.msra.mxu3 %v730_v47  ;;  %954 = vmatpush.msra.mxu0 %v6328_v49  ;;  %v6316_v47 = vld [vmem:[%s12511_s5 + $0x118] sm:$0xff]  ;;  %v717_v49 = vld [vmem:[%s12511_s5 + $0x10] sm:$0xff] }
 0x175   :  { %399 = vmatpush.msrb.mxu2 %v177_v25  ;;  %v6265_v25 = vld [vmem:[%s12510_s3 + $0x1e8] sm:$0xff] }
 0x176   :  { %955 = vmatpush.msra.mxu0 %v6327_v54  ;;  %v716_v54 = vld [vmem:[%s12511_s5 + $0x8] sm:$0xff] }
 0x177   :  { %400 = vmatpush.msrb.mxu2 %v174_v27 }
 0x178   :  { %6244 = vmatmul.msk.f32.vlgmr.msrb.gmra.mxu3 %vm198_vm1, %v6228_v50  ;;  %956 = vmatpush.msra.mxu0 %v6326_v57 }
 0x179   :  { %401 = vmatpush.msrb.mxu2 %v171_v28  ;;  %v6267_v28 = vld [vmem:[%s12510_s3 + $0x1f8] sm:$0xff] }
 0x17a   :  { %6195 = vmatmul.msk.f32.gmra.mxu2 %vm198_vm1, %v185_v39 }
 0x17b   :  { %402 = vmatpush.msrb.mxu2 %v168_v29  ;;  %v6260_v29 = vld [vmem:[%s12510_s3 + $0x1c0] sm:$0xff] }
 0x17d   :  { %403 = vmatpush.msrb.mxu2 %v165_v31 }
 0x17f   :  { %404 = vmatpush.msrb.mxu2 %v162_v33  ;;  %v6262_v33 = vld [vmem:[%s12510_s3 + $0x1d0] sm:$0xff] }
 0x180   :  { %6245 = vmatmul.msk.f32.gmra.mxu3 %vm198_vm1, %v6230_v53  ;;  %v6296_v53 = vld [vmem:[%s12511_s5 + $0xf0] sm:$0xff] }
 0x181   :  { %405 = vmatpush.msrb.mxu2 %v159_v34 }
 0x182   :  { %6196 = vmatmul.msk.f32.gmra.mxu2 %vm198_vm1, %v187_v42 }
 0x183   :  { %406 = vmatpush.msrb.mxu2 %v156_v35 }
 0x185   :  { %612 = vmatpush.msra.mxu2 %v7718_v59  ;;  %v6234_v59 = vld [vmem:[%s12510_s3 + $0x138] sm:$0xff] }
 0x187   :  { %613 = vmatpush.msra.mxu2 %v7721_v60  ;;  %v6233_v60 = vld [vmem:[%s12510_s3 + $0x130] sm:$0xff] }
 0x188   :  { %6246 = vmatmul.msk.f32.gmra.mxu3 %vm198_vm1, %v6232_v56  ;;  %506 = vmatmul.f32.gmra.mxu1 %v6233_v60  ;;  %v6295_v56 = vld [vmem:[%s12511_s5 + $0xe8] sm:$0xff]  ;;  %v6325_v60 = vld [vmem:[%s12511_s5 + $0x160] sm:$0xff] }
 0x189   :  { %614 = vmatpush.msra.mxu2 %v7727_v61  ;;  %v6203_v61 = vld [vmem:[%s12510_s3 + $0x88] sm:$0xff]  ;;  %957 = vmatpush.msra.mxu0 %v6325_v60  ;;  %v6313_v60 = vld [vmem:[%s12511_s5 + $0x100] sm:$0xff] }
 0x18a   :  { %6197 = vmatmul.msk.f32.gmra.mxu2 %vm198_vm1, %v189_v45 }
 0x18b   :  { %615 = vmatpush.msra.mxu2 %v7733_v62  ;;  %v6236_v62 = vld [vmem:[%s12510_s3 + $0x148] sm:$0xff] }
 0x18d   :  { %616 = vmatpush.msra.mxu2 %v7741_v0  ;;  %v6205_v0 = vld [vmem:[%s12510_s3 + $0x98] sm:$0xff] }
 0x18f   :  { %617 = vmatpush.msra.mxu2 %v7747_v1  ;;  %v6238_v1 = vld [vmem:[%s12510_s3 + $0x158] sm:$0xff] }
 0x190   :  { %6247 = vmatmul.msk.f32.gmra.mxu3 %vm198_vm1, %v6234_v59  ;;  %509 = vmatmul.f32.gmra.mxu1 %v6235_v63  ;;  %v6294_v59 = vld [vmem:[%s12511_s5 + $0xe0] sm:$0xff]  ;;  %v6324_v63 = vld [vmem:[%s12511_s5 + $0x158] sm:$0xff] }
 0x191   :  { %618 = vmatpush.msra.mxu2 %v7753_v2  ;;  %v6237_v2 = vld [vmem:[%s12510_s3 + $0x150] sm:$0xff]  ;;  %958 = vmatpush.msra.mxu0 %v6324_v63 }
 0x192   :  { %6198 = vmatmul.msk.f32.gmra.mxu2 %vm198_vm1, %v191_v48  ;;  %v6297_v48 = vld [vmem:[%s12511_s5 + $0xf8] sm:$0xff] }
 0x193   :  { %619 = vmatpush.msra.mxu2 %v7759_v3  ;;  %v6207_v3 = vld [vmem:[%s12510_s3 + $0xa8] sm:$0xff] }
 0x195   :  { %620 = vmatpush.msra.mxu2 %v7767_v5  ;;  %v6239_v5 = vld [vmem:[%s12510_s3 + $0x160] sm:$0xff] }
 0x197   :  { %621 = vmatpush.msra.mxu2 %v7773_v6  ;;  %v6209_v6 = vld [vmem:[%s12510_s3 + $0xb8] sm:$0xff] }
 0x198   :  { %6248 = vmatmul.msk.f32.gmra.mxu3 %vm198_vm1, %v6236_v62  ;;  %512 = vmatmul.f32.gmra.mxu1 %v6237_v2  ;;  %v6293_v62 = vld [vmem:[%s12511_s5 + $0xd8] sm:$0xff]  ;;  %v725_v2 = vld [vmem:[%s12511_s5 + $0x50] sm:$0xff] }
 0x199   :  { %622 = vmatpush.msra.mxu2 %v7779_v7  ;;  %v6242_v7 = vld [vmem:[%s12510_s3 + $0x178] sm:$0xff] }
 0x19a   :  { %6199 = vmatmul.msk.f32.gmra.mxu2 %vm198_vm1, %v193_v52  ;;  %v729_v52 = vld [vmem:[%s12511_s5 + $0x70] sm:$0xff] }
 0x19b   :  { %623 = vmatpush.msra.mxu2 %v7786_v8  ;;  %v6241_v8 = vld [vmem:[%s12510_s3 + $0x170] sm:$0xff]  ;;  %732 = vmatpush.msra.mxu3 %v729_v52 }
 0x19c   :  { %v6284_v52 = vld [vmem:[%s12511_s5 + $0x90] sm:$0xff] }
 0x19d   :  { %624 = vmatpush.msra.mxu2 %v7793_v10  ;;  %v6253_v10 = vld [vmem:[%s12510_s3 + $0x188] sm:$0xff] }
 0x19f   :  { %625 = vmatpush.msra.mxu2 %v7800_v11  ;;  %v6213_v11 = vld [vmem:[%s12510_s3 + $0xd8] sm:$0xff] }
 0x1a0   :  { %6249 = vmatmul.msk.f32.gmra.mxu3 %vm198_vm1, %v6238_v1  ;;  %515 = vmatmul.f32.gmra.mxu1 %v6239_v5 }
 0x1a1   :  { %626 = vmatpush.msra.mxu2 %v7807_v12  ;;  %v6255_v12 = vld [vmem:[%s12510_s3 + $0x198] sm:$0xff] }
 0x1a2   :  { %6200 = vmatmul.msk.f32.gmra.mxu2 %vm198_vm1, %v195_v55  ;;  %v728_v55 = vld [vmem:[%s12511_s5 + $0x68] sm:$0xff] }
 0x1a3   :  { %627 = vmatpush.msra.mxu2 %v7814_v13  ;;  %v6215_v13 = vld [vmem:[%s12510_s3 + $0xe8] sm:$0xff]  ;;  %733 = vmatpush.msra.mxu3 %v728_v55 }
 0x1a4   :  { %v6283_v55 = vld [vmem:[%s12511_s5 + $0x88] sm:$0xff] }
 0x1a8   :  { %6250 = vmatmul.msk.f32.gmra.mxu3 %vm198_vm1, %v6240_v4  ;;  %518 = vmatmul.f32.gmra.mxu1 %v6241_v8  ;;  %v6323_v4 = vld [vmem:[%s12511_s5 + $0x150] sm:$0xff]  ;;  %v6322_v8 = vld [vmem:[%s12511_s5 + $0x148] sm:$0xff] }
 0x1a9   :  { %959 = vmatpush.msra.mxu0 %v6323_v4 }
 0x1aa   :  { %6201 = vmatmul.msk.f32.gmra.mxu2 %vm198_vm1, %v197_v58  ;;  %v727_v58 = vld [vmem:[%s12511_s5 + $0x60] sm:$0xff] }
 0x1ab   :  { %734 = vmatpush.msra.mxu3 %v727_v58  ;;  %960 = vmatpush.msra.mxu0 %v6322_v8  ;;  %v715_v58 = vld [vmem:[%s12511_s5] sm:$0xff] }
 0x1b0   :  { %6251 = vmatmul.msk.f32.gmra.mxu3 %vm198_vm1, %v6242_v7  ;;  %6269 = vmatmul.msk.f32.vlgmr.msrb.gmra.mxu1 %vm198_vm1, %v6253_v10  ;;  %v6291_v7 = vld [vmem:[%s12511_s5 + $0xc8] sm:$0xff]  ;;  %v6290_v10 = vld [vmem:[%s12511_s5 + $0xc0] sm:$0xff] }
 0x1b2   :  { %6219 = vmatmul.msk.f32.vlgmr.msrb.gmra.mxu2 %vm198_vm1, %v6203_v61  ;;  %v726_v61 = vld [vmem:[%s12511_s5 + $0x58] sm:$0xff] }
 0x1b3   :  { %795 = vmatpush.msrb.mxu2 %v6297_v48  ;;  %735 = vmatpush.msra.mxu3 %v726_v61 }
 0x1b5   :  { %796 = vmatpush.msrb.mxu2 %v6296_v53  ;;  %736 = vmatpush.msra.mxu3 %v725_v2  ;;  %v6315_v53 = vld [vmem:[%s12511_s5 + $0x110] sm:$0xff] }
 0x1b6   :  { %v8080_v32 = vpop.f32.mrf.mxu1  ;;  %v244_v63 = vpop.f32.mrf.mxu0 }
 0x1b7   :  { %797 = vmatpush.msrb.mxu2 %v6295_v56  ;;  %v6314_v56 = vld [vmem:[%s12511_s5 + $0x108] sm:$0xff] }
 0x1b8   :  { %6270 = vmatmul.msk.f32.gmra.mxu1 %vm198_vm1, %v6255_v12  ;;  %v722_v12 = vld [vmem:[%s12511_s5 + $0x38] sm:$0xff] }
 0x1b9   :  { %798 = vmatpush.msrb.mxu2 %v6294_v59  ;;  %v6282_v59 = vld [vmem:[%s12511_s5 + $0x80] sm:$0xff] }
 0x1ba   :  { %6220 = vmatmul.msk.f32.gmra.mxu2 %vm198_vm1, %v6205_v0 }
 0x1bb   :  { %v8076_v30 = vpop.f32.mrf.mxu3  ;;  %799 = vmatpush.msrb.mxu2 %v6293_v62 }
 0x1be   :  { %v8092_v37 = vpop.f32.mrf.mxu1 }
 0x1c0   :  { %6271 = vmatmul.msk.f32.gmra.mxu1 %vm198_vm1, %v6257_v14  ;;  %v6320_v14 = vld [vmem:[%s12511_s5 + $0x138] sm:$0xff] }
 0x1c2   :  { %6221 = vmatmul.msk.f32.gmra.mxu2 %vm198_vm1, %v6207_v3  ;;  %v6292_v3 = vld [vmem:[%s12511_s5 + $0xd0] sm:$0xff] }
 0x1c3   :  { %v8085_v34 = vpop.f32.mrf.mxu3  ;;  %800 = vmatpush.msrb.mxu2 %v6292_v3 }
 0x1c5   :  { %801 = vmatpush.msrb.mxu2 %v6291_v7 }
 0x1c7   :  { %802 = vmatpush.msrb.mxu2 %v6290_v10 }
 0x1c8   :  { %6272 = vmatmul.msk.f32.gmra.mxu1 %vm198_vm1, %v6259_v16  ;;  %v721_v16 = vld [vmem:[%s12511_s5 + $0x30] sm:$0xff] }
 0x1ca   :  { %6222 = vmatmul.msk.f32.gmra.mxu2 %vm198_vm1, %v6209_v6  ;;  %v724_v6 = vld [vmem:[%s12511_s5 + $0x48] sm:$0xff] }
 0x1cb   :  { %v8096_v39 = vpop.f32.mrf.mxu3  ;;  %737 = vmatpush.msra.mxu3 %v724_v6  ;;  %v247_v6 = vpop.f32.mrf.mxu0 }
 0x1d0   :  { %6273 = vmatmul.msk.f32.gmra.mxu1 %vm198_vm1, %v6261_v19  ;;  %v6319_v19 = vld [vmem:[%s12511_s5 + $0x130] sm:$0xff] }
 0x1d2   :  { %6223 = vmatmul.msk.f32.gmra.mxu2 %vm198_vm1, %v6211_v9  ;;  %v723_v9 = vld [vmem:[%s12511_s5 + $0x40] sm:$0xff] }
 0x1d3   :  { %v8105_v43 = vpop.f32.mrf.mxu3  ;;  %738 = vmatpush.msra.mxu3 %v723_v9 }
 0x1d5   :  { %739 = vmatpush.msra.mxu3 %v722_v12 }
 0x1d7   :  { %740 = vmatpush.msra.mxu3 %v721_v16 }
 0x1d8   :  { %6274 = vmatmul.msk.f32.gmra.mxu1 %vm198_vm1, %v6263_v22  ;;  %v720_v22 = vld [vmem:[%s12511_s5 + $0x28] sm:$0xff] }
 0x1d9   :  { %741 = vmatpush.msra.mxu3 %v720_v22 }
 0x1da   :  { %6224 = vmatmul.msk.f32.gmra.mxu2 %vm198_vm1, %v6213_v11  ;;  %v6321_v11 = vld [vmem:[%s12511_s5 + $0x140] sm:$0xff] }
 0x1db   :  { %v8111_v46 = vpop.f32.mrf.mxu3  ;;  %961 = vmatpush.msra.mxu0 %v6321_v11 }
 0x1dd   :  { %v8101_v41 = vpop.f32.mrf.mxu1  ;;  %962 = vmatpush.msra.mxu0 %v6320_v14 }
 0x1df   :  { %963 = vmatpush.msra.mxu0 %v6319_v19 }
 0x1e0   :  { %6275 = vmatmul.msk.f32.gmra.mxu1 %vm198_vm1, %v6265_v25  ;;  %v6318_v25 = vld [vmem:[%s12511_s5 + $0x128] sm:$0xff] }
 0x1e1   :  { %964 = vmatpush.msra.mxu0 %v6318_v25 }
 0x1e2   :  { %6225 = vmatmul.msk.f32.gmra.mxu2 %vm198_vm1, %v6215_v13  ;;  %v6289_v13 = vld [vmem:[%s12511_s5 + $0xb8] sm:$0xff] }
 0x1e3   :  { %v8162_v0 = vpop.f32.mrf.mxu3  ;;  %803 = vmatpush.msrb.mxu2 %v6289_v13  ;;  %v250_v13 = vpop.f32.mrf.mxu0 }
 0x1e8   :  { %6276 = vmatmul.msk.f32.gmra.mxu1 %vm198_vm1, %v6267_v28  ;;  %v719_v28 = vld [vmem:[%s12511_s5 + $0x20] sm:$0xff] }
 0x1e9   :  { %742 = vmatpush.msra.mxu3 %v719_v28 }
 0x1ea   :  { %6226 = vmatmul.msk.f32.gmra.mxu2 %vm198_vm1, %v6217_v15 }
 0x1f2   :  { %628 = vmatmul.f32.vlgmr.msra.gmra.mxu2 %v6252_v17  ;;  %v6288_v17 = vld [vmem:[%s12511_s5 + $0xb0] sm:$0xff] }
 0x1f3   :  { %804 = vmatpush.msrb.mxu2 %v6288_v17 }
 0x1f5   :  { %v8040_v18 = vpop.f32.mrf.mxu2 }
 0x1f6   :  { %v286_v11 = vadd.f32 %v8040_v18, %v244_v63 }
 0x1fa   :  { %631 = vmatmul.f32.gmra.mxu2 %v6254_v20  ;;  %v8215_v20 = vpop.f32.mrf.mxu3 }
 0x1fd   :  { %v8049_v21 = vpop.f32.mrf.mxu2 }
 0x1fe   :  { %v289_v25 = vadd.f32 %v8049_v21, %v247_v6 }
 0x202   :  { %634 = vmatmul.f32.gmra.mxu2 %v6256_v23  ;;  %v6287_v23 = vld [vmem:[%s12511_s5 + $0xa8] sm:$0xff]  ;;  %v8266_v57 = vpop.f32.mrf.mxu3 }
 0x203   :  { %805 = vmatpush.msrb.mxu2 %v6287_v23 }
 0x205   :  { %v8058_v24 = vpop.f32.mrf.mxu2  ;;  %v8107_v44 = vpop.f32.mrf.mxu1 }
 0x20a   :  { %637 = vmatmul.f32.gmra.mxu2 %v6258_v26  ;;  %v539_v2 = vpop.f32.mrf.mxu3 }
 0x20b   :  { %v540_v14 = vadd.f32 %v539_v2, %v8080_v32  ;;  %v253_v32 = vpop.f32.mrf.mxu0 }
 0x20d   :  { %v8067_v27 = vpop.f32.mrf.mxu2  ;;  %v8124_v51 = vpop.f32.mrf.mxu1 }
 0x20e   :  { %v295_v2 = vadd.f32 %v8067_v27, %v253_v32 }
 0x212   :  { %640 = vmatmul.f32.gmra.mxu2 %v6260_v29  ;;  %v6286_v29 = vld [vmem:[%s12511_s5 + $0xa0] sm:$0xff]  ;;  %v542_v7 = vpop.f32.mrf.mxu3 }
 0x213   :  { %806 = vmatpush.msrb.mxu2 %v6286_v29  ;;  %v543_v18 = vadd.f32 %v542_v7, %v8092_v37  ;;  %v6379_v37 = vld [vmem:[%s12511_s5 + $0x270] sm:$0xff]  ;;  %v256_v63 = vpop.f32.mrf.mxu0 }
 0x215   :  { %v8078_v31 = vpop.f32.mrf.mxu2  ;;  %v8175_v5 = vpop.f32.mrf.mxu1 }
 0x21a   :  { %643 = vmatmul.f32.gmra.mxu2 %v6262_v33  ;;  %v6317_v33 = vld [vmem:[%s12511_s5 + $0x120] sm:$0xff]  ;;  %v545_v23 = vpop.f32.mrf.mxu3 }
 0x21b   :  { %965 = vmatpush.msra.mxu0 %v6317_v33 }
 0x21d   :  { %v8087_v35 = vpop.f32.mrf.mxu2  ;;  %v8226_v26 = vpop.f32.mrf.mxu1  ;;  %966 = vmatpush.msra.mxu0 %v6316_v47 }
 0x21f   :  { %967 = vmatpush.msra.mxu0 %v6315_v53 }
 0x221   :  { %968 = vmatpush.msra.mxu0 %v6314_v56  ;;  %v6376_v56 = vld [vmem:[%s12511_s5 + $0x258] sm:$0xff] }
 0x222   :  { %646 = vmatmul.f32.gmra.mxu2 %v6264_v36  ;;  %v718_v36 = vld [vmem:[%s12511_s5 + $0x18] sm:$0xff] }
 0x223   :  { %743 = vmatpush.msra.mxu3 %v718_v36  ;;  %969 = vmatpush.msra.mxu0 %v6313_v60 }
 0x225   :  { %v8094_v38 = vpop.f32.mrf.mxu2  ;;  %744 = vmatpush.msra.mxu3 %v717_v49  ;;  %v8277_v61 = vpop.f32.mrf.mxu1 }
 0x226   :  { %v548_v49 = vpop.f32.mrf.mxu3 }
 0x227   :  { %745 = vmatpush.msra.mxu3 %v716_v54 }
 0x229   :  { %746 = vmatpush.msra.mxu3 %v715_v58 }
 0x22a   :  { %649 = vmatmul.f32.gmra.mxu2 %v6266_v40  ;;  %v6285_v40 = vld [vmem:[%s12511_s5 + $0x98] sm:$0xff] }
 0x22b   :  { %807 = vmatpush.msrb.mxu2 %v6285_v40  ;;  %v292_v40 = vadd.f32 %v8058_v24, %v250_v13 }
 0x22d   :  { %v8103_v42 = vpop.f32.mrf.mxu2  ;;  %808 = vmatpush.msrb.mxu2 %v6284_v52  ;;  %v670_v4 = vpop.f32.mrf.mxu1  ;;  %v6378_v52 = vld [vmem:[%s12511_s5 + $0x268] sm:$0xff] }
 0x22f   :  { %809 = vmatpush.msrb.mxu2 %v6283_v55  ;;  %v546_v55 = vadd.f32 %v545_v23, %v8101_v41  ;;  %v6375_v41 = vld [vmem:[%s12511_s5 + $0x250] sm:$0xff] }
 0x231   :  { %810 = vmatpush.msrb.mxu2 %v6282_v59 }
 0x235   :  { %v8109_v45 = vpop.f32.mrf.mxu2  ;;  %v673_v10 = vpop.f32.mrf.mxu1 }
 0x236   :  { %v409_v9 = vadd.f32 %v8109_v45, %v8076_v30 }
 0x238   :  { %v432_v12 = vmax.f32 %v286_v11, %v409_v9  ;;  %v551_v9 = vpop.f32.mrf.mxu3  ;;  %v6373_v11 = vld [vmem:[%s12511_s5 + $0x240] sm:$0xff] }
 0x23a   :  { %v563_v17 = vmax.f32 %v432_v12, %v540_v14 }
 0x23d   :  { %v8122_v50 = vpop.f32.mrf.mxu2  ;;  %v676_v29 = vpop.f32.mrf.mxu1 }
 0x23e   :  { %v412_v19 = vadd.f32 %v8122_v50, %v8085_v34  ;;  %v6380_v34 = vld [vmem:[%s12511_s5 + $0x278] sm:$0xff] }
 0x23f   :  { %1186 = vmatpush.msrb.mxu0 %v6380_v34 }
 0x240   :  { %v433_v33 = vmax.f32 %v289_v25, %v412_v19  ;;  %v259_v19 = vpop.f32.mrf.mxu0  ;;  %v6371_v25 = vld [vmem:[%s12511_s5 + $0x230] sm:$0xff] }
 0x241   :  { %1187 = vmatpush.msrb.mxu0 %v6379_v37  ;;  %v6367_v37 = vld [vmem:[%s12511_s5 + $0x210] sm:$0xff] }
 0x242   :  { %v564_v21 = vmax.f32 %v433_v33, %v543_v18 }
 0x243   :  { %1188 = vmatpush.msrb.mxu0 %v6378_v52 }
 0x245   :  { %v8164_v1 = vpop.f32.mrf.mxu2 }
 0x246   :  { %v415_v50 = vadd.f32 %v8164_v1, %v8096_v39  ;;  %v679_v39 = vpop.f32.mrf.mxu1  ;;  %v6377_v1 = vld [vmem:[%s12511_s5 + $0x260] sm:$0xff] }
 0x247   :  { %1189 = vmatpush.msrb.mxu0 %v6377_v1 }
 0x248   :  { %v434_v53 = vmax.f32 %v292_v40, %v415_v50 }
 0x249   :  { %1190 = vmatpush.msrb.mxu0 %v6376_v56 }
 0x24a   :  { %v565_v58 = vmax.f32 %v434_v53, %v546_v55 }
 0x24b   :  { %1191 = vmatpush.msrb.mxu0 %v6375_v41 }
 0x24d   :  { %v8204_v15 = vpop.f32.mrf.mxu2 }
 0x24e   :  { %v418_v59 = vadd.f32 %v8204_v15, %v8105_v43  ;;  %v6374_v43 = vld [vmem:[%s12511_s5 + $0x248] sm:$0xff]  ;;  %v549_v15 = vadd.f32 %v548_v49, %v8107_v44  ;;  %v6372_v44 = vld [vmem:[%s12511_s5 + $0x238] sm:$0xff] }
 0x24f   :  { %1192 = vmatpush.msrb.mxu0 %v6374_v43 }
 0x250   :  { %v435_v6 = vmax.f32 %v295_v2, %v418_v59 }
 0x251   :  { %1193 = vmatpush.msrb.mxu0 %v6373_v11 }
 0x252   :  { %v566_v12 = vmax.f32 %v435_v6, %v549_v15 }
 0x253   :  { %1194 = vmatpush.msrb.mxu0 %v6372_v44 }
 0x255   :  { %v8246_v48 = vpop.f32.mrf.mxu2  ;;  %1195 = vmatpush.msrb.mxu0 %v6371_v25 }
 0x256   :  { %v421_v13 = vadd.f32 %v8246_v48, %v8111_v46  ;;  %v552_v46 = vadd.f32 %v551_v9, %v8124_v51  ;;  %v554_v48 = vpop.f32.mrf.mxu3  ;;  %v6369_v51 = vld [vmem:[%s12511_s5 + $0x220] sm:$0xff] }
 0x25d   :  { %v8279_v62 = vpop.f32.mrf.mxu2 }
 0x25e   :  { %v424_v33 = vadd.f32 %v8279_v62, %v8162_v0  ;;  %v6368_v0 = vld [vmem:[%s12511_s5 + $0x218] sm:$0xff]  ;;  %v555_v62 = vadd.f32 %v554_v48, %v8175_v5  ;;  %v557_v52 = vpop.f32.mrf.mxu3  ;;  %v6366_v5 = vld [vmem:[%s12511_s5 + $0x208] sm:$0xff] }
 0x265   :  { %v8281_v3 = vpop.f32.mrf.mxu2 }
 0x266   :  { %v560_v2 = vpop.f32.mrf.mxu3 }
 0x267   :  { %v561_v9 = vadd.f32 %v560_v2, %v8277_v61  ;;  %v713_v2 = vld [vmem:[%s12512_s4 + $0x18] sm:$0xff] }
 0x26d   :  { %v8283_v8 = vpop.f32.mrf.mxu2 }
 0x26e   :  { %v430_v59 = vadd.f32 %v8283_v8, %v8266_v57 }
 0x275   :  { %v629_v16 = vpop.f32.mrf.mxu2 }
 0x276   :  { %v671_v22 = vadd.f32 %v670_v4, %v629_v16  ;;  %v298_v16 = vadd.f32 %v8078_v31, %v256_v63 }
 0x278   :  { %v694_v28 = vmax.f32 %v563_v17, %v671_v22  ;;  %v436_v22 = vmax.f32 %v298_v16, %v421_v13 }
 0x27a   :  { %v8292_v30 = vmax.f32 %v694_v28, 0.0  ;;  %v6370_v28 = vld [vmem:[%s12511_s5 + $0x228] sm:$0xff] }
 0x27b   :  { %1196 = vmatpush.msrb.mxu0 %v6370_v28 }
 0x27c   :  { %747 = vmatmul.f32.vlgmr.msra.gmra.mxu3 %v8292_v30  ;;  %811 = vmatmul.f32.vlgmr.msrb.gmra.mxu2 %v8292_v30 }
 0x27d   :  { %970 = vmatmul.f32.vlgmr.msra.gmra.mxu0 %v8292_v30  ;;  %v632_v45 = vpop.f32.mrf.mxu2 }
 0x27e   :  { %v674_v36 = vadd.f32 %v673_v10, %v632_v45  ;;  %v682_v10 = vpop.f32.mrf.mxu1  ;;  %v301_v45 = vadd.f32 %v8087_v35, %v259_v19  ;;  %1197 = vmatpush.msrb.mxu0 %v6369_v51 }
 0x280   :  { %v695_v47 = vmax.f32 %v564_v21, %v674_v36  ;;  %v437_v21 = vmax.f32 %v301_v45, %v424_v33  ;;  %v262_v36 = vpop.f32.mrf.mxu0  ;;  %1198 = vmatpush.msrb.mxu0 %v6368_v0  ;;  %v6277_v0 = vld [vmem:[%s12512_s4 + $0x28] sm:$0xff] }
 0x281   :  { %v304_v53 = vadd.f32 %v8094_v38, %v262_v36 }
 0x282   :  { %v8310_v54 = vmax.f32 %v695_v47, 0.0  ;;  %v568_v40 = vmax.f32 %v437_v21, %v555_v62  ;;  %v427_v47 = vadd.f32 %v8281_v3, %v8215_v20  ;;  %1199 = vmatpush.msrb.mxu0 %v6367_v37  ;;  %v6365_v20 = vld [vmem:[%s12511_s5 + $0x200] sm:$0xff]  ;;  %v558_v3 = vadd.f32 %v557_v52, %v8226_v26  ;;  %v6353_v37 = vld [vmem:[%s12511_s5 + $0x1f0] sm:$0xff] }
 0x283   :  { %v710_v62 = vld [vmem:[%s12512_s4] sm:$0xff]  ;;  %v6278_v52 = vld [vmem:[%s12512_s4 + $0x30] sm:$0xff] }
 0x284   :  { %750 = vmatmul.f32.gmra.mxu3 %v8310_v54  ;;  %814 = vmatmul.f32.gmra.mxu2 %v8310_v54  ;;  %v438_v55 = vmax.f32 %v304_v53, %v427_v47  ;;  %v6350_v53 = vld [vmem:[%s12511_s5 + $0x1d8] sm:$0xff] }
 0x285   :  { %973 = vmatmul.f32.gmra.mxu0 %v8310_v54  ;;  %v635_v24 = vpop.f32.mrf.mxu2 }
 0x286   :  { %v677_v60 = vadd.f32 %v676_v29, %v635_v24  ;;  %v567_v29 = vmax.f32 %v436_v22, %v552_v46  ;;  %v685_v32 = vpop.f32.mrf.mxu1  ;;  %1200 = vmatpush.msrb.mxu0 %v6366_v5  ;;  %v711_v5 = vld [vmem:[%s12512_s4 + $0x8] sm:$0xff] }
 0x288   :  { %v696_v4 = vmax.f32 %v565_v58, %v677_v60  ;;  %v265_v56 = vpop.f32.mrf.mxu0  ;;  %v569_v58 = vmax.f32 %v438_v55, %v558_v3  ;;  %1201 = vmatpush.msrb.mxu0 %v6365_v20  ;;  %v6347_v20 = vld [vmem:[%s12511_s5 + $0x1c0] sm:$0xff]  ;;  %v6279_v3 = vld [vmem:[%s12512_s4 + $0x38] sm:$0xff] }
 0x289   :  { %v307_v63 = vadd.f32 %v8103_v42, %v265_v56  ;;  %v712_v56 = vld [vmem:[%s12512_s4 + $0x10] sm:$0xff] }
 0x28a   :  { %v8328_v7 = vmax.f32 %v696_v4, 0.0 }
 0x28b   :  { %v439_v4 = vmax.f32 %v307_v63, %v430_v59  ;;  %v6344_v59 = vld [vmem:[%s12511_s5 + $0x1a8] sm:$0xff]  ;;  %v6343_v63 = vld [vmem:[%s12511_s5 + $0x1a0] sm:$0xff] }
 0x28c   :  { %753 = vmatmul.f32.gmra.mxu3 %v8328_v7  ;;  %817 = vmatmul.f32.gmra.mxu2 %v8328_v7 }
 0x28d   :  { %976 = vmatmul.f32.gmra.mxu0 %v8328_v7  ;;  %v638_v27 = vpop.f32.mrf.mxu2  ;;  %v570_v57 = vmax.f32 %v439_v4, %v561_v9  ;;  %v6342_v4 = vld [vmem:[%s12511_s5 + $0x198] sm:$0xff]  ;;  %v6340_v9 = vld [vmem:[%s12511_s5 + $0x188] sm:$0xff] }
 0x28e   :  { %v680_v14 = vadd.f32 %v679_v39, %v638_v27  ;;  %v688_v1 = vpop.f32.mrf.mxu1 }
 0x290   :  { %v697_v17 = vmax.f32 %v566_v12, %v680_v14 }
 0x292   :  { %v8346_v23 = vmax.f32 %v697_v17, 0.0 }
 0x294   :  { %756 = vmatmul.f32.gmra.mxu3 %v8346_v23  ;;  %820 = vmatmul.f32.gmra.mxu2 %v8346_v23 }
 0x295   :  { %979 = vmatmul.f32.gmra.mxu0 %v8346_v23  ;;  %v641_v31 = vpop.f32.mrf.mxu2 }
 0x296   :  { %v683_v18 = vadd.f32 %v682_v10, %v641_v31  ;;  %v691_v6 = vpop.f32.mrf.mxu1 }
 0x298   :  { %v698_v34 = vmax.f32 %v567_v29, %v683_v18 }
 0x29a   :  { %v8364_v50 = vmax.f32 %v698_v34, 0.0 }
 0x29c   :  { %759 = vmatmul.f32.gmra.mxu3 %v8364_v50  ;;  %823 = vmatmul.f32.gmra.mxu2 %v8364_v50 }
 0x29d   :  { %982 = vmatmul.f32.gmra.mxu0 %v8364_v50  ;;  %v644_v35 = vpop.f32.mrf.mxu2 }
 0x29e   :  { %v686_v49 = vadd.f32 %v685_v32, %v644_v35  ;;  %v6354_v35 = vld [vmem:[%s12511_s5 + $0x1f8] sm:$0xff] }
 0x2a0   :  { %v699_v39 = vmax.f32 %v568_v40, %v686_v49  ;;  %v6352_v40 = vld [vmem:[%s12511_s5 + $0x1e8] sm:$0xff]  ;;  %v6351_v49 = vld [vmem:[%s12511_s5 + $0x1e0] sm:$0xff] }
 0x2a2   :  { %v8382_v24 = vmax.f32 %v699_v39, 0.0  ;;  %v6349_v39 = vld [vmem:[%s12511_s5 + $0x1d0] sm:$0xff] }
 0x2a4   :  { %762 = vmatmul.f32.gmra.mxu3 %v8382_v24  ;;  %826 = vmatmul.f32.gmra.mxu2 %v8382_v24 }
 0x2a5   :  { %985 = vmatmul.f32.gmra.mxu0 %v8382_v24  ;;  %v647_v38 = vpop.f32.mrf.mxu2 }
 0x2a6   :  { %v689_v60 = vadd.f32 %v688_v1, %v647_v38  ;;  %v6348_v1 = vld [vmem:[%s12511_s5 + $0x1c8] sm:$0xff]  ;;  %v6346_v38 = vld [vmem:[%s12511_s5 + $0x1b8] sm:$0xff] }
 0x2a8   :  { %v700_v41 = vmax.f32 %v569_v58, %v689_v60  ;;  %v6345_v58 = vld [vmem:[%s12511_s5 + $0x1b0] sm:$0xff] }
 0x2aa   :  { %v8394_v26 = vmax.f32 %v700_v41, 0.0  ;;  %v6280_v41 = vld [vmem:[%s12512_s4 + $0x40] sm:$0xff] }
 0x2ac   :  { %765 = vmatmul.f32.gmra.mxu3 %v8394_v26  ;;  %829 = vmatmul.f32.gmra.mxu2 %v8394_v26 }
 0x2ad   :  { %988 = vmatmul.f32.gmra.mxu0 %v8394_v26  ;;  %v650_v43 = vpop.f32.mrf.mxu2 }
 0x2ae   :  { %v692_v8 = vadd.f32 %v691_v6, %v650_v43  ;;  %v6341_v6 = vld [vmem:[%s12511_s5 + $0x190] sm:$0xff] }
 0x2b0   :  { %v701_v15 = vmax.f32 %v570_v57, %v692_v8  ;;  %v6339_v57 = vld [vmem:[%s12511_s5 + $0x180] sm:$0xff]  ;;  %v6281_v8 = vld [vmem:[%s12512_s4 + $0x48] sm:$0xf] }
 0x2b2   :  { %v8400_v27 = vmax.f32 %v701_v15, 0.0  ;;  %v714_v15 = vld [vmem:[%s12512_s4 + $0x20] sm:$0xf] }
 0x2b4   :  { %768 = vmatmul.f32.gmra.mxu3 %v8400_v27  ;;  %832 = vmatmul.f32.gmra.mxu2 %v8400_v27 }
 0x2b5   :  { %991 = vmatmul.f32.gmra.mxu0 %v8400_v27 }
 0x2bd   :  { %1202 = vmatmul.f32.vlgmr.msrb.gmra.mxu0 %v8292_v30 }
 0x2c5   :  { %1205 = vmatmul.f32.gmra.mxu0 %v8310_v54 }
 0x2cd   :  { %1208 = vmatmul.f32.gmra.mxu0 %v8328_v7 }
 0x2d5   :  { %1211 = vmatmul.f32.gmra.mxu0 %v8346_v23 }
 0x2dd   :  { %1214 = vmatmul.f32.gmra.mxu0 %v8364_v50 }
 0x2e5   :  { %1217 = vmatmul.f32.gmra.mxu0 %v8382_v24 }
 0x2ed   :  { %1220 = vmatmul.f32.gmra.mxu0 %v8394_v26 }
 0x2f5   :  { %1223 = vmatmul.f32.gmra.mxu0 %v8400_v27 }
 0x2fa   :  { %v8413_v42 = vpop.f32.mrf.mxu0 }
 0x2ff   :  { %v748_v61 = vpop.f32.mrf.mxu3  ;;  %v812_v10 = vpop.f32.mrf.mxu2 }
 0x302   :  { %v8415_v11 = vpop.f32.mrf.mxu0 }
 0x307   :  { %v751_v12 = vpop.f32.mrf.mxu3  ;;  %v815_v13 = vpop.f32.mrf.mxu2 }
 0x30a   :  { %v8417_v14 = vpop.f32.mrf.mxu0 }
 0x30f   :  { %v754_v44 = vpop.f32.mrf.mxu3  ;;  %v818_v16 = vpop.f32.mrf.mxu2 }
 0x312   :  { %v980_v17 = vpop.f32.mrf.mxu0 }
 0x317   :  { %v757_v19 = vpop.f32.mrf.mxu3  ;;  %v821_v22 = vpop.f32.mrf.mxu2 }
 0x31a   :  { %v983_v25 = vpop.f32.mrf.mxu0 }
 0x31f   :  { %v760_v46 = vpop.f32.mrf.mxu3  ;;  %v824_v48 = vpop.f32.mrf.mxu2 }
 0x322   :  { %v986_v31 = vpop.f32.mrf.mxu0 }
 0x327   :  { %v763_v28 = vpop.f32.mrf.mxu3  ;;  %v827_v29 = vpop.f32.mrf.mxu2 }
 0x32a   :  { %v989_v33 = vpop.f32.mrf.mxu0 }
 0x32f   :  { %v766_v18 = vpop.f32.mrf.mxu3  ;;  %v830_v32 = vpop.f32.mrf.mxu2 }
 0x332   :  { %v992_v51 = vpop.f32.mrf.mxu0 }
 0x337   :  { %v769_v45 = vpop.f32.mrf.mxu3  ;;  %v833_v34 = vpop.f32.mrf.mxu2 }
 0x338   :  { %860 = vmatpush.msra.mxu1 %v833_v34  ;;  %907 = vmatpush.msrb.mxu3 %v769_v45  ;;  %v6418_v45 = vld [vmem:[%s12511_s5 + $0x308] sm:$0xff] }
 0x339   :  { %v6361_v34 = vld [vmem:[%s12512_s4 + $0xa8] sm:$0xff] }
 0x33a   :  { %v8419_v21 = vpop.f32.mrf.mxu0  ;;  %861 = vmatpush.msra.mxu1 %v830_v32  ;;  %908 = vmatpush.msrb.mxu3 %v766_v18  ;;  %v6421_v18 = vld [vmem:[%s12511_s5 + $0x320] sm:$0xff]  ;;  %v6420_v32 = vld [vmem:[%s12511_s5 + $0x318] sm:$0xff] }
 0x33c   :  { %862 = vmatpush.msra.mxu1 %v827_v29  ;;  %909 = vmatpush.msrb.mxu3 %v763_v28  ;;  %v6423_v28 = vld [vmem:[%s12511_s5 + $0x330] sm:$0xff]  ;;  %v6422_v29 = vld [vmem:[%s12511_s5 + $0x328] sm:$0xff] }
 0x33e   :  { %863 = vmatpush.msra.mxu1 %v824_v48  ;;  %910 = vmatpush.msrb.mxu3 %v760_v46  ;;  %v6312_v46 = vld [vmem:[%s12512_s4 + $0x70] sm:$0xf]  ;;  %v6425_v48 = vld [vmem:[%s12511_s5 + $0x340] sm:$0xff] }
 0x340   :  { %864 = vmatpush.msra.mxu1 %v821_v22  ;;  %911 = vmatpush.msrb.mxu3 %v757_v19  ;;  %v6428_v19 = vld [vmem:[%s12511_s5 + $0x358] sm:$0xff]  ;;  %v6427_v22 = vld [vmem:[%s12511_s5 + $0x350] sm:$0xff] }
 0x342   :  { %v8421_v36 = vpop.f32.mrf.mxu0  ;;  %865 = vmatpush.msra.mxu1 %v818_v16  ;;  %912 = vmatpush.msrb.mxu3 %v754_v44  ;;  %v6430_v44 = vld [vmem:[%s12511_s5 + $0x368] sm:$0xff] }
 0x343   :  { %v6311_v16 = vld [vmem:[%s12512_s4 + $0x68] sm:$0xff] }
 0x344   :  { %866 = vmatpush.msra.mxu1 %v815_v13  ;;  %913 = vmatpush.msrb.mxu3 %v751_v12  ;;  %v6310_v12 = vld [vmem:[%s12512_s4 + $0x60] sm:$0xff]  ;;  %v6432_v13 = vld [vmem:[%s12511_s5 + $0x378] sm:$0xff] }
 0x346   :  { %867 = vmatpush.msra.mxu1 %v812_v10  ;;  %914 = vmatpush.msrb.mxu3 %v748_v61  ;;  %v6308_v61 = vld [vmem:[%s12512_s4 + $0x50] sm:$0xff] }
 0x347   :  { %6298 = vmatmul.msk.f32.vlgmr.msra.gmra.mxu1 %vm836_vm2, %v6277_v0  ;;  %6303 = vmatmul.msk.f32.vlgmr.msrb.gmra.mxu3 %vm836_vm2, %v710_v62  ;;  %v6363_v0 = vld [vmem:[%s12512_s4 + $0xb8] sm:$0xff]  ;;  %v6364_v62 = vld [vmem:[%s12512_s4 + $0xc0] sm:$0xf] }
 0x348   :  { %1018 = vmatpush.msrb.mxu1 %v992_v51  ;;  %1070 = vmatpush.msra.mxu3 %v6354_v35  ;;  %v6419_v51 = vld [vmem:[%s12511_s5 + $0x310] sm:$0xff] }
 0x34a   :  { %1019 = vmatpush.msrb.mxu1 %v989_v33  ;;  %v8440_v47 = vpop.f32.mrf.mxu0  ;;  %1071 = vmatpush.msra.mxu3 %v6353_v37  ;;  %v6360_v33 = vld [vmem:[%s12512_s4 + $0xa0] sm:$0xff] }
 0x34c   :  { %1020 = vmatpush.msrb.mxu1 %v986_v31  ;;  %1072 = vmatpush.msra.mxu3 %v6352_v40  ;;  %v6424_v31 = vld [vmem:[%s12511_s5 + $0x338] sm:$0xff] }
 0x34e   :  { %1021 = vmatpush.msrb.mxu1 %v983_v25  ;;  %1073 = vmatpush.msra.mxu3 %v6351_v49  ;;  %v6426_v25 = vld [vmem:[%s12511_s5 + $0x348] sm:$0xff] }
 0x34f   :  { %6299 = vmatmul.msk.f32.gmra.mxu1 %vm836_vm2, %v6278_v52  ;;  %6304 = vmatmul.msk.f32.gmra.mxu3 %vm836_vm2, %v711_v5 }
 0x350   :  { %1022 = vmatpush.msrb.mxu1 %v980_v17  ;;  %1074 = vmatpush.msra.mxu3 %v6350_v53  ;;  %v6429_v17 = vld [vmem:[%s12511_s5 + $0x360] sm:$0xff] }
 0x352   :  { %1023 = vmatpush.msrb.mxu1 %v8417_v14  ;;  %v1212_v55 = vpop.f32.mrf.mxu0  ;;  %1075 = vmatpush.msra.mxu3 %v6349_v39  ;;  %v6431_v14 = vld [vmem:[%s12511_s5 + $0x370] sm:$0xff] }
 0x354   :  { %1024 = vmatpush.msrb.mxu1 %v8415_v11  ;;  %1076 = vmatpush.msra.mxu3 %v6348_v1  ;;  %v6309_v11 = vld [vmem:[%s12512_s4 + $0x58] sm:$0xff] }
 0x356   :  { %1025 = vmatpush.msrb.mxu1 %v8413_v42  ;;  %1077 = vmatpush.msra.mxu3 %v6347_v20 }
 0x357   :  { %6300 = vmatmul.msk.f32.gmra.mxu1 %vm836_vm2, %v6279_v3  ;;  %6305 = vmatmul.msk.f32.gmra.mxu3 %vm836_vm2, %v712_v56 }
 0x358   :  { %1078 = vmatpush.msra.mxu3 %v6346_v38 }
 0x35a   :  { %v1215_v60 = vpop.f32.mrf.mxu0  ;;  %1079 = vmatpush.msra.mxu3 %v6345_v58 }
 0x35c   :  { %1080 = vmatpush.msra.mxu3 %v6344_v59 }
 0x35e   :  { %1081 = vmatpush.msra.mxu3 %v6343_v63 }
 0x35f   :  { %6301 = vmatmul.msk.f32.gmra.mxu1 %vm836_vm2, %v6280_v41  ;;  %6306 = vmatmul.msk.f32.gmra.mxu3 %vm836_vm2, %v713_v2 }
 0x360   :  { %1082 = vmatpush.msra.mxu3 %v6342_v4 }
 0x362   :  { %v1218_v43 = vpop.f32.mrf.mxu0  ;;  %1083 = vmatpush.msra.mxu3 %v6341_v6 }
 0x364   :  { %1084 = vmatpush.msra.mxu3 %v6340_v9 }
 0x366   :  { %1085 = vmatpush.msra.mxu3 %v6339_v57 }
 0x367   :  { %6302 = vmatmul.msk.f32.gmra.mxu1 %vm836_vm2, %v6281_v8  ;;  %6307 = vmatmul.msk.f32.gmra.mxu3 %vm836_vm2, %v714_v15 }
 0x36a   :  { %v1221_v42 = vpop.f32.mrf.mxu0 }
 0x36f   :  { %6329 = vmatmul.msk.f32.vlgmr.msrb.gmra.mxu1 %vm836_vm2, %v6308_v61  ;;  %1086 = vmatmul.f32.vlgmr.msra.gmra.mxu3 %v8292_v30  ;;  %v6406_v61 = vld [vmem:[%s12511_s5 + $0x2f8] sm:$0xff] }
 0x372   :  { %v1224_v10 = vpop.f32.mrf.mxu0 }
 0x373   :  { %1250 = vmatpush.msra.mxu1 %v1224_v10  ;;  %v6405_v10 = vld [vmem:[%s12511_s5 + $0x2f0] sm:$0xff] }
 0x375   :  { %1251 = vmatpush.msra.mxu1 %v1221_v42  ;;  %v6334_v42 = vld [vmem:[%s12512_s4 + $0x78] sm:$0xff] }
 0x377   :  { %1252 = vmatpush.msra.mxu1 %v1218_v43  ;;  %1089 = vmatmul.f32.gmra.mxu3 %v8310_v54 }
 0x378   :  { %6330 = vmatmul.msk.f32.gmra.mxu1 %vm836_vm2, %v6309_v11  ;;  %v6404_v11 = vld [vmem:[%s12511_s5 + $0x2e8] sm:$0xff] }
 0x379   :  { %1253 = vmatpush.msra.mxu1 %v1215_v60 }
 0x37b   :  { %1254 = vmatpush.msra.mxu1 %v1212_v55 }
 0x37d   :  { %1255 = vmatpush.msra.mxu1 %v8440_v47 }
 0x37f   :  { %1256 = vmatpush.msra.mxu1 %v8421_v36  ;;  %1092 = vmatmul.f32.gmra.mxu3 %v8328_v7  ;;  %v6362_v36 = vld [vmem:[%s12512_s4 + $0xb0] sm:$0xff] }
 0x380   :  { %6331 = vmatmul.msk.f32.gmra.mxu1 %vm836_vm2, %v6310_v12 }
 0x381   :  { %1257 = vmatpush.msra.mxu1 %v8419_v21  ;;  %v6417_v21 = vld [vmem:[%s12511_s5 + $0x300] sm:$0xff] }
 0x383   :  { %1418 = vmatpush.msrb.mxu1 %v6432_v13  ;;  %v6403_v13 = vld [vmem:[%s12511_s5 + $0x2e0] sm:$0xff] }
 0x385   :  { %1419 = vmatpush.msrb.mxu1 %v6431_v14  ;;  %v6335_v14 = vld [vmem:[%s12512_s4 + $0x80] sm:$0xff] }
 0x387   :  { %1420 = vmatpush.msrb.mxu1 %v6430_v44  ;;  %1095 = vmatmul.f32.gmra.mxu3 %v8346_v23  ;;  %v6402_v44 = vld [vmem:[%s12511_s5 + $0x2d8] sm:$0xff] }
 0x388   :  { %6332 = vmatmul.msk.f32.gmra.mxu1 %vm836_vm2, %v6311_v16  ;;  %v6401_v16 = vld [vmem:[%s12511_s5 + $0x2d0] sm:$0xff] }
 0x389   :  { %1421 = vmatpush.msrb.mxu1 %v6429_v17  ;;  %v6400_v17 = vld [vmem:[%s12511_s5 + $0x2c8] sm:$0xff] }
 0x38b   :  { %1422 = vmatpush.msrb.mxu1 %v6428_v19 }
 0x38d   :  { %1423 = vmatpush.msrb.mxu1 %v6427_v22  ;;  %v6399_v22 = vld [vmem:[%s12511_s5 + $0x2c0] sm:$0xff] }
 0x38f   :  { %1098 = vmatmul.f32.gmra.mxu3 %v8364_v50  ;;  %1424 = vmatpush.msrb.mxu1 %v6426_v25  ;;  %v6336_v25 = vld [vmem:[%s12512_s4 + $0x88] sm:$0xff] }
 0x390   :  { %6333 = vmatmul.msk.f32.gmra.mxu1 %vm836_vm2, %v6312_v46  ;;  %v6398_v46 = vld [vmem:[%s12511_s5 + $0x2b8] sm:$0xff] }
 0x391   :  { %1425 = vmatpush.msrb.mxu1 %v6425_v48  ;;  %v6397_v48 = vld [vmem:[%s12511_s5 + $0x2b0] sm:$0xff] }
 0x393   :  { %1426 = vmatpush.msrb.mxu1 %v6424_v31  ;;  %v6396_v31 = vld [vmem:[%s12511_s5 + $0x2a8] sm:$0xff] }
 0x395   :  { %1427 = vmatpush.msrb.mxu1 %v6423_v28 }
 0x397   :  { %1101 = vmatmul.f32.gmra.mxu3 %v8382_v24  ;;  %1428 = vmatpush.msrb.mxu1 %v6422_v29  ;;  %v6395_v29 = vld [vmem:[%s12511_s5 + $0x2a0] sm:$0xff] }
 0x398   :  { %6381 = vmatmul.msk.f32.vlgmr.msra.gmra.mxu1 %vm836_vm2, %v6360_v33  ;;  %v6337_v33 = vld [vmem:[%s12512_s4 + $0x90] sm:$0xff] }
 0x399   :  { %1429 = vmatpush.msrb.mxu1 %v6421_v18  ;;  %v6394_v18 = vld [vmem:[%s12511_s5 + $0x298] sm:$0xff] }
 0x39b   :  { %1430 = vmatpush.msrb.mxu1 %v6420_v32  ;;  %v6393_v32 = vld [vmem:[%s12511_s5 + $0x290] sm:$0xff] }
 0x39d   :  { %1431 = vmatpush.msrb.mxu1 %v6419_v51  ;;  %v6392_v51 = vld [vmem:[%s12511_s5 + $0x288] sm:$0xff] }
 0x39f   :  { %1104 = vmatmul.f32.gmra.mxu3 %v8394_v26  ;;  %1432 = vmatpush.msrb.mxu1 %v6418_v45 }
 0x3a0   :  { %6382 = vmatmul.msk.f32.gmra.mxu1 %vm836_vm2, %v6361_v34  ;;  %v6391_v34 = vld [vmem:[%s12511_s5 + $0x280] sm:$0xff] }
 0x3a1   :  { %1433 = vmatpush.msrb.mxu1 %v6417_v21  ;;  %v6338_v21 = vld [vmem:[%s12512_s4 + $0x98] sm:$0xf] }
 0x3a7   :  { %1107 = vmatmul.f32.gmra.mxu3 %v8400_v27 }
 0x3a8   :  { %6383 = vmatmul.msk.f32.gmra.mxu1 %vm836_vm2, %v6362_v36 }
 0x3b0   :  { %6384 = vmatmul.msk.f32.gmra.mxu1 %vm836_vm2, %v6363_v0 }
 0x3b8   :  { %6385 = vmatmul.msk.f32.gmra.mxu1 %vm836_vm2, %v6364_v62 }
 0x3c0   :  { %1434 = vmatmul.f32.vlgmr.msrb.gmra.mxu1 %v8292_v30 }
 0x3c4   :  { %v8616_v35 = vpop.f32.mrf.mxu1 }
 0x3c8   :  { %1437 = vmatmul.f32.gmra.mxu1 %v8310_v54 }
 0x3ca   :  { %v8619_v37 = vpop.f32.mrf.mxu3 }
 0x3cc   :  { %v8621_v40 = vpop.f32.mrf.mxu1 }
 0x3d0   :  { %1440 = vmatmul.f32.gmra.mxu1 %v8328_v7 }
 0x3d2   :  { %v8624_v47 = vpop.f32.mrf.mxu3 }
 0x3d4   :  { %v8626_v49 = vpop.f32.mrf.mxu1 }
 0x3d8   :  { %1443 = vmatmul.f32.gmra.mxu1 %v8346_v23 }
 0x3da   :  { %v8629_v52 = vpop.f32.mrf.mxu3 }
 0x3dc   :  { %v8631_v5 = vpop.f32.mrf.mxu1 }
 0x3e0   :  { %1446 = vmatmul.f32.gmra.mxu1 %v8364_v50 }
 0x3e2   :  { %v8634_v53 = vpop.f32.mrf.mxu3 }
 0x3e4   :  { %v8636_v39 = vpop.f32.mrf.mxu1 }
 0x3e8   :  { %1449 = vmatmul.f32.gmra.mxu1 %v8382_v24 }
 0x3ea   :  { %v8639_v1 = vpop.f32.mrf.mxu3 }
 0x3ec   :  { %v8641_v55 = vpop.f32.mrf.mxu1 }
 0x3f0   :  { %1452 = vmatmul.f32.gmra.mxu1 %v8394_v26 }
 0x3f2   :  { %v1087_v20 = vpop.f32.mrf.mxu3 }
 0x3f5   :  { %v8644_v3 = vpop.f32.mrf.mxu1 }
 0x3f8   :  { %1455 = vmatmul.f32.gmra.mxu1 %v8400_v27 }
 0x3fa   :  { %v1090_v56 = vpop.f32.mrf.mxu3 }
 0x3fd   :  { %v8647_v38 = vpop.f32.mrf.mxu1 }
 0x402   :  { %v1093_v58 = vpop.f32.mrf.mxu3 }
 0x405   :  { %v8649_v59 = vpop.f32.mrf.mxu1 }
 0x40a   :  { %v1096_v60 = vpop.f32.mrf.mxu3 }
 0x40d   :  { %v8651_v63 = vpop.f32.mrf.mxu1 }
 0x412   :  { %v1099_v41 = vpop.f32.mrf.mxu3 }
 0x415   :  { %v8653_v2 = vpop.f32.mrf.mxu1 }
 0x41a   :  { %v1102_v4 = vpop.f32.mrf.mxu3 }
 0x41d   :  { %v8655_v6 = vpop.f32.mrf.mxu1 }
 0x422   :  { %v1105_v9 = vpop.f32.mrf.mxu3 }
 0x425   :  { %v8657_v43 = vpop.f32.mrf.mxu1 }
 0x42a   :  { %v1108_v57 = vpop.f32.mrf.mxu3 }
 0x42b   :  { %1134 = vmatpush.msra.mxu2 %v1108_v57  ;;  %v6480_v57 = vld [vmem:[%s12511_s5 + $0x458] sm:$0xff] }
 0x42d   :  { %v8659_v8 = vpop.f32.mrf.mxu1  ;;  %1135 = vmatpush.msra.mxu2 %v1105_v9  ;;  %v6413_v9 = vld [vmem:[%s12512_s4 + $0xf8] sm:$0xff] }
 0x42f   :  { %1136 = vmatpush.msra.mxu2 %v1102_v4  ;;  %v6481_v4 = vld [vmem:[%s12511_s5 + $0x460] sm:$0xff] }
 0x431   :  { %1137 = vmatpush.msra.mxu2 %v1099_v41  ;;  %v6482_v41 = vld [vmem:[%s12511_s5 + $0x468] sm:$0xff] }
 0x433   :  { %1138 = vmatpush.msra.mxu2 %v1096_v60  ;;  %v6483_v60 = vld [vmem:[%s12511_s5 + $0x470] sm:$0xff] }
 0x435   :  { %v8661_v15 = vpop.f32.mrf.mxu1  ;;  %1139 = vmatpush.msra.mxu2 %v1093_v58  ;;  %v6484_v58 = vld [vmem:[%s12511_s5 + $0x478] sm:$0xff] }
 0x437   :  { %1140 = vmatpush.msra.mxu2 %v1090_v56  ;;  %v6412_v56 = vld [vmem:[%s12512_s4 + $0xf0] sm:$0xff] }
 0x439   :  { %1141 = vmatpush.msra.mxu2 %v1087_v20 }
 0x43a   :  { %6355 = vmatmul.msk.f32.vlgmr.msra.gmra.mxu2 %vm836_vm2, %v6334_v42  ;;  %v6479_v42 = vld [vmem:[%s12511_s5 + $0x450] sm:$0xff] }
 0x43b   :  { %1302 = vmatpush.msrb.mxu2 %v6406_v61  ;;  %v6478_v61 = vld [vmem:[%s12511_s5 + $0x448] sm:$0xff] }
 0x43d   :  { %v1435_v12 = vpop.f32.mrf.mxu1  ;;  %1303 = vmatpush.msrb.mxu2 %v6405_v10  ;;  %v6477_v10 = vld [vmem:[%s12511_s5 + $0x440] sm:$0xff] }
 0x43f   :  { %1304 = vmatpush.msrb.mxu2 %v6404_v11  ;;  %v6414_v11 = vld [vmem:[%s12512_s4 + $0x100] sm:$0xff] }
 0x441   :  { %1305 = vmatpush.msrb.mxu2 %v6403_v13  ;;  %v6475_v13 = vld [vmem:[%s12511_s5 + $0x430] sm:$0xff] }
 0x442   :  { %6356 = vmatmul.msk.f32.gmra.mxu2 %vm836_vm2, %v6335_v14  ;;  %v6474_v14 = vld [vmem:[%s12511_s5 + $0x428] sm:$0xff] }
 0x443   :  { %1306 = vmatpush.msrb.mxu2 %v6402_v44  ;;  %v6473_v44 = vld [vmem:[%s12511_s5 + $0x420] sm:$0xff] }
 0x445   :  { %v1438_v19 = vpop.f32.mrf.mxu1  ;;  %1307 = vmatpush.msrb.mxu2 %v6401_v16  ;;  %v6415_v16 = vld [vmem:[%s12512_s4 + $0x108] sm:$0xff] }
 0x447   :  { %1308 = vmatpush.msrb.mxu2 %v6400_v17  ;;  %v6472_v17 = vld [vmem:[%s12511_s5 + $0x418] sm:$0xff] }
 0x449   :  { %1309 = vmatpush.msrb.mxu2 %v6399_v22  ;;  %v6470_v22 = vld [vmem:[%s12511_s5 + $0x408] sm:$0xff] }
 0x44a   :  { %6357 = vmatmul.msk.f32.gmra.mxu2 %vm836_vm2, %v6336_v25  ;;  %v6469_v25 = vld [vmem:[%s12511_s5 + $0x400] sm:$0xff] }
 0x44b   :  { %1310 = vmatpush.msrb.mxu2 %v6398_v46  ;;  %v6416_v46 = vld [vmem:[%s12512_s4 + $0x110] sm:$0xf] }
 0x44d   :  { %v1441_v28 = vpop.f32.mrf.mxu1  ;;  %1311 = vmatpush.msrb.mxu2 %v6397_v48 }
 0x44f   :  { %1312 = vmatpush.msrb.mxu2 %v6396_v31 }
 0x451   :  { %1313 = vmatpush.msrb.mxu2 %v6395_v29 }
 0x452   :  { %6358 = vmatmul.msk.f32.gmra.mxu2 %vm836_vm2, %v6337_v33 }
 0x453   :  { %1314 = vmatpush.msrb.mxu2 %v6394_v18 }
 0x455   :  { %v1444_v45 = vpop.f32.mrf.mxu1  ;;  %1315 = vmatpush.msrb.mxu2 %v6393_v32 }
 0x457   :  { %1316 = vmatpush.msrb.mxu2 %v6392_v51 }
 0x459   :  { %1317 = vmatpush.msrb.mxu2 %v6391_v34 }
 0x45a   :  { %6359 = vmatmul.msk.f32.gmra.mxu2 %vm836_vm2, %v6338_v21 }
 0x45d   :  { %v1447_v36 = vpop.f32.mrf.mxu1 }
 0x462   :  { %1318 = vmatmul.f32.vlgmr.msrb.gmra.mxu2 %v8292_v30 }
 0x465   :  { %v1450_v0 = vpop.f32.mrf.mxu1 }
 0x46a   :  { %1321 = vmatmul.f32.gmra.mxu2 %v8310_v54 }
 0x46d   :  { %v1453_v62 = vpop.f32.mrf.mxu1 }
 0x472   :  { %1324 = vmatmul.f32.gmra.mxu2 %v8328_v7 }
 0x475   :  { %v1456_v20 = vpop.f32.mrf.mxu1 }
 0x476   :  { %1482 = vmatpush.msra.mxu0 %v1456_v20 }
 0x478   :  { %1483 = vmatpush.msra.mxu0 %v1453_v62 }
 0x47a   :  { %1484 = vmatpush.msra.mxu0 %v1450_v0  ;;  %1327 = vmatmul.f32.gmra.mxu2 %v8346_v23 }
 0x47c   :  { %1485 = vmatpush.msra.mxu0 %v1447_v36 }
 0x47e   :  { %1486 = vmatpush.msra.mxu0 %v1444_v45 }
 0x480   :  { %1487 = vmatpush.msra.mxu0 %v1441_v28 }
 0x482   :  { %1488 = vmatpush.msra.mxu0 %v1438_v19  ;;  %1330 = vmatmul.f32.gmra.mxu2 %v8364_v50  ;;  %v6471_v19 = vld [vmem:[%s12511_s5 + $0x410] sm:$0xff] }
 0x484   :  { %1489 = vmatpush.msra.mxu0 %v1435_v12  ;;  %v6476_v12 = vld [vmem:[%s12511_s5 + $0x438] sm:$0xff] }
 0x485   :  { %6433 = vmatmul.msk.f32.vlgmr.msra.gmra.mxu0 %vm836_vm2, %v6412_v56 }
 0x486   :  { %1650 = vmatpush.msrb.mxu0 %v6484_v58 }
 0x488   :  { %1651 = vmatpush.msrb.mxu0 %v6483_v60 }
 0x48a   :  { %1333 = vmatmul.f32.gmra.mxu2 %v8382_v24  ;;  %1652 = vmatpush.msrb.mxu0 %v6482_v41 }
 0x48c   :  { %1653 = vmatpush.msrb.mxu0 %v6481_v4  ;;  %v6386_v4 = vld [vmem:[%s12512_s4 + $0xc8] sm:$0xff] }
 0x48d   :  { %6434 = vmatmul.msk.f32.gmra.mxu0 %vm836_vm2, %v6413_v9  ;;  %v6458_v9 = vld [vmem:[%s12511_s5 + $0x3f8] sm:$0xff] }
 0x48e   :  { %1654 = vmatpush.msrb.mxu0 %v6480_v57  ;;  %v6457_v57 = vld [vmem:[%s12511_s5 + $0x3f0] sm:$0xff] }
 0x490   :  { %1655 = vmatpush.msrb.mxu0 %v6479_v42  ;;  %v6456_v42 = vld [vmem:[%s12511_s5 + $0x3e8] sm:$0xff] }
 0x492   :  { %1336 = vmatmul.f32.gmra.mxu2 %v8394_v26  ;;  %1656 = vmatpush.msrb.mxu0 %v6478_v61  ;;  %v6455_v61 = vld [vmem:[%s12511_s5 + $0x3e0] sm:$0xff] }
 0x494   :  { %1657 = vmatpush.msrb.mxu0 %v6477_v10 }
 0x495   :  { %6435 = vmatmul.msk.f32.gmra.mxu0 %vm836_vm2, %v6414_v11  ;;  %v6387_v11 = vld [vmem:[%s12512_s4 + $0xd0] sm:$0xff] }
 0x496   :  { %1658 = vmatpush.msrb.mxu0 %v6476_v12  ;;  %v6454_v12 = vld [vmem:[%s12511_s5 + $0x3d8] sm:$0xff] }
 0x498   :  { %1659 = vmatpush.msrb.mxu0 %v6475_v13  ;;  %v6453_v13 = vld [vmem:[%s12511_s5 + $0x3d0] sm:$0xff] }
 0x49a   :  { %1339 = vmatmul.f32.gmra.mxu2 %v8400_v27  ;;  %1660 = vmatpush.msrb.mxu0 %v6474_v14  ;;  %v6452_v14 = vld [vmem:[%s12511_s5 + $0x3c8] sm:$0xff] }
 0x49c   :  { %1661 = vmatpush.msrb.mxu0 %v6473_v44  ;;  %v6451_v44 = vld [vmem:[%s12511_s5 + $0x3c0] sm:$0xff] }
 0x49d   :  { %6436 = vmatmul.msk.f32.gmra.mxu0 %vm836_vm2, %v6415_v16 }
 0x49e   :  { %1662 = vmatpush.msrb.mxu0 %v6472_v17  ;;  %v6388_v17 = vld [vmem:[%s12512_s4 + $0xd8] sm:$0xff] }
 0x4a0   :  { %1663 = vmatpush.msrb.mxu0 %v6471_v19  ;;  %v6450_v19 = vld [vmem:[%s12511_s5 + $0x3b8] sm:$0xff] }
 0x4a2   :  { %1664 = vmatpush.msrb.mxu0 %v6470_v22  ;;  %v6449_v22 = vld [vmem:[%s12511_s5 + $0x3b0] sm:$0xff] }
 0x4a4   :  { %1665 = vmatpush.msrb.mxu0 %v6469_v25  ;;  %v6448_v25 = vld [vmem:[%s12511_s5 + $0x3a8] sm:$0xff] }
 0x4a5   :  { %6437 = vmatmul.msk.f32.gmra.mxu0 %vm836_vm2, %v6416_v46  ;;  %v6447_v46 = vld [vmem:[%s12511_s5 + $0x3a0] sm:$0xff] }
 0x4ad   :  { %1666 = vmatmul.f32.vlgmr.msrb.gmra.mxu0 %v8292_v30 }
 0x4b5   :  { %1669 = vmatmul.f32.gmra.mxu0 %v8310_v54 }
 0x4bd   :  { %1672 = vmatmul.f32.gmra.mxu0 %v8328_v7  ;;  %v8810_v48 = vpop.f32.mrf.mxu2 }
 0x4c5   :  { %1675 = vmatmul.f32.gmra.mxu0 %v8346_v23  ;;  %v8813_v31 = vpop.f32.mrf.mxu2 }
 0x4cd   :  { %1678 = vmatmul.f32.gmra.mxu0 %v8364_v50  ;;  %v8816_v28 = vpop.f32.mrf.mxu2 }
 0x4d5   :  { %1681 = vmatmul.f32.gmra.mxu0 %v8382_v24  ;;  %v8819_v29 = vpop.f32.mrf.mxu2 }
 0x4dd   :  { %1684 = vmatmul.f32.gmra.mxu0 %v8394_v26  ;;  %v8822_v33 = vpop.f32.mrf.mxu2 }
 0x4e5   :  { %1687 = vmatmul.f32.gmra.mxu0 %v8400_v27  ;;  %v1319_v18 = vpop.f32.mrf.mxu2 }
 0x4ed   :  { %v1322_v32 = vpop.f32.mrf.mxu2 }
 0x4f5   :  { %v1325_v51 = vpop.f32.mrf.mxu2 }
 0x4fd   :  { %v1328_v45 = vpop.f32.mrf.mxu2 }
 0x502   :  { %v8825_v34 = vpop.f32.mrf.mxu0 }
 0x505   :  { %v1331_v21 = vpop.f32.mrf.mxu2 }
 0x50a   :  { %v8827_v36 = vpop.f32.mrf.mxu0 }
 0x50d   :  { %v1334_v0 = vpop.f32.mrf.mxu2 }
 0x512   :  { %v8829_v62 = vpop.f32.mrf.mxu0 }
 0x515   :  { %v1337_v20 = vpop.f32.mrf.mxu2 }
 0x51a   :  { %v8831_v56 = vpop.f32.mrf.mxu0 }
 0x51d   :  { %v1340_v58 = vpop.f32.mrf.mxu2 }
 0x51e   :  { %1366 = vmatpush.msrb.mxu3 %v1340_v58  ;;  %v6390_v58 = vld [vmem:[%s12512_s4 + $0xe8] sm:$0xf] }
 0x520   :  { %1367 = vmatpush.msrb.mxu3 %v1337_v20 }
 0x522   :  { %v8833_v60 = vpop.f32.mrf.mxu0  ;;  %1368 = vmatpush.msrb.mxu3 %v1334_v0  ;;  %v6443_v0 = vld [vmem:[%s12511_s5 + $0x380] sm:$0xff] }
 0x524   :  { %1369 = vmatpush.msrb.mxu3 %v1331_v21  ;;  %v6444_v21 = vld [vmem:[%s12511_s5 + $0x388] sm:$0xff] }
 0x526   :  { %1370 = vmatpush.msrb.mxu3 %v1328_v45  ;;  %v6445_v45 = vld [vmem:[%s12511_s5 + $0x390] sm:$0xff] }
 0x528   :  { %1371 = vmatpush.msrb.mxu3 %v1325_v51  ;;  %v6446_v51 = vld [vmem:[%s12511_s5 + $0x398] sm:$0xff] }
 0x52a   :  { %v1667_v41 = vpop.f32.mrf.mxu0  ;;  %1372 = vmatpush.msrb.mxu3 %v1322_v32  ;;  %v6389_v32 = vld [vmem:[%s12512_s4 + $0xe0] sm:$0xff] }
 0x52c   :  { %1373 = vmatpush.msrb.mxu3 %v1319_v18 }
 0x52d   :  { %6407 = vmatmul.msk.f32.vlgmr.msrb.gmra.mxu3 %vm836_vm2, %v6386_v4 }
 0x52e   :  { %1534 = vmatpush.msra.mxu3 %v6458_v9 }
 0x530   :  { %1535 = vmatpush.msra.mxu3 %v6457_v57 }
 0x532   :  { %v1670_v10 = vpop.f32.mrf.mxu0  ;;  %1536 = vmatpush.msra.mxu3 %v6456_v42 }
 0x534   :  { %1537 = vmatpush.msra.mxu3 %v6455_v61 }
 0x535   :  { %6408 = vmatmul.msk.f32.gmra.mxu3 %vm836_vm2, %v6387_v11 }
 0x536   :  { %1538 = vmatpush.msra.mxu3 %v6454_v12 }
 0x538   :  { %1539 = vmatpush.msra.mxu3 %v6453_v13  ;;  %v6465_v13 = vld [vmem:[%s12512_s4 + $0x148] sm:$0xff] }
 0x53a   :  { %v1673_v16 = vpop.f32.mrf.mxu0  ;;  %1540 = vmatpush.msra.mxu3 %v6452_v14  ;;  %v6466_v14 = vld [vmem:[%s12512_s4 + $0x150] sm:$0xff] }
 0x53c   :  { %1541 = vmatpush.msra.mxu3 %v6451_v44  ;;  %v6438_v44 = vld [vmem:[%s12512_s4 + $0x118] sm:$0xff] }
 0x53d   :  { %6409 = vmatmul.msk.f32.gmra.mxu3 %vm836_vm2, %v6388_v17  ;;  %v6439_v17 = vld [vmem:[%s12512_s4 + $0x120] sm:$0xff] }
 0x53e   :  { %1542 = vmatpush.msra.mxu3 %v6450_v19  ;;  %v6468_v19 = vld [vmem:[%s12512_s4 + $0x160] sm:$0xf] }
 0x540   :  { %1543 = vmatpush.msra.mxu3 %v6449_v22  ;;  %v6440_v22 = vld [vmem:[%s12512_s4 + $0x128] sm:$0xff] }
 0x542   :  { %v1676_v18 = vpop.f32.mrf.mxu0  ;;  %1544 = vmatpush.msra.mxu3 %v6448_v25  ;;  %v6441_v25 = vld [vmem:[%s12512_s4 + $0x130] sm:$0xff] }
 0x544   :  { %1545 = vmatpush.msra.mxu3 %v6447_v46  ;;  %v6442_v46 = vld [vmem:[%s12512_s4 + $0x138] sm:$0xf] }
 0x545   :  { %6410 = vmatmul.msk.f32.gmra.mxu3 %vm836_vm2, %v6389_v32 }
 0x546   :  { %1546 = vmatpush.msra.mxu3 %v6446_v51 }
 0x548   :  { %1547 = vmatpush.msra.mxu3 %v6445_v45 }
 0x54a   :  { %v1679_v20 = vpop.f32.mrf.mxu0  ;;  %1548 = vmatpush.msra.mxu3 %v6444_v21 }
 0x54c   :  { %1549 = vmatpush.msra.mxu3 %v6443_v0  ;;  %v926_v0 = vadd.f32 %v8634_v53, %v8631_v5  ;;  %v917_v5 = vadd.f32 %v8619_v37, %v8616_v35 }
 0x54d   :  { %6411 = vmatmul.msk.f32.gmra.mxu3 %vm836_vm2, %v6390_v58  ;;  %v923_v58 = vadd.f32 %v8629_v52, %v8626_v49 }
 0x552   :  { %v1682_v4 = vpop.f32.mrf.mxu0 }
 0x555   :  { %1550 = vmatmul.f32.vlgmr.msra.gmra.mxu3 %v8292_v30 }
 0x55a   :  { %v1685_v9 = vpop.f32.mrf.mxu0 }
 0x55d   :  { %1553 = vmatmul.f32.gmra.mxu3 %v8310_v54 }
 0x562   :  { %v1688_v57 = vpop.f32.mrf.mxu0 }
 0x563   :  { %1714 = vmatpush.msra.mxu1 %v1688_v57  ;;  %v920_v57 = vadd.f32 %v8624_v47, %v8621_v40 }
 0x565   :  { %1715 = vmatpush.msra.mxu1 %v1685_v9  ;;  %1556 = vmatmul.f32.gmra.mxu3 %v8328_v7  ;;  %v1045_v9 = vadd.f32 %v8649_v59, %v926_v0  ;;  %v1043_v53 = vadd.f32 %v8644_v3, %v920_v57  ;;  %v1904_v0 = vld [vmem:[%s12514_s8 + $0x78] sm:$0xff]  ;;  %v6519_v57 = vld [vmem:[%s12514_s8 + $0xd0] sm:$0xff] }
 0x566   :  { %1905 = vmatpush.msra.mxu0 %v1904_v0  ;;  %v6563_v0 = vld [vmem:[%s12514_s8 + $0x1f0] sm:$0xff] }
 0x567   :  { %1716 = vmatpush.msra.mxu1 %v1682_v4  ;;  %v929_v4 = vadd.f32 %v8639_v1, %v8636_v39  ;;  %v1042_v39 = vadd.f32 %v8641_v55, %v917_v5  ;;  %v1159_v40 = vadd.f32 %v8813_v31, %v1043_v53  ;;  %v1901_v5 = vld [vmem:[%s12514_s8 + $0x60] sm:$0xff]  ;;  %v6539_v53 = vld [vmem:[%s12514_s8 + $0x148] sm:$0xff] }
 0x569   :  { %1717 = vmatpush.msra.mxu1 %v1679_v20  ;;  %v1275_v3 = vadd.f32 %v8655_v6, %v1159_v40  ;;  %v6537_v40 = vld [vmem:[%s12514_s8 + $0x138] sm:$0xff] }
 0x56b   :  { %1718 = vmatpush.msra.mxu1 %v1676_v18 }
 0x56d   :  { %1719 = vmatpush.msra.mxu1 %v1673_v16  ;;  %1559 = vmatmul.f32.gmra.mxu3 %v8346_v23  ;;  %v6467_v16 = vld [vmem:[%s12512_s4 + $0x158] sm:$0xff] }
 0x56f   :  { %1720 = vmatpush.msra.mxu1 %v1670_v10 }
 0x571   :  { %1721 = vmatpush.msra.mxu1 %v1667_v41 }
 0x575   :  { %1562 = vmatmul.f32.gmra.mxu3 %v8364_v50 }
 0x57d   :  { %1565 = vmatmul.f32.gmra.mxu3 %v8382_v24 }
 0x585   :  { %1568 = vmatmul.f32.gmra.mxu3 %v8394_v26  ;;  %v6464_v26 = vld [vmem:[%s12512_s4 + $0x140] sm:$0xff] }
 0x586   :  { %6485 = vmatmul.msk.f32.vlgmr.msra.gmra.mxu1 %vm836_vm2, %v6464_v26 }
 0x58d   :  { %1571 = vmatmul.f32.gmra.mxu3 %v8400_v27 }
 0x58e   :  { %6486 = vmatmul.msk.f32.gmra.mxu1 %vm836_vm2, %v6465_v13 }
 0x596   :  { %6487 = vmatmul.msk.f32.gmra.mxu1 %vm836_vm2, %v6466_v14 }
 0x59e   :  { %6488 = vmatmul.msk.f32.gmra.mxu1 %vm836_vm2, %v6467_v16  ;;  %v6503_v16 = vld [vmem:[%s12513_s6 + $0x30] sm:$0xff] }
 0x5a6   :  { %6489 = vmatmul.msk.f32.gmra.mxu1 %vm836_vm2, %v6468_v19  ;;  %v6504_v19 = vld [vmem:[%s12513_s6 + $0x38] sm:$0x1] }
 0x5b0   :  { %v8911_v30 = vpop.f32.mrf.mxu3 }
 0x5b8   :  { %v8913_v54 = vpop.f32.mrf.mxu3 }
 0x5b9   :  { %v1391_v31 = vadd.f32 %v8913_v54, %v1275_v3  ;;  %v6513_v3 = vld [vmem:[%s12514_s8 + $0xa0] sm:$0xff] }
 0x5bb   :  { %v1507_v6 = vadd.f32 %v8827_v36, %v1391_v31  ;;  %v6533_v31 = vld [vmem:[%s12514_s8 + $0x118] sm:$0xff] }
 0x5c0   :  { %v8915_v7 = vpop.f32.mrf.mxu3 }
 0x5c8   :  { %v8917_v42 = vpop.f32.mrf.mxu3 }
 0x5d0   :  { %v8919_v61 = vpop.f32.mrf.mxu3 }
 0x5d8   :  { %v1551_v23 = vpop.f32.mrf.mxu3 }
 0x5e0   :  { %v1554_v41 = vpop.f32.mrf.mxu3 }
 0x5e8   :  { %v1557_v10 = vpop.f32.mrf.mxu3 }
 0x5f0   :  { %v1560_v50 = vpop.f32.mrf.mxu3 }
 0x5f8   :  { %v1563_v11 = vpop.f32.mrf.mxu3 }
 0x600   :  { %v1566_v24 = vpop.f32.mrf.mxu3 }
 0x603   :  { %v1723_v18 = vpop.f32.mrf.mxu1 }
 0x608   :  { %v1569_v12 = vpop.f32.mrf.mxu3 }
 0x60b   :  { %v1726_v51 = vpop.f32.mrf.mxu1 }
 0x610   :  { %v1572_v27 = vpop.f32.mrf.mxu3 }
 0x611   :  { %1598 = vmatpush.msra.mxu2 %v1572_v27 }
 0x613   :  { %1599 = vmatpush.msra.mxu2 %v1569_v12  ;;  %v1729_v21 = vpop.f32.mrf.mxu1 }
 0x615   :  { %1600 = vmatpush.msra.mxu2 %v1566_v24 }
 0x617   :  { %1601 = vmatpush.msra.mxu2 %v1563_v11 }
 0x619   :  { %1602 = vmatpush.msra.mxu2 %v1560_v50 }
 0x61b   :  { %1603 = vmatpush.msra.mxu2 %v1557_v10  ;;  %v1161_v10 = vadd.f32 %v8819_v29, %v1045_v9  ;;  %v1732_v1 = vpop.f32.mrf.mxu1  ;;  %v6541_v9 = vld [vmem:[%s12514_s8 + $0x158] sm:$0xff] }
 0x61d   :  { %1604 = vmatpush.msra.mxu2 %v1554_v41  ;;  %v1046_v41 = vadd.f32 %v8651_v63, %v929_v4  ;;  %v1277_v47 = vadd.f32 %v8659_v8, %v1161_v10  ;;  %v1903_v4 = vld [vmem:[%s12514_s8 + $0x70] sm:$0xff]  ;;  %v6518_v10 = vld [vmem:[%s12514_s8 + $0xc8] sm:$0xff] }
 0x61e   :  { %1906 = vmatpush.msra.mxu0 %v1903_v4  ;;  %v6562_v4 = vld [vmem:[%s12514_s8 + $0x1e8] sm:$0xff] }
 0x61f   :  { %1605 = vmatpush.msra.mxu2 %v1551_v23  ;;  %v1044_v23 = vadd.f32 %v8647_v38, %v923_v58  ;;  %v1162_v52 = vadd.f32 %v8822_v33, %v1046_v41  ;;  %v1158_v38 = vadd.f32 %v8810_v48, %v1042_v39  ;;  %v1393_v35 = vadd.f32 %v8917_v42, %v1277_v47  ;;  %v6520_v58 = vld [vmem:[%s12514_s8 + $0xd8] sm:$0xff]  ;;  %v6540_v41 = vld [vmem:[%s12514_s8 + $0x150] sm:$0xff]  ;;  %v6538_v39 = vld [vmem:[%s12514_s8 + $0x140] sm:$0xff] }
 0x620   :  { %6459 = vmatmul.msk.f32.vlgmr.msra.gmra.mxu2 %vm836_vm2, %v6438_v44  ;;  %v1749_v44 = vld [vmem:[%s12513_s6] sm:$0xff]  ;;  %v6515_v47 = vld [vmem:[%s12514_s8 + $0xb0] sm:$0xff] }
 0x621   :  { %v1160_v49 = vadd.f32 %v8816_v28, %v1044_v23  ;;  %v1278_v37 = vadd.f32 %v8661_v15, %v1162_v52  ;;  %v1274_v29 = vadd.f32 %v8653_v2, %v1158_v38  ;;  %v1509_v8 = vadd.f32 %v8831_v56, %v1393_v35  ;;  %v8999_v2 = vld [vmem:[%s12509_s2] sm:$0x3f]  ;;  %v1902_v23 = vld [vmem:[%s12514_s8 + $0x68] sm:$0xff]  ;;  %v6536_v38 = vld [vmem:[%s12514_s8 + $0x130] sm:$0xff] }
 0x622   :  { %v1743_v56 = vperm.slane %v8999_v2, 1  ;;  %1907 = vmatpush.msra.mxu0 %v1902_v23  ;;  %v6517_v52 = vld [vmem:[%s12514_s8 + $0xc0] sm:$0xff] }
 0x623   :  { %v1276_v63 = vadd.f32 %v8657_v43, %v1160_v49  ;;  %v1394_v55 = vadd.f32 %v8919_v61, %v1278_v37  ;;  %v1390_v48 = vadd.f32 %v8911_v30, %v1274_v29  ;;  %v1735_v50 = vpop.f32.mrf.mxu1  ;;  %v6494_v49 = vld [vmem:[%s12513_s6 + $0x18] sm:$0x1]  ;;  %v6498_v35 = vld [vmem:[%s12513_s6 + $0x20] sm:$0xff]  ;;  %v6499_v37 = vld [vmem:[%s12513_s6 + $0x28] sm:$0x1] }
 0x624   :  { %1908 = vmatpush.msra.mxu0 %v1901_v5  ;;  %v6512_v29 = vld [vmem:[%s12514_s8 + $0x98] sm:$0xff]  ;;  %v6561_v23 = vld [vmem:[%s12514_s8 + $0x1e0] sm:$0xff] }
 0x625   :  { %v1392_v28 = vadd.f32 %v8915_v7, %v1276_v63  ;;  %v1510_v42 = vadd.f32 %v8833_v60, %v1394_v55  ;;  %v1506_v61 = vadd.f32 %v8825_v34, %v1390_v48  ;;  %v6535_v63 = vld [vmem:[%s12514_s8 + $0x128] sm:$0xff]  ;;  %v1900_v55 = vld [vmem:[%s12514_s8 + $0x58] sm:$0xff]  ;;  %v6511_v48 = vld [vmem:[%s12514_s8 + $0x90] sm:$0xff] }
 0x626   :  { %1909 = vmatpush.msra.mxu0 %v1900_v55  ;;  %v6555_v55 = vld [vmem:[%s12514_s8 + $0x1b0] sm:$0xff] }
 0x627   :  { %v1508_v43 = vadd.f32 %v8829_v62, %v1392_v28  ;;  %v6534_v28 = vld [vmem:[%s12514_s8 + $0x120] sm:$0xff] }
 0x628   :  { %6460 = vmatmul.msk.f32.gmra.mxu2 %vm836_vm2, %v6439_v17  ;;  %v1750_v17 = vld [vmem:[%s12513_s6 + $0x8] sm:$0x1] }
 0x630   :  { %6461 = vmatmul.msk.f32.gmra.mxu2 %vm836_vm2, %v6440_v22  ;;  %v6524_v22 = vld [vmem:[%s12514_s8 + $0xf8] sm:$0xff] }
 0x638   :  { %6462 = vmatmul.msk.f32.gmra.mxu2 %vm836_vm2, %v6441_v25  ;;  %v6545_v25 = vld [vmem:[%s12514_s8 + $0x178] sm:$0xff] }
 0x639   :  { %2043 = vmatpush.msrb.mxu1 %v6545_v25  ;;  %v6596_v25 = vld [vmem:[%s12514_s8 + $0x2c8] sm:$0xff] }
 0x640   :  { %6463 = vmatmul.msk.f32.gmra.mxu2 %vm836_vm2, %v6442_v46  ;;  %v6523_v46 = vld [vmem:[%s12514_s8 + $0xf0] sm:$0xff] }
 0x6a3   :  { %v1607_v32 = vpop.f32.mrf.mxu2 }
 0x6a4   :  { %v1622_v24 = vadd.f32 %v1607_v32, %v1506_v61  ;;  %v6522_v32 = vld [vmem:[%s12514_s8 + $0xe8] sm:$0xff]  ;;  %v6583_v61 = vld [vmem:[%s12514_s8 + $0x278] sm:$0xff] }
 0x6a6   :  { %v1738_v34 = vadd.f32 %v1723_v18, %v1622_v24  ;;  %v6544_v18 = vld [vmem:[%s12514_s8 + $0x170] sm:$0xff]  ;;  %v1894_v24 = vld [vmem:[%s12514_s8 + $0x28] sm:$0xff] }
 0x6a7   :  { %2044 = vmatpush.msrb.mxu1 %v6544_v18  ;;  %v6576_v18 = vld [vmem:[%s12514_s8 + $0x240] sm:$0xff] }
 0x6a8   :  { %v1744_v14 = vadd.f32 %v1743_v56, %v1738_v34  ;;  %v6599_v34 = vld [vmem:[%s12514_s8 + $0x2e0] sm:$0xff] }
 0x6ab   :  { %v1610_v45 = vpop.f32.mrf.mxu2 }
 0x6ac   :  { %v1623_v30 = vadd.f32 %v1610_v45, %v1507_v6  ;;  %v6493_v45 = vld [vmem:[%s12513_s6 + $0x10] sm:$0xff]  ;;  %v6509_v6 = vld [vmem:[%s12514_s8 + $0x80] sm:$0xff] }
 0x6ae   :  { %v1739_v26 = vadd.f32 %v1726_v51, %v1623_v30  ;;  %v6543_v51 = vld [vmem:[%s12514_s8 + $0x168] sm:$0xff]  ;;  %v1895_v30 = vld [vmem:[%s12514_s8 + $0x30] sm:$0xff] }
 0x6af   :  { %2045 = vmatpush.msrb.mxu1 %v6543_v51  ;;  %v6564_v51 = vld [vmem:[%s12514_s8 + $0x1f8] sm:$0xff] }
 0x6b0   :  { %v1745_v13 = vadd.f32 %v1743_v56, %v1739_v26  ;;  %v1893_v26 = vld [vmem:[%s12514_s8 + $0x20] sm:$0xff] }
 0x6b3   :  { %v1613_v20 = vpop.f32.mrf.mxu2 }
 0x6b4   :  { %v1624_v7 = vadd.f32 %v1613_v20, %v1508_v43  ;;  %v6542_v20 = vld [vmem:[%s12514_s8 + $0x160] sm:$0xff]  ;;  %v6532_v43 = vld [vmem:[%s12514_s8 + $0x110] sm:$0xff] }
 0x6b5   :  { %2046 = vmatpush.msrb.mxu1 %v6542_v20  ;;  %v6574_v20 = vld [vmem:[%s12514_s8 + $0x230] sm:$0xff] }
 0x6b6   :  { %v1740_v60 = vadd.f32 %v1729_v21, %v1624_v7  ;;  %v6521_v21 = vld [vmem:[%s12514_s8 + $0xe0] sm:$0xff] }
 0x6b7   :  { %2047 = vmatpush.msrb.mxu1 %v6541_v9  ;;  %v6530_v7 = vld [vmem:[%s12514_s8 + $0x100] sm:$0xff]  ;;  %v6573_v9 = vld [vmem:[%s12514_s8 + $0x228] sm:$0xff] }
 0x6b8   :  { %v1746_v36 = vadd.f32 %v1743_v56, %v1740_v60  ;;  %v6581_v60 = vld [vmem:[%s12514_s8 + $0x268] sm:$0xff] }
 0x6b9   :  { %2048 = vmatpush.msrb.mxu1 %v6540_v41  ;;  %v6572_v41 = vld [vmem:[%s12514_s8 + $0x220] sm:$0xff] }
 0x6bb   :  { %v1616_v59 = vpop.f32.mrf.mxu2  ;;  %2049 = vmatpush.msrb.mxu1 %v6539_v53  ;;  %v6560_v53 = vld [vmem:[%s12514_s8 + $0x1d8] sm:$0xff] }
 0x6bc   :  { %v1625_v33 = vadd.f32 %v1616_v59, %v1509_v8  ;;  %v6514_v59 = vld [vmem:[%s12514_s8 + $0xa8] sm:$0xff]  ;;  %v1899_v8 = vld [vmem:[%s12514_s8 + $0x50] sm:$0xff] }
 0x6bd   :  { %2050 = vmatpush.msrb.mxu1 %v6538_v39  ;;  %1910 = vmatpush.msra.mxu0 %v1899_v8  ;;  %v6559_v39 = vld [vmem:[%s12514_s8 + $0x1d0] sm:$0xff] }
 0x6be   :  { %v1741_v62 = vadd.f32 %v1732_v1, %v1625_v33  ;;  %v6516_v1 = vld [vmem:[%s12514_s8 + $0xb8] sm:$0xff]  ;;  %v1898_v33 = vld [vmem:[%s12514_s8 + $0x48] sm:$0xff] }
 0x6bf   :  { %2051 = vmatpush.msrb.mxu1 %v6537_v40  ;;  %1911 = vmatpush.msra.mxu0 %v1898_v33  ;;  %v6589_v40 = vld [vmem:[%s12514_s8 + $0x290] sm:$0xff]  ;;  %v6550_v33 = vld [vmem:[%s12514_s8 + $0x188] sm:$0xff] }
 0x6c0   :  { %v1747_v27 = vadd.f32 %v1743_v56, %v1741_v62  ;;  %v6582_v62 = vld [vmem:[%s12514_s8 + $0x270] sm:$0xff] }
 0x6c1   :  { %2052 = vmatpush.msrb.mxu1 %v6536_v38  ;;  %v6569_v38 = vld [vmem:[%s12514_s8 + $0x208] sm:$0xff] }
 0x6c3   :  { %v1619_v15 = vpop.f32.mrf.mxu2  ;;  %2053 = vmatpush.msrb.mxu1 %v6535_v63  ;;  %v6557_v63 = vld [vmem:[%s12514_s8 + $0x1c0] sm:$0xff] }
 0x6c4   :  { %v1626_v11 = vadd.f32 %v1619_v15, %v1510_v42  ;;  %v6510_v42 = vld [vmem:[%s12514_s8 + $0x88] sm:$0xff] }
 0x6c5   :  { %2054 = vmatpush.msrb.mxu1 %v6534_v28  ;;  %v6531_v15 = vld [vmem:[%s12514_s8 + $0x108] sm:$0xff]  ;;  %v6556_v28 = vld [vmem:[%s12514_s8 + $0x1b8] sm:$0xff] }
 0x6c6   :  { %v1742_v54 = vadd.f32 %v1735_v50, %v1626_v11  ;;  %v1897_v50 = vld [vmem:[%s12514_s8 + $0x40] sm:$0xff]  ;;  %v1896_v11 = vld [vmem:[%s12514_s8 + $0x38] sm:$0xff] }
 0x6c7   :  { %2055 = vmatpush.msrb.mxu1 %v6533_v31  ;;  %1912 = vmatpush.msra.mxu0 %v1897_v50  ;;  %v6553_v31 = vld [vmem:[%s12514_s8 + $0x1a0] sm:$0xff] }
 0x6c8   :  { %v1748_v12 = vadd.f32 %v1743_v56, %v1742_v54  ;;  %v6602_v56 = vld [vmem:[%s12514_s8 + $0x2f8] sm:$0xff]  ;;  %v6601_v54 = vld [vmem:[%s12514_s8 + $0x2f0] sm:$0xff] }
 0x6c9   :  { %2056 = vmatpush.msrb.mxu1 %v6532_v43  ;;  %1913 = vmatpush.msra.mxu0 %v1896_v11  ;;  %v6551_v43 = vld [vmem:[%s12514_s8 + $0x190] sm:$0xff] }
 0x6ca   :  { %6490 = vmatpush.msk.msrb.mxu2 %vm223_vm0, %v1748_v12  ;;  %6505 = vmatpush.msk.msrb.mxu3 %vm223_vm0, %v1748_v12 }
 0x6cb   :  { %2057 = vmatpush.msrb.mxu1 %v6531_v15  ;;  %1914 = vmatpush.msra.mxu0 %v1895_v30  ;;  %v6640_v30 = vld [vmem:[%s12514_s8 + $0x3f8] sm:$0xff] }
 0x6cc   :  { %1773 = vmatpush.msrb.mxu2 %v1747_v27  ;;  %1873 = vmatpush.msrb.mxu3 %v1747_v27 }
 0x6cd   :  { %2058 = vmatpush.msrb.mxu1 %v6530_v7  ;;  %1915 = vmatpush.msra.mxu0 %v1894_v24  ;;  %v6639_v24 = vld [vmem:[%s12514_s8 + $0x3f0] sm:$0xff] }
 0x6ce   :  { %1774 = vmatpush.msrb.mxu2 %v1746_v36  ;;  %1874 = vmatpush.msrb.mxu3 %v1746_v36 }
 0x6cf   :  { %2250 = vmatpush.msra.mxu1 %v6602_v56  ;;  %1916 = vmatpush.msra.mxu0 %v1893_v26  ;;  %v6658_v26 = vld [vmem:[%s12514_s8 + $0x470] sm:$0xff] }
 0x6d0   :  { %1775 = vmatpush.msrb.mxu2 %v1745_v13  ;;  %1875 = vmatpush.msrb.mxu3 %v1745_v13 }
 0x6d1   :  { %2251 = vmatpush.msra.mxu1 %v6601_v54 }
 0x6d2   :  { %1776 = vmatpush.msrb.mxu2 %v1744_v14  ;;  %1876 = vmatpush.msrb.mxu3 %v1744_v14 }
 0x6d3   :  { %6491 = vmatmul.msk.f32.vlgmr.msrb.gmra.mxu2 %vm1751_vm3, %v1749_v44  ;;  %6506 = vmatmul.msk.f32.vlgmr.msrb.gmra.mxu3 %vm1751_vm3, %v6503_v16  ;;  %v1891_v44 = vld [vmem:[%s12514_s8 + $0x10] sm:$0xff] }
 0x6d4   :  { %6495 = vmatpush.msk.msra.mxu2 %vm223_vm0, %v1748_v12  ;;  %1947 = vmatpush.msra.mxu3 %v6524_v22  ;;  %v6578_v16 = vld [vmem:[%s12514_s8 + $0x250] sm:$0xff]  ;;  %v6577_v22 = vld [vmem:[%s12514_s8 + $0x248] sm:$0xff] }
 0x6d6   :  { %1805 = vmatpush.msra.mxu2 %v1747_v27  ;;  %1948 = vmatpush.msra.mxu3 %v6523_v46  ;;  %v1889_v46 = vld [vmem:[%s12514_s8] sm:$0xff] }
 0x6d8   :  { %1806 = vmatpush.msra.mxu2 %v1746_v36  ;;  %1949 = vmatpush.msra.mxu3 %v6522_v32  ;;  %v6595_v32 = vld [vmem:[%s12514_s8 + $0x2c0] sm:$0xff] }
 0x6da   :  { %1807 = vmatpush.msra.mxu2 %v1745_v13  ;;  %1950 = vmatpush.msra.mxu3 %v6521_v21  ;;  %v6594_v21 = vld [vmem:[%s12514_s8 + $0x2b8] sm:$0xff] }
 0x6db   :  { %6492 = vmatmul.msk.f32.gmra.mxu2 %vm1751_vm3, %v1750_v17  ;;  %6507 = vmatmul.msk.f32.gmra.mxu3 %vm1751_vm3, %v6504_v19  ;;  %v6597_v17 = vld [vmem:[%s12514_s8 + $0x2d0] sm:$0xff]  ;;  %v1890_v19 = vld [vmem:[%s12514_s8 + $0x8] sm:$0xff] }
 0x6dc   :  { %1808 = vmatpush.msra.mxu2 %v1744_v14  ;;  %1951 = vmatpush.msra.mxu3 %v6520_v58  ;;  %v6593_v58 = vld [vmem:[%s12514_s8 + $0x2b0] sm:$0xff] }
 0x6de   :  { %6500 = vmatpush.msk.msrb.mxu2 %vm223_vm0, %v1748_v12  ;;  %1952 = vmatpush.msra.mxu3 %v6519_v57  ;;  %v6600_v12 = vld [vmem:[%s12514_s8 + $0x2e8] sm:$0xff] }
 0x6df   :  { %2252 = vmatpush.msra.mxu1 %v6600_v12  ;;  %v6592_v57 = vld [vmem:[%s12514_s8 + $0x2a8] sm:$0xff] }
 0x6e0   :  { %1839 = vmatpush.msrb.mxu2 %v1747_v27  ;;  %1953 = vmatpush.msra.mxu3 %v6518_v10  ;;  %v6580_v27 = vld [vmem:[%s12514_s8 + $0x260] sm:$0xff] }
 0x6e1   :  { %2253 = vmatpush.msra.mxu1 %v6599_v34  ;;  %v6591_v10 = vld [vmem:[%s12514_s8 + $0x2a0] sm:$0xff]  ;;  %v6638_v34 = vld [vmem:[%s12514_s8 + $0x3e8] sm:$0xff] }
 0x6e2   :  { %1840 = vmatpush.msrb.mxu2 %v1746_v36  ;;  %1954 = vmatpush.msra.mxu3 %v6517_v52  ;;  %v1892_v36 = vld [vmem:[%s12514_s8 + $0x18] sm:$0xff] }
 0x6e3   :  { %6496 = vmatmul.msk.f32.vlgmr.msra.gmra.mxu2 %vm1751_vm3, %v6493_v45  ;;  %1917 = vmatpush.msra.mxu0 %v1892_v36  ;;  %v6575_v45 = vld [vmem:[%s12514_s8 + $0x238] sm:$0xff]  ;;  %v6657_v36 = vld [vmem:[%s12514_s8 + $0x468] sm:$0xff] }
 0x6e4   :  { %1841 = vmatpush.msrb.mxu2 %v1745_v13  ;;  %1955 = vmatpush.msra.mxu3 %v6516_v1  ;;  %v6579_v13 = vld [vmem:[%s12514_s8 + $0x258] sm:$0xff]  ;;  %v6570_v1 = vld [vmem:[%s12514_s8 + $0x210] sm:$0xff] }
 0x6e5   :  { %1918 = vmatpush.msra.mxu0 %v1891_v44  ;;  %v6590_v52 = vld [vmem:[%s12514_s8 + $0x298] sm:$0xff]  ;;  %v6656_v44 = vld [vmem:[%s12514_s8 + $0x460] sm:$0xff] }
 0x6e6   :  { %1842 = vmatpush.msrb.mxu2 %v1744_v14  ;;  %1956 = vmatpush.msra.mxu3 %v6515_v47  ;;  %v6598_v14 = vld [vmem:[%s12514_s8 + $0x2d8] sm:$0xff]  ;;  %v6558_v47 = vld [vmem:[%s12514_s8 + $0x1c8] sm:$0xff] }
 0x6e7   :  { %2254 = vmatpush.msra.mxu1 %v6598_v14  ;;  %1919 = vmatpush.msra.mxu0 %v1890_v19  ;;  %v6637_v14 = vld [vmem:[%s12514_s8 + $0x3e0] sm:$0xff]  ;;  %v6655_v19 = vld [vmem:[%s12514_s8 + $0x458] sm:$0xff] }
 0x6e8   :  { %1957 = vmatpush.msra.mxu3 %v6514_v59  ;;  %v6588_v59 = vld [vmem:[%s12514_s8 + $0x288] sm:$0xff] }
 0x6e9   :  { %2255 = vmatpush.msra.mxu1 %v6597_v17  ;;  %1920 = vmatpush.msra.mxu0 %v1889_v46  ;;  %v6636_v17 = vld [vmem:[%s12514_s8 + $0x3d8] sm:$0xff]  ;;  %v6634_v46 = vld [vmem:[%s12514_s8 + $0x3c8] sm:$0xff] }
 0x6ea   :  { %1958 = vmatpush.msra.mxu3 %v6513_v3  ;;  %v6587_v3 = vld [vmem:[%s12514_s8 + $0x280] sm:$0xff] }
 0x6eb   :  { %6497 = vmatmul.msk.f32.gmra.mxu2 %vm1751_vm3, %v6494_v49  ;;  %2256 = vmatpush.msra.mxu1 %v6596_v25  ;;  %v6571_v49 = vld [vmem:[%s12514_s8 + $0x218] sm:$0xff]  ;;  %v6654_v25 = vld [vmem:[%s12514_s8 + $0x450] sm:$0xff] }
 0x6ec   :  { %1959 = vmatpush.msra.mxu3 %v6512_v29  ;;  %2112 = vmatpush.msrb.mxu0 %v6564_v51  ;;  %v6554_v29 = vld [vmem:[%s12514_s8 + $0x1a8] sm:$0xff]  ;;  %v6652_v51 = vld [vmem:[%s12514_s8 + $0x440] sm:$0xff] }
 0x6ed   :  { %2257 = vmatpush.msra.mxu1 %v6595_v32  ;;  %v6633_v32 = vld [vmem:[%s12514_s8 + $0x3c0] sm:$0xff] }
 0x6ee   :  { %1960 = vmatpush.msra.mxu3 %v6511_v48  ;;  %2113 = vmatpush.msrb.mxu0 %v6563_v0  ;;  %v6552_v48 = vld [vmem:[%s12514_s8 + $0x198] sm:$0xff]  ;;  %v6631_v0 = vld [vmem:[%s12514_s8 + $0x3b0] sm:$0xff] }
 0x6ef   :  { %2258 = vmatpush.msra.mxu1 %v6594_v21  ;;  %v6651_v21 = vld [vmem:[%s12514_s8 + $0x438] sm:$0xff] }
 0x6f0   :  { %1961 = vmatpush.msra.mxu3 %v6510_v42  ;;  %2114 = vmatpush.msrb.mxu0 %v6562_v4  ;;  %v6549_v42 = vld [vmem:[%s12514_s8 + $0x180] sm:$0xff]  ;;  %v6649_v4 = vld [vmem:[%s12514_s8 + $0x428] sm:$0xff] }
 0x6f1   :  { %2259 = vmatpush.msra.mxu1 %v6593_v58  ;;  %v6630_v58 = vld [vmem:[%s12514_s8 + $0x3a8] sm:$0xff] }
 0x6f2   :  { %1962 = vmatpush.msra.mxu3 %v6509_v6  ;;  %2115 = vmatpush.msrb.mxu0 %v6561_v23  ;;  %v6628_v23 = vld [vmem:[%s12514_s8 + $0x398] sm:$0xff] }
 0x6f3   :  { %6501 = vmatmul.msk.f32.vlgmr.msrb.gmra.mxu2 %vm1751_vm3, %v6498_v35  ;;  %2260 = vmatpush.msra.mxu1 %v6592_v57  ;;  %v6648_v57 = vld [vmem:[%s12514_s8 + $0x420] sm:$0xff] }
 0x6f4   :  { %2181 = vmatpush.msrb.mxu3 %v6583_v61  ;;  %2116 = vmatpush.msrb.mxu0 %v6560_v53  ;;  %v6626_v53 = vld [vmem:[%s12514_s8 + $0x388] sm:$0xff] }
 0x6f5   :  { %2261 = vmatpush.msra.mxu1 %v6591_v10  ;;  %v6627_v10 = vld [vmem:[%s12514_s8 + $0x390] sm:$0xff] }
 0x6f6   :  { %2182 = vmatpush.msrb.mxu3 %v6582_v62  ;;  %2117 = vmatpush.msrb.mxu0 %v6559_v39  ;;  %v6659_v62 = vld [vmem:[%s12514_s8 + $0x478] sm:$0xff]  ;;  %v6644_v39 = vld [vmem:[%s12514_s8 + $0x400] sm:$0xff] }
 0x6f7   :  { %2262 = vmatpush.msra.mxu1 %v6590_v52  ;;  %v6625_v52 = vld [vmem:[%s12514_s8 + $0x380] sm:$0xff] }
 0x6f8   :  { %2183 = vmatpush.msrb.mxu3 %v6581_v60  ;;  %2118 = vmatpush.msrb.mxu0 %v6558_v47 }
 0x6f9   :  { %2263 = vmatpush.msra.mxu1 %v6589_v40 }
 0x6fa   :  { %2184 = vmatpush.msrb.mxu3 %v6580_v27  ;;  %2119 = vmatpush.msrb.mxu0 %v6557_v63  ;;  %v6508_v63 = vld [vmem:[%s12515_s7 + $0x4] sm:$0xf] }
 0x6fb   :  { %6502 = vmatmul.msk.f32.gmra.mxu2 %vm1751_vm3, %v6499_v37  ;;  %2264 = vmatpush.msra.mxu1 %v6588_v59  ;;  %v6568_v37 = vld [vmem:[%s12514_s8 + $0x200] sm:$0xff] }
 0x6fc   :  { %2185 = vmatpush.msrb.mxu3 %v6579_v13  ;;  %2120 = vmatpush.msrb.mxu0 %v6556_v28 }
 0x6fd   :  { %2265 = vmatpush.msra.mxu1 %v6587_v3  ;;  %v1888_v3 = vld [vmem:[%s12515_s7] sm:$0xf] }
 0x6fe   :  { %2186 = vmatpush.msrb.mxu3 %v6578_v16  ;;  %2121 = vmatpush.msrb.mxu0 %v6555_v55 }
 0x700   :  { %2187 = vmatpush.msrb.mxu3 %v6577_v22  ;;  %2122 = vmatpush.msrb.mxu0 %v6554_v29  ;;  %v6635_v22 = vld [vmem:[%s12514_s8 + $0x3d0] sm:$0xff]  ;;  %v6529_v29 = vld [vmem:[%s12515_s7 + $0x8] sm:$0xf] }
 0x702   :  { %2188 = vmatpush.msrb.mxu3 %v6576_v18  ;;  %2123 = vmatpush.msrb.mxu0 %v6553_v31  ;;  %v6653_v18 = vld [vmem:[%s12514_s8 + $0x448] sm:$0xff] }
 0x704   :  { %2189 = vmatpush.msrb.mxu3 %v6575_v45  ;;  %2124 = vmatpush.msrb.mxu0 %v6552_v48  ;;  %v6632_v45 = vld [vmem:[%s12514_s8 + $0x3b8] sm:$0xff]  ;;  %v6548_v48 = vld [vmem:[%s12515_s7 + $0xc] sm:$0xf] }
 0x706   :  { %2190 = vmatpush.msrb.mxu3 %v6574_v20  ;;  %2125 = vmatpush.msrb.mxu0 %v6551_v43  ;;  %v6650_v20 = vld [vmem:[%s12514_s8 + $0x430] sm:$0xff] }
 0x708   :  { %2191 = vmatpush.msrb.mxu3 %v6573_v9  ;;  %2126 = vmatpush.msrb.mxu0 %v6550_v33  ;;  %v6629_v9 = vld [vmem:[%s12514_s8 + $0x3a0] sm:$0xff]  ;;  %v6567_v33 = vld [vmem:[%s12515_s7 + $0x10] sm:$0xf] }
 0x70a   :  { %2192 = vmatpush.msrb.mxu3 %v6572_v41  ;;  %2127 = vmatpush.msrb.mxu0 %v6549_v42  ;;  %v6647_v41 = vld [vmem:[%s12514_s8 + $0x418] sm:$0xff] }
 0x70b   :  { %v6621_v42 = vld [vmem:[%s12514_s8 + $0x378] sm:$0xff] }
 0x70c   :  { %2193 = vmatpush.msrb.mxu3 %v6571_v49  ;;  %v6645_v49 = vld [vmem:[%s12514_s8 + $0x408] sm:$0xff] }
 0x70e   :  { %2194 = vmatpush.msrb.mxu3 %v6570_v1 }
 0x710   :  { %2195 = vmatpush.msrb.mxu3 %v6569_v38 }
 0x712   :  { %2196 = vmatpush.msrb.mxu3 %v6568_v37 }
 0x756   :  { %v1778_v5 = vpop.f32.mrf.mxu2  ;;  %v1878_v50 = vpop.f32.mrf.mxu3 }
 0x75e   :  { %v1781_v35 = vpop.f32.mrf.mxu2  ;;  %v1881_v12 = vpop.f32.mrf.mxu3 }
 0x766   :  { %v1810_v8 = vpop.f32.mrf.mxu2 }
 0x767   :  { %v1816_v6 = vmax.f32 %v1778_v5, %v1810_v8  ;;  %v6646_v5 = vld [vmem:[%s12514_s8 + $0x410] sm:$0xff] }
 0x76e   :  { %v1813_v15 = vpop.f32.mrf.mxu2 }
 0x76f   :  { %v1817_v54 = vmax.f32 %v1781_v35, %v1813_v15  ;;  %v6620_v15 = vld [vmem:[%s12514_s8 + $0x370] sm:$0xff] }
 0x776   :  { %v1844_v7 = vpop.f32.mrf.mxu2 }
 0x777   :  { %v1850_v11 = vmax.f32 %v1816_v6, %v1844_v7  ;;  %v6618_v6 = vld [vmem:[%s12514_s8 + $0x360] sm:$0xff]  ;;  %v6586_v7 = vld [vmem:[%s12515_s7 + $0x14] sm:$0xf] }
 0x779   :  { %v1884_v61 = vmax.f32 %v1850_v11, %v1878_v50  ;;  %v6619_v50 = vld [vmem:[%s12514_s8 + $0x368] sm:$0xff]  ;;  %v6617_v11 = vld [vmem:[%s12514_s8 + $0x358] sm:$0xff] }
 0x77b   :  { %v9326_v56 = vmax.f32 %v1884_v61, 0.0  ;;  %v6616_v61 = vld [vmem:[%s12514_s8 + $0x350] sm:$0xff] }
 0x77d   :  { %1921 = vmatmul.f32.vlgmr.msra.gmra.mxu0 %v9326_v56  ;;  %1963 = vmatmul.f32.vlgmr.msra.gmra.mxu3 %v9326_v56 }
 0x77e   :  { %2059 = vmatmul.f32.vlgmr.msrb.gmra.mxu1 %v9326_v56  ;;  %v1847_v60 = vpop.f32.mrf.mxu2  ;;  %2388 = vmatpush.msra.mxu3 %v6640_v30  ;;  %v6615_v30 = vld [vmem:[%s12514_s8 + $0x348] sm:$0xff] }
 0x77f   :  { %v1851_v27 = vmax.f32 %v1817_v54, %v1847_v60  ;;  %2457 = vmatpush.msrb.mxu1 %v6659_v62  ;;  %v6614_v62 = vld [vmem:[%s12514_s8 + $0x340] sm:$0xff]  ;;  %v6613_v54 = vld [vmem:[%s12514_s8 + $0x338] sm:$0xff]  ;;  %v6611_v60 = vld [vmem:[%s12514_s8 + $0x328] sm:$0xff] }
 0x780   :  { %2389 = vmatpush.msra.mxu3 %v6639_v24  ;;  %v6612_v24 = vld [vmem:[%s12514_s8 + $0x330] sm:$0xff] }
 0x781   :  { %v1885_v13 = vmax.f32 %v1851_v27, %v1881_v12  ;;  %2458 = vmatpush.msrb.mxu1 %v6658_v26  ;;  %v6610_v12 = vld [vmem:[%s12514_s8 + $0x320] sm:$0xff]  ;;  %v6609_v26 = vld [vmem:[%s12514_s8 + $0x318] sm:$0xff]  ;;  %v6608_v27 = vld [vmem:[%s12514_s8 + $0x310] sm:$0xff] }
 0x782   :  { %2390 = vmatpush.msra.mxu3 %v6638_v34  ;;  %v6607_v34 = vld [vmem:[%s12514_s8 + $0x308] sm:$0xff] }
 0x783   :  { %v9355_v16 = vmax.f32 %v1885_v13, 0.0  ;;  %2459 = vmatpush.msrb.mxu1 %v6657_v36  ;;  %v6606_v36 = vld [vmem:[%s12514_s8 + $0x300] sm:$0xff] }
 0x784   :  { %2391 = vmatpush.msra.mxu3 %v6637_v14 }
 0x785   :  { %2460 = vmatpush.msrb.mxu1 %v6656_v44  ;;  %1924 = vmatmul.f32.gmra.mxu0 %v9355_v16 }
 0x786   :  { %1966 = vmatmul.f32.gmra.mxu3 %v9355_v16  ;;  %2062 = vmatmul.f32.gmra.mxu1 %v9355_v16 }
 0x787   :  { %2392 = vmatpush.msra.mxu3 %v6636_v17  ;;  %2461 = vmatpush.msrb.mxu1 %v6655_v19 }
 0x789   :  { %2393 = vmatpush.msra.mxu3 %v6635_v22  ;;  %2462 = vmatpush.msrb.mxu1 %v6654_v25  ;;  %v2528_v25 = vld [vmem:[%s12516_s10 + $0x78] sm:$0xff] }
 0x78b   :  { %2394 = vmatpush.msra.mxu3 %v6634_v46  ;;  %2463 = vmatpush.msrb.mxu1 %v6653_v18  ;;  %v2525_v18 = vld [vmem:[%s12516_s10 + $0x60] sm:$0xff] }
 0x78d   :  { %2395 = vmatpush.msra.mxu3 %v6633_v32  ;;  %2464 = vmatpush.msrb.mxu1 %v6652_v51  ;;  %v2524_v51 = vld [vmem:[%s12516_s10 + $0x58] sm:$0xff] }
 0x78e   :  { %2128 = vmatmul.f32.vlgmr.msrb.gmra.mxu0 %v9326_v56  ;;  %2197 = vmatmul.f32.vlgmr.msrb.gmra.mxu3 %v9326_v56 }
 0x78f   :  { %2266 = vmatmul.f32.vlgmr.msra.gmra.mxu1 %v9326_v56  ;;  %2396 = vmatpush.msra.mxu3 %v6632_v45 }
 0x790   :  { %2465 = vmatpush.msrb.mxu1 %v6651_v21 }
 0x791   :  { %2397 = vmatpush.msra.mxu3 %v6631_v0  ;;  %v6605_v0 = vld [vmem:[%s12515_s7 + $0x18] sm:$0xf] }
 0x792   :  { %2466 = vmatpush.msrb.mxu1 %v6650_v20 }
 0x793   :  { %2398 = vmatpush.msra.mxu3 %v6630_v58 }
 0x794   :  { %2467 = vmatpush.msrb.mxu1 %v6649_v4  ;;  %v6624_v4 = vld [vmem:[%s12515_s7 + $0x1c] sm:$0xf] }
 0x795   :  { %2399 = vmatpush.msra.mxu3 %v6629_v9  ;;  %v6681_v9 = vld [vmem:[%s12516_s10 + $0xf8] sm:$0xff] }
 0x796   :  { %2468 = vmatpush.msrb.mxu1 %v6648_v57  ;;  %2131 = vmatmul.f32.gmra.mxu0 %v9355_v16  ;;  %v6680_v57 = vld [vmem:[%s12516_s10 + $0xf0] sm:$0xff] }
 0x797   :  { %2200 = vmatmul.f32.gmra.mxu3 %v9355_v16  ;;  %2269 = vmatmul.f32.gmra.mxu1 %v9355_v16 }
 0x798   :  { %2400 = vmatpush.msra.mxu3 %v6628_v23  ;;  %2469 = vmatpush.msrb.mxu1 %v6647_v41  ;;  %v6679_v23 = vld [vmem:[%s12516_s10 + $0xe8] sm:$0xff]  ;;  %v6678_v41 = vld [vmem:[%s12516_s10 + $0xe0] sm:$0xff] }
 0x79a   :  { %2401 = vmatpush.msra.mxu3 %v6627_v10  ;;  %2470 = vmatpush.msrb.mxu1 %v6646_v5  ;;  %v6643_v10 = vld [vmem:[%s12515_s7 + $0x20] sm:$0xf]  ;;  %v6677_v5 = vld [vmem:[%s12516_s10 + $0xd8] sm:$0xff] }
 0x79c   :  { %2402 = vmatpush.msra.mxu3 %v6626_v53  ;;  %2471 = vmatpush.msrb.mxu1 %v6645_v49  ;;  %v2523_v53 = vld [vmem:[%s12516_s10 + $0x50] sm:$0xff] }
 0x79d   :  { %v6676_v49 = vld [vmem:[%s12516_s10 + $0xd0] sm:$0xff] }
 0x79e   :  { %2403 = vmatpush.msra.mxu3 %v6625_v52  ;;  %2472 = vmatpush.msrb.mxu1 %v6644_v39  ;;  %v2522_v52 = vld [vmem:[%s12516_s10 + $0x48] sm:$0xff] }
 0x79f   :  { %2404 = vmatmul.f32.vlgmr.msra.gmra.mxu3 %v9326_v56  ;;  %2473 = vmatmul.f32.vlgmr.msrb.gmra.mxu1 %v9326_v56  ;;  %v6675_v39 = vld [vmem:[%s12516_s10 + $0xc8] sm:$0xff] }
 0x7a7   :  { %2407 = vmatmul.f32.gmra.mxu3 %v9355_v16  ;;  %2476 = vmatmul.f32.gmra.mxu1 %v9355_v16 }
 0x7fa   :  { %v1922_v1 = vpop.f32.mrf.mxu0 }
 0x7fb   :  { %v2060_v38 = vpop.f32.mrf.mxu1 }
 0x800   :  { %v1964_v40 = vpop.f32.mrf.mxu3 }
 0x802   :  { %v1925_v47 = vpop.f32.mrf.mxu0 }
 0x803   :  { %v2063_v37 = vpop.f32.mrf.mxu1 }
 0x809   :  { %v1967_v59 = vpop.f32.mrf.mxu3 }
 0x80a   :  { %6525 = vmatpush.msk.msra.mxu2 %vm1974_vm4, %v1967_v59  ;;  %v2519_v59 = vld [vmem:[%s12516_s10 + $0x30] sm:$0xff] }
 0x80b   :  { %v2129_v35 = vpop.f32.mrf.mxu0 }
 0x80c   :  { %1993 = vmatpush.msra.mxu2 %v1964_v40  ;;  %v2267_v31 = vpop.f32.mrf.mxu1  ;;  %v6674_v40 = vld [vmem:[%s12516_s10 + $0xc0] sm:$0xff] }
 0x80d   :  { %6526 = vmatmul.msk.f32.vlgmr.msra.gmra.mxu2 %vm1970_vm5, %v6508_v63  ;;  %v6672_v63 = vld [vmem:[%s12516_s10 + $0xb0] sm:$0xff] }
 0x80e   :  { %6527 = vmatpush.msk.msrb.mxu2 %vm1974_vm4, %v1925_v47  ;;  %v2520_v47 = vld [vmem:[%s12516_s10 + $0x38] sm:$0xff] }
 0x810   :  { %2019 = vmatpush.msrb.mxu2 %v1922_v1  ;;  %v2521_v1 = vld [vmem:[%s12516_s10 + $0x40] sm:$0xff] }
 0x811   :  { %v2198_v28 = vpop.f32.mrf.mxu3 }
 0x812   :  { %6546 = vmatpush.msk.msra.mxu2 %vm1974_vm4, %v2063_v37  ;;  %v6671_v37 = vld [vmem:[%s12516_s10 + $0xa8] sm:$0xff] }
 0x813   :  { %v2132_v55 = vpop.f32.mrf.mxu0 }
 0x814   :  { %2087 = vmatpush.msra.mxu2 %v2060_v38  ;;  %v2270_v43 = vpop.f32.mrf.mxu1  ;;  %v6673_v38 = vld [vmem:[%s12516_s10 + $0xb8] sm:$0xff] }
 0x815   :  { %6528 = vmatmul.msk.f32.vlgmr.msrb.gmra.mxu2 %vm1970_vm5, %v1888_v3  ;;  %v2517_v3 = vld [vmem:[%s12516_s10 + $0x20] sm:$0xff] }
 0x816   :  { %6565 = vmatpush.msk.msrb.mxu2 %vm1974_vm4, %v2132_v55  ;;  %v2516_v55 = vld [vmem:[%s12516_s10 + $0x18] sm:$0xff] }
 0x818   :  { %2156 = vmatpush.msrb.mxu2 %v2129_v35  ;;  %v2518_v35 = vld [vmem:[%s12516_s10 + $0x28] sm:$0xff] }
 0x81a   :  { %v2201_v8 = vpop.f32.mrf.mxu3 }
 0x81c   :  { %v2474_v45 = vpop.f32.mrf.mxu1 }
 0x81d   :  { %6547 = vmatmul.msk.f32.vlgmr.msra.gmra.mxu2 %vm1970_vm5, %v6529_v29  ;;  %v6669_v29 = vld [vmem:[%s12516_s10 + $0x98] sm:$0xff] }
 0x81e   :  { %6584 = vmatpush.msk.msra.mxu2 %vm1974_vm4, %v2201_v8  ;;  %v6668_v8 = vld [vmem:[%s12516_s10 + $0x90] sm:$0xff] }
 0x820   :  { %2225 = vmatpush.msra.mxu2 %v2198_v28  ;;  %v6670_v28 = vld [vmem:[%s12516_s10 + $0xa0] sm:$0xff] }
 0x822   :  { %v2405_v32 = vpop.f32.mrf.mxu3 }
 0x824   :  { %v2477_v58 = vpop.f32.mrf.mxu1 }
 0x825   :  { %6566 = vmatmul.msk.f32.vlgmr.msrb.gmra.mxu2 %vm1970_vm5, %v6548_v48  ;;  %v2514_v48 = vld [vmem:[%s12516_s10 + $0x8] sm:$0xff] }
 0x826   :  { %6603 = vmatpush.msk.msrb.mxu2 %vm1974_vm4, %v2270_v43  ;;  %v6667_v43 = vld [vmem:[%s12516_s10 + $0x88] sm:$0xff] }
 0x828   :  { %2294 = vmatpush.msrb.mxu2 %v2267_v31  ;;  %v2515_v31 = vld [vmem:[%s12516_s10 + $0x10] sm:$0xff] }
 0x82a   :  { %v2408_v20 = vpop.f32.mrf.mxu3 }
 0x82d   :  { %6585 = vmatmul.msk.f32.vlgmr.msra.gmra.mxu2 %vm1970_vm5, %v6567_v33  ;;  %v2513_v33 = vld [vmem:[%s12516_s10] sm:$0xff] }
 0x82e   :  { %2319 = vmatpush.msra.mxu2 %v6621_v42  ;;  %v6666_v42 = vld [vmem:[%s12516_s10 + $0x80] sm:$0xff] }
 0x830   :  { %2320 = vmatpush.msra.mxu2 %v6620_v15 }
 0x832   :  { %2321 = vmatpush.msra.mxu2 %v6619_v50 }
 0x834   :  { %2322 = vmatpush.msra.mxu2 %v6618_v6 }
 0x835   :  { %6604 = vmatmul.msk.f32.vlgmr.msrb.gmra.mxu2 %vm1970_vm5, %v6586_v7 }
 0x836   :  { %2323 = vmatpush.msra.mxu2 %v6617_v11 }
 0x838   :  { %2324 = vmatpush.msra.mxu2 %v6616_v61 }
 0x83a   :  { %2325 = vmatpush.msra.mxu2 %v6615_v30 }
 0x83c   :  { %2326 = vmatpush.msra.mxu2 %v6614_v62 }
 0x83e   :  { %2327 = vmatpush.msra.mxu2 %v6613_v54 }
 0x840   :  { %2328 = vmatpush.msra.mxu2 %v6612_v24  ;;  %v2507_v24 = vperm.slane %v8999_v2, 2  ;;  %v6710_v2 = vld [vmem:[%s12516_s10 + $0x170] sm:$0xff] }
 0x842   :  { %2329 = vmatpush.msra.mxu2 %v6611_v60 }
 0x844   :  { %2330 = vmatpush.msra.mxu2 %v6610_v12 }
 0x846   :  { %2331 = vmatpush.msra.mxu2 %v6609_v26 }
 0x848   :  { %2332 = vmatpush.msra.mxu2 %v6608_v27  ;;  %v6662_v27 = vld [vmem:[%s12517_s9 + $0x20] sm:$0xff] }
 0x84a   :  { %2333 = vmatpush.msra.mxu2 %v6607_v34 }
 0x84c   :  { %2334 = vmatpush.msra.mxu2 %v6606_v36  ;;  %v6711_v36 = vld [vmem:[%s12516_s10 + $0x178] sm:$0xff] }
 0x84d   :  { %2335 = vmatmul.f32.vlgmr.msra.gmra.mxu2 %v9326_v56  ;;  %v2527_v56 = vld [vmem:[%s12516_s10 + $0x70] sm:$0xff] }
 0x84e   :  { %2529 = vmatpush.msrb.mxu2 %v2528_v25  ;;  %v6707_v25 = vld [vmem:[%s12516_s10 + $0x158] sm:$0xff] }
 0x850   :  { %2530 = vmatpush.msrb.mxu2 %v2527_v56  ;;  %v6760_v56 = vld [vmem:[%s12516_s10 + $0x270] sm:$0xff] }
 0x855   :  { %2338 = vmatmul.f32.gmra.mxu2 %v9355_v16  ;;  %v2526_v16 = vld [vmem:[%s12516_s10 + $0x68] sm:$0xff] }
 0x856   :  { %2531 = vmatpush.msrb.mxu2 %v2526_v16  ;;  %v6706_v16 = vld [vmem:[%s12516_s10 + $0x150] sm:$0xff] }
 0x858   :  { %2532 = vmatpush.msrb.mxu2 %v2525_v18  ;;  %v6705_v18 = vld [vmem:[%s12516_s10 + $0x148] sm:$0xff] }
 0x85a   :  { %2533 = vmatpush.msrb.mxu2 %v2524_v51  ;;  %v2510_v51 = vld [vmem:[%s12517_s9 + $0x8] sm:$0xff] }
 0x85c   :  { %2534 = vmatpush.msrb.mxu2 %v2523_v53  ;;  %v6665_v53 = vld [vmem:[%s12517_s9 + $0x38] sm:$0x1] }
 0x85e   :  { %2535 = vmatpush.msrb.mxu2 %v2522_v52  ;;  %v6752_v52 = vld [vmem:[%s12516_s10 + $0x230] sm:$0xff] }
 0x860   :  { %2536 = vmatpush.msrb.mxu2 %v2521_v1  ;;  %v6751_v1 = vld [vmem:[%s12516_s10 + $0x228] sm:$0xff] }
 0x862   :  { %2537 = vmatpush.msrb.mxu2 %v2520_v47  ;;  %v6750_v47 = vld [vmem:[%s12516_s10 + $0x220] sm:$0xff] }
 0x864   :  { %2538 = vmatpush.msrb.mxu2 %v2519_v59  ;;  %v6696_v59 = vld [vmem:[%s12516_s10 + $0x100] sm:$0xff] }
 0x866   :  { %2539 = vmatpush.msrb.mxu2 %v2518_v35  ;;  %v6748_v35 = vld [vmem:[%s12516_s10 + $0x210] sm:$0xff] }
 0x868   :  { %2540 = vmatpush.msrb.mxu2 %v2517_v3  ;;  %v6746_v3 = vld [vmem:[%s12516_s10 + $0x200] sm:$0xff] }
 0x86a   :  { %2541 = vmatpush.msrb.mxu2 %v2516_v55 }
 0x86c   :  { %2542 = vmatpush.msrb.mxu2 %v2515_v31 }
 0x86e   :  { %2543 = vmatpush.msrb.mxu2 %v2514_v48 }
 0x870   :  { %2544 = vmatpush.msrb.mxu2 %v2513_v33 }
 0x890   :  { %v9522_v13 = vpop.f32.mrf.mxu2 }
 0x898   :  { %v9524_v14 = vpop.f32.mrf.mxu2 }
 0x899   :  { %v2022_v50 = vadd.f32 %v9524_v14, %v9522_v13  ;;  %v6709_v13 = vld [vmem:[%s12516_s10 + $0x168] sm:$0xff]  ;;  %v2509_v14 = vld [vmem:[%s12517_s9] sm:$0xff] }
 0x8a0   :  { %v9526_v44 = vpop.f32.mrf.mxu2 }
 0x8a1   :  { %v2092_v6 = vadd.f32 %v9526_v44, %v2022_v50 }
 0x8a8   :  { %v9528_v17 = vpop.f32.mrf.mxu2 }
 0x8a9   :  { %v2161_v7 = vadd.f32 %v9528_v17, %v2092_v6  ;;  %v6708_v17 = vld [vmem:[%s12516_s10 + $0x160] sm:$0xff] }
 0x8b0   :  { %v9530_v19 = vpop.f32.mrf.mxu2 }
 0x8b1   :  { %v2230_v61 = vadd.f32 %v9530_v19, %v2161_v7  ;;  %v6761_v19 = vld [vmem:[%s12516_s10 + $0x278] sm:$0xff] }
 0x8b2   :  { %v6736_v7 = vld [vmem:[%s12516_s10 + $0x1f8] sm:$0xff] }
 0x8b8   :  { %v9532_v22 = vpop.f32.mrf.mxu2 }
 0x8b9   :  { %v2299_v30 = vadd.f32 %v9532_v22, %v2230_v61  ;;  %v6663_v22 = vld [vmem:[%s12517_s9 + $0x28] sm:$0xff]  ;;  %v6735_v61 = vld [vmem:[%s12516_s10 + $0x1f0] sm:$0xff] }
 0x8d0   :  { %v2336_v46 = vpop.f32.mrf.mxu2 }
 0x8d8   :  { %v2339_v21 = vpop.f32.mrf.mxu2 }
 0x8d9   :  { %6622 = vmatpush.msk.msra.mxu0 %vm1974_vm4, %v2339_v21  ;;  %v6757_v21 = vld [vmem:[%s12516_s10 + $0x258] sm:$0xff] }
 0x8db   :  { %2363 = vmatpush.msra.mxu0 %v2336_v46  ;;  %v6759_v46 = vld [vmem:[%s12516_s10 + $0x268] sm:$0xff] }
 0x8dc   :  { %6623 = vmatmul.msk.f32.vlgmr.msra.gmra.mxu0 %vm1970_vm5, %v6605_v0  ;;  %v6664_v0 = vld [vmem:[%s12517_s9 + $0x30] sm:$0xff] }
 0x8dd   :  { %6641 = vmatpush.msk.msrb.mxu0 %vm1974_vm4, %v2408_v20  ;;  %v6703_v20 = vld [vmem:[%s12516_s10 + $0x138] sm:$0xff] }
 0x8df   :  { %2432 = vmatpush.msrb.mxu0 %v2405_v32  ;;  %v6758_v32 = vld [vmem:[%s12516_s10 + $0x260] sm:$0xff] }
 0x8e1   :  { %6660 = vmatpush.msk.msra.mxu0 %vm1974_vm4, %v2477_v58  ;;  %v6756_v58 = vld [vmem:[%s12516_s10 + $0x250] sm:$0xff] }
 0x8e3   :  { %2501 = vmatpush.msra.mxu0 %v2474_v45  ;;  %v6704_v45 = vld [vmem:[%s12516_s10 + $0x140] sm:$0xff] }
 0x8e4   :  { %6642 = vmatmul.msk.f32.vlgmr.msrb.gmra.mxu0 %vm1970_vm5, %v6624_v4  ;;  %v6702_v4 = vld [vmem:[%s12516_s10 + $0x130] sm:$0xff] }
 0x8e5   :  { %2571 = vmatpush.msrb.mxu0 %v6681_v9  ;;  %v6755_v9 = vld [vmem:[%s12516_s10 + $0x248] sm:$0xff] }
 0x8e7   :  { %2572 = vmatpush.msrb.mxu0 %v6680_v57  ;;  %v6701_v57 = vld [vmem:[%s12516_s10 + $0x128] sm:$0xff] }
 0x8e9   :  { %2573 = vmatpush.msrb.mxu0 %v6679_v23  ;;  %v6754_v23 = vld [vmem:[%s12516_s10 + $0x240] sm:$0xff] }
 0x8eb   :  { %2574 = vmatpush.msrb.mxu0 %v6678_v41  ;;  %v2511_v41 = vld [vmem:[%s12517_s9 + $0x10] sm:$0xff] }
 0x8ec   :  { %6661 = vmatmul.msk.f32.vlgmr.msra.gmra.mxu0 %vm1970_vm5, %v6643_v10  ;;  %v6700_v10 = vld [vmem:[%s12516_s10 + $0x120] sm:$0xff] }
 0x8ed   :  { %2575 = vmatpush.msrb.mxu0 %v6677_v5  ;;  %v6753_v5 = vld [vmem:[%s12516_s10 + $0x238] sm:$0xff] }
 0x8ef   :  { %2576 = vmatpush.msrb.mxu0 %v6676_v49  ;;  %v6699_v49 = vld [vmem:[%s12516_s10 + $0x118] sm:$0xff] }
 0x8f1   :  { %2577 = vmatpush.msrb.mxu0 %v6675_v39  ;;  %v6698_v39 = vld [vmem:[%s12516_s10 + $0x110] sm:$0xff] }
 0x8f3   :  { %2578 = vmatpush.msrb.mxu0 %v6674_v40  ;;  %v6697_v40 = vld [vmem:[%s12516_s10 + $0x108] sm:$0xff] }
 0x8f5   :  { %2579 = vmatpush.msrb.mxu0 %v6673_v38  ;;  %v2512_v38 = vld [vmem:[%s12517_s9 + $0x18] sm:$0x1] }
 0x8f7   :  { %2580 = vmatpush.msrb.mxu0 %v6672_v63  ;;  %v6749_v63 = vld [vmem:[%s12516_s10 + $0x218] sm:$0xff] }
 0x8f9   :  { %2581 = vmatpush.msrb.mxu0 %v6671_v37  ;;  %v6747_v37 = vld [vmem:[%s12516_s10 + $0x208] sm:$0xff] }
 0x8fb   :  { %2582 = vmatpush.msrb.mxu0 %v6670_v28 }
 0x8fd   :  { %2583 = vmatpush.msrb.mxu0 %v6669_v29 }
 0x8ff   :  { %2584 = vmatpush.msrb.mxu0 %v6668_v8 }
 0x901   :  { %2585 = vmatpush.msrb.mxu0 %v6667_v43 }
 0x903   :  { %2586 = vmatpush.msrb.mxu0 %v6666_v42  ;;  %v6692_v42 = vld [vmem:[%s12517_s9 + $0x40] sm:$0xff] }
 0x959   :  { %v2365_v15 = vpop.f32.mrf.mxu0 }
 0x95a   :  { %v2368_v62 = vadd.f32 %v2365_v15, %v2299_v30  ;;  %v6742_v15 = vld [vmem:[%s12517_s9 + $0x80] sm:$0xff]  ;;  %v6835_v30 = vld [vmem:[%s12516_s10 + $0x3f0] sm:$0xff] }
 0x961   :  { %v2434_v11 = vpop.f32.mrf.mxu0 }
 0x962   :  { %v2437_v54 = vadd.f32 %v2434_v11, %v2368_v62  ;;  %v6836_v11 = vld [vmem:[%s12516_s10 + $0x3f8] sm:$0xff]  ;;  %v6734_v62 = vld [vmem:[%s12516_s10 + $0x1e8] sm:$0xff] }
 0x969   :  { %v2503_v60 = vpop.f32.mrf.mxu0 }
 0x96a   :  { %v2506_v12 = vadd.f32 %v2503_v60, %v2437_v54  ;;  %v6834_v54 = vld [vmem:[%s12516_s10 + $0x3e8] sm:$0xff]  ;;  %v6833_v60 = vld [vmem:[%s12516_s10 + $0x3e0] sm:$0xff] }
 0x96c   :  { %v9652_v26 = vadd.f32 %v2507_v24, %v2506_v12  ;;  %v6733_v24 = vld [vmem:[%s12516_s10 + $0x1e0] sm:$0xff]  ;;  %v6693_v12 = vld [vmem:[%s12517_s9 + $0x48] sm:$0xff] }
 0x96e   :  { %2545 = vmatmul.f32.vlgmr.msrb.gmra.mxu2 %v9652_v26  ;;  %2587 = vmatmul.f32.vlgmr.msrb.gmra.mxu0 %v9652_v26 }
 0x9eb   :  { %v2588_v34 = vpop.f32.mrf.mxu0 }
 0x9ec   :  { %6682 = vmatpush.msk.msrb.mxu3 %vm223_vm0, %v2588_v34  ;;  %v6732_v34 = vld [vmem:[%s12516_s10 + $0x1d8] sm:$0xff] }
 0x9ed   :  { %6683 = vmatmul.msk.f32.vlgmr.msrb.gmra.mxu3 %vm2591_vm6, %v6662_v27  ;;  %v6743_v27 = vld [vmem:[%s12517_s9 + $0x88] sm:$0xff] }
 0x9ee   :  { %2702 = vmatpush.msra.mxu3 %v6711_v36  ;;  %v6832_v36 = vld [vmem:[%s12516_s10 + $0x3d8] sm:$0xff] }
 0x9f0   :  { %2703 = vmatpush.msra.mxu3 %v6710_v2  ;;  %v6731_v2 = vld [vmem:[%s12516_s10 + $0x1d0] sm:$0xff] }
 0x9f1   :  { %v2546_v44 = vpop.f32.mrf.mxu2 }
 0x9f2   :  { %6687 = vmatpush.msk.msra.mxu1 %vm223_vm0, %v2546_v44  ;;  %2704 = vmatpush.msra.mxu3 %v6709_v13  ;;  %v6831_v13 = vld [vmem:[%s12516_s10 + $0x3d0] sm:$0xff]  ;;  %v6830_v44 = vld [vmem:[%s12516_s10 + $0x3c8] sm:$0xff] }
 0x9f3   :  { %6688 = vmatmul.msk.f32.vlgmr.msra.gmra.mxu1 %vm2591_vm6, %v2509_v14  ;;  %v6730_v14 = vld [vmem:[%s12516_s10 + $0x1c8] sm:$0xff] }
 0x9f4   :  { %2705 = vmatpush.msra.mxu3 %v6708_v17  ;;  %2882 = vmatpush.msrb.mxu1 %v6761_v19  ;;  %v6729_v17 = vld [vmem:[%s12516_s10 + $0x1c0] sm:$0xff] }
 0x9f5   :  { %6684 = vmatmul.msk.f32.gmra.mxu3 %vm2591_vm6, %v6663_v22  ;;  %v6829_v19 = vld [vmem:[%s12516_s10 + $0x3c0] sm:$0xff]  ;;  %v6694_v22 = vld [vmem:[%s12517_s9 + $0x50] sm:$0xff] }
 0x9f6   :  { %2706 = vmatpush.msra.mxu3 %v6707_v25  ;;  %2883 = vmatpush.msrb.mxu1 %v6760_v56  ;;  %v6744_v25 = vld [vmem:[%s12517_s9 + $0x90] sm:$0xff]  ;;  %v6728_v56 = vld [vmem:[%s12516_s10 + $0x1b8] sm:$0xff] }
 0x9f8   :  { %2707 = vmatpush.msra.mxu3 %v6706_v16  ;;  %2884 = vmatpush.msrb.mxu1 %v6759_v46  ;;  %v6828_v16 = vld [vmem:[%s12516_s10 + $0x3b8] sm:$0xff]  ;;  %v6727_v46 = vld [vmem:[%s12516_s10 + $0x1b0] sm:$0xff] }
 0x9fa   :  { %2708 = vmatpush.msra.mxu3 %v6705_v18  ;;  %2885 = vmatpush.msrb.mxu1 %v6758_v32  ;;  %v6827_v18 = vld [vmem:[%s12516_s10 + $0x3b0] sm:$0xff]  ;;  %v6726_v32 = vld [vmem:[%s12516_s10 + $0x1a8] sm:$0xff] }
 0x9fb   :  { %6689 = vmatmul.msk.f32.gmra.mxu1 %vm2591_vm6, %v2510_v51  ;;  %v6826_v51 = vld [vmem:[%s12516_s10 + $0x3a8] sm:$0xff] }
 0x9fc   :  { %2709 = vmatpush.msra.mxu3 %v6704_v45  ;;  %2886 = vmatpush.msrb.mxu1 %v6757_v21  ;;  %v6725_v45 = vld [vmem:[%s12516_s10 + $0x1a0] sm:$0xff] }
 0x9fd   :  { %6685 = vmatmul.msk.f32.gmra.mxu3 %vm2591_vm6, %v6664_v0  ;;  %v6825_v21 = vld [vmem:[%s12516_s10 + $0x3a0] sm:$0xff]  ;;  %v6695_v0 = vld [vmem:[%s12517_s9 + $0x58] sm:$0x1] }
 0x9fe   :  { %2710 = vmatpush.msra.mxu3 %v6703_v20  ;;  %2887 = vmatpush.msrb.mxu1 %v6756_v58  ;;  %v6745_v20 = vld [vmem:[%s12517_s9 + $0x98] sm:$0x1] }
 0x9ff   :  { %v6724_v58 = vld [vmem:[%s12516_s10 + $0x198] sm:$0xff] }
 0xa00   :  { %2711 = vmatpush.msra.mxu3 %v6702_v4  ;;  %2888 = vmatpush.msrb.mxu1 %v6755_v9  ;;  %v6824_v4 = vld [vmem:[%s12516_s10 + $0x398] sm:$0xff]  ;;  %v6723_v9 = vld [vmem:[%s12516_s10 + $0x190] sm:$0xff] }
 0xa02   :  { %2712 = vmatpush.msra.mxu3 %v6701_v57  ;;  %2889 = vmatpush.msrb.mxu1 %v6754_v23  ;;  %v6823_v57 = vld [vmem:[%s12516_s10 + $0x390] sm:$0xff]  ;;  %v6722_v23 = vld [vmem:[%s12516_s10 + $0x188] sm:$0xff] }
 0xa03   :  { %6690 = vmatmul.msk.f32.gmra.mxu1 %vm2591_vm6, %v2511_v41  ;;  %v6822_v41 = vld [vmem:[%s12516_s10 + $0x388] sm:$0xff] }
 0xa04   :  { %2713 = vmatpush.msra.mxu3 %v6700_v10  ;;  %2890 = vmatpush.msrb.mxu1 %v6753_v5  ;;  %v6721_v10 = vld [vmem:[%s12516_s10 + $0x180] sm:$0xff] }
 0xa05   :  { %6686 = vmatmul.msk.f32.gmra.mxu3 %vm2591_vm6, %v6665_v53  ;;  %v6821_v5 = vld [vmem:[%s12516_s10 + $0x380] sm:$0xff] }
 0xa06   :  { %2714 = vmatpush.msra.mxu3 %v6699_v49  ;;  %2891 = vmatpush.msrb.mxu1 %v6752_v52 }
 0xa08   :  { %2715 = vmatpush.msra.mxu3 %v6698_v39  ;;  %2892 = vmatpush.msrb.mxu1 %v6751_v1 }
 0xa0a   :  { %2716 = vmatpush.msra.mxu3 %v6697_v40  ;;  %2893 = vmatpush.msrb.mxu1 %v6750_v47 }
 0xa0b   :  { %6691 = vmatmul.msk.f32.gmra.mxu1 %vm2591_vm6, %v2512_v38 }
 0xa0c   :  { %2717 = vmatpush.msra.mxu3 %v6696_v59  ;;  %2894 = vmatpush.msrb.mxu1 %v6749_v63  ;;  %v6717_v59 = vld [vmem:[%s12517_s9 + $0x60] sm:$0xff] }
 0xa0d   :  { %2718 = vmatmul.f32.vlgmr.msra.gmra.mxu3 %v9652_v26 }
 0xa0e   :  { %2895 = vmatpush.msrb.mxu1 %v6748_v35  ;;  %v6786_v35 = vld [vmem:[%s12516_s10 + $0x2f8] sm:$0xff] }
 0xa10   :  { %2896 = vmatpush.msrb.mxu1 %v6747_v37  ;;  %v6785_v37 = vld [vmem:[%s12516_s10 + $0x2f0] sm:$0xff] }
 0xa12   :  { %2897 = vmatpush.msrb.mxu1 %v6746_v3  ;;  %v6784_v3 = vld [vmem:[%s12516_s10 + $0x2e8] sm:$0xff] }
 0xa13   :  { %2898 = vmatmul.f32.vlgmr.msrb.gmra.mxu1 %v9652_v26 }
 0xa70   :  { %v9788_v28 = vpop.f32.mrf.mxu3  ;;  %v9790_v55 = vpop.f32.mrf.mxu1 }
 0xa78   :  { %v9792_v29 = vpop.f32.mrf.mxu3  ;;  %v9794_v31 = vpop.f32.mrf.mxu1 }
 0xa80   :  { %v9796_v8 = vpop.f32.mrf.mxu3  ;;  %v9798_v48 = vpop.f32.mrf.mxu1 }
 0xa88   :  { %v9800_v43 = vpop.f32.mrf.mxu3  ;;  %v9802_v33 = vpop.f32.mrf.mxu1 }
 0xa90   :  { %v2719_v50 = vpop.f32.mrf.mxu3  ;;  %v2899_v6 = vpop.f32.mrf.mxu1 }
 0xa91   :  { %6712 = vmatpush.msk.msra.mxu0 %vm223_vm0, %v2719_v50  ;;  %6762 = vmatpush.msk.msra.mxu2 %vm223_vm0, %v2899_v6  ;;  %v6718_v50 = vld [vmem:[%s12517_s9 + $0x68] sm:$0xff]  ;;  %v6782_v6 = vld [vmem:[%s12516_s10 + $0x2d8] sm:$0xff] }
 0xa92   :  { %6713 = vmatmul.msk.f32.vlgmr.msra.gmra.mxu0 %vm2591_vm6, %v6692_v42  ;;  %6763 = vmatmul.msk.f32.vlgmr.msra.gmra.mxu2 %vm2591_vm6, %v6742_v15  ;;  %v6783_v15 = vld [vmem:[%s12516_s10 + $0x2e0] sm:$0xff] }
 0xa93   :  { %2792 = vmatpush.msrb.mxu0 %v6736_v7  ;;  %3152 = vmatpush.msrb.mxu2 %v6836_v11  ;;  %v6781_v7 = vld [vmem:[%s12516_s10 + $0x2d0] sm:$0xff]  ;;  %v6780_v11 = vld [vmem:[%s12516_s10 + $0x2c8] sm:$0xff] }
 0xa95   :  { %2793 = vmatpush.msrb.mxu0 %v6735_v61  ;;  %3153 = vmatpush.msrb.mxu2 %v6835_v30  ;;  %v6779_v61 = vld [vmem:[%s12516_s10 + $0x2c0] sm:$0xff]  ;;  %v6719_v30 = vld [vmem:[%s12517_s9 + $0x70] sm:$0xff] }
 0xa97   :  { %2794 = vmatpush.msrb.mxu0 %v6734_v62  ;;  %3154 = vmatpush.msrb.mxu2 %v6834_v54  ;;  %v6778_v62 = vld [vmem:[%s12516_s10 + $0x2b8] sm:$0xff]  ;;  %v6777_v54 = vld [vmem:[%s12516_s10 + $0x2b0] sm:$0xff] }
 0xa99   :  { %2795 = vmatpush.msrb.mxu0 %v6733_v24  ;;  %3155 = vmatpush.msrb.mxu2 %v6833_v60  ;;  %v6776_v24 = vld [vmem:[%s12516_s10 + $0x2a8] sm:$0xff]  ;;  %v6775_v60 = vld [vmem:[%s12516_s10 + $0x2a0] sm:$0xff] }
 0xa9a   :  { %6714 = vmatmul.msk.f32.gmra.mxu0 %vm2591_vm6, %v6693_v12  ;;  %6764 = vmatmul.msk.f32.gmra.mxu2 %vm2591_vm6, %v6743_v27  ;;  %v6720_v12 = vld [vmem:[%s12517_s9 + $0x78] sm:$0x1] }
 0xa9b   :  { %2796 = vmatpush.msrb.mxu0 %v6732_v34  ;;  %3156 = vmatpush.msrb.mxu2 %v6832_v36  ;;  %v6774_v27 = vld [vmem:[%s12516_s10 + $0x298] sm:$0xff]  ;;  %v6773_v34 = vld [vmem:[%s12516_s10 + $0x290] sm:$0xff]  ;;  %v6772_v36 = vld [vmem:[%s12516_s10 + $0x288] sm:$0xff] }
 0xa9d   :  { %2797 = vmatpush.msrb.mxu0 %v6731_v2  ;;  %3157 = vmatpush.msrb.mxu2 %v6831_v13  ;;  %v6771_v2 = vld [vmem:[%s12516_s10 + $0x280] sm:$0xff] }
 0xa9f   :  { %2798 = vmatpush.msrb.mxu0 %v6730_v14  ;;  %3158 = vmatpush.msrb.mxu2 %v6830_v44 }
 0xaa1   :  { %2799 = vmatpush.msrb.mxu0 %v6729_v17  ;;  %3159 = vmatpush.msrb.mxu2 %v6829_v19  ;;  %v6767_v19 = vld [vmem:[%s12517_s9 + $0xa0] sm:$0xff] }
 0xaa2   :  { %6715 = vmatmul.msk.f32.gmra.mxu0 %vm2591_vm6, %v6694_v22  ;;  %6765 = vmatmul.msk.f32.gmra.mxu2 %vm2591_vm6, %v6744_v25  ;;  %v6811_v25 = vld [vmem:[%s12516_s10 + $0x378] sm:$0xff] }
 0xaa3   :  { %2800 = vmatpush.msrb.mxu0 %v6728_v56  ;;  %3160 = vmatpush.msrb.mxu2 %v6828_v16  ;;  %v6810_v56 = vld [vmem:[%s12516_s10 + $0x370] sm:$0xff]  ;;  %v6809_v16 = vld [vmem:[%s12516_s10 + $0x368] sm:$0xff] }
 0xaa5   :  { %2801 = vmatpush.msrb.mxu0 %v6727_v46  ;;  %3161 = vmatpush.msrb.mxu2 %v6827_v18  ;;  %v6808_v46 = vld [vmem:[%s12516_s10 + $0x360] sm:$0xff]  ;;  %v6768_v18 = vld [vmem:[%s12517_s9 + $0xa8] sm:$0xff] }
 0xaa7   :  { %2802 = vmatpush.msrb.mxu0 %v6726_v32  ;;  %3162 = vmatpush.msrb.mxu2 %v6826_v51  ;;  %v6807_v32 = vld [vmem:[%s12516_s10 + $0x358] sm:$0xff]  ;;  %v6806_v51 = vld [vmem:[%s12516_s10 + $0x350] sm:$0xff] }
 0xaa9   :  { %2803 = vmatpush.msrb.mxu0 %v6725_v45  ;;  %3163 = vmatpush.msrb.mxu2 %v6825_v21  ;;  %v6805_v45 = vld [vmem:[%s12516_s10 + $0x348] sm:$0xff]  ;;  %v6804_v21 = vld [vmem:[%s12516_s10 + $0x340] sm:$0xff] }
 0xaaa   :  { %6716 = vmatmul.msk.f32.gmra.mxu0 %vm2591_vm6, %v6695_v0  ;;  %6766 = vmatmul.msk.f32.gmra.mxu2 %vm2591_vm6, %v6745_v20  ;;  %v6769_v0 = vld [vmem:[%s12517_s9 + $0xb0] sm:$0xff]  ;;  %v6803_v20 = vld [vmem:[%s12516_s10 + $0x338] sm:$0xff] }
 0xaab   :  { %2804 = vmatpush.msrb.mxu0 %v6724_v58  ;;  %3164 = vmatpush.msrb.mxu2 %v6824_v4  ;;  %v6802_v58 = vld [vmem:[%s12516_s10 + $0x330] sm:$0xff]  ;;  %v6801_v4 = vld [vmem:[%s12516_s10 + $0x328] sm:$0xff] }
 0xaad   :  { %2805 = vmatpush.msrb.mxu0 %v6723_v9  ;;  %3165 = vmatpush.msrb.mxu2 %v6823_v57  ;;  %v6800_v9 = vld [vmem:[%s12516_s10 + $0x320] sm:$0xff]  ;;  %v6770_v57 = vld [vmem:[%s12517_s9 + $0xb8] sm:$0x1] }
 0xaaf   :  { %2806 = vmatpush.msrb.mxu0 %v6722_v23  ;;  %3166 = vmatpush.msrb.mxu2 %v6822_v41  ;;  %v6799_v23 = vld [vmem:[%s12516_s10 + $0x318] sm:$0xff]  ;;  %v6798_v41 = vld [vmem:[%s12516_s10 + $0x310] sm:$0xff] }
 0xab1   :  { %2807 = vmatpush.msrb.mxu0 %v6721_v10  ;;  %3167 = vmatpush.msrb.mxu2 %v6821_v5  ;;  %v6797_v10 = vld [vmem:[%s12516_s10 + $0x308] sm:$0xff]  ;;  %v6796_v5 = vld [vmem:[%s12516_s10 + $0x300] sm:$0xff] }
 0xab2   :  { %2808 = vmatmul.f32.vlgmr.msrb.gmra.mxu0 %v9652_v26  ;;  %3168 = vmatmul.f32.vlgmr.msrb.gmra.mxu2 %v9652_v26 }
 0xb0f   :  { %v9936_v53 = vpop.f32.mrf.mxu0 }
 0xb15   :  { %v9938_v49 = vpop.f32.mrf.mxu2 }
 0xb17   :  { %v9940_v52 = vpop.f32.mrf.mxu0 }
 0xb1d   :  { %v9942_v39 = vpop.f32.mrf.mxu2 }
 0xb1f   :  { %v9944_v1 = vpop.f32.mrf.mxu0 }
 0xb25   :  { %v9946_v40 = vpop.f32.mrf.mxu2 }
 0xb27   :  { %v9948_v47 = vpop.f32.mrf.mxu0 }
 0xb2d   :  { %v9950_v38 = vpop.f32.mrf.mxu2 }
 0xb2f   :  { %v2809_v63 = vpop.f32.mrf.mxu0 }
 0xb30   :  { %6737 = vmatpush.msk.msrb.mxu3 %vm223_vm0, %v2809_v63  ;;  %v6860_v63 = vld [vmem:[%s12516_s10 + $0x470] sm:$0xff] }
 0xb31   :  { %6738 = vmatmul.msk.f32.vlgmr.msrb.gmra.mxu3 %vm2591_vm6, %v6717_v59  ;;  %v6861_v59 = vld [vmem:[%s12516_s10 + $0x478] sm:$0xff] }
 0xb32   :  { %2972 = vmatpush.msra.mxu3 %v6786_v35  ;;  %v6859_v35 = vld [vmem:[%s12516_s10 + $0x468] sm:$0xff] }
 0xb34   :  { %2973 = vmatpush.msra.mxu3 %v6785_v37  ;;  %v6858_v37 = vld [vmem:[%s12516_s10 + $0x460] sm:$0xff] }
 0xb35   :  { %v3169_v42 = vpop.f32.mrf.mxu2 }
 0xb36   :  { %2974 = vmatpush.msra.mxu3 %v6784_v3  ;;  %6837 = vmatpush.msk.msra.mxu0 %vm223_vm0, %v3169_v42  ;;  %v6857_v3 = vld [vmem:[%s12516_s10 + $0x458] sm:$0xff]  ;;  %v6856_v42 = vld [vmem:[%s12516_s10 + $0x450] sm:$0xff] }
 0xb38   :  { %2975 = vmatpush.msra.mxu3 %v6783_v15  ;;  %v6855_v15 = vld [vmem:[%s12516_s10 + $0x448] sm:$0xff] }
 0xb39   :  { %6739 = vmatmul.msk.f32.gmra.mxu3 %vm2591_vm6, %v6718_v50  ;;  %v6854_v50 = vld [vmem:[%s12516_s10 + $0x440] sm:$0xff] }
 0xb3a   :  { %2976 = vmatpush.msra.mxu3 %v6782_v6  ;;  %v6853_v6 = vld [vmem:[%s12516_s10 + $0x438] sm:$0xff] }
 0xb3c   :  { %2977 = vmatpush.msra.mxu3 %v6781_v7  ;;  %v6852_v7 = vld [vmem:[%s12516_s10 + $0x430] sm:$0xff] }
 0xb3e   :  { %2978 = vmatpush.msra.mxu3 %v6780_v11  ;;  %v6851_v11 = vld [vmem:[%s12516_s10 + $0x428] sm:$0xff] }
 0xb40   :  { %2979 = vmatpush.msra.mxu3 %v6779_v61  ;;  %v6850_v61 = vld [vmem:[%s12516_s10 + $0x420] sm:$0xff] }
 0xb41   :  { %6740 = vmatmul.msk.f32.gmra.mxu3 %vm2591_vm6, %v6719_v30  ;;  %v6849_v30 = vld [vmem:[%s12516_s10 + $0x418] sm:$0xff] }
 0xb42   :  { %2980 = vmatpush.msra.mxu3 %v6778_v62  ;;  %v6848_v62 = vld [vmem:[%s12516_s10 + $0x410] sm:$0xff] }
 0xb44   :  { %2981 = vmatpush.msra.mxu3 %v6777_v54  ;;  %v6847_v54 = vld [vmem:[%s12516_s10 + $0x408] sm:$0xff] }
 0xb46   :  { %2982 = vmatpush.msra.mxu3 %v6776_v24  ;;  %v6846_v24 = vld [vmem:[%s12516_s10 + $0x400] sm:$0xff] }
 0xb48   :  { %2983 = vmatpush.msra.mxu3 %v6775_v60 }
 0xb49   :  { %6741 = vmatmul.msk.f32.gmra.mxu3 %vm2591_vm6, %v6720_v12 }
 0xb4a   :  { %2984 = vmatpush.msra.mxu3 %v6774_v27  ;;  %v6817_v27 = vld [vmem:[%s12517_s9 + $0xe0] sm:$0xff] }
 0xb4b   :  { %6838 = vmatmul.msk.f32.vlgmr.msra.gmra.mxu0 %vm2591_vm6, %v6817_v27  ;;  %v3350_v27 = vld [vmem:[%s12518_s12 + $0x10] sm:$0xff] }
 0xb4c   :  { %2985 = vmatpush.msra.mxu3 %v6773_v34 }
 0xb4e   :  { %2986 = vmatpush.msra.mxu3 %v6772_v36  ;;  %v6818_v36 = vld [vmem:[%s12517_s9 + $0xe8] sm:$0xff] }
 0xb50   :  { %2987 = vmatpush.msra.mxu3 %v6771_v2 }
 0xb51   :  { %2988 = vmatmul.f32.vlgmr.msra.gmra.mxu3 %v9652_v26 }
 0xb53   :  { %6839 = vmatmul.msk.f32.gmra.mxu0 %vm2591_vm6, %v6818_v36  ;;  %v6898_v36 = vld [vmem:[%s12518_s12 + $0x90] sm:$0xff] }
 0xbb4   :  { %v10019_v13 = vpop.f32.mrf.mxu3 }
 0xbbc   :  { %v10021_v14 = vpop.f32.mrf.mxu3 }
 0xbc4   :  { %v10023_v44 = vpop.f32.mrf.mxu3 }
 0xbcc   :  { %v10025_v17 = vpop.f32.mrf.mxu3 }
 0xbd4   :  { %v2989_v22 = vpop.f32.mrf.mxu3 }
 0xbd5   :  { %6787 = vmatpush.msk.msra.mxu1 %vm223_vm0, %v2989_v22 }
 0xbd6   :  { %6788 = vmatmul.msk.f32.vlgmr.msra.gmra.mxu1 %vm2591_vm6, %v6767_v19  ;;  %v6792_v19 = vld [vmem:[%s12517_s9 + $0xc0] sm:$0xff] }
 0xbd7   :  { %3062 = vmatpush.msrb.mxu1 %v6811_v25  ;;  %v6820_v25 = vld [vmem:[%s12517_s9 + $0xf8] sm:$0x1] }
 0xbd9   :  { %3063 = vmatpush.msrb.mxu1 %v6810_v56  ;;  %v6793_v56 = vld [vmem:[%s12517_s9 + $0xc8] sm:$0xff] }
 0xbdb   :  { %3064 = vmatpush.msrb.mxu1 %v6809_v16  ;;  %v6794_v16 = vld [vmem:[%s12517_s9 + $0xd0] sm:$0xff] }
 0xbdd   :  { %3065 = vmatpush.msrb.mxu1 %v6808_v46  ;;  %v6795_v46 = vld [vmem:[%s12517_s9 + $0xd8] sm:$0x1] }
 0xbde   :  { %6789 = vmatmul.msk.f32.gmra.mxu1 %vm2591_vm6, %v6768_v18  ;;  %v6842_v18 = vld [vmem:[%s12517_s9 + $0x100] sm:$0xff] }
 0xbdf   :  { %3066 = vmatpush.msrb.mxu1 %v6807_v32 }
 0xbe1   :  { %3067 = vmatpush.msrb.mxu1 %v6806_v51  ;;  %v6843_v51 = vld [vmem:[%s12517_s9 + $0x108] sm:$0xff] }
 0xbe3   :  { %3068 = vmatpush.msrb.mxu1 %v6805_v45  ;;  %v6844_v45 = vld [vmem:[%s12517_s9 + $0x110] sm:$0xff] }
 0xbe5   :  { %3069 = vmatpush.msrb.mxu1 %v6804_v21  ;;  %v6845_v21 = vld [vmem:[%s12517_s9 + $0x118] sm:$0x1] }
 0xbe6   :  { %6790 = vmatmul.msk.f32.gmra.mxu1 %vm2591_vm6, %v6769_v0  ;;  %v3363_v0 = vld [vmem:[%s12518_s12 + $0x78] sm:$0xff] }
 0xbe7   :  { %3070 = vmatpush.msrb.mxu1 %v6803_v20  ;;  %v6911_v20 = vld [vmem:[%s12518_s12 + $0xf8] sm:$0xff] }
 0xbe8   :  { %3440 = vmatpush.msrb.mxu0 %v6911_v20 }
 0xbe9   :  { %3071 = vmatpush.msrb.mxu1 %v6802_v58  ;;  %v3362_v58 = vld [vmem:[%s12518_s12 + $0x70] sm:$0xff] }
 0xbeb   :  { %3072 = vmatpush.msrb.mxu1 %v6801_v4  ;;  %v6910_v4 = vld [vmem:[%s12518_s12 + $0xf0] sm:$0xff] }
 0xbec   :  { %3441 = vmatpush.msrb.mxu0 %v6910_v4 }
 0xbed   :  { %3073 = vmatpush.msrb.mxu1 %v6800_v9  ;;  %v3361_v9 = vld [vmem:[%s12518_s12 + $0x68] sm:$0xff] }
 0xbee   :  { %6791 = vmatmul.msk.f32.gmra.mxu1 %vm2591_vm6, %v6770_v57  ;;  %v6909_v57 = vld [vmem:[%s12518_s12 + $0xe8] sm:$0xff] }
 0xbef   :  { %3074 = vmatpush.msrb.mxu1 %v6799_v23  ;;  %3442 = vmatpush.msrb.mxu0 %v6909_v57  ;;  %v3360_v23 = vld [vmem:[%s12518_s12 + $0x60] sm:$0xff] }
 0xbf1   :  { %3075 = vmatpush.msrb.mxu1 %v6798_v41  ;;  %v6908_v41 = vld [vmem:[%s12518_s12 + $0xe0] sm:$0xff] }
 0xbf2   :  { %3443 = vmatpush.msrb.mxu0 %v6908_v41 }
 0xbf3   :  { %3076 = vmatpush.msrb.mxu1 %v6797_v10  ;;  %v3359_v10 = vld [vmem:[%s12518_s12 + $0x58] sm:$0xff] }
 0xbf5   :  { %3077 = vmatpush.msrb.mxu1 %v6796_v5  ;;  %v6907_v5 = vld [vmem:[%s12518_s12 + $0xd8] sm:$0xff] }
 0xbf6   :  { %3078 = vmatmul.f32.vlgmr.msrb.gmra.mxu1 %v9652_v26  ;;  %3444 = vmatpush.msrb.mxu0 %v6907_v5 }
 0xbf7   :  { %3242 = vmatpush.msra.mxu1 %v6861_v59  ;;  %v3358_v59 = vld [vmem:[%s12518_s12 + $0x50] sm:$0xff] }
 0xbf9   :  { %3243 = vmatpush.msra.mxu1 %v6860_v63  ;;  %v6906_v63 = vld [vmem:[%s12518_s12 + $0xd0] sm:$0xff] }
 0xbfa   :  { %3445 = vmatpush.msrb.mxu0 %v6906_v63 }
 0xbfb   :  { %3244 = vmatpush.msra.mxu1 %v6859_v35  ;;  %v3357_v35 = vld [vmem:[%s12518_s12 + $0x48] sm:$0xff] }
 0xbfd   :  { %3245 = vmatpush.msra.mxu1 %v6858_v37  ;;  %v6905_v37 = vld [vmem:[%s12518_s12 + $0xc8] sm:$0xff] }
 0xbfe   :  { %3446 = vmatpush.msrb.mxu0 %v6905_v37 }
 0xbff   :  { %3246 = vmatpush.msra.mxu1 %v6857_v3  ;;  %v3356_v3 = vld [vmem:[%s12518_s12 + $0x40] sm:$0xff] }
 0xc01   :  { %3247 = vmatpush.msra.mxu1 %v6856_v42  ;;  %v6904_v42 = vld [vmem:[%s12518_s12 + $0xc0] sm:$0xff] }
 0xc02   :  { %3447 = vmatpush.msrb.mxu0 %v6904_v42 }
 0xc03   :  { %3248 = vmatpush.msra.mxu1 %v6855_v15  ;;  %v3355_v15 = vld [vmem:[%s12518_s12 + $0x38] sm:$0xff] }
 0xc05   :  { %3249 = vmatpush.msra.mxu1 %v6854_v50  ;;  %v6903_v50 = vld [vmem:[%s12518_s12 + $0xb8] sm:$0xff] }
 0xc06   :  { %3448 = vmatpush.msrb.mxu0 %v6903_v50 }
 0xc07   :  { %3250 = vmatpush.msra.mxu1 %v6853_v6  ;;  %v3354_v6 = vld [vmem:[%s12518_s12 + $0x30] sm:$0xff] }
 0xc09   :  { %3251 = vmatpush.msra.mxu1 %v6852_v7  ;;  %v6902_v7 = vld [vmem:[%s12518_s12 + $0xb0] sm:$0xff] }
 0xc0a   :  { %3449 = vmatpush.msrb.mxu0 %v6902_v7 }
 0xc0b   :  { %3252 = vmatpush.msra.mxu1 %v6851_v11  ;;  %v3353_v11 = vld [vmem:[%s12518_s12 + $0x28] sm:$0xff] }
 0xc0d   :  { %3253 = vmatpush.msra.mxu1 %v6850_v61  ;;  %v6901_v61 = vld [vmem:[%s12518_s12 + $0xa8] sm:$0xff] }
 0xc0e   :  { %3450 = vmatpush.msrb.mxu0 %v6901_v61 }
 0xc0f   :  { %3254 = vmatpush.msra.mxu1 %v6849_v30  ;;  %v3352_v30 = vld [vmem:[%s12518_s12 + $0x20] sm:$0xff] }
 0xc11   :  { %3255 = vmatpush.msra.mxu1 %v6848_v62  ;;  %v6900_v62 = vld [vmem:[%s12518_s12 + $0xa0] sm:$0xff] }
 0xc12   :  { %3451 = vmatpush.msrb.mxu0 %v6900_v62 }
 0xc13   :  { %3256 = vmatpush.msra.mxu1 %v6847_v54  ;;  %v3351_v54 = vld [vmem:[%s12518_s12 + $0x18] sm:$0xff] }
 0xc15   :  { %3257 = vmatpush.msra.mxu1 %v6846_v24  ;;  %v6899_v24 = vld [vmem:[%s12518_s12 + $0x98] sm:$0xff] }
 0xc16   :  { %3258 = vmatmul.f32.vlgmr.msra.gmra.mxu1 %v9652_v26  ;;  %v6819_v26 = vld [vmem:[%s12517_s9 + $0xf0] sm:$0xff]  ;;  %3452 = vmatpush.msrb.mxu0 %v6899_v24 }
 0xc17   :  { %6840 = vmatmul.msk.f32.gmra.mxu0 %vm2591_vm6, %v6819_v26  ;;  %v3349_v26 = vld [vmem:[%s12518_s12 + $0x8] sm:$0xff] }
 0xc18   :  { %3453 = vmatpush.msrb.mxu0 %v6898_v36 }
 0xc1f   :  { %6841 = vmatmul.msk.f32.gmra.mxu0 %vm2591_vm6, %v6820_v25  ;;  %v6896_v25 = vld [vmem:[%s12518_s12 + $0x80] sm:$0xff] }
 0xc53   :  { %v10142_v60 = vpop.f32.mrf.mxu1 }
 0xc5b   :  { %v10144_v12 = vpop.f32.mrf.mxu1 }
 0xc63   :  { %v10150_v34 = vpop.f32.mrf.mxu1 }
 0xc6b   :  { %v10156_v2 = vpop.f32.mrf.mxu1 }
 0xc73   :  { %v3079_v22 = vpop.f32.mrf.mxu1 }
 0xc74   :  { %6812 = vmatpush.msk.msrb.mxu3 %vm223_vm0, %v3079_v22  ;;  %v3348_v22 = vld [vmem:[%s12518_s12] sm:$0xff] }
 0xc75   :  { %6813 = vmatmul.msk.f32.vlgmr.msrb.gmra.mxu3 %vm2591_vm6, %v6792_v19  ;;  %v6897_v19 = vld [vmem:[%s12518_s12 + $0x88] sm:$0xff] }
 0xc76   :  { %3364 = vmatpush.msra.mxu3 %v3363_v0  ;;  %3454 = vmatpush.msrb.mxu0 %v6897_v19  ;;  %v6867_v19 = vld [vmem:[%s12519_s11 + $0xe8] sm:$0xff] }
 0xc78   :  { %3365 = vmatpush.msra.mxu3 %v3362_v58  ;;  %3455 = vmatpush.msrb.mxu0 %v6896_v25  ;;  %v3319_v25 = vld [vmem:[%s12519_s11] sm:$0xff] }
 0xc7a   :  { %3366 = vmatpush.msra.mxu3 %v3361_v9 }
 0xc7c   :  { %3367 = vmatpush.msra.mxu3 %v3360_v23 }
 0xc7d   :  { %6814 = vmatmul.msk.f32.gmra.mxu3 %vm2591_vm6, %v6793_v56  ;;  %v2669_v56 = vadd.f32 %v9790_v55, %v9788_v28  ;;  %v2675_v28 = vadd.f32 %v9798_v48, %v9796_v8 }
 0xc7e   :  { %3368 = vmatpush.msra.mxu3 %v3359_v10 }
 0xc80   :  { %3369 = vmatpush.msra.mxu3 %v3358_v59 }
 0xc82   :  { %3370 = vmatpush.msra.mxu3 %v3357_v35 }
 0xc84   :  { %3371 = vmatpush.msra.mxu3 %v3356_v3 }
 0xc85   :  { %6815 = vmatmul.msk.f32.gmra.mxu3 %vm2591_vm6, %v6794_v16  ;;  %v2766_v16 = vadd.f32 %v9936_v53, %v2669_v56  ;;  %v3338_v56 = vld [vmem:[%s12519_s11 + $0x98] sm:$0xff] }
 0xc86   :  { %3372 = vmatpush.msra.mxu3 %v3355_v15 }
 0xc88   :  { %3373 = vmatpush.msra.mxu3 %v3354_v6 }
 0xc8a   :  { %3374 = vmatpush.msra.mxu3 %v3353_v11 }
 0xc8c   :  { %3375 = vmatpush.msra.mxu3 %v3352_v30 }
 0xc8d   :  { %6816 = vmatmul.msk.f32.gmra.mxu3 %vm2591_vm6, %v6795_v46 }
 0xc8e   :  { %3376 = vmatpush.msra.mxu3 %v3351_v54 }
 0xc90   :  { %3377 = vmatpush.msra.mxu3 %v3350_v27 }
 0xc92   :  { %3378 = vmatpush.msra.mxu3 %v3349_v26 }
 0xc93   :  { %v3259_v32 = vpop.f32.mrf.mxu1 }
 0xc94   :  { %6862 = vmatpush.msk.msra.mxu2 %vm223_vm0, %v3259_v32  ;;  %3379 = vmatpush.msra.mxu3 %v3348_v22  ;;  %v3204_v32 = vpop.f32.mrf.mxu0 }
 0xc95   :  { %6863 = vmatmul.msk.f32.vlgmr.msra.gmra.mxu2 %vm2591_vm6, %v6842_v18  ;;  %v2856_v18 = vadd.f32 %v10019_v13, %v2766_v16  ;;  %v6868_v16 = vld [vmem:[%s12519_s11 + $0xf0] sm:$0xff] }
 0xc9d   :  { %6864 = vmatmul.msk.f32.gmra.mxu2 %vm2591_vm6, %v6843_v51  ;;  %v2672_v51 = vadd.f32 %v9794_v31, %v9792_v29  ;;  %v7502_v29 = vld [vmem:[%s12509_s2] sm:$0x3f] }
 0xc9e   :  { %v3310_v31 = vperm.slane %v7502_v29, 3  ;;  %v7012_v29 = vld [vmem:[%s12518_s12 + $0x158] sm:$0xff] }
 0xca5   :  { %6865 = vmatmul.msk.f32.gmra.mxu2 %vm2591_vm6, %v6844_v45  ;;  %v2946_v45 = vadd.f32 %v9938_v49, %v2856_v18  ;;  %v3207_v49 = vpop.f32.mrf.mxu0  ;;  %v3339_v18 = vld [vmem:[%s12519_s11 + $0xa0] sm:$0xff] }
 0xca7   :  { %v3036_v0 = vadd.f32 %v10142_v60, %v2946_v45  ;;  %v3340_v45 = vld [vmem:[%s12519_s11 + $0xa8] sm:$0xff] }
 0xcad   :  { %6866 = vmatmul.msk.f32.gmra.mxu2 %vm2591_vm6, %v6845_v21  ;;  %v2767_v21 = vadd.f32 %v9940_v52, %v2672_v51  ;;  %v2768_v52 = vadd.f32 %v9944_v1, %v2675_v28  ;;  %v3210_v59 = vpop.f32.mrf.mxu0  ;;  %v3321_v51 = vld [vmem:[%s12519_s11 + $0x10] sm:$0xff]  ;;  %v7013_v28 = vld [vmem:[%s12518_s12 + $0x160] sm:$0xff] }
 0xcaf   :  { %v2857_v20 = vadd.f32 %v10021_v14, %v2767_v21  ;;  %v2858_v9 = vadd.f32 %v10023_v44, %v2768_v52  ;;  %v6870_v21 = vld [vmem:[%s12519_s11 + $0x100] sm:$0xff] }
 0xcb0   :  { %v7009_v52 = vld [vmem:[%s12518_s12 + $0x140] sm:$0xff] }
 0xcb1   :  { %v2947_v55 = vadd.f32 %v9942_v39, %v2857_v20  ;;  %v2678_v39 = vadd.f32 %v9802_v33, %v9800_v43  ;;  %v2948_v41 = vadd.f32 %v9946_v40, %v2858_v9  ;;  %v7015_v20 = vld [vmem:[%s12518_s12 + $0x170] sm:$0xff]  ;;  %v7008_v9 = vld [vmem:[%s12518_s12 + $0x138] sm:$0xff] }
 0xcb3   :  { %v3037_v60 = vadd.f32 %v10144_v12, %v2947_v55  ;;  %v2769_v12 = vadd.f32 %v9948_v47, %v2678_v39  ;;  %v3038_v44 = vadd.f32 %v10150_v34, %v2948_v41  ;;  %v3341_v55 = vld [vmem:[%s12519_s11 + $0xb0] sm:$0xff]  ;;  %v7005_v39 = vld [vmem:[%s12518_s12 + $0x120] sm:$0xff] }
 0xcb4   :  { %v3343_v41 = vld [vmem:[%s12519_s11 + $0xc0] sm:$0xff] }
 0xcb5   :  { %v2859_v63 = vadd.f32 %v10025_v17, %v2769_v12  ;;  %v3213_v6 = vpop.f32.mrf.mxu0  ;;  %v7003_v12 = vld [vmem:[%s12518_s12 + $0x110] sm:$0xff] }
 0xcb7   :  { %v2949_v43 = vadd.f32 %v9950_v38, %v2859_v63  ;;  %v3344_v63 = vld [vmem:[%s12519_s11 + $0xc8] sm:$0xff] }
 0xcb9   :  { %v3039_v47 = vadd.f32 %v10156_v2, %v2949_v43  ;;  %v7090_v43 = vld [vmem:[%s12518_s12 + $0x1f0] sm:$0xff] }
 0xcf8   :  { %v3114_v46 = vpop.f32.mrf.mxu3 }
 0xcf9   :  { %v3126_v58 = vadd.f32 %v3114_v46, %v3036_v0  ;;  %v3320_v46 = vld [vmem:[%s12519_s11 + $0x8] sm:$0xff]  ;;  %v7016_v0 = vld [vmem:[%s12518_s12 + $0x178] sm:$0xff] }
 0xcfb   :  { %v3216_v53 = vadd.f32 %v3204_v32, %v3126_v58  ;;  %v6869_v32 = vld [vmem:[%s12519_s11 + $0xf8] sm:$0xff]  ;;  %v7014_v58 = vld [vmem:[%s12518_s12 + $0x168] sm:$0xff] }
 0xd00   :  { %v3117_v4 = vpop.f32.mrf.mxu3 }
 0xd01   :  { %v3127_v57 = vadd.f32 %v3117_v4, %v3037_v60  ;;  %v3322_v4 = vld [vmem:[%s12519_s11 + $0x18] sm:$0xff] }
 0xd02   :  { %v3342_v60 = vld [vmem:[%s12519_s11 + $0xb8] sm:$0xff] }
 0xd03   :  { %v3217_v10 = vadd.f32 %v3207_v49, %v3127_v57  ;;  %v7010_v49 = vld [vmem:[%s12518_s12 + $0x148] sm:$0xff]  ;;  %v7007_v57 = vld [vmem:[%s12518_s12 + $0x130] sm:$0xff] }
 0xd08   :  { %v3120_v48 = vpop.f32.mrf.mxu3 }
 0xd09   :  { %v3128_v35 = vadd.f32 %v3120_v48, %v3038_v44  ;;  %v3324_v48 = vld [vmem:[%s12519_s11 + $0x28] sm:$0xff] }
 0xd0a   :  { %v7002_v44 = vld [vmem:[%s12518_s12 + $0x108] sm:$0xff] }
 0xd0b   :  { %v3218_v33 = vadd.f32 %v3210_v59, %v3128_v35  ;;  %v7001_v59 = vld [vmem:[%s12518_s12 + $0x100] sm:$0xff] }
 0xd0c   :  { %v6874_v35 = vld [vmem:[%s12519_s11 + $0x120] sm:$0xff] }
 0xd10   :  { %v3123_v40 = vpop.f32.mrf.mxu3 }
 0xd11   :  { %v3129_v15 = vadd.f32 %v3123_v40, %v3039_v47  ;;  %v3326_v40 = vld [vmem:[%s12519_s11 + $0x38] sm:$0xff]  ;;  %v3345_v47 = vld [vmem:[%s12519_s11 + $0xd0] sm:$0xff] }
 0xd13   :  { %v3219_v7 = vadd.f32 %v3213_v6, %v3129_v15  ;;  %v7087_v15 = vld [vmem:[%s12518_s12 + $0x1d8] sm:$0xff]  ;;  %v7085_v6 = vld [vmem:[%s12518_s12 + $0x1c8] sm:$0xff] }
 0xd18   :  { %v3294_v13 = vpop.f32.mrf.mxu2 }
 0xd19   :  { %v3306_v14 = vadd.f32 %v3294_v13, %v3216_v53  ;;  %v6871_v53 = vld [vmem:[%s12519_s11 + $0x108] sm:$0xff]  ;;  %v3323_v13 = vld [vmem:[%s12519_s11 + $0x20] sm:$0xff] }
 0xd1b   :  { %v3311_v23 = vadd.f32 %v3310_v31, %v3306_v14  ;;  %v6872_v14 = vld [vmem:[%s12519_s11 + $0x110] sm:$0xff] }
 0xd1d   :  { %v10315_v8 = vmax.f32 %v3311_v23, 0.0  ;;  %v7006_v23 = vld [vmem:[%s12518_s12 + $0x128] sm:$0xff] }
 0xd1f   :  { %3380 = vmatmul.f32.vlgmr.msra.gmra.mxu3 %v10315_v8  ;;  %3456 = vmatmul.f32.vlgmr.msrb.gmra.mxu0 %v10315_v8 }
 0xd20   :  { %v3297_v1 = vpop.f32.mrf.mxu2 }
 0xd21   :  { %v3307_v5 = vadd.f32 %v3297_v1, %v3217_v10  ;;  %v6873_v10 = vld [vmem:[%s12519_s11 + $0x118] sm:$0xff] }
 0xd22   :  { %v7004_v1 = vld [vmem:[%s12518_s12 + $0x118] sm:$0xff] }
 0xd23   :  { %v3312_v37 = vadd.f32 %v3310_v31, %v3307_v5  ;;  %v3325_v5 = vld [vmem:[%s12519_s11 + $0x30] sm:$0xff] }
 0xd25   :  { %v10325_v3 = vmax.f32 %v3312_v37, 0.0  ;;  %v7091_v37 = vld [vmem:[%s12518_s12 + $0x1f8] sm:$0xff] }
 0xd27   :  { %3383 = vmatmul.f32.gmra.mxu3 %v10325_v3  ;;  %3459 = vmatmul.f32.gmra.mxu0 %v10325_v3 }
 0xd28   :  { %v3300_v42 = vpop.f32.mrf.mxu2 }
 0xd29   :  { %v3308_v34 = vadd.f32 %v3300_v42, %v3218_v33  ;;  %v7089_v33 = vld [vmem:[%s12518_s12 + $0x1e8] sm:$0xff]  ;;  %v7088_v42 = vld [vmem:[%s12518_s12 + $0x1e0] sm:$0xff] }
 0xd2b   :  { %v3313_v50 = vadd.f32 %v3310_v31, %v3308_v34  ;;  %v6875_v34 = vld [vmem:[%s12519_s11 + $0x128] sm:$0xff] }
 0xd2d   :  { %v10331_v17 = vmax.f32 %v3313_v50, 0.0  ;;  %v7086_v50 = vld [vmem:[%s12518_s12 + $0x1d0] sm:$0xff] }
 0xd2f   :  { %3386 = vmatmul.f32.gmra.mxu3 %v10331_v17  ;;  %3462 = vmatmul.f32.gmra.mxu0 %v10331_v17 }
 0xd30   :  { %v3303_v38 = vpop.f32.mrf.mxu2 }
 0xd31   :  { %v3309_v11 = vadd.f32 %v3303_v38, %v3219_v7  ;;  %v3327_v7 = vld [vmem:[%s12519_s11 + $0x40] sm:$0xff] }
 0xd32   :  { %v7084_v38 = vld [vmem:[%s12518_s12 + $0x1c0] sm:$0xff] }
 0xd33   :  { %v3314_v61 = vadd.f32 %v3310_v31, %v3309_v11  ;;  %v7011_v31 = vld [vmem:[%s12518_s12 + $0x150] sm:$0xff]  ;;  %v3346_v11 = vld [vmem:[%s12519_s11 + $0xd8] sm:$0xff] }
 0xd35   :  { %v10335_v30 = vmax.f32 %v3314_v61, 0.0  ;;  %v6876_v61 = vld [vmem:[%s12519_s11 + $0x130] sm:$0xff] }
 0xd37   :  { %3389 = vmatmul.f32.gmra.mxu3 %v10335_v30  ;;  %3465 = vmatmul.f32.gmra.mxu0 %v10335_v30 }
 0xd9c   :  { %v3457_v2 = vpop.f32.mrf.mxu0 }
 0xda2   :  { %v3381_v62 = vpop.f32.mrf.mxu3 }
 0xda4   :  { %v3460_v54 = vpop.f32.mrf.mxu0 }
 0xdaa   :  { %v3384_v24 = vpop.f32.mrf.mxu3 }
 0xdac   :  { %v3463_v27 = vpop.f32.mrf.mxu0 }
 0xdb2   :  { %v3387_v36 = vpop.f32.mrf.mxu3 }
 0xdb4   :  { %v3466_v26 = vpop.f32.mrf.mxu0 }
 0xdb5   :  { %6912 = vmatpush.msk.msrb.mxu1 %vm1974_vm4, %v3466_v26  ;;  %v6877_v26 = vld [vmem:[%s12519_s11 + $0x138] sm:$0xff] }
 0xdb7   :  { %3573 = vmatpush.msrb.mxu1 %v3463_v27  ;;  %v7080_v27 = vld [vmem:[%s12518_s12 + $0x1a0] sm:$0xff] }
 0xdb9   :  { %3574 = vmatpush.msrb.mxu1 %v3460_v54  ;;  %v7081_v54 = vld [vmem:[%s12518_s12 + $0x1a8] sm:$0xff] }
 0xdba   :  { %v3390_v22 = vpop.f32.mrf.mxu3 }
 0xdbb   :  { %3575 = vmatpush.msrb.mxu1 %v3457_v2  ;;  %6942 = vmatpush.msk.msrb.mxu2 %vm1974_vm4, %v3390_v22  ;;  %v7083_v2 = vld [vmem:[%s12518_s12 + $0x1b8] sm:$0xff] }
 0xdbc   :  { %7497 = vmatpush.msk.msrb.mxu3 %vm1974_vm4, %v3390_v22  ;;  %6913 = vmatmul.msk.f32.vlgmr.msrb.gmra.mxu1 %vm3469_vm7, %v6867_v19  ;;  %v7079_v19 = vld [vmem:[%s12518_s12 + $0x198] sm:$0xff]  ;;  %v7078_v22 = vld [vmem:[%s12518_s12 + $0x190] sm:$0xff] }
 0xdbd   :  { %3767 = vmatpush.msrb.mxu2 %v3387_v36 }
 0xdbe   :  { %7498 = vmatpush.msrb.mxu3 %v3387_v36  ;;  %v3347_v36 = vld [vmem:[%s12519_s11 + $0xe0] sm:$0x1] }
 0xdbf   :  { %3768 = vmatpush.msrb.mxu2 %v3384_v24 }
 0xdc0   :  { %7499 = vmatpush.msrb.mxu3 %v3384_v24  ;;  %v3328_v24 = vld [vmem:[%s12519_s11 + $0x48] sm:$0xff] }
 0xdc1   :  { %3769 = vmatpush.msrb.mxu2 %v3381_v62 }
 0xdc2   :  { %7500 = vmatpush.msrb.mxu3 %v3381_v62  ;;  %6943 = vmatmul.msk.f32.vlgmr.msrb.gmra.mxu2 %vm3469_vm7, %v3319_v25  ;;  %v7082_v62 = vld [vmem:[%s12518_s12 + $0x1b0] sm:$0xff]  ;;  %v7077_v25 = vld [vmem:[%s12518_s12 + $0x188] sm:$0xff] }
 0xdc3   :  { %6962 = vmatmul.msk.f32.vlgmr.msrb.gmra.mxu3 %vm3469_vm7, %v3338_v56  ;;  %v3329_v56 = vld [vmem:[%s12519_s11 + $0x50] sm:$0xff] }
 0xdc4   :  { %6914 = vmatmul.msk.f32.gmra.mxu1 %vm3469_vm7, %v6868_v16  ;;  %3905 = vmatpush.msra.mxu3 %v7016_v0  ;;  %v7076_v16 = vld [vmem:[%s12518_s12 + $0x180] sm:$0xff]  ;;  %v6881_v0 = vld [vmem:[%s12519_s11 + $0x158] sm:$0xff] }
 0xdc6   :  { %3906 = vmatpush.msra.mxu3 %v7015_v20  ;;  %v3333_v20 = vld [vmem:[%s12519_s11 + $0x70] sm:$0xff] }
 0xdc8   :  { %3907 = vmatpush.msra.mxu3 %v7014_v58  ;;  %v6882_v58 = vld [vmem:[%s12519_s11 + $0x160] sm:$0xff] }
 0xdca   :  { %6944 = vmatmul.msk.f32.gmra.mxu2 %vm3469_vm7, %v3320_v46  ;;  %3908 = vmatpush.msra.mxu3 %v7013_v28  ;;  %v6878_v46 = vld [vmem:[%s12519_s11 + $0x140] sm:$0xff] }
 0xdcb   :  { %6963 = vmatmul.msk.f32.gmra.mxu3 %vm3469_vm7, %v3339_v18  ;;  %v3330_v18 = vld [vmem:[%s12519_s11 + $0x58] sm:$0xff] }
 0xdcc   :  { %6915 = vmatmul.msk.f32.gmra.mxu1 %vm3469_vm7, %v6869_v32  ;;  %3909 = vmatpush.msra.mxu3 %v7012_v29  ;;  %v6879_v32 = vld [vmem:[%s12519_s11 + $0x148] sm:$0xff] }
 0xdce   :  { %3910 = vmatpush.msra.mxu3 %v7011_v31  ;;  %v6884_v31 = vld [vmem:[%s12519_s11 + $0x170] sm:$0xff] }
 0xdd0   :  { %3911 = vmatpush.msra.mxu3 %v7010_v49 }
 0xdd2   :  { %6945 = vmatmul.msk.f32.gmra.mxu2 %vm3469_vm7, %v3321_v51  ;;  %3912 = vmatpush.msra.mxu3 %v7009_v52  ;;  %v3331_v51 = vld [vmem:[%s12519_s11 + $0x60] sm:$0xff] }
 0xdd3   :  { %6964 = vmatmul.msk.f32.gmra.mxu3 %vm3469_vm7, %v3340_v45  ;;  %v6880_v45 = vld [vmem:[%s12519_s11 + $0x150] sm:$0xff] }
 0xdd4   :  { %6916 = vmatmul.msk.f32.gmra.mxu1 %vm3469_vm7, %v6870_v21  ;;  %3913 = vmatpush.msra.mxu3 %v7008_v9  ;;  %v3332_v21 = vld [vmem:[%s12519_s11 + $0x68] sm:$0xff]  ;;  %v3337_v9 = vld [vmem:[%s12519_s11 + $0x90] sm:$0xff] }
 0xdd6   :  { %3914 = vmatpush.msra.mxu3 %v7007_v57 }
 0xdd8   :  { %3915 = vmatpush.msra.mxu3 %v7006_v23  ;;  %v6886_v23 = vld [vmem:[%s12519_s11 + $0x180] sm:$0xff] }
 0xdda   :  { %6946 = vmatmul.msk.f32.gmra.mxu2 %vm3469_vm7, %v3322_v4  ;;  %3916 = vmatpush.msra.mxu3 %v7005_v39  ;;  %v3334_v4 = vld [vmem:[%s12519_s11 + $0x78] sm:$0xff] }
 0xddb   :  { %6965 = vmatmul.msk.f32.gmra.mxu3 %vm3469_vm7, %v3341_v55  ;;  %v6883_v55 = vld [vmem:[%s12519_s11 + $0x168] sm:$0xff] }
 0xddc   :  { %6917 = vmatmul.msk.f32.gmra.mxu1 %vm3469_vm7, %v6871_v53  ;;  %3917 = vmatpush.msra.mxu3 %v7004_v1  ;;  %v3335_v53 = vld [vmem:[%s12519_s11 + $0x80] sm:$0xff] }
 0xdde   :  { %3918 = vmatpush.msra.mxu3 %v7003_v12  ;;  %v6888_v12 = vld [vmem:[%s12519_s11 + $0x190] sm:$0xff] }
 0xde0   :  { %3919 = vmatpush.msra.mxu3 %v7002_v44  ;;  %v7166_v44 = vld [vmem:[%s12518_s12 + $0x278] sm:$0xff] }
 0xde1   :  { %4503 = vmatpush.msra.mxu1 %v7166_v44 }
 0xde2   :  { %6947 = vmatmul.msk.f32.gmra.mxu2 %vm3469_vm7, %v3323_v13  ;;  %3920 = vmatpush.msra.mxu3 %v7001_v59  ;;  %v3336_v13 = vld [vmem:[%s12519_s11 + $0x88] sm:$0xff]  ;;  %v7165_v59 = vld [vmem:[%s12518_s12 + $0x270] sm:$0xff] }
 0xde3   :  { %6966 = vmatmul.msk.f32.gmra.mxu3 %vm3469_vm7, %v3342_v60  ;;  %v6885_v60 = vld [vmem:[%s12519_s11 + $0x178] sm:$0xff]  ;;  %4504 = vmatpush.msra.mxu1 %v7165_v59 }
 0xde4   :  { %6918 = vmatmul.msk.f32.gmra.mxu1 %vm3469_vm7, %v6872_v14  ;;  %4204 = vmatpush.msrb.mxu3 %v7091_v37  ;;  %v7164_v37 = vld [vmem:[%s12518_s12 + $0x268] sm:$0xff] }
 0xde5   :  { %4505 = vmatpush.msra.mxu1 %v7164_v37 }
 0xde6   :  { %4205 = vmatpush.msrb.mxu3 %v7090_v43  ;;  %v7163_v43 = vld [vmem:[%s12518_s12 + $0x260] sm:$0xff] }
 0xde7   :  { %4506 = vmatpush.msra.mxu1 %v7163_v43 }
 0xde8   :  { %4206 = vmatpush.msrb.mxu3 %v7089_v33  ;;  %v7162_v33 = vld [vmem:[%s12518_s12 + $0x258] sm:$0xff] }
 0xde9   :  { %4507 = vmatpush.msra.mxu1 %v7162_v33  ;;  %v6976_v33 = vld [vmem:[%s12519_s11 + $0x1f0] sm:$0xff] }
 0xdea   :  { %6948 = vmatmul.msk.f32.gmra.mxu2 %vm3469_vm7, %v3324_v48  ;;  %4207 = vmatpush.msrb.mxu3 %v7088_v42  ;;  %v7161_v42 = vld [vmem:[%s12518_s12 + $0x250] sm:$0xff] }
 0xdeb   :  { %6967 = vmatmul.msk.f32.gmra.mxu3 %vm3469_vm7, %v3343_v41  ;;  %v6887_v41 = vld [vmem:[%s12519_s11 + $0x188] sm:$0xff]  ;;  %4508 = vmatpush.msra.mxu1 %v7161_v42  ;;  %v7047_v42 = vld [vmem:[%s12519_s11 + $0x2b8] sm:$0xff] }
 0xdec   :  { %6919 = vmatmul.msk.f32.gmra.mxu1 %vm3469_vm7, %v6873_v10  ;;  %4208 = vmatpush.msrb.mxu3 %v7087_v15  ;;  %v7160_v15 = vld [vmem:[%s12518_s12 + $0x248] sm:$0xff] }
 0xded   :  { %4509 = vmatpush.msra.mxu1 %v7160_v15  ;;  %v6977_v15 = vld [vmem:[%s12519_s11 + $0x1f8] sm:$0xff] }
 0xdee   :  { %4209 = vmatpush.msrb.mxu3 %v7086_v50  ;;  %v7159_v50 = vld [vmem:[%s12518_s12 + $0x240] sm:$0xff] }
 0xdef   :  { %4510 = vmatpush.msra.mxu1 %v7159_v50  ;;  %v7048_v50 = vld [vmem:[%s12519_s11 + $0x2c0] sm:$0xff] }
 0xdf0   :  { %4210 = vmatpush.msrb.mxu3 %v7085_v6  ;;  %v7158_v6 = vld [vmem:[%s12518_s12 + $0x238] sm:$0xff] }
 0xdf1   :  { %4511 = vmatpush.msra.mxu1 %v7158_v6 }
 0xdf2   :  { %6949 = vmatmul.msk.f32.gmra.mxu2 %vm3469_vm7, %v3325_v5  ;;  %4211 = vmatpush.msrb.mxu3 %v7084_v38  ;;  %v7157_v38 = vld [vmem:[%s12518_s12 + $0x230] sm:$0xff] }
 0xdf3   :  { %6968 = vmatmul.msk.f32.gmra.mxu3 %vm3469_vm7, %v3344_v63  ;;  %4512 = vmatpush.msra.mxu1 %v7157_v38  ;;  %v6978_v38 = vld [vmem:[%s12519_s11 + $0x200] sm:$0xff] }
 0xdf4   :  { %6920 = vmatmul.msk.f32.gmra.mxu1 %vm3469_vm7, %v6874_v35  ;;  %4212 = vmatpush.msrb.mxu3 %v7083_v2  ;;  %v6889_v35 = vld [vmem:[%s12519_s11 + $0x198] sm:$0xff]  ;;  %v7156_v2 = vld [vmem:[%s12518_s12 + $0x228] sm:$0xff] }
 0xdf5   :  { %4513 = vmatpush.msra.mxu1 %v7156_v2 }
 0xdf6   :  { %4213 = vmatpush.msrb.mxu3 %v7082_v62  ;;  %v7155_v62 = vld [vmem:[%s12518_s12 + $0x220] sm:$0xff] }
 0xdf7   :  { %4514 = vmatpush.msra.mxu1 %v7155_v62  ;;  %v6979_v62 = vld [vmem:[%s12519_s11 + $0x208] sm:$0xff] }
 0xdf8   :  { %4214 = vmatpush.msrb.mxu3 %v7081_v54  ;;  %v7154_v54 = vld [vmem:[%s12518_s12 + $0x218] sm:$0xff] }
 0xdf9   :  { %4515 = vmatpush.msra.mxu1 %v7154_v54  ;;  %v7050_v54 = vld [vmem:[%s12519_s11 + $0x2d0] sm:$0xff] }
 0xdfa   :  { %6950 = vmatmul.msk.f32.gmra.mxu2 %vm3469_vm7, %v3326_v40  ;;  %4215 = vmatpush.msrb.mxu3 %v7080_v27  ;;  %v7153_v27 = vld [vmem:[%s12518_s12 + $0x210] sm:$0xff] }
 0xdfb   :  { %6969 = vmatmul.msk.f32.gmra.mxu3 %vm3469_vm7, %v3345_v47  ;;  %4516 = vmatpush.msra.mxu1 %v7153_v27 }
 0xdfc   :  { %6921 = vmatmul.msk.f32.gmra.mxu1 %vm3469_vm7, %v6875_v34  ;;  %4216 = vmatpush.msrb.mxu3 %v7079_v19  ;;  %v6890_v34 = vld [vmem:[%s12519_s11 + $0x1a0] sm:$0xff]  ;;  %v7152_v19 = vld [vmem:[%s12518_s12 + $0x208] sm:$0xff] }
 0xdfd   :  { %4517 = vmatpush.msra.mxu1 %v7152_v19  ;;  %v7051_v19 = vld [vmem:[%s12519_s11 + $0x2d8] sm:$0xff] }
 0xdfe   :  { %4217 = vmatpush.msrb.mxu3 %v7078_v22  ;;  %v7151_v22 = vld [vmem:[%s12518_s12 + $0x200] sm:$0xff] }
 0xdff   :  { %4518 = vmatpush.msra.mxu1 %v7151_v22 }
 0xe00   :  { %4218 = vmatpush.msrb.mxu3 %v7077_v25 }
 0xe02   :  { %6951 = vmatmul.msk.f32.gmra.mxu2 %vm3469_vm7, %v3327_v7  ;;  %4219 = vmatpush.msrb.mxu3 %v7076_v16  ;;  %v6893_v16 = vld [vmem:[%s12519_s11 + $0x1b8] sm:$0xff] }
 0xe03   :  { %6970 = vmatmul.msk.f32.gmra.mxu3 %vm3469_vm7, %v3346_v11 }
 0xe04   :  { %6922 = vmatmul.msk.f32.gmra.mxu1 %vm3469_vm7, %v6876_v61  ;;  %v6891_v61 = vld [vmem:[%s12519_s11 + $0x1a8] sm:$0xff] }
 0xe0a   :  { %6952 = vmatmul.msk.f32.gmra.mxu2 %vm3469_vm7, %v3328_v24 }
 0xe0b   :  { %6971 = vmatmul.msk.f32.gmra.mxu3 %vm3469_vm7, %v3347_v36 }
 0xe0c   :  { %6923 = vmatmul.msk.f32.gmra.mxu1 %vm3469_vm7, %v6877_v26  ;;  %v6892_v26 = vld [vmem:[%s12519_s11 + $0x1b0] sm:$0xff] }
 0xe12   :  { %6953 = vmatmul.msk.f32.gmra.mxu2 %vm3469_vm7, %v3329_v56 }
 0xe13   :  { %3921 = vmatmul.f32.vlgmr.msra.gmra.mxu3 %v10315_v8 }
 0xe14   :  { %6924 = vmatmul.msk.f32.gmra.mxu1 %vm3469_vm7, %v6878_v46 }
 0xe1a   :  { %6954 = vmatmul.msk.f32.gmra.mxu2 %vm3469_vm7, %v3330_v18 }
 0xe1b   :  { %3924 = vmatmul.f32.gmra.mxu3 %v10325_v3 }
 0xe1c   :  { %6925 = vmatmul.msk.f32.gmra.mxu1 %vm3469_vm7, %v6879_v32  ;;  %v6894_v32 = vld [vmem:[%s12519_s11 + $0x1c0] sm:$0xff] }
 0xe22   :  { %6955 = vmatmul.msk.f32.gmra.mxu2 %vm3469_vm7, %v3331_v51 }
 0xe23   :  { %3927 = vmatmul.f32.gmra.mxu3 %v10331_v17 }
 0xe24   :  { %6926 = vmatmul.msk.f32.gmra.mxu1 %vm3469_vm7, %v6880_v45 }
 0xe2a   :  { %6956 = vmatmul.msk.f32.gmra.mxu2 %vm3469_vm7, %v3332_v21  ;;  %v6895_v21 = vld [vmem:[%s12519_s11 + $0x1c8] sm:$0x1] }
 0xe2b   :  { %3930 = vmatmul.f32.gmra.mxu3 %v10335_v30 }
 0xe2c   :  { %6927 = vmatmul.msk.f32.gmra.mxu1 %vm3469_vm7, %v6881_v0 }
 0xe32   :  { %6957 = vmatmul.msk.f32.gmra.mxu2 %vm3469_vm7, %v3333_v20 }
 0xe33   :  { %4220 = vmatmul.f32.vlgmr.msrb.gmra.mxu3 %v10315_v8 }
 0xe34   :  { %6928 = vmatmul.msk.f32.gmra.mxu1 %vm3469_vm7, %v6882_v58 }
 0xe39   :  { %v10610_v28 = vpop.f32.mrf.mxu1 }
 0xe3a   :  { %6958 = vmatmul.msk.f32.gmra.mxu2 %vm3469_vm7, %v3334_v4 }
 0xe3b   :  { %4223 = vmatmul.f32.gmra.mxu3 %v10325_v3 }
 0xe3c   :  { %6929 = vmatmul.msk.f32.gmra.mxu1 %vm3469_vm7, %v6883_v55 }
 0xe41   :  { %v10621_v29 = vpop.f32.mrf.mxu1 }
 0xe42   :  { %6959 = vmatmul.msk.f32.gmra.mxu2 %vm3469_vm7, %v3335_v53 }
 0xe43   :  { %4226 = vmatmul.f32.gmra.mxu3 %v10331_v17 }
 0xe44   :  { %6930 = vmatmul.msk.f32.gmra.mxu1 %vm3469_vm7, %v6884_v31  ;;  %v6972_v31 = vld [vmem:[%s12519_s11 + $0x1d0] sm:$0xff] }
 0xe46   :  { %v10629_v49 = vpop.f32.mrf.mxu3 }
 0xe47   :  { %12523 = vst [vmem:[#allocation2_spill] sm:$0xff] %v10629_v49  ;;  %v7272_v49 = vld [vmem:[%s12519_s11 + $0x570] sm:$0xff] }
 0xe49   :  { %v10634_v52 = vpop.f32.mrf.mxu1 }
 0xe4a   :  { %6960 = vmatmul.msk.f32.gmra.mxu2 %vm3469_vm7, %v3336_v13 }
 0xe4b   :  { %4229 = vmatmul.f32.gmra.mxu3 %v10335_v30 }
 0xe4c   :  { %6931 = vmatmul.msk.f32.gmra.mxu1 %vm3469_vm7, %v6885_v60 }
 0xe4e   :  { %v10642_v14 = vpop.f32.mrf.mxu3 }
 0xe4f   :  { %12524 = vst [vmem:[#allocation3_spill] sm:$0xff] %v10642_v14 }
 0xe51   :  { %v10647_v57 = vpop.f32.mrf.mxu1 }
 0xe52   :  { %6961 = vmatmul.msk.f32.gmra.mxu2 %vm3469_vm7, %v3337_v9  ;;  %v6973_v9 = vld [vmem:[%s12519_s11 + $0x1d8] sm:$0xff] }
 0xe54   :  { %6932 = vmatmul.msk.f32.gmra.mxu1 %vm3469_vm7, %v6886_v23 }
 0xe56   :  { %v10654_v48 = vpop.f32.mrf.mxu3 }
 0xe57   :  { %12525 = vst [vmem:[#allocation4_spill] sm:$0xff] %v10654_v48 }
 0xe59   :  { %v10656_v39 = vpop.f32.mrf.mxu1 }
 0xe5c   :  { %6933 = vmatmul.msk.f32.gmra.mxu1 %vm3469_vm7, %v6887_v41 }
 0xe5e   :  { %v10662_v10 = vpop.f32.mrf.mxu3 }
 0xe5f   :  { %12526 = vst [vmem:[#allocation5_spill] sm:$0xff] %v10662_v10 }
 0xe61   :  { %v10664_v1 = vpop.f32.mrf.mxu1 }
 0xe64   :  { %6934 = vmatmul.msk.f32.gmra.mxu1 %vm3469_vm7, %v6888_v12  ;;  %v6974_v12 = vld [vmem:[%s12519_s11 + $0x1e0] sm:$0xff] }
 0xe66   :  { %v10673_v5 = vpop.f32.mrf.mxu3 }
 0xe67   :  { %12527 = vst [vmem:[#allocation6_spill] sm:$0xff] %v10673_v5 }
 0xe69   :  { %v10678_v63 = vpop.f32.mrf.mxu1 }
 0xe6c   :  { %6935 = vmatmul.msk.f32.gmra.mxu1 %vm3469_vm7, %v6889_v35  ;;  %v6975_v35 = vld [vmem:[%s12519_s11 + $0x1e8] sm:$0xff] }
 0xe6e   :  { %v10693_v40 = vpop.f32.mrf.mxu3 }
 0xe6f   :  { %12528 = vst [vmem:[#allocation7_spill] sm:$0xff] %v10693_v40  ;;  %v7075_v40 = vld [vmem:[%s12519_s11 + $0x398] sm:$0x1] }
 0xe71   :  { %v10698_v47 = vpop.f32.mrf.mxu1 }
 0xe74   :  { %6936 = vmatmul.msk.f32.gmra.mxu1 %vm3469_vm7, %v6890_v34 }
 0xe76   :  { %v10713_v7 = vpop.f32.mrf.mxu3 }
 0xe77   :  { %12529 = vst [vmem:[#allocation8_spill] sm:$0xff] %v10713_v7  ;;  %v7074_v7 = vld [vmem:[%s12519_s11 + $0x390] sm:$0xff] }
 0xe79   :  { %v10718_v11 = vpop.f32.mrf.mxu1 }
 0xe7c   :  { %6937 = vmatmul.msk.f32.gmra.mxu1 %vm3469_vm7, %v6891_v61  ;;  %v7049_v61 = vld [vmem:[%s12519_s11 + $0x2c8] sm:$0xff] }
 0xe7e   :  { %v10733_v24 = vpop.f32.mrf.mxu3 }
 0xe7f   :  { %12530 = vst [vmem:[#allocation9_spill] sm:$0xff] %v10733_v24  ;;  %v7073_v24 = vld [vmem:[%s12519_s11 + $0x388] sm:$0xff] }
 0xe81   :  { %v10738_v36 = vpop.f32.mrf.mxu1 }
 0xe84   :  { %6938 = vmatmul.msk.f32.gmra.mxu1 %vm3469_vm7, %v6892_v26  ;;  %v6980_v26 = vld [vmem:[%s12519_s11 + $0x210] sm:$0xff] }
 0xe86   :  { %v10750_v25 = vpop.f32.mrf.mxu3 }
 0xe87   :  { %12531 = vst [vmem:[#allocation10_spill] sm:$0xff] %v10750_v25  ;;  %v7133_v25 = vld [vmem:[%s12519_s11 + $0x3f8] sm:$0xff] }
 0xe89   :  { %v10752_v56 = vpop.f32.mrf.mxu1 }
 0xe8c   :  { %6939 = vmatmul.msk.f32.gmra.mxu1 %vm3469_vm7, %v6893_v16  ;;  %v6981_v16 = vld [vmem:[%s12519_s11 + $0x218] sm:$0xff] }
 0xe8e   :  { %v10758_v46 = vpop.f32.mrf.mxu3 }
 0xe8f   :  { %12532 = vst [vmem:[#allocation11_spill] sm:$0xff] %v10758_v46 }
 0xe91   :  { %v10760_v18 = vpop.f32.mrf.mxu1 }
 0xe94   :  { %6940 = vmatmul.msk.f32.gmra.mxu1 %vm3469_vm7, %v6894_v32  ;;  %v7052_v32 = vld [vmem:[%s12519_s11 + $0x2e0] sm:$0xff] }
 0xe96   :  { %v3922_v51 = vpop.f32.mrf.mxu3 }
 0xe99   :  { %v10766_v45 = vpop.f32.mrf.mxu1 }
 0xe9c   :  { %6941 = vmatmul.msk.f32.gmra.mxu1 %vm3469_vm7, %v6895_v21  ;;  %v6982_v21 = vld [vmem:[%s12519_s11 + $0x220] sm:$0xff] }
 0xe9e   :  { %v3925_v0 = vpop.f32.mrf.mxu3 }
 0xea1   :  { %v10772_v20 = vpop.f32.mrf.mxu1 }
 0xea4   :  { %4519 = vmatmul.f32.vlgmr.msra.gmra.mxu1 %v10315_v8 }
 0xea6   :  { %v3928_v58 = vpop.f32.mrf.mxu3 }
 0xea9   :  { %v10775_v4 = vpop.f32.mrf.mxu1 }
 0xeac   :  { %4522 = vmatmul.f32.gmra.mxu1 %v10325_v3 }
 0xeae   :  { %v3931_v55 = vpop.f32.mrf.mxu3 }
 0xeaf   :  { %7017 = vmatpush.msk.msra.mxu0 %vm1974_vm4, %v3931_v55 }
 0xeb1   :  { %4037 = vmatpush.msra.mxu0 %v3928_v58  ;;  %v10779_v53 = vpop.f32.mrf.mxu1  ;;  %v10876_v58 = vpop.f32.mrf.mxu2 }
 0xeb2   :  { %12533 = vst [vmem:[#allocation12_spill] sm:$0xff] %v10779_v53 }
 0xeb3   :  { %4038 = vmatpush.msra.mxu0 %v3925_v0  ;;  %v7053_v0 = vld [vmem:[%s12519_s11 + $0x2e8] sm:$0xff] }
 0xeb4   :  { %4525 = vmatmul.f32.gmra.mxu1 %v10331_v17 }
 0xeb5   :  { %4039 = vmatpush.msra.mxu0 %v3922_v51 }
 0xeb6   :  { %7018 = vmatmul.msk.f32.vlgmr.msra.gmra.mxu0 %vm3469_vm7, %v6972_v31  ;;  %v4221_v13 = vpop.f32.mrf.mxu3  ;;  %v6983_v31 = vld [vmem:[%s12519_s11 + $0x228] sm:$0xff] }
 0xeb9   :  { %v10786_v60 = vpop.f32.mrf.mxu1 }
 0xeba   :  { %12534 = vst [vmem:[#allocation13_spill] sm:$0xff] %v10786_v60 }
 0xebc   :  { %4528 = vmatmul.f32.gmra.mxu1 %v10335_v30 }
 0xebe   :  { %7019 = vmatmul.msk.f32.gmra.mxu0 %vm3469_vm7, %v6973_v9  ;;  %v4224_v23 = vpop.f32.mrf.mxu3 }
 0xec1   :  { %v10793_v41 = vpop.f32.mrf.mxu1 }
 0xec2   :  { %12535 = vst [vmem:[#allocation14_spill] sm:$0xff] %v10793_v41  ;;  %v7368_v41 = vld [vmem:[%s12519_s11 + $0x700] sm:$0xff] }
 0xec6   :  { %7020 = vmatmul.msk.f32.gmra.mxu0 %vm3469_vm7, %v6974_v12  ;;  %v4227_v44 = vpop.f32.mrf.mxu3  ;;  %v6984_v12 = vld [vmem:[%s12519_s11 + $0x230] sm:$0xff] }
 0xec9   :  { %v10799_v59 = vpop.f32.mrf.mxu1 }
 0xeca   :  { %12536 = vst [vmem:[#allocation15_spill] sm:$0xff] %v10799_v59  ;;  %v7276_v59 = vld [vmem:[%s12519_s11 + $0x590] sm:$0xff] }
 0xece   :  { %7021 = vmatmul.msk.f32.gmra.mxu0 %vm3469_vm7, %v6975_v35  ;;  %v4230_v37 = vpop.f32.mrf.mxu3 }
 0xecf   :  { %7092 = vmatpush.msk.msra.mxu3 %vm1974_vm4, %v4230_v37  ;;  %v6985_v37 = vld [vmem:[%s12519_s11 + $0x238] sm:$0xff] }
 0xed1   :  { %4336 = vmatpush.msra.mxu3 %v4227_v44  ;;  %v10806_v43 = vpop.f32.mrf.mxu1  ;;  %v7055_v44 = vld [vmem:[%s12519_s11 + $0x2f8] sm:$0xff] }
 0xed2   :  { %12537 = vst [vmem:[#allocation16_spill] sm:$0xff] %v10806_v43 }
 0xed3   :  { %4337 = vmatpush.msra.mxu3 %v4224_v23  ;;  %v10890_v23 = vpop.f32.mrf.mxu2 }
 0xed5   :  { %4338 = vmatpush.msra.mxu3 %v4221_v13  ;;  %v7054_v13 = vld [vmem:[%s12519_s11 + $0x2f0] sm:$0xff] }
 0xed6   :  { %7022 = vmatmul.msk.f32.gmra.mxu0 %vm3469_vm7, %v6976_v33  ;;  %7093 = vmatmul.msk.f32.vlgmr.msra.gmra.mxu3 %vm3469_vm7, %v7047_v42  ;;  %v7056_v33 = vld [vmem:[%s12519_s11 + $0x300] sm:$0xff] }
 0xed9   :  { %v10816_v34 = vpop.f32.mrf.mxu1 }
 0xeda   :  { %12538 = vst [vmem:[#allocation17_spill] sm:$0xff] %v10816_v34 }
 0xedb   :  { %v10908_v42 = vpop.f32.mrf.mxu2 }
 0xede   :  { %7023 = vmatmul.msk.f32.gmra.mxu0 %vm3469_vm7, %v6977_v15  ;;  %7094 = vmatmul.msk.f32.gmra.mxu3 %vm3469_vm7, %v7048_v50  ;;  %v7241_v50 = vld [vmem:[%s12518_s12 + $0x2f8] sm:$0xff] }
 0xedf   :  { %4802 = vmatpush.msrb.mxu0 %v7241_v50  ;;  %v7060_v50 = vld [vmem:[%s12519_s11 + $0x320] sm:$0xff] }
 0xee1   :  { %v10826_v6 = vpop.f32.mrf.mxu1 }
 0xee2   :  { %12539 = vst [vmem:[#allocation18_spill] sm:$0xff] %v10826_v6 }
 0xee6   :  { %7024 = vmatmul.msk.f32.gmra.mxu0 %vm3469_vm7, %v6978_v38  ;;  %7095 = vmatmul.msk.f32.gmra.mxu3 %vm3469_vm7, %v7049_v61  ;;  %v6986_v38 = vld [vmem:[%s12519_s11 + $0x240] sm:$0xff]  ;;  %v7057_v61 = vld [vmem:[%s12519_s11 + $0x308] sm:$0xff] }
 0xee9   :  { %v10836_v2 = vpop.f32.mrf.mxu1 }
 0xeea   :  { %12540 = vst [vmem:[#allocation19_spill] sm:$0xff] %v10836_v2 }
 0xeee   :  { %7025 = vmatmul.msk.f32.gmra.mxu0 %vm3469_vm7, %v6979_v62  ;;  %7096 = vmatmul.msk.f32.gmra.mxu3 %vm3469_vm7, %v7050_v54  ;;  %v10923_v62 = vpop.f32.mrf.mxu2 }
 0xef1   :  { %v10846_v27 = vpop.f32.mrf.mxu1 }
 0xef2   :  { %12541 = vst [vmem:[#allocation20_spill] sm:$0xff] %v10846_v27 }
 0xef6   :  { %7026 = vmatmul.msk.f32.gmra.mxu0 %vm3469_vm7, %v6980_v26  ;;  %7097 = vmatmul.msk.f32.gmra.mxu3 %vm3469_vm7, %v7051_v19  ;;  %v6987_v26 = vld [vmem:[%s12519_s11 + $0x248] sm:$0xff]  ;;  %v7058_v19 = vld [vmem:[%s12519_s11 + $0x310] sm:$0xff] }
 0xef9   :  { %v10856_v22 = vpop.f32.mrf.mxu1 }
 0xefa   :  { %12542 = vst [vmem:[#allocation21_spill] sm:$0xff] %v10856_v22  ;;  %v7376_v22 = vld [vmem:[%s12518_s12 + $0x380] sm:$0xff] }
 0xefe   :  { %7027 = vmatmul.msk.f32.gmra.mxu0 %vm3469_vm7, %v6981_v16  ;;  %7098 = vmatmul.msk.f32.gmra.mxu3 %vm3469_vm7, %v7052_v32  ;;  %v7240_v16 = vld [vmem:[%s12518_s12 + $0x2f0] sm:$0xff]  ;;  %v10936_v32 = vpop.f32.mrf.mxu2 }
 0xeff   :  { %4803 = vmatpush.msrb.mxu0 %v7240_v16  ;;  %v7061_v16 = vld [vmem:[%s12519_s11 + $0x328] sm:$0xff] }
 0xf01   :  { %v10866_v51 = vpop.f32.mrf.mxu1 }
 0xf02   :  { %12543 = vst [vmem:[#allocation22_spill] sm:$0xff] %v10866_v51 }
 0xf06   :  { %7028 = vmatmul.msk.f32.gmra.mxu0 %vm3469_vm7, %v6982_v21  ;;  %7099 = vmatmul.msk.f32.gmra.mxu3 %vm3469_vm7, %v7053_v0 }
 0xf09   :  { %v10878_v55 = vpop.f32.mrf.mxu1 }
 0xf0a   :  { %12544 = vst [vmem:[#allocation23_spill] sm:$0xff] %v10878_v55 }
 0xf0e   :  { %7029 = vmatmul.msk.f32.gmra.mxu0 %vm3469_vm7, %v6983_v31  ;;  %7100 = vmatmul.msk.f32.gmra.mxu3 %vm3469_vm7, %v7054_v13  ;;  %v6988_v31 = vld [vmem:[%s12519_s11 + $0x250] sm:$0xff]  ;;  %v7059_v13 = vld [vmem:[%s12519_s11 + $0x318] sm:$0xff] }
 0xf11   :  { %v10888_v9 = vpop.f32.mrf.mxu1 }
 0xf12   :  { %12545 = vst [vmem:[#allocation24_spill] sm:$0xff] %v10888_v9  ;;  %v7134_v9 = vld [vmem:[%s12519_s11 + $0x400] sm:$0xff] }
 0xf16   :  { %7030 = vmatmul.msk.f32.gmra.mxu0 %vm3469_vm7, %v6984_v12  ;;  %7101 = vmatmul.msk.f32.gmra.mxu3 %vm3469_vm7, %v7055_v44  ;;  %v10947_v44 = vpop.f32.mrf.mxu2 }
 0xf19   :  { %v10900_v35 = vpop.f32.mrf.mxu1 }
 0xf1a   :  { %12546 = vst [vmem:[#allocation25_spill] sm:$0xff] %v10900_v35  ;;  %v7304_v35 = vld [vmem:[%s12518_s12 + $0x318] sm:$0xff] }
 0xf1e   :  { %7031 = vmatmul.msk.f32.gmra.mxu0 %vm3469_vm7, %v6985_v37  ;;  %7102 = vmatmul.msk.f32.gmra.mxu3 %vm3469_vm7, %v7056_v33  ;;  %v6989_v33 = vld [vmem:[%s12519_s11 + $0x258] sm:$0xff] }
 0xf21   :  { %v4520_v15 = vpop.f32.mrf.mxu1 }
 0xf26   :  { %7032 = vmatmul.msk.f32.gmra.mxu0 %vm3469_vm7, %v6986_v38  ;;  %7103 = vmatmul.msk.f32.gmra.mxu3 %vm3469_vm7, %v7057_v61  ;;  %v7239_v38 = vld [vmem:[%s12518_s12 + $0x2e8] sm:$0xff]  ;;  %v7122_v61 = vld [vmem:[%s12519_s11 + $0x3a0] sm:$0xff] }
 0xf27   :  { %4804 = vmatpush.msrb.mxu0 %v7239_v38 }
 0xf29   :  { %v4523_v54 = vpop.f32.mrf.mxu1 }
 0xf2e   :  { %7033 = vmatmul.msk.f32.gmra.mxu0 %vm3469_vm7, %v6987_v26  ;;  %7104 = vmatmul.msk.f32.gmra.mxu3 %vm3469_vm7, %v7058_v19  ;;  %v6990_v19 = vld [vmem:[%s12519_s11 + $0x260] sm:$0xff] }
 0xf31   :  { %v4526_v21 = vpop.f32.mrf.mxu1 }
 0xf33   :  { %v4041_v0 = vpop.f32.mrf.mxu0 }
 0xf36   :  { %7034 = vmatmul.msk.f32.gmra.mxu0 %vm3469_vm7, %v6988_v31  ;;  %7105 = vmatmul.msk.f32.gmra.mxu3 %vm3469_vm7, %v7059_v13  ;;  %v6991_v31 = vld [vmem:[%s12519_s11 + $0x268] sm:$0xff]  ;;  %v7062_v13 = vld [vmem:[%s12519_s11 + $0x330] sm:$0xff] }
 0xf39   :  { %v4529_v12 = vpop.f32.mrf.mxu1 }
 0xf3a   :  { %7167 = vmatpush.msk.msra.mxu2 %vm1974_vm4, %v4529_v12  ;;  %v7238_v12 = vld [vmem:[%s12518_s12 + $0x2e0] sm:$0xff] }
 0xf3b   :  { %v4044_v37 = vpop.f32.mrf.mxu0  ;;  %4805 = vmatpush.msrb.mxu0 %v7238_v12 }
 0xf3c   :  { %4635 = vmatpush.msra.mxu2 %v4526_v21  ;;  %v10970_v21 = vpop.f32.mrf.mxu2 }
 0xf3e   :  { %7035 = vmatmul.msk.f32.gmra.mxu0 %vm3469_vm7, %v6989_v33  ;;  %7106 = vmatmul.msk.f32.gmra.mxu3 %vm3469_vm7, %v7060_v50  ;;  %v7124_v50 = vld [vmem:[%s12519_s11 + $0x3b0] sm:$0xff] }
 0xf3f   :  { %4636 = vmatpush.msra.mxu2 %v4523_v54 }
 0xf41   :  { %4637 = vmatpush.msra.mxu2 %v4520_v15  ;;  %v7123_v15 = vld [vmem:[%s12519_s11 + $0x3a8] sm:$0xff] }
 0xf42   :  { %7168 = vmatmul.msk.f32.vlgmr.msra.gmra.mxu2 %vm3469_vm7, %v7122_v61  ;;  %v6992_v61 = vld [vmem:[%s12519_s11 + $0x270] sm:$0xff] }
 0xf43   :  { %v4047_v26 = vpop.f32.mrf.mxu0 }
 0xf44   :  { %v10991_v33 = vpop.f32.mrf.mxu2 }
 0xf46   :  { %7036 = vmatmul.msk.f32.gmra.mxu0 %vm3469_vm7, %v6990_v19  ;;  %7107 = vmatmul.msk.f32.gmra.mxu3 %vm3469_vm7, %v7061_v16  ;;  %v7063_v19 = vld [vmem:[%s12519_s11 + $0x338] sm:$0xff]  ;;  %v3772_v16 = vadd.f32 %v10876_v58, %v10610_v28  ;;  %v7064_v58 = vld [vmem:[%s12519_s11 + $0x340] sm:$0xff] }
 0xf47   :  { %v6993_v28 = vld [vmem:[%s12519_s11 + $0x278] sm:$0xff] }
 0xf4a   :  { %7169 = vmatmul.msk.f32.gmra.mxu2 %vm3469_vm7, %v7123_v15  ;;  %v7125_v15 = vld [vmem:[%s12519_s11 + $0x3b8] sm:$0xff] }
 0xf4b   :  { %v10978_v54 = vpop.f32.mrf.mxu0 }
 0xf4e   :  { %7037 = vmatmul.msk.f32.gmra.mxu0 %vm3469_vm7, %v6991_v31  ;;  %7108 = vmatmul.msk.f32.gmra.mxu3 %vm3469_vm7, %v7062_v13  ;;  %v4128_v31 = vadd.f32 %v4041_v0, %v3772_v16  ;;  %v11012_v13 = vpop.f32.mrf.mxu2  ;;  %v7237_v0 = vld [vmem:[%s12518_s12 + $0x2d8] sm:$0xff] }
 0xf4f   :  { %4806 = vmatpush.msrb.mxu0 %v7237_v0 }
 0xf52   :  { %7170 = vmatmul.msk.f32.gmra.mxu2 %vm3469_vm7, %v7124_v50 }
 0xf53   :  { %v10997_v38 = vpop.f32.mrf.mxu0 }
 0xf56   :  { %7038 = vmatmul.msk.f32.gmra.mxu0 %vm3469_vm7, %v6992_v61  ;;  %7109 = vmatmul.msk.f32.gmra.mxu3 %vm3469_vm7, %v7063_v19  ;;  %v3775_v61 = vadd.f32 %v10890_v23, %v10621_v29  ;;  %v7126_v19 = vld [vmem:[%s12519_s11 + $0x3c0] sm:$0xff]  ;;  %v7065_v23 = vld [vmem:[%s12519_s11 + $0x348] sm:$0xff] }
 0xf57   :  { %v6994_v29 = vld [vmem:[%s12519_s11 + $0x280] sm:$0xff] }
 0xf58   :  { %v4129_v16 = vadd.f32 %v4044_v37, %v3775_v61  ;;  %v3778_v37 = vadd.f32 %v10908_v42, %v10634_v52  ;;  %v7236_v61 = vld [vmem:[%s12518_s12 + $0x2d0] sm:$0xff]  ;;  %v7235_v52 = vld [vmem:[%s12518_s12 + $0x2c8] sm:$0xff] }
 0xf59   :  { %v4340_v12 = vpop.f32.mrf.mxu3  ;;  %4807 = vmatpush.msrb.mxu0 %v7236_v61 }
 0xf5a   :  { %v11014_v50 = vadd.f32 %v4340_v12, %v4128_v31  ;;  %7171 = vmatmul.msk.f32.gmra.mxu2 %vm3469_vm7, %v7125_v15  ;;  %v11038_v12 = vpop.f32.mrf.mxu2 }
 0xf5b   :  { %v11017_v46 = vpop.f32.mrf.mxu0  ;;  %4808 = vmatpush.msrb.mxu0 %v7235_v52  ;;  %v7231_v52 = vld [vmem:[%s12518_s12 + $0x2a8] sm:$0xff] }
 0xf5e   :  { %7039 = vmatmul.msk.f32.gmra.mxu0 %vm3469_vm7, %v6993_v28  ;;  %7110 = vmatmul.msk.f32.gmra.mxu3 %vm3469_vm7, %v7064_v58  ;;  %v7127_v28 = vld [vmem:[%s12519_s11 + $0x3c8] sm:$0xff]  ;;  %v4130_v58 = vadd.f32 %v4047_v26, %v3778_v37  ;;  %v3781_v37 = vadd.f32 %v10923_v62, %v10647_v57 }
 0xf5f   :  { %v6995_v26 = vld [vmem:[%s12519_s11 + $0x288] sm:$0xff] }
 0xf60   :  { %v4131_v61 = vadd.f32 %v10978_v54, %v3781_v37  ;;  %v6996_v54 = vld [vmem:[%s12519_s11 + $0x290] sm:$0xff]  ;;  %v3784_v37 = vadd.f32 %v10936_v32, %v10656_v39 }
 0xf61   :  { %v4343_v15 = vpop.f32.mrf.mxu3  ;;  %v7228_v39 = vld [vmem:[%s12518_s12 + $0x290] sm:$0xff] }
 0xf62   :  { %v11035_v31 = vadd.f32 %v4343_v15, %v4129_v16  ;;  %7172 = vmatmul.msk.f32.gmra.mxu2 %vm3469_vm7, %v7126_v19  ;;  %v7066_v15 = vld [vmem:[%s12519_s11 + $0x350] sm:$0xff] }
 0xf63   :  { %v11040_v0 = vpop.f32.mrf.mxu0 }
 0xf66   :  { %7040 = vmatmul.msk.f32.gmra.mxu0 %vm3469_vm7, %v6994_v29  ;;  %7111 = vmatmul.msk.f32.gmra.mxu3 %vm3469_vm7, %v7065_v23  ;;  %v7234_v29 = vld [vmem:[%s12518_s12 + $0x2c0] sm:$0xff]  ;;  %v11075_v23 = vpop.f32.mrf.mxu2 }
 0xf67   :  { %4809 = vmatpush.msrb.mxu0 %v7234_v29  ;;  %v7230_v29 = vld [vmem:[%s12518_s12 + $0x2a0] sm:$0xff] }
 0xf69   :  { %v4346_v19 = vpop.f32.mrf.mxu3 }
 0xf6a   :  { %v11058_v16 = vadd.f32 %v4346_v19, %v4130_v58  ;;  %7173 = vmatmul.msk.f32.gmra.mxu2 %vm3469_vm7, %v7127_v28  ;;  %v7233_v28 = vld [vmem:[%s12518_s12 + $0x2b8] sm:$0xff]  ;;  %v7128_v58 = vld [vmem:[%s12519_s11 + $0x3d0] sm:$0xff] }
 0xf6b   :  { %v11064_v42 = vpop.f32.mrf.mxu0  ;;  %4810 = vmatpush.msrb.mxu0 %v7233_v28  ;;  %v7232_v19 = vld [vmem:[%s12518_s12 + $0x2b0] sm:$0xff]  ;;  %v7229_v28 = vld [vmem:[%s12518_s12 + $0x298] sm:$0xff] }
 0xf6d   :  { %4811 = vmatpush.msrb.mxu0 %v7232_v19  ;;  %v4132_v19 = vadd.f32 %v10997_v38, %v3784_v37  ;;  %v6997_v38 = vld [vmem:[%s12519_s11 + $0x298] sm:$0xff] }
 0xf6e   :  { %7041 = vmatmul.msk.f32.gmra.mxu0 %vm3469_vm7, %v6995_v26  ;;  %7112 = vmatmul.msk.f32.gmra.mxu3 %vm3469_vm7, %v7066_v15  ;;  %v7067_v15 = vld [vmem:[%s12519_s11 + $0x358] sm:$0xff] }
 0xf6f   :  { %4812 = vmatpush.msrb.mxu0 %v7231_v52  ;;  %v7227_v52 = vld [vmem:[%s12518_s12 + $0x288] sm:$0xff]  ;;  %v7316_v37 = vld [vmem:[%s12518_s12 + $0x378] sm:$0xff] }
 0xf71   :  { %v4349_v57 = vpop.f32.mrf.mxu3  ;;  %4813 = vmatpush.msrb.mxu0 %v7230_v29  ;;  %v7226_v29 = vld [vmem:[%s12518_s12 + $0x280] sm:$0xff] }
 0xf72   :  { %v11091_v62 = vadd.f32 %v4349_v57, %v4131_v61  ;;  %7174 = vmatmul.msk.f32.gmra.mxu2 %vm3469_vm7, %v7128_v58  ;;  %v11115_v58 = vpop.f32.mrf.mxu2  ;;  %v7129_v61 = vld [vmem:[%s12519_s11 + $0x3d8] sm:$0xff] }
 0xf73   :  { %v11097_v26 = vpop.f32.mrf.mxu0  ;;  %4814 = vmatpush.msrb.mxu0 %v7229_v28  ;;  %v7130_v28 = vld [vmem:[%s12519_s11 + $0x3e0] sm:$0xff] }
 0xf75   :  { %4815 = vmatpush.msrb.mxu0 %v7228_v39  ;;  %v7314_v39 = vld [vmem:[%s12518_s12 + $0x368] sm:$0xff] }
 0xf76   :  { %7042 = vmatmul.msk.f32.gmra.mxu0 %vm3469_vm7, %v6996_v54  ;;  %7113 = vmatmul.msk.f32.gmra.mxu3 %vm3469_vm7, %v7067_v15  ;;  %v7068_v15 = vld [vmem:[%s12519_s11 + $0x360] sm:$0xff] }
 0xf77   :  { %4816 = vmatpush.msrb.mxu0 %v7227_v52  ;;  %v6998_v52 = vld [vmem:[%s12519_s11 + $0x2a0] sm:$0xff] }
 0xf79   :  { %v4352_v32 = vpop.f32.mrf.mxu3  ;;  %4817 = vmatpush.msrb.mxu0 %v7226_v29  ;;  %v7312_v29 = vld [vmem:[%s12518_s12 + $0x358] sm:$0xff] }
 0xf7a   :  { %v11124_v57 = vadd.f32 %v4352_v32, %v4132_v19  ;;  %7175 = vmatmul.msk.f32.gmra.mxu2 %vm3469_vm7, %v7129_v61  ;;  %v7315_v61 = vld [vmem:[%s12518_s12 + $0x370] sm:$0xff]  ;;  %v11152_v19 = vpop.f32.mrf.mxu2 }
 0xf7b   :  { %v11130_v54 = vpop.f32.mrf.mxu0  ;;  %5101 = vmatpush.msra.mxu0 %v7316_v37  ;;  %v7131_v37 = vld [vmem:[%s12519_s11 + $0x3e8] sm:$0xff] }
 0xf7d   :  { %5102 = vmatpush.msra.mxu0 %v7315_v61  ;;  %v7310_v61 = vld [vmem:[%s12518_s12 + $0x348] sm:$0xff] }
 0xf7e   :  { %7043 = vmatmul.msk.f32.gmra.mxu0 %vm3469_vm7, %v6997_v38  ;;  %7114 = vmatmul.msk.f32.gmra.mxu3 %vm3469_vm7, %v7068_v15  ;;  %v7069_v38 = vld [vmem:[%s12519_s11 + $0x368] sm:$0xff]  ;;  %v7313_v15 = vld [vmem:[%s12518_s12 + $0x360] sm:$0xff] }
 0xf7f   :  { %5103 = vmatpush.msra.mxu0 %v7314_v39 }
 0xf81   :  { %5104 = vmatpush.msra.mxu0 %v7313_v15  ;;  %v7070_v15 = vld [vmem:[%s12519_s11 + $0x370] sm:$0xff] }
 0xf82   :  { %7176 = vmatmul.msk.f32.gmra.mxu2 %vm3469_vm7, %v7130_v28  ;;  %v7311_v28 = vld [vmem:[%s12518_s12 + $0x350] sm:$0xff]  ;;  %v11184_v39 = vpop.f32.mrf.mxu2 }
 0xf83   :  { %v11158_v32 = vpop.f32.mrf.mxu0  ;;  %5105 = vmatpush.msra.mxu0 %v7312_v29  ;;  %v7309_v29 = vld [vmem:[%s12518_s12 + $0x340] sm:$0xff] }
 0xf85   :  { %5106 = vmatpush.msra.mxu0 %v7311_v28  ;;  %v7132_v28 = vld [vmem:[%s12519_s11 + $0x3f0] sm:$0xff] }
 0xf86   :  { %7044 = vmatmul.msk.f32.gmra.mxu0 %vm3469_vm7, %v6998_v52  ;;  %7115 = vmatmul.msk.f32.gmra.mxu3 %vm3469_vm7, %v7069_v38  ;;  %v6999_v38 = vld [vmem:[%s12519_s11 + $0x2a8] sm:$0xff] }
 0xf87   :  { %5107 = vmatpush.msra.mxu0 %v7310_v61  ;;  %v7307_v61 = vld [vmem:[%s12518_s12 + $0x330] sm:$0xff] }
 0xf89   :  { %5108 = vmatpush.msra.mxu0 %v7309_v29  ;;  %v7000_v29 = vld [vmem:[%s12519_s11 + $0x2b0] sm:$0x1] }
 0xf8a   :  { %7177 = vmatmul.msk.f32.gmra.mxu2 %vm3469_vm7, %v7131_v37  ;;  %v7308_v37 = vld [vmem:[%s12518_s12 + $0x338] sm:$0xff] }
 0xf8b   :  { %v11186_v52 = vpop.f32.mrf.mxu0  ;;  %5109 = vmatpush.msra.mxu0 %v7308_v37  ;;  %v7071_v37 = vld [vmem:[%s12519_s11 + $0x378] sm:$0xff] }
 0xf8d   :  { %5110 = vmatpush.msra.mxu0 %v7307_v61  ;;  %v7305_v61 = vld [vmem:[%s12518_s12 + $0x320] sm:$0xff] }
 0xf8e   :  { %7045 = vmatmul.msk.f32.gmra.mxu0 %vm3469_vm7, %v6999_v38  ;;  %7116 = vmatmul.msk.f32.gmra.mxu3 %vm3469_vm7, %v7070_v15  ;;  %v7306_v38 = vld [vmem:[%s12518_s12 + $0x328] sm:$0xff] }
 0xf8f   :  { %5111 = vmatpush.msra.mxu0 %v7306_v38  ;;  %v7303_v38 = vld [vmem:[%s12518_s12 + $0x310] sm:$0xff] }
 0xf91   :  { %5112 = vmatpush.msra.mxu0 %v7305_v61  ;;  %v7072_v61 = vld [vmem:[%s12519_s11 + $0x380] sm:$0xff] }
 0xf92   :  { %7178 = vmatmul.msk.f32.gmra.mxu2 %vm3469_vm7, %v7132_v28  ;;  %v11223_v28 = vpop.f32.mrf.mxu2 }
 0xf93   :  { %v11212_v15 = vpop.f32.mrf.mxu0  ;;  %12547 = vst [vmem:[#allocation26_spill] sm:$0xff] %v11223_v28  ;;  %5113 = vmatpush.msra.mxu0 %v7304_v35  ;;  %v7301_v35 = vld [vmem:[%s12518_s12 + $0x300] sm:$0xff] }
 0xf95   :  { %5114 = vmatpush.msra.mxu0 %v7303_v38 }
 0xf96   :  { %7046 = vmatmul.msk.f32.gmra.mxu0 %vm3469_vm7, %v7000_v29  ;;  %7117 = vmatmul.msk.f32.gmra.mxu3 %vm3469_vm7, %v7071_v37  ;;  %v7302_v29 = vld [vmem:[%s12518_s12 + $0x308] sm:$0xff] }
 0xf97   :  { %5115 = vmatpush.msra.mxu0 %v7302_v29  ;;  %v7390_v29 = vld [vmem:[%s12518_s12 + $0x3f0] sm:$0xff] }
 0xf99   :  { %5116 = vmatpush.msra.mxu0 %v7301_v35 }
 0xf9a   :  { %7179 = vmatmul.msk.f32.gmra.mxu2 %vm3469_vm7, %v7133_v25  ;;  %v7391_v25 = vld [vmem:[%s12518_s12 + $0x3f8] sm:$0xff]  ;;  %v11253_v38 = vpop.f32.mrf.mxu2 }
 0xf9b   :  { %v11240_v37 = vpop.f32.mrf.mxu0  ;;  %12548 = vst [vmem:[#allocation27_spill] sm:$0xff] %v11253_v38  ;;  %v7438_v38 = vld [vmem:[%s12519_s11 + $0x7c0] sm:$0xff] }
 0xf9e   :  { %7118 = vmatmul.msk.f32.gmra.mxu3 %vm3469_vm7, %v7072_v61  ;;  %4818 = vmatmul.f32.vlgmr.msrb.gmra.mxu0 %v10315_v8  ;;  %v7389_v61 = vld [vmem:[%s12518_s12 + $0x3e8] sm:$0xff] }
 0xf9f   :  { %5400 = vmatpush.msrb.mxu0 %v7391_v25  ;;  %v7388_v25 = vld [vmem:[%s12518_s12 + $0x3e0] sm:$0xff] }
 0xfa1   :  { %5401 = vmatpush.msrb.mxu0 %v7390_v29  ;;  %v7135_v29 = vld [vmem:[%s12519_s11 + $0x408] sm:$0xff] }
 0xfa2   :  { %7180 = vmatmul.msk.f32.gmra.mxu2 %vm3469_vm7, %v7134_v9  ;;  %v7387_v9 = vld [vmem:[%s12518_s12 + $0x3d8] sm:$0xff]  ;;  %v11284_v55 = vpop.f32.mrf.mxu2 }
 0xfa3   :  { %v11265_v35 = vpop.f32.mrf.mxu0  ;;  %5402 = vmatpush.msrb.mxu0 %v7389_v61  ;;  %v7386_v61 = vld [vmem:[%s12518_s12 + $0x3d0] sm:$0xff]  ;;  %12550 = vst [vmem:[#allocation29_spill] sm:$0xff] %v11284_v55 }
 0xfa4   :  { %12549 = vst [vmem:[#allocation28_spill] sm:$0xff] %v11265_v35 }
 0xfa5   :  { %5403 = vmatpush.msrb.mxu0 %v7388_v25 }
 0xfa6   :  { %7119 = vmatmul.msk.f32.gmra.mxu3 %vm3469_vm7, %v7073_v24  ;;  %4821 = vmatmul.f32.gmra.mxu0 %v10325_v3  ;;  %v7385_v24 = vld [vmem:[%s12518_s12 + $0x3c8] sm:$0xff] }
 0xfa7   :  { %5404 = vmatpush.msrb.mxu0 %v7387_v9  ;;  %v7384_v9 = vld [vmem:[%s12518_s12 + $0x3c0] sm:$0xff] }
 0xfa9   :  { %5405 = vmatpush.msrb.mxu0 %v7386_v61  ;;  %v7136_v61 = vld [vmem:[%s12519_s11 + $0x410] sm:$0xff] }
 0xfaa   :  { %7181 = vmatmul.msk.f32.gmra.mxu2 %vm3469_vm7, %v7135_v29  ;;  %v7383_v29 = vld [vmem:[%s12518_s12 + $0x3b8] sm:$0xff] }
 0xfab   :  { %v11290_v25 = vpop.f32.mrf.mxu0  ;;  %5406 = vmatpush.msrb.mxu0 %v7385_v24  ;;  %v7382_v24 = vld [vmem:[%s12518_s12 + $0x3b0] sm:$0xff] }
 0xfac   :  { %12551 = vst [vmem:[#allocation30_spill] sm:$0xff] %v11290_v25 }
 0xfad   :  { %5407 = vmatpush.msrb.mxu0 %v7384_v9  ;;  %v11313_v9 = vpop.f32.mrf.mxu2 }
 0xfae   :  { %7120 = vmatmul.msk.f32.gmra.mxu3 %vm3469_vm7, %v7074_v7  ;;  %4824 = vmatmul.f32.gmra.mxu0 %v10331_v17  ;;  %v7381_v7 = vld [vmem:[%s12518_s12 + $0x3a8] sm:$0xff]  ;;  %12552 = vst [vmem:[#allocation31_spill] sm:$0xff] %v11313_v9  ;;  %v7289_v9 = vld [vmem:[%s12519_s11 + $0x5f8] sm:$0xff] }
 0xfaf   :  { %5408 = vmatpush.msrb.mxu0 %v7383_v29  ;;  %v7380_v29 = vld [vmem:[%s12518_s12 + $0x3a0] sm:$0xff] }
 0xfb1   :  { %5409 = vmatpush.msrb.mxu0 %v7382_v24  ;;  %v7137_v24 = vld [vmem:[%s12519_s11 + $0x418] sm:$0xff] }
 0xfb2   :  { %7182 = vmatmul.msk.f32.gmra.mxu2 %vm3469_vm7, %v7136_v61  ;;  %v7379_v61 = vld [vmem:[%s12518_s12 + $0x398] sm:$0xff] }
 0xfb3   :  { %v11315_v51 = vpop.f32.mrf.mxu0  ;;  %5410 = vmatpush.msrb.mxu0 %v7381_v7  ;;  %v7378_v7 = vld [vmem:[%s12518_s12 + $0x390] sm:$0xff] }
 0xfb4   :  { %12553 = vst [vmem:[#allocation32_spill] sm:$0xff] %v11315_v51  ;;  %v7425_v51 = vld [vmem:[%s12519_s11 + $0x758] sm:$0xff] }
 0xfb5   :  { %5411 = vmatpush.msrb.mxu0 %v7380_v29  ;;  %v11343_v5 = vpop.f32.mrf.mxu2 }
 0xfb6   :  { %7121 = vmatmul.msk.f32.gmra.mxu3 %vm3469_vm7, %v7075_v40  ;;  %4827 = vmatmul.f32.gmra.mxu0 %v10335_v30  ;;  %v7377_v40 = vld [vmem:[%s12518_s12 + $0x388] sm:$0xff]  ;;  %12555 = vst [vmem:[#allocation34_spill] sm:$0xff] %v11343_v5 }
 0xfb7   :  { %5412 = vmatpush.msrb.mxu0 %v7379_v61  ;;  %v7138_v61 = vld [vmem:[%s12519_s11 + $0x420] sm:$0xff] }
 0xfb9   :  { %5413 = vmatpush.msrb.mxu0 %v7378_v7 }
 0xfba   :  { %7183 = vmatmul.msk.f32.gmra.mxu2 %vm3469_vm7, %v7137_v24 }
 0xfbb   :  { %v11338_v29 = vpop.f32.mrf.mxu0  ;;  %5414 = vmatpush.msrb.mxu0 %v7377_v40 }
 0xfbc   :  { %12554 = vst [vmem:[#allocation33_spill] sm:$0xff] %v11338_v29  ;;  %v7286_v29 = vld [vmem:[%s12519_s11 + $0x5e0] sm:$0xff] }
 0xfbd   :  { %5415 = vmatpush.msrb.mxu0 %v7376_v22  ;;  %v7139_v22 = vld [vmem:[%s12519_s11 + $0x428] sm:$0xff] }
 0xfbe   :  { %5117 = vmatmul.f32.vlgmr.msra.gmra.mxu0 %v10315_v8 }
 0xfc2   :  { %7184 = vmatmul.msk.f32.gmra.mxu2 %vm3469_vm7, %v7138_v61 }
 0xfc3   :  { %v11350_v24 = vpop.f32.mrf.mxu0 }
 0xfc4   :  { %12556 = vst [vmem:[#allocation35_spill] sm:$0xff] %v11350_v24 }
 0xfc5   :  { %v4639_v7 = vpop.f32.mrf.mxu2 }
 0xfc6   :  { %v11353_v40 = vadd.f32 %v4639_v7, %v11014_v50  ;;  %5120 = vmatmul.f32.gmra.mxu0 %v10325_v3  ;;  %v7140_v50 = vld [vmem:[%s12519_s11 + $0x430] sm:$0xff] }
 0xfca   :  { %7185 = vmatmul.msk.f32.gmra.mxu2 %vm3469_vm7, %v7139_v22 }
 0xfcb   :  { %v11360_v27 = vpop.f32.mrf.mxu0 }
 0xfcc   :  { %12557 = vst [vmem:[#allocation36_spill] sm:$0xff] %v11360_v27 }
 0xfcd   :  { %v4642_v10 = vpop.f32.mrf.mxu2 }
 0xfce   :  { %v11363_v2 = vadd.f32 %v4642_v10, %v11035_v31  ;;  %5123 = vmatmul.f32.gmra.mxu0 %v10331_v17  ;;  %v7141_v10 = vld [vmem:[%s12519_s11 + $0x438] sm:$0xff] }
 0xfd2   :  { %7186 = vmatmul.msk.f32.gmra.mxu2 %vm3469_vm7, %v7140_v50  ;;  %v4355_v50 = vpop.f32.mrf.mxu3 }
 0xfd3   :  { %v11370_v61 = vpop.f32.mrf.mxu0 }
 0xfd4   :  { %12558 = vst [vmem:[#allocation37_spill] sm:$0xff] %v11370_v61 }
 0xfd5   :  { %v4645_v7 = vpop.f32.mrf.mxu2 }
 0xfd6   :  { %v11373_v48 = vadd.f32 %v4645_v7, %v11058_v16  ;;  %5126 = vmatmul.f32.gmra.mxu0 %v10335_v30  ;;  %v7142_v16 = vld [vmem:[%s12519_s11 + $0x440] sm:$0xff] }
 0xfda   :  { %7187 = vmatmul.msk.f32.gmra.mxu2 %vm3469_vm7, %v7141_v10  ;;  %v4358_v14 = vpop.f32.mrf.mxu3 }
 0xfdb   :  { %v11380_v31 = vpop.f32.mrf.mxu0 }
 0xfdc   :  { %12559 = vst [vmem:[#allocation38_spill] sm:$0xff] %v11380_v31 }
 0xfdd   :  { %v4648_v22 = vpop.f32.mrf.mxu2 }
 0xfde   :  { %v11383_v6 = vadd.f32 %v4648_v22, %v11091_v62  ;;  %5416 = vmatmul.f32.vlgmr.msrb.gmra.mxu0 %v10315_v8  ;;  %v7143_v62 = vld [vmem:[%s12519_s11 + $0x448] sm:$0xff]  ;;  %v3787_v22 = vadd.f32 %v10947_v44, %v10664_v1  ;;  %v7144_v44 = vld [vmem:[%s12519_s11 + $0x450] sm:$0xff] }
 0xfe0   :  { %v4133_v31 = vadd.f32 %v11017_v46, %v3787_v22  ;;  %v7464_v46 = vld [vmem:[%s12518_s12 + $0x468] sm:$0xff] }
 0xfe2   :  { %7188 = vmatmul.msk.f32.gmra.mxu2 %vm3469_vm7, %v7142_v16  ;;  %v7466_v16 = vld [vmem:[%s12518_s12 + $0x478] sm:$0xff] }
 0xfe3   :  { %v11390_v7 = vpop.f32.mrf.mxu0  ;;  %5699 = vmatpush.msrb.mxu2 %v7466_v16 }
 0xfe4   :  { %12560 = vst [vmem:[#allocation39_spill] sm:$0xff] %v11390_v7 }
 0xfe5   :  { %v4651_v61 = vpop.f32.mrf.mxu2 }
 0xfe6   :  { %v11393_v10 = vadd.f32 %v4651_v61, %v11124_v57  ;;  %5419 = vmatmul.f32.gmra.mxu0 %v10325_v3  ;;  %v4432_v57 = vadd.f32 %v4355_v50, %v4133_v31  ;;  %v7465_v61 = vld [vmem:[%s12518_s12 + $0x470] sm:$0xff]  ;;  %v3790_v31 = vadd.f32 %v10970_v21, %v10678_v63  ;;  %v7463_v50 = vld [vmem:[%s12518_s12 + $0x460] sm:$0xff] }
 0xfe7   :  { %5700 = vmatpush.msrb.mxu2 %v7465_v61  ;;  %v7461_v63 = vld [vmem:[%s12518_s12 + $0x450] sm:$0xff]  ;;  %v4361_v61 = vpop.f32.mrf.mxu3 }
 0xfe9   :  { %5701 = vmatpush.msrb.mxu2 %v7464_v46  ;;  %v7145_v46 = vld [vmem:[%s12519_s11 + $0x458] sm:$0xff] }
 0xfea   :  { %7189 = vmatmul.msk.f32.gmra.mxu2 %vm3469_vm7, %v7143_v62  ;;  %v7462_v62 = vld [vmem:[%s12518_s12 + $0x458] sm:$0xff] }
 0xfeb   :  { %v11406_v7 = vpop.f32.mrf.mxu0  ;;  %5702 = vmatpush.msrb.mxu2 %v7463_v50  ;;  %v7458_v50 = vld [vmem:[%s12518_s12 + $0x438] sm:$0xff] }
 0xfec   :  { %12561 = vst [vmem:[#allocation40_spill] sm:$0xff] %v11406_v7 }
 0xfed   :  { %v4654_v34 = vpop.f32.mrf.mxu2  ;;  %5703 = vmatpush.msrb.mxu2 %v7462_v62 }
 0xfee   :  { %v11411_v1 = vadd.f32 %v4654_v34, %v4432_v57  ;;  %5422 = vmatmul.f32.gmra.mxu0 %v10331_v17  ;;  %v4134_v34 = vadd.f32 %v11040_v0, %v3790_v31  ;;  %v7460_v0 = vld [vmem:[%s12518_s12 + $0x448] sm:$0xff] }
 0xfef   :  { %5704 = vmatpush.msrb.mxu2 %v7461_v63  ;;  %v7146_v63 = vld [vmem:[%s12519_s11 + $0x460] sm:$0xff] }
 0xff0   :  { %v4433_v16 = vadd.f32 %v4358_v14, %v4134_v34  ;;  %v3793_v14 = vadd.f32 %v10991_v33, %v10698_v47  ;;  %v7457_v47 = vld [vmem:[%s12518_s12 + $0x430] sm:$0xff] }
 0xff1   :  { %5705 = vmatpush.msrb.mxu2 %v7460_v0  ;;  %v7455_v0 = vld [vmem:[%s12518_s12 + $0x420] sm:$0xff] }
 0xff2   :  { %7190 = vmatmul.msk.f32.gmra.mxu2 %vm3469_vm7, %v7144_v44  ;;  %v7459_v44 = vld [vmem:[%s12518_s12 + $0x440] sm:$0xff]  ;;  %v4135_v31 = vadd.f32 %v11064_v42, %v3793_v14  ;;  %v7456_v42 = vld [vmem:[%s12518_s12 + $0x428] sm:$0xff]  ;;  %v7454_v14 = vld [vmem:[%s12518_s12 + $0x418] sm:$0xff] }
 0xff3   :  { %v11430_v22 = vpop.f32.mrf.mxu0  ;;  %5706 = vmatpush.msrb.mxu2 %v7459_v44 }
 0xff4   :  { %12562 = vst [vmem:[#allocation41_spill] sm:$0xff] %v11430_v22  ;;  %v4434_v62 = vadd.f32 %v4361_v61, %v4135_v31  ;;  %v4364_v61 = vpop.f32.mrf.mxu3 }
 0xff5   :  { %v4657_v21 = vpop.f32.mrf.mxu2  ;;  %5707 = vmatpush.msrb.mxu2 %v7458_v50 }
 0xff6   :  { %v11435_v57 = vadd.f32 %v4657_v21, %v4433_v16  ;;  %5425 = vmatmul.f32.gmra.mxu0 %v10335_v30  ;;  %v3796_v21 = vadd.f32 %v11012_v13, %v10718_v11  ;;  %v7453_v11 = vld [vmem:[%s12518_s12 + $0x410] sm:$0xff] }
 0xff7   :  { %5708 = vmatpush.msrb.mxu2 %v7457_v47  ;;  %v7451_v47 = vld [vmem:[%s12518_s12 + $0x400] sm:$0xff] }
 0xff9   :  { %5709 = vmatpush.msrb.mxu2 %v7456_v42 }
 0xffa   :  { %7191 = vmatmul.msk.f32.gmra.mxu2 %vm3469_vm7, %v7145_v46  ;;  %v4136_v46 = vadd.f32 %v11097_v26, %v3796_v21  ;;  %v7452_v26 = vld [vmem:[%s12518_s12 + $0x408] sm:$0xff] }
 0xffb   :  { %v11454_v34 = vpop.f32.mrf.mxu0  ;;  %5710 = vmatpush.msrb.mxu2 %v7455_v0 }
 0xffc   :  { %12563 = vst [vmem:[#allocation42_spill] sm:$0xff] %v11454_v34  ;;  %v4435_v31 = vadd.f32 %v4364_v61, %v4136_v46  ;;  %v7149_v61 = vld [vmem:[%s12519_s11 + $0x478] sm:$0xff]  ;;  %v11509_v46 = vpop.f32.mrf.mxu3 }
 0xffd   :  { %v4660_v33 = vpop.f32.mrf.mxu2  ;;  %5711 = vmatpush.msrb.mxu2 %v7454_v14 }
 0xffe   :  { %v11459_v16 = vadd.f32 %v4660_v33, %v4434_v62  ;;  %v7147_v62 = vld [vmem:[%s12519_s11 + $0x468] sm:$0xff] }
 0xfff   :  { %5712 = vmatpush.msrb.mxu2 %v7453_v11  ;;  %v7150_v11 = vld [vmem:[%s12519_s11 + $0x480] sm:$0x1] }
0x1001   :  { %5713 = vmatpush.msrb.mxu2 %v7452_v26 }
0x1002   :  { %7192 = vmatmul.msk.f32.gmra.mxu2 %vm3469_vm7, %v7146_v63  ;;  %v7148_v63 = vld [vmem:[%s12519_s11 + $0x470] sm:$0xff] }
0x1003   :  { %v11477_v44 = vpop.f32.mrf.mxu0  ;;  %5714 = vmatpush.msrb.mxu2 %v7451_v47 }
0x1004   :  { %12564 = vst [vmem:[#allocation43_spill] sm:$0xff] %v11477_v44 }
0x1005   :  { %v4663_v13 = vpop.f32.mrf.mxu2 }
0x1006   :  { %v11482_v50 = vadd.f32 %v4663_v13, %v4435_v31  ;;  %v11517_v13 = vpop.f32.mrf.mxu3 }
0x100a   :  { %7193 = vmatmul.msk.f32.gmra.mxu2 %vm3469_vm7, %v7147_v62 }
0x100b   :  { %v11494_v33 = vpop.f32.mrf.mxu0 }
0x100c   :  { %12565 = vst [vmem:[#allocation44_spill] sm:$0xff] %v11494_v33 }
0x100d   :  { %v11496_v42 = vpop.f32.mrf.mxu2 }
0x1012   :  { %7194 = vmatmul.msk.f32.gmra.mxu2 %vm3469_vm7, %v7148_v63  ;;  %v11523_v63 = vpop.f32.mrf.mxu3 }
0x1013   :  { %v11502_v21 = vpop.f32.mrf.mxu0 }
0x1014   :  { %12566 = vst [vmem:[#allocation45_spill] sm:$0xff] %v11502_v21 }
0x1015   :  { %v11504_v0 = vpop.f32.mrf.mxu2 }
0x101a   :  { %7195 = vmatmul.msk.f32.gmra.mxu2 %vm3469_vm7, %v7149_v61  ;;  %v11531_v44 = vpop.f32.mrf.mxu3 }
0x101b   :  { %v4819_v14 = vpop.f32.mrf.mxu0 }
0x101d   :  { %v11512_v31 = vpop.f32.mrf.mxu2 }
0x1022   :  { %7196 = vmatmul.msk.f32.gmra.mxu2 %vm3469_vm7, %v7150_v11  ;;  %v11540_v34 = vpop.f32.mrf.mxu3 }
0x1023   :  { %v4822_v26 = vpop.f32.mrf.mxu0 }
0x1025   :  { %v11520_v62 = vpop.f32.mrf.mxu2 }
0x102a   :  { %5715 = vmatmul.f32.vlgmr.msrb.gmra.mxu2 %v10315_v8  ;;  %v7197_v8 = vld [vmem:[%s12519_s11 + $0x488] sm:$0xff] }
0x102b   :  { %v4825_v47 = vpop.f32.mrf.mxu0 }
0x102d   :  { %v11525_v61 = vpop.f32.mrf.mxu2 }
0x1032   :  { %5718 = vmatmul.f32.gmra.mxu2 %v10325_v3 }
0x1033   :  { %v4828_v21 = vpop.f32.mrf.mxu0 }
0x1034   :  { %7242 = vmatpush.msk.msrb.mxu1 %vm1974_vm4, %v4828_v21  ;;  %v7198_v21 = vld [vmem:[%s12519_s11 + $0x490] sm:$0xff] }
0x1035   :  { %v11529_v33 = vpop.f32.mrf.mxu2 }
0x1036   :  { %12567 = vst [vmem:[#allocation46_spill] sm:$0xff] %v11529_v33  ;;  %4934 = vmatpush.msrb.mxu1 %v4825_v47 }
0x1038   :  { %4935 = vmatpush.msrb.mxu1 %v4822_v26 }
0x103a   :  { %4936 = vmatpush.msrb.mxu1 %v4819_v14  ;;  %5721 = vmatmul.f32.gmra.mxu2 %v10331_v17  ;;  %v7199_v17 = vld [vmem:[%s12519_s11 + $0x498] sm:$0xff]  ;;  %v11552_v14 = vpop.f32.mrf.mxu3 }
0x103b   :  { %7243 = vmatmul.msk.f32.vlgmr.msrb.gmra.mxu1 %vm3469_vm7, %v7197_v8  ;;  %v5118_v11 = vpop.f32.mrf.mxu0  ;;  %12570 = vst [vmem:[#allocation49_spill] sm:$0xff] %v11552_v14 }
0x103d   :  { %v11538_v3 = vpop.f32.mrf.mxu2 }
0x103e   :  { %12568 = vst [vmem:[#allocation47_spill] sm:$0xff] %v11538_v3 }
0x1042   :  { %5724 = vmatmul.f32.gmra.mxu2 %v10335_v30  ;;  %v7200_v30 = vld [vmem:[%s12519_s11 + $0x4a0] sm:$0xff]  ;;  %v11561_v7 = vpop.f32.mrf.mxu3 }
0x1043   :  { %7244 = vmatmul.msk.f32.gmra.mxu1 %vm3469_vm7, %v7198_v21  ;;  %v5121_v26 = vpop.f32.mrf.mxu0  ;;  %12572 = vst [vmem:[#allocation51_spill] sm:$0xff] %v11561_v7 }
0x1045   :  { %v11547_v47 = vpop.f32.mrf.mxu2 }
0x1046   :  { %12569 = vst [vmem:[#allocation48_spill] sm:$0xff] %v11547_v47  ;;  %v7369_v47 = vld [vmem:[%s12519_s11 + $0x708] sm:$0xff] }
0x104b   :  { %7245 = vmatmul.msk.f32.gmra.mxu1 %vm3469_vm7, %v7199_v17  ;;  %v5124_v8 = vpop.f32.mrf.mxu0  ;;  %v7201_v17 = vld [vmem:[%s12519_s11 + $0x4a8] sm:$0xff] }
0x104d   :  { %v11555_v22 = vpop.f32.mrf.mxu2 }
0x104e   :  { %12571 = vst [vmem:[#allocation50_spill] sm:$0xff] %v11555_v22  ;;  %v7356_v22 = vld [vmem:[%s12519_s11 + $0x6a0] sm:$0xff] }
0x1053   :  { %7246 = vmatmul.msk.f32.gmra.mxu1 %vm3469_vm7, %v7200_v30  ;;  %v5127_v21 = vpop.f32.mrf.mxu0 }
0x1054   :  { %7317 = vmatpush.msk.msrb.mxu3 %vm1974_vm4, %v5127_v21  ;;  %v11576_v21 = vpop.f32.mrf.mxu3 }
0x1055   :  { %v11564_v27 = vpop.f32.mrf.mxu2  ;;  %12575 = vst [vmem:[#allocation54_spill] sm:$0xff] %v11576_v21  ;;  %v7370_v21 = vld [vmem:[%s12519_s11 + $0x710] sm:$0xff] }
0x1056   :  { %12573 = vst [vmem:[#allocation52_spill] sm:$0xff] %v11564_v27  ;;  %5233 = vmatpush.msrb.mxu3 %v5124_v8  ;;  %v7273_v8 = vld [vmem:[%s12519_s11 + $0x578] sm:$0xff]  ;;  %v7274_v27 = vld [vmem:[%s12519_s11 + $0x580] sm:$0xff] }
0x1058   :  { %5234 = vmatpush.msrb.mxu3 %v5121_v26  ;;  %v7202_v26 = vld [vmem:[%s12519_s11 + $0x4b0] sm:$0xff] }
0x105a   :  { %5235 = vmatpush.msrb.mxu3 %v5118_v11 }
0x105b   :  { %7247 = vmatmul.msk.f32.gmra.mxu1 %vm3469_vm7, %v7201_v17  ;;  %7318 = vmatmul.msk.f32.vlgmr.msrb.gmra.mxu3 %vm3469_vm7, %v7272_v49  ;;  %v5417_v30 = vpop.f32.mrf.mxu0 }
0x105c   :  { %v11588_v49 = vpop.f32.mrf.mxu3 }
0x105d   :  { %v11574_v43 = vpop.f32.mrf.mxu2  ;;  %12577 = vst [vmem:[#allocation56_spill] sm:$0xff] %v11588_v49 }
0x105e   :  { %12574 = vst [vmem:[#allocation53_spill] sm:$0xff] %v11574_v43  ;;  %v7203_v43 = vld [vmem:[%s12519_s11 + $0x4b8] sm:$0xff] }
0x1063   :  { %7248 = vmatmul.msk.f32.gmra.mxu1 %vm3469_vm7, %v7202_v26  ;;  %7319 = vmatmul.msk.f32.gmra.mxu3 %vm3469_vm7, %v7273_v8  ;;  %v5420_v11 = vpop.f32.mrf.mxu0  ;;  %v7204_v8 = vld [vmem:[%s12519_s11 + $0x4c0] sm:$0xff] }
0x1064   :  { %v11606_v5 = vpop.f32.mrf.mxu3 }
0x1065   :  { %v11586_v17 = vpop.f32.mrf.mxu2  ;;  %12579 = vst [vmem:[#allocation58_spill] sm:$0xff] %v11606_v5  ;;  %v7285_v5 = vld [vmem:[%s12519_s11 + $0x5d8] sm:$0xff] }
0x1066   :  { %12576 = vst [vmem:[#allocation55_spill] sm:$0xff] %v11586_v17  ;;  %v7275_v17 = vld [vmem:[%s12519_s11 + $0x588] sm:$0xff] }
0x106b   :  { %7249 = vmatmul.msk.f32.gmra.mxu1 %vm3469_vm7, %v7203_v43  ;;  %7320 = vmatmul.msk.f32.gmra.mxu3 %vm3469_vm7, %v7274_v27  ;;  %v5423_v26 = vpop.f32.mrf.mxu0 }
0x106d   :  { %v11598_v24 = vpop.f32.mrf.mxu2 }
0x106e   :  { %12578 = vst [vmem:[#allocation57_spill] sm:$0xff] %v11598_v24  ;;  %v7205_v24 = vld [vmem:[%s12519_s11 + $0x4c8] sm:$0xff] }
0x1073   :  { %7250 = vmatmul.msk.f32.gmra.mxu1 %vm3469_vm7, %v7204_v8  ;;  %7321 = vmatmul.msk.f32.gmra.mxu3 %vm3469_vm7, %v7275_v17  ;;  %v5426_v43 = vpop.f32.mrf.mxu0  ;;  %v7347_v8 = vld [vmem:[%s12519_s11 + $0x658] sm:$0xff]  ;;  %v11624_v17 = vpop.f32.mrf.mxu3 }
0x1074   :  { %7392 = vmatpush.msk.msra.mxu0 %vm1974_vm4, %v5426_v43  ;;  %12581 = vst [vmem:[#allocation60_spill] sm:$0xff] %v11624_v17  ;;  %v7277_v43 = vld [vmem:[%s12519_s11 + $0x598] sm:$0xff]  ;;  %v7284_v17 = vld [vmem:[%s12519_s11 + $0x5d0] sm:$0xff] }
0x1075   :  { %v11611_v27 = vpop.f32.mrf.mxu2 }
0x1076   :  { %12580 = vst [vmem:[#allocation59_spill] sm:$0xff] %v11611_v27  ;;  %5532 = vmatpush.msra.mxu0 %v5423_v26  ;;  %v7206_v26 = vld [vmem:[%s12519_s11 + $0x4d0] sm:$0xff]  ;;  %v7279_v27 = vld [vmem:[%s12519_s11 + $0x5a8] sm:$0xff] }
0x1078   :  { %5533 = vmatpush.msra.mxu0 %v5420_v11 }
0x107a   :  { %5534 = vmatpush.msra.mxu0 %v5417_v30 }
0x107b   :  { %7251 = vmatmul.msk.f32.gmra.mxu1 %vm3469_vm7, %v7205_v24  ;;  %7322 = vmatmul.msk.f32.gmra.mxu3 %vm3469_vm7, %v7276_v59  ;;  %v7348_v24 = vld [vmem:[%s12519_s11 + $0x660] sm:$0xff]  ;;  %v11643_v30 = vpop.f32.mrf.mxu3 }
0x107c   :  { %7393 = vmatmul.msk.f32.vlgmr.msra.gmra.mxu0 %vm3469_vm7, %v7347_v8  ;;  %12584 = vst [vmem:[#allocation63_spill] sm:$0xff] %v11643_v30  ;;  %v7207_v8 = vld [vmem:[%s12519_s11 + $0x4d8] sm:$0xff] }
0x107d   :  { %v11627_v11 = vpop.f32.mrf.mxu2 }
0x107e   :  { %12582 = vst [vmem:[#allocation61_spill] sm:$0xff] %v11627_v11  ;;  %v7278_v11 = vld [vmem:[%s12519_s11 + $0x5a0] sm:$0xff] }
0x1083   :  { %7252 = vmatmul.msk.f32.gmra.mxu1 %vm3469_vm7, %v7206_v26  ;;  %7323 = vmatmul.msk.f32.gmra.mxu3 %vm3469_vm7, %v7277_v43  ;;  %v7349_v26 = vld [vmem:[%s12519_s11 + $0x668] sm:$0xff] }
0x1084   :  { %7394 = vmatmul.msk.f32.gmra.mxu0 %vm3469_vm7, %v7348_v24  ;;  %v11659_v24 = vpop.f32.mrf.mxu3 }
0x1085   :  { %v11641_v59 = vpop.f32.mrf.mxu2  ;;  %12586 = vst [vmem:[#allocation65_spill] sm:$0xff] %v11659_v24  ;;  %v7351_v24 = vld [vmem:[%s12519_s11 + $0x678] sm:$0xff] }
0x1086   :  { %12583 = vst [vmem:[#allocation62_spill] sm:$0xff] %v11641_v59  ;;  %v7208_v59 = vld [vmem:[%s12519_s11 + $0x4e0] sm:$0xff] }
0x108b   :  { %7253 = vmatmul.msk.f32.gmra.mxu1 %vm3469_vm7, %v7207_v8  ;;  %7324 = vmatmul.msk.f32.gmra.mxu3 %vm3469_vm7, %v7278_v11  ;;  %v7350_v8 = vld [vmem:[%s12519_s11 + $0x670] sm:$0xff] }
0x108c   :  { %7395 = vmatmul.msk.f32.gmra.mxu0 %vm3469_vm7, %v7349_v26  ;;  %v7209_v26 = vld [vmem:[%s12519_s11 + $0x4e8] sm:$0xff]  ;;  %v11684_v30 = vpop.f32.mrf.mxu3 }
0x108d   :  { %v11657_v43 = vpop.f32.mrf.mxu2  ;;  %12588 = vst [vmem:[#allocation67_spill] sm:$0xff] %v11684_v30  ;;  %v7354_v30 = vld [vmem:[%s12519_s11 + $0x690] sm:$0xff] }
0x108e   :  { %12585 = vst [vmem:[#allocation64_spill] sm:$0xff] %v11657_v43  ;;  %v7280_v43 = vld [vmem:[%s12519_s11 + $0x5b0] sm:$0xff] }
0x1093   :  { %7254 = vmatmul.msk.f32.gmra.mxu1 %vm3469_vm7, %v7208_v59  ;;  %7325 = vmatmul.msk.f32.gmra.mxu3 %vm3469_vm7, %v7279_v27  ;;  %v7210_v59 = vld [vmem:[%s12519_s11 + $0x4f0] sm:$0xff] }
0x1094   :  { %7396 = vmatmul.msk.f32.gmra.mxu0 %vm3469_vm7, %v7350_v8  ;;  %v7281_v8 = vld [vmem:[%s12519_s11 + $0x5b8] sm:$0xff] }
0x1095   :  { %v11673_v11 = vpop.f32.mrf.mxu2 }
0x1096   :  { %12587 = vst [vmem:[#allocation66_spill] sm:$0xff] %v11673_v11  ;;  %v7352_v11 = vld [vmem:[%s12519_s11 + $0x680] sm:$0xff] }
0x109b   :  { %7255 = vmatmul.msk.f32.gmra.mxu1 %vm3469_vm7, %v7209_v26  ;;  %7326 = vmatmul.msk.f32.gmra.mxu3 %vm3469_vm7, %v7280_v43  ;;  %v11702_v43 = vpop.f32.mrf.mxu3  ;;  %v7211_v26 = vld [vmem:[%s12519_s11 + $0x4f8] sm:$0xff] }
0x109c   :  { %7397 = vmatmul.msk.f32.gmra.mxu0 %vm3469_vm7, %v7351_v24  ;;  %12590 = vst [vmem:[#allocation69_spill] sm:$0xff] %v11702_v43  ;;  %v7283_v43 = vld [vmem:[%s12519_s11 + $0x5c8] sm:$0xff] }
0x109d   :  { %v11689_v27 = vpop.f32.mrf.mxu2 }
0x109e   :  { %12589 = vst [vmem:[#allocation68_spill] sm:$0xff] %v11689_v27  ;;  %v7282_v27 = vld [vmem:[%s12519_s11 + $0x5c0] sm:$0xff] }
0x10a3   :  { %7256 = vmatmul.msk.f32.gmra.mxu1 %vm3469_vm7, %v7210_v59  ;;  %7327 = vmatmul.msk.f32.gmra.mxu3 %vm3469_vm7, %v7281_v8  ;;  %v7353_v59 = vld [vmem:[%s12519_s11 + $0x688] sm:$0xff]  ;;  %v11719_v8 = vpop.f32.mrf.mxu3 }
0x10a4   :  { %7398 = vmatmul.msk.f32.gmra.mxu0 %vm3469_vm7, %v7352_v11  ;;  %12592 = vst [vmem:[#allocation71_spill] sm:$0xff] %v11719_v8  ;;  %v7213_v8 = vld [vmem:[%s12519_s11 + $0x508] sm:$0xff] }
0x10a5   :  { %v11705_v24 = vpop.f32.mrf.mxu2 }
0x10a6   :  { %12591 = vst [vmem:[#allocation70_spill] sm:$0xff] %v11705_v24  ;;  %v7212_v24 = vld [vmem:[%s12519_s11 + $0x500] sm:$0xff] }
0x10ab   :  { %7257 = vmatmul.msk.f32.gmra.mxu1 %vm3469_vm7, %v7211_v26  ;;  %7328 = vmatmul.msk.f32.gmra.mxu3 %vm3469_vm7, %v7282_v27  ;;  %v11733_v26 = vpop.f32.mrf.mxu3 }
0x10ac   :  { %7399 = vmatmul.msk.f32.gmra.mxu0 %vm3469_vm7, %v7353_v59  ;;  %12593 = vst [vmem:[#allocation72_spill] sm:$0xff] %v11733_v26  ;;  %v7214_v26 = vld [vmem:[%s12519_s11 + $0x510] sm:$0xff] }
0x10ad   :  { %v5716_v11 = vpop.f32.mrf.mxu2 }
0x10b3   :  { %7258 = vmatmul.msk.f32.gmra.mxu1 %vm3469_vm7, %v7212_v24  ;;  %7329 = vmatmul.msk.f32.gmra.mxu3 %vm3469_vm7, %v7283_v43  ;;  %v7355_v24 = vld [vmem:[%s12519_s11 + $0x698] sm:$0xff]  ;;  %v11756_v49 = vpop.f32.mrf.mxu3 }
0x10b4   :  { %7400 = vmatmul.msk.f32.gmra.mxu0 %vm3469_vm7, %v7354_v30  ;;  %12594 = vst [vmem:[#allocation73_spill] sm:$0xff] %v11756_v49  ;;  %v7218_v49 = vld [vmem:[%s12519_s11 + $0x530] sm:$0xff] }
0x10b5   :  { %v5719_v27 = vpop.f32.mrf.mxu2 }
0x10b8   :  { %v4938_v59 = vpop.f32.mrf.mxu1 }
0x10bb   :  { %7259 = vmatmul.msk.f32.gmra.mxu1 %vm3469_vm7, %v7213_v8  ;;  %7330 = vmatmul.msk.f32.gmra.mxu3 %vm3469_vm7, %v7284_v17 }
0x10bc   :  { %7401 = vmatmul.msk.f32.gmra.mxu0 %vm3469_vm7, %v7355_v24  ;;  %v7215_v24 = vld [vmem:[%s12519_s11 + $0x518] sm:$0xff] }
0x10bd   :  { %v5722_v30 = vpop.f32.mrf.mxu2 }
0x10c0   :  { %v4941_v43 = vpop.f32.mrf.mxu1 }
0x10c3   :  { %7260 = vmatmul.msk.f32.gmra.mxu1 %vm3469_vm7, %v7214_v26  ;;  %7331 = vmatmul.msk.f32.gmra.mxu3 %vm3469_vm7, %v7285_v5  ;;  %v7357_v26 = vld [vmem:[%s12519_s11 + $0x6a8] sm:$0xff]  ;;  %v11773_v5 = vpop.f32.mrf.mxu3 }
0x10c4   :  { %7402 = vmatmul.msk.f32.gmra.mxu0 %vm3469_vm7, %v7356_v22  ;;  %12595 = vst [vmem:[#allocation74_spill] sm:$0xff] %v11773_v5  ;;  %v7359_v5 = vld [vmem:[%s12519_s11 + $0x6b8] sm:$0xff] }
0x10c5   :  { %v5725_v17 = vpop.f32.mrf.mxu2 }
0x10c6   :  { %7467 = vmatpush.msk.msra.mxu1 %vm1974_vm4, %v5725_v17  ;;  %v7287_v17 = vld [vmem:[%s12519_s11 + $0x5e8] sm:$0xff] }
0x10c8   :  { %v4944_v8 = vpop.f32.mrf.mxu1  ;;  %5831 = vmatpush.msra.mxu1 %v5722_v30  ;;  %v7216_v30 = vld [vmem:[%s12519_s11 + $0x520] sm:$0xff] }
0x10ca   :  { %5832 = vmatpush.msra.mxu1 %v5719_v27  ;;  %v7358_v27 = vld [vmem:[%s12519_s11 + $0x6b0] sm:$0xff] }
0x10cb   :  { %7261 = vmatmul.msk.f32.gmra.mxu1 %vm3469_vm7, %v7215_v24  ;;  %7332 = vmatmul.msk.f32.gmra.mxu3 %vm3469_vm7, %v7286_v29  ;;  %v11788_v29 = vpop.f32.mrf.mxu3  ;;  %v7217_v24 = vld [vmem:[%s12519_s11 + $0x528] sm:$0xff] }
0x10cc   :  { %7403 = vmatmul.msk.f32.gmra.mxu0 %vm3469_vm7, %v7357_v26  ;;  %5833 = vmatpush.msra.mxu1 %v5716_v11  ;;  %12596 = vst [vmem:[#allocation75_spill] sm:$0xff] %v11788_v29  ;;  %v7288_v26 = vld [vmem:[%s12519_s11 + $0x5f0] sm:$0xff] }
0x10d0   :  { %v4947_v22 = vpop.f32.mrf.mxu1 }
0x10d3   :  { %7262 = vmatmul.msk.f32.gmra.mxu1 %vm3469_vm7, %v7216_v30  ;;  %7333 = vmatmul.msk.f32.gmra.mxu3 %vm3469_vm7, %v7287_v17  ;;  %v5025_v30 = vadd.f32 %v4938_v59, %v11353_v40  ;;  %v5026_v40 = vadd.f32 %v4941_v43, %v11363_v2  ;;  %v5027_v2 = vadd.f32 %v4944_v8, %v11373_v48 }
0x10d4   :  { %7404 = vmatmul.msk.f32.gmra.mxu0 %vm3469_vm7, %v7358_v27  ;;  %v5028_v48 = vadd.f32 %v4947_v22, %v11383_v6 }
0x10d8   :  { %v4950_v11 = vpop.f32.mrf.mxu1 }
0x10d9   :  { %v5029_v6 = vadd.f32 %v4950_v11, %v11393_v10  ;;  %v7223_v11 = vld [vmem:[%s12519_s11 + $0x558] sm:$0xff] }
0x10db   :  { %7263 = vmatmul.msk.f32.gmra.mxu1 %vm3469_vm7, %v7217_v24  ;;  %7334 = vmatmul.msk.f32.gmra.mxu3 %vm3469_vm7, %v7288_v26  ;;  %v7360_v24 = vld [vmem:[%s12519_s11 + $0x6c0] sm:$0xff] }
0x10dc   :  { %7405 = vmatmul.msk.f32.gmra.mxu0 %vm3469_vm7, %v7359_v5 }
0x10de   :  { %v5237_v17 = vpop.f32.mrf.mxu3 }
0x10df   :  { %v11803_v27 = vadd.f32 %v5237_v17, %v5025_v30  ;;  %v7219_v30 = vld [vmem:[%s12519_s11 + $0x538] sm:$0xff]  ;;  %v7290_v17 = vld [vmem:[%s12519_s11 + $0x600] sm:$0xff] }
0x10e0   :  { %v11805_v29 = vpop.f32.mrf.mxu1 }
0x10e3   :  { %7264 = vmatmul.msk.f32.gmra.mxu1 %vm3469_vm7, %v7218_v49  ;;  %7335 = vmatmul.msk.f32.gmra.mxu3 %vm3469_vm7, %v7289_v9  ;;  %v7361_v9 = vld [vmem:[%s12519_s11 + $0x6c8] sm:$0xff] }
0x10e4   :  { %7406 = vmatmul.msk.f32.gmra.mxu0 %vm3469_vm7, %v7360_v24 }
0x10e6   :  { %v5240_v59 = vpop.f32.mrf.mxu3 }
0x10e7   :  { %v11820_v5 = vadd.f32 %v5240_v59, %v5026_v40  ;;  %v7220_v40 = vld [vmem:[%s12519_s11 + $0x540] sm:$0xff]  ;;  %v7291_v59 = vld [vmem:[%s12519_s11 + $0x608] sm:$0xff] }
0x10e8   :  { %v11822_v26 = vpop.f32.mrf.mxu1 }
0x10eb   :  { %7265 = vmatmul.msk.f32.gmra.mxu1 %vm3469_vm7, %v7219_v30  ;;  %7336 = vmatmul.msk.f32.gmra.mxu3 %vm3469_vm7, %v7290_v17  ;;  %v7362_v30 = vld [vmem:[%s12519_s11 + $0x6d0] sm:$0xff] }
0x10ec   :  { %7407 = vmatmul.msk.f32.gmra.mxu0 %vm3469_vm7, %v7361_v9 }
0x10ee   :  { %v5243_v49 = vpop.f32.mrf.mxu3 }
0x10ef   :  { %v11837_v43 = vadd.f32 %v5243_v49, %v5027_v2  ;;  %v7221_v2 = vld [vmem:[%s12519_s11 + $0x548] sm:$0xff]  ;;  %v7292_v49 = vld [vmem:[%s12519_s11 + $0x610] sm:$0xff] }
0x10f0   :  { %v11839_v24 = vpop.f32.mrf.mxu1 }
0x10f3   :  { %7266 = vmatmul.msk.f32.gmra.mxu1 %vm3469_vm7, %v7220_v40  ;;  %7337 = vmatmul.msk.f32.gmra.mxu3 %vm3469_vm7, %v7291_v59  ;;  %v7363_v40 = vld [vmem:[%s12519_s11 + $0x6d8] sm:$0xff] }
0x10f4   :  { %7408 = vmatmul.msk.f32.gmra.mxu0 %vm3469_vm7, %v7362_v30 }
0x10f6   :  { %v5246_v8 = vpop.f32.mrf.mxu3 }
0x10f7   :  { %v11854_v17 = vadd.f32 %v5246_v8, %v5028_v48  ;;  %v7222_v48 = vld [vmem:[%s12519_s11 + $0x550] sm:$0xff]  ;;  %v7293_v8 = vld [vmem:[%s12519_s11 + $0x618] sm:$0xff] }
0x10f8   :  { %v11856_v9 = vpop.f32.mrf.mxu1 }
0x10fb   :  { %7267 = vmatmul.msk.f32.gmra.mxu1 %vm3469_vm7, %v7221_v2  ;;  %7338 = vmatmul.msk.f32.gmra.mxu3 %vm3469_vm7, %v7292_v49  ;;  %v7364_v2 = vld [vmem:[%s12519_s11 + $0x6e0] sm:$0xff] }
0x10fc   :  { %7409 = vmatmul.msk.f32.gmra.mxu0 %vm3469_vm7, %v7363_v40  ;;  %v7294_v49 = vld [vmem:[%s12519_s11 + $0x620] sm:$0xff]  ;;  %v7365_v40 = vld [vmem:[%s12519_s11 + $0x6e8] sm:$0xff] }
0x10fe   :  { %v5249_v22 = vpop.f32.mrf.mxu3 }
0x10ff   :  { %v11871_v59 = vadd.f32 %v5249_v22, %v5029_v6  ;;  %v7224_v22 = vld [vmem:[%s12519_s11 + $0x560] sm:$0xff] }
0x1100   :  { %v11873_v30 = vpop.f32.mrf.mxu1 }
0x1103   :  { %7268 = vmatmul.msk.f32.gmra.mxu1 %vm3469_vm7, %v7222_v48  ;;  %7339 = vmatmul.msk.f32.gmra.mxu3 %vm3469_vm7, %v7293_v8  ;;  %v7295_v48 = vld [vmem:[%s12519_s11 + $0x628] sm:$0xff]  ;;  %v7366_v8 = vld [vmem:[%s12519_s11 + $0x6f0] sm:$0xff] }
0x1104   :  { %7410 = vmatmul.msk.f32.gmra.mxu0 %vm3469_vm7, %v7364_v2 }
0x1108   :  { %v11887_v10 = vpop.f32.mrf.mxu1 }
0x110b   :  { %7269 = vmatmul.msk.f32.gmra.mxu1 %vm3469_vm7, %v7223_v11  ;;  %7340 = vmatmul.msk.f32.gmra.mxu3 %vm3469_vm7, %v7294_v49  ;;  %v7225_v11 = vld [vmem:[%s12519_s11 + $0x568] sm:$0x1]  ;;  %v7296_v49 = vld [vmem:[%s12519_s11 + $0x630] sm:$0xff] }
0x110c   :  { %7411 = vmatmul.msk.f32.gmra.mxu0 %vm3469_vm7, %v7365_v40  ;;  %v7367_v40 = vld [vmem:[%s12519_s11 + $0x6f8] sm:$0xff] }
0x1110   :  { %v11901_v6 = vpop.f32.mrf.mxu1 }
0x1113   :  { %7270 = vmatmul.msk.f32.gmra.mxu1 %vm3469_vm7, %v7224_v22  ;;  %7341 = vmatmul.msk.f32.gmra.mxu3 %vm3469_vm7, %v7295_v48  ;;  %v7297_v48 = vld [vmem:[%s12519_s11 + $0x638] sm:$0xff] }
0x1114   :  { %7412 = vmatmul.msk.f32.gmra.mxu0 %vm3469_vm7, %v7366_v8  ;;  %v7422_v8 = vld [vmem:[%s12519_s11 + $0x740] sm:$0xff] }
0x1118   :  { %v11915_v2 = vpop.f32.mrf.mxu1 }
0x111b   :  { %7271 = vmatmul.msk.f32.gmra.mxu1 %vm3469_vm7, %v7225_v11  ;;  %7342 = vmatmul.msk.f32.gmra.mxu3 %vm3469_vm7, %v7296_v49  ;;  %v7298_v49 = vld [vmem:[%s12519_s11 + $0x640] sm:$0xff] }
0x111c   :  { %7413 = vmatmul.msk.f32.gmra.mxu0 %vm3469_vm7, %v7367_v40  ;;  %v7423_v40 = vld [vmem:[%s12519_s11 + $0x748] sm:$0xff] }
0x1120   :  { %v11929_v22 = vpop.f32.mrf.mxu1 }
0x1121   :  { %12597 = vst [vmem:[#allocation76_spill] sm:$0xff] %v11929_v22 }
0x1123   :  { %7343 = vmatmul.msk.f32.gmra.mxu3 %vm3469_vm7, %v7297_v48  ;;  %7468 = vmatmul.msk.f32.vlgmr.msra.gmra.mxu1 %vm3469_vm7, %v7422_v8  ;;  %v7299_v48 = vld [vmem:[%s12519_s11 + $0x648] sm:$0xff]  ;;  %v7424_v8 = vld [vmem:[%s12519_s11 + $0x750] sm:$0xff] }
0x1124   :  { %7414 = vmatmul.msk.f32.gmra.mxu0 %vm3469_vm7, %v7368_v41 }
0x1128   :  { %v11943_v11 = vpop.f32.mrf.mxu1 }
0x1129   :  { %12598 = vst [vmem:[#allocation77_spill] sm:$0xff] %v11943_v11 }
0x112b   :  { %7344 = vmatmul.msk.f32.gmra.mxu3 %vm3469_vm7, %v7298_v49  ;;  %7469 = vmatmul.msk.f32.gmra.mxu1 %vm3469_vm7, %v7423_v40  ;;  %v11970_v49 = vpop.f32.mrf.mxu0  ;;  %v7300_v40 = vld [vmem:[%s12519_s11 + $0x650] sm:$0x1] }
0x112c   :  { %7415 = vmatmul.msk.f32.gmra.mxu0 %vm3469_vm7, %v7369_v47 }
0x1130   :  { %v11957_v41 = vpop.f32.mrf.mxu1 }
0x1131   :  { %12599 = vst [vmem:[#allocation78_spill] sm:$0xff] %v11957_v41  ;;  %v7372_v41 = vld [vmem:[%s12519_s11 + $0x720] sm:$0xff] }
0x1133   :  { %7345 = vmatmul.msk.f32.gmra.mxu3 %vm3469_vm7, %v7299_v48  ;;  %7470 = vmatmul.msk.f32.gmra.mxu1 %vm3469_vm7, %v7424_v8  ;;  %v7371_v48 = vld [vmem:[%s12519_s11 + $0x718] sm:$0xff] }
0x1134   :  { %7416 = vmatmul.msk.f32.gmra.mxu0 %vm3469_vm7, %v7370_v21  ;;  %v11987_v21 = vpop.f32.mrf.mxu0 }
0x1138   :  { %v11973_v47 = vpop.f32.mrf.mxu1 }
0x1139   :  { %12600 = vst [vmem:[#allocation79_spill] sm:$0xff] %v11973_v47  ;;  %v7426_v47 = vld [vmem:[%s12519_s11 + $0x760] sm:$0xff] }
0x113b   :  { %7346 = vmatmul.msk.f32.gmra.mxu3 %vm3469_vm7, %v7300_v40  ;;  %7471 = vmatmul.msk.f32.gmra.mxu1 %vm3469_vm7, %v7425_v51 }
0x113c   :  { %7417 = vmatmul.msk.f32.gmra.mxu0 %vm3469_vm7, %v7371_v48  ;;  %v11999_v40 = vpop.f32.mrf.mxu0  ;;  %v7427_v48 = vld [vmem:[%s12519_s11 + $0x768] sm:$0xff] }
0x1140   :  { %v11989_v8 = vpop.f32.mrf.mxu1 }
0x1141   :  { %12601 = vst [vmem:[#allocation80_spill] sm:$0xff] %v11989_v8  ;;  %v7373_v8 = vld [vmem:[%s12519_s11 + $0x728] sm:$0xff] }
0x1143   :  { %7472 = vmatmul.msk.f32.gmra.mxu1 %vm3469_vm7, %v7426_v47  ;;  %v7374_v47 = vld [vmem:[%s12519_s11 + $0x730] sm:$0xff] }
0x1144   :  { %7418 = vmatmul.msk.f32.gmra.mxu0 %vm3469_vm7, %v7372_v41  ;;  %v7428_v41 = vld [vmem:[%s12519_s11 + $0x770] sm:$0xff] }
0x1148   :  { %v12001_v51 = vpop.f32.mrf.mxu1 }
0x1149   :  { %12602 = vst [vmem:[#allocation81_spill] sm:$0xff] %v12001_v51  ;;  %v12019_v51 = vpop.f32.mrf.mxu0 }
0x114b   :  { %7473 = vmatmul.msk.f32.gmra.mxu1 %vm3469_vm7, %v7427_v48  ;;  %v7375_v48 = vld [vmem:[%s12519_s11 + $0x738] sm:$0x1] }
0x114c   :  { %7419 = vmatmul.msk.f32.gmra.mxu0 %vm3469_vm7, %v7373_v8  ;;  %v7429_v8 = vld [vmem:[%s12519_s11 + $0x778] sm:$0xff] }
0x1150   :  { %v12011_v55 = vpop.f32.mrf.mxu1 }
0x1151   :  { %12603 = vst [vmem:[#allocation82_spill] sm:$0xff] %v12011_v55  ;;  %v12032_v55 = vpop.f32.mrf.mxu0 }
0x1153   :  { %7474 = vmatmul.msk.f32.gmra.mxu1 %vm3469_vm7, %v7428_v41  ;;  %v7430_v41 = vld [vmem:[%s12519_s11 + $0x780] sm:$0xff] }
0x1154   :  { %7420 = vmatmul.msk.f32.gmra.mxu0 %vm3469_vm7, %v7374_v47 }
0x1158   :  { %v12023_v60 = vpop.f32.mrf.mxu1 }
0x1159   :  { %12604 = vst [vmem:[#allocation83_spill] sm:$0xff] %v12023_v60  ;;  %v7431_v60 = vld [vmem:[%s12519_s11 + $0x788] sm:$0xff]  ;;  %v5551_v7 = vpop.f32.mrf.mxu0 }
0x115b   :  { %7475 = vmatmul.msk.f32.gmra.mxu1 %vm3469_vm7, %v7429_v8  ;;  %v6025_v8 = vld [vmem:[%s12520_s13 + $0x78] sm:$0xff] }
0x115c   :  { %7421 = vmatmul.msk.f32.gmra.mxu0 %vm3469_vm7, %v7375_v48  ;;  %6027 = vmatpush.msra.mxu2 %v6025_v8  ;;  %v6024_v48 = vld [vmem:[%s12520_s13 + $0x70] sm:$0xff] }
0x115d   :  { %v7432_v8 = vld [vmem:[%s12519_s11 + $0x790] sm:$0xff] }
0x115e   :  { %6028 = vmatpush.msra.mxu2 %v6024_v48  ;;  %v6020_v48 = vld [vmem:[%s12520_s13 + $0x50] sm:$0xff] }
0x1160   :  { %v12035_v3 = vpop.f32.mrf.mxu1 }
0x1161   :  { %12605 = vst [vmem:[#allocation84_spill] sm:$0xff] %v12035_v3  ;;  %v5554_v11 = vpop.f32.mrf.mxu0 }
0x1163   :  { %7476 = vmatmul.msk.f32.gmra.mxu1 %vm3469_vm7, %v7430_v41  ;;  %v6023_v41 = vld [vmem:[%s12520_s13 + $0x68] sm:$0xff] }
0x1164   :  { %6029 = vmatpush.msra.mxu2 %v6023_v41  ;;  %v6018_v41 = vld [vmem:[%s12520_s13 + $0x40] sm:$0xff] }
0x1168   :  { %v12041_v47 = vpop.f32.mrf.mxu1 }
0x1169   :  { %12606 = vst [vmem:[#allocation85_spill] sm:$0xff] %v12041_v47  ;;  %v6022_v47 = vld [vmem:[%s12520_s13 + $0x60] sm:$0xff]  ;;  %v5557_v22 = vpop.f32.mrf.mxu0 }
0x116a   :  { %6030 = vmatpush.msra.mxu2 %v6022_v47  ;;  %v6019_v47 = vld [vmem:[%s12520_s13 + $0x48] sm:$0xff] }
0x116b   :  { %7477 = vmatmul.msk.f32.gmra.mxu1 %vm3469_vm7, %v7431_v60  ;;  %v6021_v60 = vld [vmem:[%s12520_s13 + $0x58] sm:$0xff] }
0x116c   :  { %6031 = vmatpush.msra.mxu2 %v6021_v60  ;;  %v7433_v60 = vld [vmem:[%s12519_s11 + $0x798] sm:$0xff] }
0x116e   :  { %6032 = vmatpush.msra.mxu2 %v6020_v48  ;;  %v6016_v48 = vld [vmem:[%s12520_s13 + $0x30] sm:$0xff] }
0x1170   :  { %v12059_v3 = vpop.f32.mrf.mxu1  ;;  %6033 = vmatpush.msra.mxu2 %v6019_v47  ;;  %v6015_v47 = vld [vmem:[%s12520_s13 + $0x28] sm:$0xff] }
0x1171   :  { %12607 = vst [vmem:[#allocation86_spill] sm:$0xff] %v12059_v3 }
0x1172   :  { %6034 = vmatpush.msra.mxu2 %v6018_v41  ;;  %v6014_v41 = vld [vmem:[%s12520_s13 + $0x20] sm:$0xff] }
0x1173   :  { %7478 = vmatmul.msk.f32.gmra.mxu1 %vm3469_vm7, %v7432_v8  ;;  %v6017_v8 = vld [vmem:[%s12520_s13 + $0x38] sm:$0xff] }
0x1174   :  { %6035 = vmatpush.msra.mxu2 %v6017_v8  ;;  %v7434_v8 = vld [vmem:[%s12519_s11 + $0x7a0] sm:$0xff] }
0x1176   :  { %6036 = vmatpush.msra.mxu2 %v6016_v48  ;;  %v6012_v48 = vld [vmem:[%s12520_s13 + $0x10] sm:$0xff] }
0x1178   :  { %v12077_v3 = vpop.f32.mrf.mxu1  ;;  %6037 = vmatpush.msra.mxu2 %v6015_v47  ;;  %v6011_v47 = vld [vmem:[%s12520_s13 + $0x8] sm:$0xff] }
0x1179   :  { %12608 = vst [vmem:[#allocation87_spill] sm:$0xff] %v12077_v3 }
0x117a   :  { %6038 = vmatpush.msra.mxu2 %v6014_v41  ;;  %v6010_v41 = vld [vmem:[%s12520_s13] sm:$0xff] }
0x117b   :  { %7479 = vmatmul.msk.f32.gmra.mxu1 %vm3469_vm7, %v7433_v60  ;;  %v6013_v60 = vld [vmem:[%s12520_s13 + $0x18] sm:$0xff] }
0x117c   :  { %6039 = vmatpush.msra.mxu2 %v6013_v60  ;;  %v7435_v60 = vld [vmem:[%s12519_s11 + $0x7a8] sm:$0xff] }
0x117e   :  { %6040 = vmatpush.msra.mxu2 %v6012_v48  ;;  %v7436_v48 = vld [vmem:[%s12519_s11 + $0x7b0] sm:$0xff] }
0x1180   :  { %v12095_v3 = vpop.f32.mrf.mxu1  ;;  %6041 = vmatpush.msra.mxu2 %v6011_v47  ;;  %v5252_v47 = vpop.f32.mrf.mxu3 }
0x1181   :  { %12609 = vst [vmem:[#allocation88_spill] sm:$0xff] %v12095_v3 }
0x1182   :  { %6042 = vmatpush.msra.mxu2 %v6010_v41  ;;  %v7437_v41 = vld [vmem:[%s12519_s11 + $0x7b8] sm:$0xff] }
0x1183   :  { %7480 = vmatmul.msk.f32.gmra.mxu1 %vm3469_vm7, %v7434_v8 }
0x1188   :  { %v12113_v3 = vpop.f32.mrf.mxu1 }
0x1189   :  { %12610 = vst [vmem:[#allocation89_spill] sm:$0xff] %v12113_v3  ;;  %v5255_v3 = vpop.f32.mrf.mxu3 }
0x118b   :  { %7481 = vmatmul.msk.f32.gmra.mxu1 %vm3469_vm7, %v7435_v60  ;;  %v5623_v60 = vadd.f32 %v11970_v49, %v11803_v27  ;;  %v5624_v49 = vadd.f32 %v11987_v21, %v11820_v5  ;;  %v7440_v5 = vld [vmem:[%s12519_s11 + $0x7d0] sm:$0xff] }
0x1190   :  { %v12119_v8 = vpop.f32.mrf.mxu1 }
0x1191   :  { %12611 = vst [vmem:[#allocation90_spill] sm:$0xff] %v12119_v8  ;;  %v12136_v8 = vld [vmem:[%s12509_s2] sm:$0x3f]  ;;  %v5258_v33 = vpop.f32.mrf.mxu3 }
0x1192   :  { %12613 = vst [vmem:[#allocation92_spill] sm:$0xff] %v12136_v8 }
0x1193   :  { %7482 = vmatmul.msk.f32.gmra.mxu1 %vm3469_vm7, %v7436_v48  ;;  %v12139_v48 = vperm.slane %v12136_v8, 4  ;;  %v7439_v8 = vld [vmem:[%s12519_s11 + $0x7c8] sm:$0xff] }
0x1198   :  { %v12125_v25 = vpop.f32.mrf.mxu1 }
0x1199   :  { %12612 = vst [vmem:[#allocation91_spill] sm:$0xff] %v12125_v25 }
0x119b   :  { %7483 = vmatmul.msk.f32.gmra.mxu1 %vm3469_vm7, %v7437_v41 }
0x11a0   :  { %v5835_v25 = vpop.f32.mrf.mxu1 }
0x11a1   :  { %v5922_v53 = vadd.f32 %v5835_v25, %v5623_v60  ;;  %v5261_v60 = vpop.f32.mrf.mxu3 }
0x11a3   :  { %v5952_v41 = vadd.f32 %v12139_v48, %v5922_v53  ;;  %7484 = vmatmul.msk.f32.gmra.mxu1 %vm3469_vm7, %v7438_v38  ;;  %v5625_v38 = vadd.f32 %v11999_v40, %v11837_v43  ;;  %v7441_v43 = vld [vmem:[%s12519_s11 + $0x7d8] sm:$0xff] }
0x11a5   :  { %v5981_v27 = vmax.f32 %v5952_v41, 0.0 }
0x11a7   :  { %6043 = vmatmul.f32.vlgmr.msra.gmra.mxu2 %v5981_v27 }
0x11a8   :  { %v5838_v14 = vpop.f32.mrf.mxu1 }
0x11a9   :  { %v5923_v35 = vadd.f32 %v5838_v14, %v5624_v49  ;;  %v5560_v14 = vpop.f32.mrf.mxu0  ;;  %v12167_v49 = vpop.f32.mrf.mxu3 }
0x11ab   :  { %v5953_v28 = vadd.f32 %v12139_v48, %v5923_v35  ;;  %7485 = vmatmul.msk.f32.gmra.mxu1 %vm3469_vm7, %v7439_v8 }
0x11ad   :  { %v5982_v53 = vmax.f32 %v5953_v28, 0.0  ;;  %v5626_v28 = vadd.f32 %v12019_v51, %v11854_v17  ;;  %v7442_v51 = vld [vmem:[%s12519_s11 + $0x7e0] sm:$0xff] }
0x11af   :  { %6046 = vmatmul.f32.gmra.mxu2 %v5982_v53 }
0x11b0   :  { %v5841_v25 = vpop.f32.mrf.mxu1 }
0x11b1   :  { %v5924_v21 = vadd.f32 %v5841_v25, %v5625_v38  ;;  %v12169_v38 = vpop.f32.mrf.mxu0  ;;  %v5627_v25 = vadd.f32 %v12032_v55, %v11871_v59 }
0x11b3   :  { %v5954_v41 = vadd.f32 %v12139_v48, %v5924_v21  ;;  %7486 = vmatmul.msk.f32.gmra.mxu1 %vm3469_vm7, %v7440_v5  ;;  %v5030_v21 = vadd.f32 %v11805_v29, %v11411_v1  ;;  %v5031_v1 = vadd.f32 %v11822_v26, %v11435_v57  ;;  %v5032_v57 = vadd.f32 %v11839_v24, %v11459_v16 }
0x11b4   :  { %v5033_v16 = vadd.f32 %v11856_v9, %v11482_v50  ;;  %v3802_v9 = vadd.f32 %v11075_v23, %v10752_v56  ;;  %v7447_v23 = vld [vmem:[%s12519_s11 + $0x808] sm:$0xff] }
0x11b5   :  { %v5983_v35 = vmax.f32 %v5954_v41, 0.0 }
0x11b7   :  { %6049 = vmatmul.f32.gmra.mxu2 %v5983_v35  ;;  %v5329_v35 = vadd.f32 %v5252_v47, %v5030_v21  ;;  %v5330_v47 = vadd.f32 %v5255_v3, %v5031_v1  ;;  %v5331_v3 = vadd.f32 %v5258_v33, %v5032_v57 }
0x11b8   :  { %v5844_v8 = vpop.f32.mrf.mxu1 }
0x11b9   :  { %v5925_v40 = vadd.f32 %v5844_v8, %v5626_v28  ;;  %v12180_v8 = vpop.f32.mrf.mxu3  ;;  %v12182_v55 = vpop.f32.mrf.mxu0 }
0x11bb   :  { %v5955_v27 = vadd.f32 %v12139_v48, %v5925_v40  ;;  %7487 = vmatmul.msk.f32.gmra.mxu1 %vm3469_vm7, %v7441_v43  ;;  %v5628_v43 = vadd.f32 %v5551_v7, %v5329_v35  ;;  %v7443_v40 = vld [vmem:[%s12519_s11 + $0x7e8] sm:$0xff] }
0x11bd   :  { %v5984_v53 = vmax.f32 %v5955_v27, 0.0 }
0x11bf   :  { %6052 = vmatmul.f32.gmra.mxu2 %v5984_v53 }
0x11c0   :  { %v5847_v17 = vpop.f32.mrf.mxu1 }
0x11c1   :  { %v5926_v5 = vadd.f32 %v5847_v17, %v5627_v25  ;;  %v5629_v25 = vadd.f32 %v5554_v11, %v5330_v47  ;;  %v12191_v7 = vpop.f32.mrf.mxu3  ;;  %v12196_v21 = vpop.f32.mrf.mxu0 }
0x11c3   :  { %v5956_v41 = vadd.f32 %v12139_v48, %v5926_v5  ;;  %7488 = vmatmul.msk.f32.gmra.mxu1 %vm3469_vm7, %v7442_v51  ;;  %v7444_v51 = vld [vmem:[%s12519_s11 + $0x7f0] sm:$0xff] }
0x11c5   :  { %v5985_v28 = vmax.f32 %v5956_v41, 0.0  ;;  %v5630_v41 = vadd.f32 %v5557_v22, %v5331_v3 }
0x11c7   :  { %6055 = vmatmul.f32.gmra.mxu2 %v5985_v28  ;;  %v7445_v28 = vld [vmem:[%s12519_s11 + $0x7f8] sm:$0xff] }
0x11c8   :  { %v5850_v59 = vpop.f32.mrf.mxu1 }
0x11c9   :  { %v5927_v27 = vadd.f32 %v5850_v59, %v5628_v43  ;;  %v12205_v59 = vpop.f32.mrf.mxu3  ;;  %v12213_v33 = vpop.f32.mrf.mxu0 }
0x11cb   :  { %v5957_v29 = vadd.f32 %v12139_v48, %v5927_v27  ;;  %7489 = vmatmul.msk.f32.gmra.mxu1 %vm3469_vm7, %v7443_v40  ;;  %v3799_v40 = vadd.f32 %v11038_v12, %v10738_v36  ;;  %v5332_v27 = vadd.f32 %v5261_v60, %v5033_v16  ;;  %v7446_v36 = vld [vmem:[%s12519_s11 + $0x800] sm:$0xff]  ;;  %v4138_v60 = vadd.f32 %v11158_v32, %v3802_v9 }
0x11cc   :  { %v3805_v32 = vadd.f32 %v11115_v58, %v10760_v18  ;;  %v7448_v18 = vld [vmem:[%s12519_s11 + $0x810] sm:$0xff] }
0x11cd   :  { %v5986_v53 = vmax.f32 %v5957_v29, 0.0  ;;  %v4137_v22 = vadd.f32 %v11130_v54, %v3799_v40  ;;  %v5631_v47 = vadd.f32 %v5560_v14, %v5332_v27 }
0x11cf   :  { %6058 = vmatmul.f32.gmra.mxu2 %v5986_v53  ;;  %v4436_v29 = vadd.f32 %v11509_v46, %v4137_v22 }
0x11d0   :  { %v5853_v17 = vpop.f32.mrf.mxu1 }
0x11d1   :  { %v5928_v5 = vadd.f32 %v5853_v17, %v5629_v25  ;;  %v4735_v12 = vadd.f32 %v11496_v42, %v4436_v29  ;;  %v12226_v46 = vpop.f32.mrf.mxu3  ;;  %v4437_v42 = vadd.f32 %v11517_v13, %v4138_v60  ;;  %v4139_v13 = vadd.f32 %v11186_v52, %v3805_v32  ;;  %v12621_v32 = vld [vmem:[#allocation77_spill] sm:$0xff] }
0x11d2   :  { %v3808_v52 = vadd.f32 %v11152_v19, %v10766_v45  ;;  %v7449_v45 = vld [vmem:[%s12519_s11 + $0x818] sm:$0xff] }
0x11d3   :  { %v5958_v26 = vadd.f32 %v12139_v48, %v5928_v5  ;;  %7490 = vmatmul.msk.f32.gmra.mxu1 %vm3469_vm7, %v7444_v51  ;;  %v5034_v25 = vadd.f32 %v11873_v30, %v4735_v12  ;;  %v12230_v51 = vpop.f32.mrf.mxu0  ;;  %v4736_v30 = vadd.f32 %v11504_v0, %v4437_v42  ;;  %v12614_v12 = vld [vmem:[#allocation26_spill] sm:$0xff] }
0x11d5   :  { %v5987_v11 = vmax.f32 %v5958_v26, 0.0  ;;  %v5333_v14 = vadd.f32 %v12167_v49, %v5034_v25  ;;  %v5035_v49 = vadd.f32 %v11887_v10, %v4736_v30  ;;  %v12620_v30 = vld [vmem:[#allocation27_spill] sm:$0xff] }
0x11d7   :  { %6061 = vmatmul.f32.gmra.mxu2 %v5987_v11  ;;  %v5632_v5 = vadd.f32 %v12169_v38, %v5333_v14  ;;  %v5334_v38 = vadd.f32 %v12180_v8, %v5035_v49  ;;  %v12617_v14 = vld [vmem:[#allocation49_spill] sm:$0xff] }
0x11d8   :  { %v5856_v35 = vpop.f32.mrf.mxu1 }
0x11d9   :  { %v5929_v43 = vadd.f32 %v5856_v35, %v5630_v41  ;;  %v5279_v11 = vpop.f32.mrf.mxu3  ;;  %v4438_v41 = vadd.f32 %v11523_v63, %v4139_v13  ;;  %v5633_v0 = vadd.f32 %v12182_v55, %v5334_v38  ;;  %v4140_v63 = vadd.f32 %v11212_v15, %v3808_v52  ;;  %v12622_v38 = vld [vmem:[#allocation30_spill] sm:$0xff] }
0x11da   :  { %v3811_v15 = vadd.f32 %v11184_v39, %v10772_v20  ;;  %v7450_v20 = vld [vmem:[%s12519_s11 + $0x820] sm:$0x1] }
0x11db   :  { %v5959_v24 = vadd.f32 %v12139_v48, %v5929_v43  ;;  %7491 = vmatmul.msk.f32.gmra.mxu1 %vm3469_vm7, %v7445_v28  ;;  %v5578_v35 = vpop.f32.mrf.mxu0  ;;  %v4737_v58 = vadd.f32 %v11512_v31, %v4438_v41  ;;  %v4439_v16 = vadd.f32 %v11531_v44, %v4140_v63  ;;  %v12626_v63 = vld [vmem:[#allocation29_spill] sm:$0xff] }
0x11dd   :  { %v5988_v1 = vmax.f32 %v5959_v24, 0.0  ;;  %v5036_v8 = vadd.f32 %v11901_v6, %v4737_v58  ;;  %v4738_v19 = vadd.f32 %v11520_v62, %v4439_v16 }
0x11df   :  { %6064 = vmatmul.f32.gmra.mxu2 %v5988_v1  ;;  %v5335_v55 = vadd.f32 %v12191_v7, %v5036_v8  ;;  %v5037_v7 = vadd.f32 %v11915_v2, %v4738_v19 }
0x11e0   :  { %v5859_v53 = vpop.f32.mrf.mxu1 }
0x11e1   :  { %v5930_v50 = vadd.f32 %v5859_v53, %v5631_v47  ;;  %v5634_v24 = vadd.f32 %v12196_v21, %v5335_v55  ;;  %v5282_v31 = vpop.f32.mrf.mxu3  ;;  %v4141_v21 = vadd.f32 %v11240_v37, %v3811_v15  ;;  %v5336_v1 = vadd.f32 %v12205_v59, %v5037_v7  ;;  %v12629_v15 = vld [vmem:[#allocation54_spill] sm:$0xff] }
0x11e2   :  { %v3814_v37 = vadd.f32 %v12614_v12, %v10775_v4 }
0x11e3   :  { %v5960_v54 = vadd.f32 %v12139_v48, %v5930_v50  ;;  %7492 = vmatmul.msk.f32.gmra.mxu1 %vm3469_vm7, %v7446_v36  ;;  %v5581_v27 = vpop.f32.mrf.mxu0  ;;  %v4440_v47 = vadd.f32 %v11540_v34, %v4141_v21  ;;  %v5635_v62 = vadd.f32 %v12213_v33, %v5336_v1  ;;  %v12615_v50 = vld [vmem:[#allocation76_spill] sm:$0xff] }
0x11e4   :  { %v12616_v33 = vld [vmem:[#allocation28_spill] sm:$0xff] }
0x11e5   :  { %v5989_v17 = vmax.f32 %v5960_v54, 0.0  ;;  %v4739_v39 = vadd.f32 %v11525_v61, %v4440_v47  ;;  %v4142_v25 = vadd.f32 %v12616_v33, %v3814_v37  ;;  %v12630_v1 = vld [vmem:[#allocation48_spill] sm:$0xff]  ;;  %v12634_v37 = vld [vmem:[#allocation33_spill] sm:$0xff] }
0x11e7   :  { %6067 = vmatmul.f32.gmra.mxu2 %v5989_v17  ;;  %v5038_v59 = vadd.f32 %v12615_v50, %v4739_v39  ;;  %v4441_v17 = vadd.f32 %v12617_v14, %v4142_v25  ;;  %v12633_v39 = vld [vmem:[#allocation79_spill] sm:$0xff] }
0x11e8   :  { %v5862_v56 = vpop.f32.mrf.mxu1 }
0x11e9   :  { %v5931_v57 = vadd.f32 %v5862_v56, %v5632_v5  ;;  %v5285_v36 = vpop.f32.mrf.mxu3  ;;  %v5337_v54 = vadd.f32 %v12226_v46, %v5038_v59  ;;  %v12618_v5 = vld [vmem:[#allocation46_spill] sm:$0xff] }
0x11ea   :  { %v4740_v4 = vadd.f32 %v12618_v5, %v4441_v17  ;;  %v12638_v5 = vld [vmem:[#allocation34_spill] sm:$0xff] }
0x11eb   :  { %v5961_v26 = vadd.f32 %v12139_v48, %v5931_v57  ;;  %7493 = vmatmul.msk.f32.gmra.mxu1 %vm3469_vm7, %v7447_v23  ;;  %v5584_v34 = vpop.f32.mrf.mxu0  ;;  %v5636_v61 = vadd.f32 %v12230_v51, %v5337_v54  ;;  %v12619_v23 = vld [vmem:[#allocation12_spill] sm:$0xff] }
0x11ec   :  { %v3817_v57 = vadd.f32 %v12620_v30, %v12619_v23  ;;  %v5039_v49 = vadd.f32 %v12621_v32, %v4740_v4 }
0x11ed   :  { %v5990_v3 = vmax.f32 %v5961_v26, 0.0 }
0x11ee   :  { %v4143_v46 = vadd.f32 %v12622_v38, %v3817_v57  ;;  %v12640_v57 = vld [vmem:[#allocation35_spill] sm:$0xff] }
0x11ef   :  { %6070 = vmatmul.f32.gmra.mxu2 %v5990_v3  ;;  %v5338_v3 = vadd.f32 %v5279_v11, %v5039_v49 }
0x11f0   :  { %v5865_v28 = vpop.f32.mrf.mxu1 }
0x11f1   :  { %v5932_v10 = vadd.f32 %v5865_v28, %v5633_v0  ;;  %v5288_v13 = vpop.f32.mrf.mxu3  ;;  %v12623_v28 = vld [vmem:[#allocation51_spill] sm:$0xff] }
0x11f2   :  { %v4442_v51 = vadd.f32 %v12623_v28, %v4143_v46  ;;  %v12642_v46 = vld [vmem:[#allocation92_spill] sm:$0xff] }
0x11f3   :  { %v5962_v43 = vadd.f32 %v12139_v48, %v5932_v10  ;;  %7494 = vmatmul.msk.f32.gmra.mxu1 %vm3469_vm7, %v7448_v18  ;;  %v5587_v0 = vpop.f32.mrf.mxu0  ;;  %v5637_v18 = vadd.f32 %v5578_v35, %v5338_v3  ;;  %v12624_v10 = vld [vmem:[#allocation47_spill] sm:$0xff]  ;;  %v12315_v3 = vperm.slane %v12642_v46, 5  ;;  %v12643_v28 = vld [vmem:[#allocation52_spill] sm:$0xff] }
0x11f4   :  { %v4741_v52 = vadd.f32 %v12624_v10, %v4442_v51 }
0x11f5   :  { %v5991_v40 = vmax.f32 %v5962_v43, 0.0  ;;  %v12625_v43 = vld [vmem:[#allocation13_spill] sm:$0xff] }
0x11f6   :  { %v3820_v55 = vadd.f32 %v12626_v63, %v12625_v43  ;;  %v12646_v63 = vld [vmem:[#allocation81_spill] sm:$0xff] }
0x11f7   :  { %6073 = vmatmul.f32.gmra.mxu2 %v5991_v40  ;;  %v12627_v40 = vld [vmem:[#allocation78_spill] sm:$0xff] }
0x11f8   :  { %v5868_v22 = vpop.f32.mrf.mxu1  ;;  %v5040_v16 = vadd.f32 %v12627_v40, %v4741_v52  ;;  %v12644_v52 = vld [vmem:[#allocation16_spill] sm:$0xff] }
0x11f9   :  { %v5933_v6 = vadd.f32 %v5868_v22, %v5634_v24  ;;  %v12628_v22 = vld [vmem:[#allocation32_spill] sm:$0xff] }
0x11fa   :  { %v5339_v11 = vadd.f32 %v5282_v31, %v5040_v16  ;;  %v12647_v16 = vld [vmem:[#allocation36_spill] sm:$0xff] }
0x11fb   :  { %v5963_v44 = vadd.f32 %v12139_v48, %v5933_v6  ;;  %7495 = vmatmul.msk.f32.gmra.mxu1 %vm3469_vm7, %v7449_v45  ;;  %v4144_v45 = vadd.f32 %v12628_v22, %v3820_v55  ;;  %v5291_v6 = vpop.f32.mrf.mxu3 }
0x11fc   :  { %v5638_v35 = vadd.f32 %v5581_v27, %v5339_v11 }
0x11fd   :  { %v5992_v29 = vmax.f32 %v5963_v44, 0.0  ;;  %v4443_v7 = vadd.f32 %v12629_v15, %v4144_v45  ;;  %v5590_v44 = vpop.f32.mrf.mxu0 }
0x11ff   :  { %6076 = vmatmul.f32.gmra.mxu2 %v5992_v29  ;;  %v4742_v29 = vadd.f32 %v12630_v1, %v4443_v7 }
0x1200   :  { %v5871_v53 = vpop.f32.mrf.mxu1 }
0x1201   :  { %v5934_v2 = vadd.f32 %v5871_v53, %v5635_v62  ;;  %v12631_v62 = vld [vmem:[#allocation14_spill] sm:$0xff]  ;;  %v12632_v53 = vld [vmem:[#allocation31_spill] sm:$0xff] }
0x1203   :  { %v5964_v9 = vadd.f32 %v12139_v48, %v5934_v2  ;;  %7496 = vmatmul.msk.f32.gmra.mxu1 %vm3469_vm7, %v7450_v20  ;;  %v3823_v20 = vadd.f32 %v12632_v53, %v12631_v62  ;;  %v5041_v2 = vadd.f32 %v12633_v39, %v4742_v29  ;;  %v5294_v25 = vpop.f32.mrf.mxu3  ;;  %v12650_v62 = vld [vmem:[#allocation17_spill] sm:$0xff]  ;;  %v12651_v53 = vld [vmem:[#allocation3_spill] sm:$0xff]  ;;  %v12652_v39 = vld [vmem:[#allocation82_spill] sm:$0xff] }
0x1205   :  { %v5993_v60 = vmax.f32 %v5964_v9, 0.0  ;;  %v4145_v31 = vadd.f32 %v12634_v37, %v3823_v20  ;;  %v5340_v50 = vadd.f32 %v5285_v36, %v5041_v2  ;;  %v12635_v9 = vld [vmem:[#allocation56_spill] sm:$0xff]  ;;  %v3832_v20 = vadd.f32 %v12651_v53, %v12650_v62  ;;  %v12653_v37 = vld [vmem:[#allocation37_spill] sm:$0xff] }
0x1207   :  { %6079 = vmatmul.f32.gmra.mxu2 %v5993_v60  ;;  %v4444_v33 = vadd.f32 %v12635_v9, %v4145_v31  ;;  %v5639_v27 = vadd.f32 %v5584_v34, %v5340_v50  ;;  %v12636_v60 = vld [vmem:[#allocation50_spill] sm:$0xff]  ;;  %v4148_v31 = vadd.f32 %v12653_v37, %v3832_v20 }
0x1208   :  { %v5874_v42 = vpop.f32.mrf.mxu1 }
0x1209   :  { %v5935_v56 = vadd.f32 %v5874_v42, %v5636_v61  ;;  %v4743_v14 = vadd.f32 %v12636_v60, %v4444_v33  ;;  %v5593_v61 = vpop.f32.mrf.mxu0  ;;  %v12637_v42 = vld [vmem:[#allocation15_spill] sm:$0xff] }
0x120a   :  { %v3826_v4 = vadd.f32 %v12638_v5, %v12637_v42 }
0x120b   :  { %v5965_v26 = vadd.f32 %v12139_v48, %v5935_v56  ;;  %v12639_v56 = vld [vmem:[#allocation80_spill] sm:$0xff] }
0x120c   :  { %v5042_v23 = vadd.f32 %v12639_v56, %v4743_v14  ;;  %v4146_v36 = vadd.f32 %v12640_v57, %v3826_v4  ;;  %v12656_v56 = vld [vmem:[#allocation18_spill] sm:$0xff] }
0x120d   :  { %v5994_v41 = vmax.f32 %v5965_v26, 0.0  ;;  %v12641_v26 = vld [vmem:[#allocation58_spill] sm:$0xff] }
0x120e   :  { %v5341_v32 = vadd.f32 %v5288_v13, %v5042_v23  ;;  %v4445_v34 = vadd.f32 %v12641_v26, %v4146_v36  ;;  %v12657_v23 = vld [vmem:[#allocation4_spill] sm:$0xff] }
0x120f   :  { %6082 = vmatmul.f32.gmra.mxu2 %v5994_v41 }
0x1210   :  { %v5877_v58 = vpop.f32.mrf.mxu1  ;;  %v5640_v38 = vadd.f32 %v5587_v0, %v5341_v32  ;;  %v4744_v51 = vadd.f32 %v12643_v28, %v4445_v34 }
0x1211   :  { %v5936_v8 = vadd.f32 %v5877_v58, %v5637_v18  ;;  %v5297_v58 = vpop.f32.mrf.mxu3  ;;  %v5596_v0 = vpop.f32.mrf.mxu0 }
0x1212   :  { %v5043_v55 = vadd.f32 %v12646_v63, %v4744_v51 }
0x1213   :  { %v5966_v24 = vadd.f32 %v12139_v48, %v5936_v8  ;;  %v12645_v8 = vld [vmem:[#allocation2_spill] sm:$0xff] }
0x1214   :  { %v3829_v43 = vadd.f32 %v12645_v8, %v12644_v52  ;;  %v5342_v22 = vadd.f32 %v5291_v6, %v5043_v55  ;;  %v12661_v52 = vld [vmem:[#allocation57_spill] sm:$0xff]  ;;  %v12662_v55 = vld [vmem:[#allocation19_spill] sm:$0xff] }
0x1215   :  { %v5995_v19 = vmax.f32 %v5966_v24, 0.0 }
0x1216   :  { %v4147_v24 = vadd.f32 %v12647_v16, %v3829_v43  ;;  %v5641_v7 = vadd.f32 %v5590_v44, %v5342_v22  ;;  %v12665_v22 = vld [vmem:[#allocation39_spill] sm:$0xff] }
0x1217   :  { %6085 = vmatmul.f32.gmra.mxu2 %v5995_v19  ;;  %v12648_v19 = vld [vmem:[#allocation60_spill] sm:$0xff] }
0x1218   :  { %v5880_v21 = vpop.f32.mrf.mxu1  ;;  %v4446_v15 = vadd.f32 %v12648_v19, %v4147_v24 }
0x1219   :  { %v5937_v47 = vadd.f32 %v5880_v21, %v5638_v35  ;;  %v12649_v21 = vld [vmem:[#allocation53_spill] sm:$0xff]  ;;  %v5300_v44 = vpop.f32.mrf.mxu3  ;;  %v5599_v33 = vpop.f32.mrf.mxu0 }
0x121a   :  { %v4745_v1 = vadd.f32 %v12649_v21, %v4446_v15 }
0x121b   :  { %v5967_v12 = vadd.f32 %v12139_v48, %v5937_v47 }
0x121c   :  { %v5044_v6 = vadd.f32 %v12652_v39, %v4745_v1 }
0x121d   :  { %v5996_v59 = vmax.f32 %v5967_v12, 0.0 }
0x121e   :  { %v5343_v50 = vadd.f32 %v5294_v25, %v5044_v6  ;;  %v12658_v25 = vld [vmem:[#allocation83_spill] sm:$0xff]  ;;  %v12668_v6 = vld [vmem:[#allocation20_spill] sm:$0xff] }
0x121f   :  { %6088 = vmatmul.f32.gmra.mxu2 %v5996_v59 }
0x1220   :  { %v5883_v54 = vpop.f32.mrf.mxu1  ;;  %v5642_v60 = vadd.f32 %v5593_v61, %v5343_v50  ;;  %v12659_v61 = vld [vmem:[#allocation38_spill] sm:$0xff] }
0x1221   :  { %v5938_v17 = vadd.f32 %v5883_v54, %v5639_v27  ;;  %v12654_v27 = vld [vmem:[#allocation63_spill] sm:$0xff]  ;;  %v5303_v46 = vpop.f32.mrf.mxu3 }
0x1222   :  { %v4447_v54 = vadd.f32 %v12654_v27, %v4148_v31 }
0x1223   :  { %v5968_v30 = vadd.f32 %v12139_v48, %v5938_v17  ;;  %v12655_v17 = vld [vmem:[#allocation55_spill] sm:$0xff] }
0x1224   :  { %v4746_v42 = vadd.f32 %v12655_v17, %v4447_v54 }
0x1225   :  { %v5997_v49 = vmax.f32 %v5968_v30, 0.0  ;;  %v3835_v30 = vadd.f32 %v12657_v23, %v12656_v56 }
0x1226   :  { %v5045_v57 = vadd.f32 %v12658_v25, %v4746_v42  ;;  %v12674_v25 = vld [vmem:[#allocation21_spill] sm:$0xff] }
0x1227   :  { %6091 = vmatmul.f32.gmra.mxu2 %v5997_v49  ;;  %v4149_v49 = vadd.f32 %v12659_v61, %v3835_v30 }
0x1228   :  { %v5886_v41 = vpop.f32.mrf.mxu1  ;;  %v5344_v26 = vadd.f32 %v5297_v58, %v5045_v57  ;;  %v12675_v57 = vld [vmem:[#allocation7_spill] sm:$0xff] }
0x1229   :  { %v5939_v18 = vadd.f32 %v5886_v41, %v5640_v38  ;;  %v12660_v41 = vld [vmem:[#allocation65_spill] sm:$0xff]  ;;  %v5306_v1 = vpop.f32.mrf.mxu3 }
0x122a   :  { %v6044_v10 = vpop.f32.mrf.mxu2  ;;  %v4448_v28 = vadd.f32 %v12660_v41, %v4149_v49  ;;  %v5643_v51 = vadd.f32 %v5596_v0, %v5344_v26 }
0x122b   :  { %v5969_v13 = vadd.f32 %v12139_v48, %v5939_v18  ;;  %v6045_v40 = vadd.f32 %v6044_v10, %v12315_v3  ;;  %v5602_v18 = vpop.f32.mrf.mxu0 }
0x122c   :  { %v4747_v8 = vadd.f32 %v12661_v52, %v4448_v28 }
0x122d   :  { %v5998_v45 = vmax.f32 %v5969_v13, 0.0  ;;  %v6131_v11 = vmax.f32 %v6045_v40, 0.0  ;;  %v12663_v13 = vld [vmem:[#allocation5_spill] sm:$0xff]  ;;  %v12664_v40 = vld [vmem:[#allocation84_spill] sm:$0xff] }
0x122e   :  { %v3838_v58 = vadd.f32 %v12663_v13, %v12662_v55  ;;  %v5046_v16 = vadd.f32 %v12664_v40, %v4747_v8  ;;  %v12681_v40 = vld [vmem:[#allocation8_spill] sm:$0xff] }
0x122f   :  { %6160 = vst [vmem:[%s12521_s14] sm:$0xff] %v6131_v11  ;;  %6094 = vmatmul.f32.gmra.mxu2 %v5998_v45 }
0x1230   :  { %v5889_v35 = vpop.f32.mrf.mxu1  ;;  %v4150_v45 = vadd.f32 %v12665_v22, %v3838_v58  ;;  %v5345_v11 = vadd.f32 %v5300_v44, %v5046_v16  ;;  %v12670_v44 = vld [vmem:[#allocation85_spill] sm:$0xff]  ;;  %v12680_v58 = vld [vmem:[#allocation22_spill] sm:$0xff] }
0x1231   :  { %v5940_v29 = vadd.f32 %v5889_v35, %v5641_v7  ;;  %v12666_v7 = vld [vmem:[#allocation67_spill] sm:$0xff]  ;;  %v5309_v23 = vpop.f32.mrf.mxu3  ;;  %v3847_v16 = vadd.f32 %v12681_v40, %v12680_v58 }
0x1232   :  { %v6047_v47 = vpop.f32.mrf.mxu2  ;;  %v4449_v35 = vadd.f32 %v12666_v7, %v4150_v45  ;;  %v5644_v21 = vadd.f32 %v5599_v33, %v5345_v11 }
0x1233   :  { %v5970_v2 = vadd.f32 %v12139_v48, %v5940_v29  ;;  %v6048_v12 = vadd.f32 %v6047_v47, %v12315_v3  ;;  %v12667_v47 = vld [vmem:[#allocation59_spill] sm:$0xff]  ;;  %v5605_v20 = vpop.f32.mrf.mxu0 }
0x1234   :  { %v4748_v62 = vadd.f32 %v12667_v47, %v4449_v35 }
0x1235   :  { %v5999_v59 = vmax.f32 %v5970_v2, 0.0  ;;  %v6132_v9 = vmax.f32 %v6048_v12, 0.0  ;;  %v12669_v2 = vld [vmem:[#allocation6_spill] sm:$0xff] }
0x1236   :  { %v3841_v12 = vadd.f32 %v12669_v2, %v12668_v6  ;;  %v5047_v37 = vadd.f32 %v12670_v44, %v4748_v62  ;;  %v12687_v44 = vld [vmem:[#allocation9_spill] sm:$0xff] }
0x1237   :  { %6161 = vst [vmem:[%s12521_s14 + $0x8] sm:$0xff] %v6132_v9  ;;  %6097 = vmatmul.f32.gmra.mxu2 %v5999_v59  ;;  %v12671_v59 = vld [vmem:[#allocation40_spill] sm:$0xff] }
0x1238   :  { %v5892_v14 = vpop.f32.mrf.mxu1  ;;  %v4151_v9 = vadd.f32 %v12671_v59, %v3841_v12  ;;  %v5346_v33 = vadd.f32 %v5303_v46, %v5047_v37  ;;  %v12686_v12 = vld [vmem:[#allocation23_spill] sm:$0xff] }
0x1239   :  { %v5941_v5 = vadd.f32 %v5892_v14, %v5642_v60  ;;  %v12672_v60 = vld [vmem:[#allocation69_spill] sm:$0xff]  ;;  %v5312_v11 = vpop.f32.mrf.mxu3  ;;  %v3850_v37 = vadd.f32 %v12687_v44, %v12686_v12 }
0x123a   :  { %v6050_v4 = vpop.f32.mrf.mxu2  ;;  %v4450_v14 = vadd.f32 %v12672_v60, %v4151_v9  ;;  %v5645_v17 = vadd.f32 %v5602_v18, %v5346_v33  ;;  %v12678_v18 = vld [vmem:[#allocation71_spill] sm:$0xff] }
0x123b   :  { %v5971_v36 = vadd.f32 %v12139_v48, %v5941_v5  ;;  %v6051_v32 = vadd.f32 %v6050_v4, %v12315_v3  ;;  %v12673_v5 = vld [vmem:[#allocation61_spill] sm:$0xff]  ;;  %v12689_v33 = vld [vmem:[#allocation43_spill] sm:$0xff] }
0x123c   :  { %v4749_v4 = vadd.f32 %v12673_v5, %v4450_v14 }
0x123d   :  { %v6000_v34 = vmax.f32 %v5971_v36, 0.0  ;;  %v6133_v38 = vmax.f32 %v6051_v32, 0.0  ;;  %v3844_v36 = vadd.f32 %v12675_v57, %v12674_v25  ;;  %v12676_v32 = vld [vmem:[#allocation86_spill] sm:$0xff] }
0x123e   :  { %v5048_v61 = vadd.f32 %v12676_v32, %v4749_v4  ;;  %v12692_v32 = vld [vmem:[#allocation24_spill] sm:$0xff] }
0x123f   :  { %6162 = vst [vmem:[%s12521_s14 + $0x10] sm:$0xff] %v6133_v38  ;;  %6100 = vmatmul.f32.gmra.mxu2 %v6000_v34  ;;  %v5608_v34 = vpop.f32.mrf.mxu0  ;;  %v12677_v38 = vld [vmem:[#allocation41_spill] sm:$0xff] }
0x1240   :  { %v5895_v10 = vpop.f32.mrf.mxu1  ;;  %v4152_v46 = vadd.f32 %v12677_v38, %v3844_v36  ;;  %v5347_v41 = vadd.f32 %v5306_v1, %v5048_v61  ;;  %v12693_v61 = vld [vmem:[#allocation10_spill] sm:$0xff] }
0x1241   :  { %v5942_v43 = vadd.f32 %v5895_v10, %v5643_v51 }
0x1242   :  { %v6053_v63 = vpop.f32.mrf.mxu2  ;;  %v4451_v10 = vadd.f32 %v12678_v18, %v4152_v46  ;;  %v5646_v52 = vadd.f32 %v5605_v20, %v5347_v41  ;;  %v12685_v20 = vld [vmem:[#allocation64_spill] sm:$0xff] }
0x1243   :  { %v5972_v24 = vadd.f32 %v12139_v48, %v5942_v43  ;;  %v6054_v0 = vadd.f32 %v6053_v63, %v12315_v3  ;;  %v12679_v43 = vld [vmem:[#allocation62_spill] sm:$0xff]  ;;  %v12695_v41 = vld [vmem:[#allocation44_spill] sm:$0xff] }
0x1244   :  { %v4750_v63 = vadd.f32 %v12679_v43, %v4451_v10 }
0x1245   :  { %v6001_v19 = vmax.f32 %v5972_v24, 0.0  ;;  %v6134_v15 = vmax.f32 %v6054_v0, 0.0  ;;  %v12682_v24 = vld [vmem:[#allocation87_spill] sm:$0xff] }
0x1246   :  { %v5049_v0 = vadd.f32 %v12682_v24, %v4750_v63 }
0x1247   :  { %6163 = vst [vmem:[%s12521_s14 + $0x18] sm:$0xff] %v6134_v15  ;;  %6103 = vmatmul.f32.gmra.mxu2 %v6001_v19  ;;  %v12683_v19 = vld [vmem:[#allocation42_spill] sm:$0xff]  ;;  %v5611_v1 = vpop.f32.mrf.mxu0 }
0x1248   :  { %v5898_v29 = vpop.f32.mrf.mxu1  ;;  %v4153_v15 = vadd.f32 %v12683_v19, %v3847_v16  ;;  %v5348_v7 = vadd.f32 %v5309_v23, %v5049_v0  ;;  %v12698_v0 = vld [vmem:[#allocation25_spill] sm:$0xff] }
0x1249   :  { %v5943_v53 = vadd.f32 %v5898_v29, %v5644_v21  ;;  %v12684_v29 = vld [vmem:[#allocation72_spill] sm:$0xff] }
0x124a   :  { %v6056_v39 = vpop.f32.mrf.mxu2  ;;  %v4452_v47 = vadd.f32 %v12684_v29, %v4153_v15  ;;  %v5647_v62 = vadd.f32 %v5608_v34, %v5348_v7 }
0x124b   :  { %v5973_v31 = vadd.f32 %v12139_v48, %v5943_v53  ;;  %v6057_v50 = vadd.f32 %v6056_v39, %v12315_v3 }
0x124c   :  { %v4751_v39 = vadd.f32 %v12685_v20, %v4452_v47 }
0x124d   :  { %v6002_v27 = vmax.f32 %v5973_v31, 0.0  ;;  %v6135_v54 = vmax.f32 %v6057_v50, 0.0  ;;  %v12688_v31 = vld [vmem:[#allocation88_spill] sm:$0xff] }
0x124e   :  { %v5050_v50 = vadd.f32 %v12688_v31, %v4751_v39  ;;  %v12704_v31 = vld [vmem:[#allocation91_spill] sm:$0xff] }
0x124f   :  { %6164 = vst [vmem:[%s12521_s14 + $0x20] sm:$0xff] %v6135_v54  ;;  %6106 = vmatmul.f32.gmra.mxu2 %v6002_v27  ;;  %v4154_v27 = vadd.f32 %v12689_v33, %v3850_v37 }
0x1250   :  { %v5901_v42 = vpop.f32.mrf.mxu1  ;;  %v5349_v54 = vadd.f32 %v5312_v11, %v5050_v50  ;;  %v12700_v11 = vld [vmem:[#allocation90_spill] sm:$0xff] }
0x1251   :  { %v5944_v56 = vadd.f32 %v5901_v42, %v5645_v17  ;;  %v5315_v17 = vpop.f32.mrf.mxu3  ;;  %v12690_v42 = vld [vmem:[#allocation73_spill] sm:$0xff] }
0x1252   :  { %v6059_v30 = vpop.f32.mrf.mxu2  ;;  %v4453_v5 = vadd.f32 %v12690_v42, %v4154_v27  ;;  %v5648_v4 = vadd.f32 %v5611_v1, %v5349_v54 }
0x1253   :  { %v5974_v49 = vadd.f32 %v12139_v48, %v5944_v56  ;;  %v6060_v26 = vadd.f32 %v6059_v30, %v12315_v3  ;;  %v5614_v56 = vpop.f32.mrf.mxu0  ;;  %v12691_v30 = vld [vmem:[#allocation66_spill] sm:$0xff] }
0x1254   :  { %v4752_v25 = vadd.f32 %v12691_v30, %v4453_v5 }
0x1255   :  { %v6003_v28 = vmax.f32 %v5974_v49, 0.0  ;;  %v6136_v51 = vmax.f32 %v6060_v26, 0.0  ;;  %v3853_v49 = vadd.f32 %v12693_v61, %v12692_v32  ;;  %v12694_v26 = vld [vmem:[#allocation89_spill] sm:$0xff] }
0x1256   :  { %v5051_v34 = vadd.f32 %v12694_v26, %v4752_v25 }
0x1257   :  { %6165 = vst [vmem:[%s12521_s14 + $0x28] sm:$0xff] %v6136_v51  ;;  %6109 = vmatmul.f32.gmra.mxu2 %v6003_v28  ;;  %v4155_v28 = vadd.f32 %v12695_v41, %v3853_v49 }
0x1258   :  { %v5904_v8 = vpop.f32.mrf.mxu1  ;;  %v5350_v51 = vadd.f32 %v5315_v17, %v5051_v34 }
0x1259   :  { %v5945_v55 = vadd.f32 %v5904_v8, %v5646_v52  ;;  %v12696_v52 = vld [vmem:[#allocation74_spill] sm:$0xff]  ;;  %v5318_v63 = vpop.f32.mrf.mxu3 }
0x125a   :  { %v6062_v13 = vpop.f32.mrf.mxu2  ;;  %v4454_v8 = vadd.f32 %v12696_v52, %v4155_v28  ;;  %v5649_v43 = vadd.f32 %v5614_v56, %v5350_v51 }
0x125b   :  { %v5975_v22 = vadd.f32 %v12139_v48, %v5945_v55  ;;  %v6063_v45 = vadd.f32 %v6062_v13, %v12315_v3  ;;  %v12697_v13 = vld [vmem:[#allocation68_spill] sm:$0xff]  ;;  %v5617_v16 = vpop.f32.mrf.mxu0 }
0x125c   :  { %v4753_v58 = vadd.f32 %v12697_v13, %v4454_v8 }
0x125d   :  { %v6004_v35 = vmax.f32 %v5975_v22, 0.0  ;;  %v6137_v21 = vmax.f32 %v6063_v45, 0.0  ;;  %v12699_v22 = vld [vmem:[#allocation11_spill] sm:$0xff] }
0x125e   :  { %v3856_v45 = vadd.f32 %v12699_v22, %v12698_v0  ;;  %v5052_v19 = vadd.f32 %v12700_v11, %v4753_v58 }
0x125f   :  { %6166 = vst [vmem:[%s12521_s14 + $0x30] sm:$0xff] %v6137_v21  ;;  %6112 = vmatmul.f32.gmra.mxu2 %v6004_v35  ;;  %v12701_v35 = vld [vmem:[#allocation45_spill] sm:$0xff] }
0x1260   :  { %v5907_v53 = vpop.f32.mrf.mxu1  ;;  %v4156_v21 = vadd.f32 %v12701_v35, %v3856_v45  ;;  %v5351_v1 = vadd.f32 %v5318_v63, %v5052_v19 }
0x1261   :  { %v5946_v6 = vadd.f32 %v5907_v53, %v5647_v62  ;;  %v12702_v62 = vld [vmem:[#allocation75_spill] sm:$0xff]  ;;  %v5321_v44 = vpop.f32.mrf.mxu3 }
0x1262   :  { %v6065_v2 = vpop.f32.mrf.mxu2  ;;  %v4455_v53 = vadd.f32 %v12702_v62, %v4156_v21  ;;  %v5650_v20 = vadd.f32 %v5617_v16, %v5351_v1 }
0x1263   :  { %v5976_v59 = vadd.f32 %v12139_v48, %v5946_v6  ;;  %v6066_v9 = vadd.f32 %v6065_v2, %v12315_v3  ;;  %v12703_v6 = vld [vmem:[#allocation70_spill] sm:$0xff]  ;;  %v5620_v33 = vpop.f32.mrf.mxu0 }
0x1264   :  { %v4754_v2 = vadd.f32 %v12703_v6, %v4455_v53 }
0x1265   :  { %v6005_v60 = vmax.f32 %v5976_v59, 0.0  ;;  %v6138_v14 = vmax.f32 %v6066_v9, 0.0 }
0x1266   :  { %v5053_v50 = vadd.f32 %v12704_v31, %v4754_v2 }
0x1267   :  { %6167 = vst [vmem:[%s12521_s14 + $0x38] sm:$0xff] %v6138_v14  ;;  %6115 = vmatmul.f32.gmra.mxu2 %v6005_v60 }
0x1268   :  { %v5910_v23 = vpop.f32.mrf.mxu1  ;;  %v5352_v27 = vadd.f32 %v5321_v44, %v5053_v50 }
0x1269   :  { %v5947_v57 = vadd.f32 %v5910_v23, %v5648_v4 }
0x126a   :  { %v6068_v36 = vpop.f32.mrf.mxu2  ;;  %v5651_v14 = vadd.f32 %v5620_v33, %v5352_v27 }
0x126b   :  { %v5977_v38 = vadd.f32 %v12139_v48, %v5947_v57  ;;  %v6069_v46 = vadd.f32 %v6068_v36, %v12315_v3 }
0x126d   :  { %v6006_v18 = vmax.f32 %v5977_v38, 0.0  ;;  %v6139_v10 = vmax.f32 %v6069_v46, 0.0 }
0x126f   :  { %6168 = vst [vmem:[%s12521_s14 + $0x40] sm:$0xff] %v6139_v10  ;;  %6118 = vmatmul.f32.gmra.mxu2 %v6006_v18 }
0x1270   :  { %v5913_v55 = vpop.f32.mrf.mxu1 }
0x1271   :  { %v5948_v40 = vadd.f32 %v5913_v55, %v5649_v43 }
0x1272   :  { %v6071_v24 = vpop.f32.mrf.mxu2 }
0x1273   :  { %v5978_v15 = vadd.f32 %v12139_v48, %v5948_v40  ;;  %v6072_v7 = vadd.f32 %v6071_v24, %v12315_v3 }
0x1275   :  { %v6007_v29 = vmax.f32 %v5978_v15, 0.0  ;;  %v6140_v47 = vmax.f32 %v6072_v7, 0.0 }
0x1277   :  { %6169 = vst [vmem:[%s12521_s14 + $0x48] sm:$0xff] %v6140_v47  ;;  %6121 = vmatmul.f32.gmra.mxu2 %v6007_v29 }
0x1278   :  { %v5916_v39 = vpop.f32.mrf.mxu1 }
0x1279   :  { %v5949_v12 = vadd.f32 %v5916_v39, %v5650_v20 }
0x127a   :  { %v6074_v37 = vpop.f32.mrf.mxu2 }
0x127b   :  { %v5979_v59 = vadd.f32 %v12139_v48, %v5949_v12  ;;  %v6075_v9 = vadd.f32 %v6074_v37, %v12315_v3 }
0x127d   :  { %v6008_v54 = vmax.f32 %v5979_v59, 0.0  ;;  %v6141_v60 = vmax.f32 %v6075_v9, 0.0 }
0x127f   :  { %6170 = vst [vmem:[%s12521_s14 + $0x50] sm:$0xff] %v6141_v60  ;;  %6124 = vmatmul.f32.gmra.mxu2 %v6008_v54 }
0x1280   :  { %v5919_v17 = vpop.f32.mrf.mxu1 }
0x1281   :  { %v5950_v42 = vadd.f32 %v5919_v17, %v5651_v14 }
0x1282   :  { %v6077_v5 = vpop.f32.mrf.mxu2 }
0x1283   :  { %v5980_v4 = vadd.f32 %v12139_v48, %v5950_v42  ;;  %v6078_v56 = vadd.f32 %v6077_v5, %v12315_v3 }
0x1285   :  { %v6009_v23 = vmax.f32 %v5980_v4, 0.0  ;;  %v6142_v30 = vmax.f32 %v6078_v56, 0.0 }
0x1287   :  { %6171 = vst [vmem:[%s12521_s14 + $0x58] sm:$0xff] %v6142_v30  ;;  %6127 = vmatmul.f32.gmra.mxu2 %v6009_v23 }
0x128a   :  { %v6080_v25 = vpop.f32.mrf.mxu2 }
0x128b   :  { %v6081_v57 = vadd.f32 %v6080_v25, %v12315_v3 }
0x128d   :  { %v6143_v36 = vmax.f32 %v6081_v57, 0.0 }
0x128f   :  { %6172 = vst [vmem:[%s12521_s14 + $0x60] sm:$0xff] %v6143_v36 }
0x1292   :  { %v6083_v32 = vpop.f32.mrf.mxu2 }
0x1293   :  { %v6084_v48 = vadd.f32 %v6083_v32, %v12315_v3 }
0x1295   :  { %v6144_v61 = vmax.f32 %v6084_v48, 0.0 }
0x1297   :  { %6173 = vst [vmem:[%s12521_s14 + $0x68] sm:$0xff] %v6144_v61 }
0x129a   :  { %v6086_v49 = vpop.f32.mrf.mxu2 }
0x129b   :  { %v6087_v26 = vadd.f32 %v6086_v49, %v12315_v3 }
0x129d   :  { %v6145_v34 = vmax.f32 %v6087_v26, 0.0 }
0x129f   :  { %6174 = vst [vmem:[%s12521_s14 + $0x70] sm:$0xff] %v6145_v34 }
0x12a2   :  { %v6089_v38 = vpop.f32.mrf.mxu2 }
0x12a3   :  { %v6090_v46 = vadd.f32 %v6089_v38, %v12315_v3 }
0x12a5   :  { %v6146_v41 = vmax.f32 %v6090_v46, 0.0 }
0x12a7   :  { %6175 = vst [vmem:[%s12521_s14 + $0x78] sm:$0xff] %v6146_v41 }
0x12aa   :  { %v6092_v28 = vpop.f32.mrf.mxu2 }
0x12ab   :  { %v6093_v51 = vadd.f32 %v6092_v28, %v12315_v3 }
0x12ad   :  { %v6147_v18 = vmax.f32 %v6093_v51, 0.0 }
0x12af   :  { %6176 = vst [vmem:[%s12521_s14 + $0x80] sm:$0xff] %v6147_v18 }
0x12b2   :  { %v6095_v10 = vpop.f32.mrf.mxu2 }
0x12b3   :  { %v6096_v52 = vadd.f32 %v6095_v10, %v12315_v3 }
0x12b5   :  { %v6148_v8 = vmax.f32 %v6096_v52, 0.0 }
0x12b7   :  { %6177 = vst [vmem:[%s12521_s14 + $0x88] sm:$0xff] %v6148_v8 }
0x12ba   :  { %v6098_v43 = vpop.f32.mrf.mxu2 }
0x12bb   :  { %v6099_v63 = vadd.f32 %v6098_v43, %v12315_v3 }
0x12bd   :  { %v6149_v55 = vmax.f32 %v6099_v63, 0.0 }
0x12bf   :  { %6178 = vst [vmem:[%s12521_s14 + $0x90] sm:$0xff] %v6149_v55 }
0x12c2   :  { %v6101_v13 = vpop.f32.mrf.mxu2 }
0x12c3   :  { %v6102_v58 = vadd.f32 %v6101_v13, %v12315_v3 }
0x12c5   :  { %v6150_v40 = vmax.f32 %v6102_v58, 0.0 }
0x12c7   :  { %6179 = vst [vmem:[%s12521_s14 + $0x98] sm:$0xff] %v6150_v40 }
0x12ca   :  { %v6104_v16 = vpop.f32.mrf.mxu2 }
0x12cb   :  { %v6105_v24 = vadd.f32 %v6104_v16, %v12315_v3 }
0x12cd   :  { %v6151_v0 = vmax.f32 %v6105_v24, 0.0 }
0x12cf   :  { %6180 = vst [vmem:[%s12521_s14 + $0xa0] sm:$0xff] %v6151_v0 }
0x12d2   :  { %v6107_v22 = vpop.f32.mrf.mxu2 }
0x12d3   :  { %v6108_v45 = vadd.f32 %v6107_v22, %v12315_v3 }
0x12d5   :  { %v6152_v11 = vmax.f32 %v6108_v45, 0.0 }
0x12d7   :  { %6181 = vst [vmem:[%s12521_s14 + $0xa8] sm:$0xff] %v6152_v11 }
0x12da   :  { %v6110_v19 = vpop.f32.mrf.mxu2 }
0x12db   :  { %v6111_v15 = vadd.f32 %v6110_v19, %v12315_v3 }
0x12dd   :  { %v6153_v7 = vmax.f32 %v6111_v15, 0.0 }
0x12df   :  { %6182 = vst [vmem:[%s12521_s14 + $0xb0] sm:$0xff] %v6153_v7 }
0x12e2   :  { %v6113_v35 = vpop.f32.mrf.mxu2 }
0x12e3   :  { %v6114_v21 = vadd.f32 %v6113_v35, %v12315_v3 }
0x12e5   :  { %v6154_v1 = vmax.f32 %v6114_v21, 0.0 }
0x12e7   :  { %6183 = vst [vmem:[%s12521_s14 + $0xb8] sm:$0xff] %v6154_v1 }
0x12ea   :  { %v6116_v29 = vpop.f32.mrf.mxu2 }
0x12eb   :  { %v6117_v47 = vadd.f32 %v6116_v29, %v12315_v3 }
0x12ed   :  { %v6155_v62 = vmax.f32 %v6117_v47, 0.0 }
0x12ef   :  { %6184 = vst [vmem:[%s12521_s14 + $0xc0] sm:$0xff] %v6155_v62 }
0x12f2   :  { %v6119_v53 = vpop.f32.mrf.mxu2 }
0x12f3   :  { %v6120_v20 = vadd.f32 %v6119_v53, %v12315_v3 }
0x12f5   :  { %v6156_v39 = vmax.f32 %v6120_v20, 0.0 }
0x12f7   :  { %6185 = vst [vmem:[%s12521_s14 + $0xc8] sm:$0xff] %v6156_v39 }
0x12fa   :  { %v6122_v6 = vpop.f32.mrf.mxu2 }
0x12fb   :  { %v6123_v2 = vadd.f32 %v6122_v6, %v12315_v3 }
0x12fd   :  { %v6157_v12 = vmax.f32 %v6123_v2, 0.0 }
0x12ff   :  { %6186 = vst [vmem:[%s12521_s14 + $0xd0] sm:$0xff] %v6157_v12 }
0x1302   :  { %v6125_v44 = vpop.f32.mrf.mxu2 }
0x1303   :  { %v6126_v37 = vadd.f32 %v6125_v44, %v12315_v3 }
0x1305   :  { %v6158_v31 = vmax.f32 %v6126_v37, 0.0 }
0x1307   :  { %6187 = vst [vmem:[%s12521_s14 + $0xd8] sm:$0xff] %v6158_v31 }
0x130a   :  { %v6128_v50 = vpop.f32.mrf.mxu2 }
0x130b   :  { %v6129_v59 = vadd.f32 %v6128_v50, %v12315_v3 }
0x130d   :  { %v6159_v9 = vmax.f32 %v6129_v59, 0.0 }
0x130f   :  { %6188 = vst [vmem:[%s12521_s14 + $0xe0] sm:$0x1] %v6159_v9 }

</bundles_post_ra>
